<compile_context>
chip_gen: v7x
topology: tpu7x:2x2x1
jax: 0.10.0
libtpu: 0.0.40
codegen_flags: <defaults>
</compile_context>

<pallas_src>
import functools

import jax
import jax.numpy as jnp
from jax.experimental import pallas as pl
from jax.experimental.pallas import tpu as pltpu


def _encoder_kernel(x_ref, ln1g_ref, ln1b_ref, wqkv_ref, bqkv_ref,
                    wout_ref, bout_ref, ln2g_ref, ln2b_ref,
                    w1_ref, b1_ref, w2_ref, b2_ref, o_ref,
                    *, tb, num_patches, num_heads, head_dim, eps=1e-5):
    P = num_patches
    H = num_heads
    hd = head_dim
    C = H * hd
    M = tb * P                     # rows processed this grid step
    mm_dtype = wqkv_ref.dtype      # MXU operand dtype (bf16 or f32)

    # (TB, P, C) -> (TB*P, C): leading-dim merge only (P is a multiple of 8),
    # so this does not change the VMEM lane layout.
    x = x_ref[...].reshape(M, C)

    # ---- pre-norm MHA branch (LayerNorm in f32 on the VPU) ----------------
    mu = jnp.mean(x, axis=-1, keepdims=True)
    var = jnp.mean(jnp.square(x - mu), axis=-1, keepdims=True)
    xn = (x - mu) * jax.lax.rsqrt(var + eps)
    xn = xn * ln1g_ref[...] + ln1b_ref[...]

    # One big (M, C) x (C, 3C) MXU matmul.  Column layout matches the PyTorch
    # reshape (P, 3, H, hd): q -> [0, C), k -> [C, 2C), v -> [2C, 3C), heads
    # major within each third.  Head scaling already folded into q columns.
    qkv = jnp.dot(xn.astype(mm_dtype), wqkv_ref[...],
                  preferred_element_type=jnp.float32) + bqkv_ref[...]

    # Per-sample / per-head attention (tb and H are small static ints, so the
    # loops fully unroll).  Head h's output lands in columns [h*hd, (h+1)*hd),
    # which is exactly the PyTorch transpose(1,2).reshape(b, P, C) layout, so
    # the out-projection is a single big matmul afterwards.
    #
    # TODO(synk): for production P >= 512 on v7x, tile the key axis here
    # (flash-style online softmax) instead of materializing (P, P) scores.
    sample_outs = []
    for s in range(tb):                      # static
        r0 = s * P
        head_outs = []
        for h in range(H):                   # static
            lo = h * hd
            q = qkv[r0:r0 + P, 0 * C + lo:0 * C + lo + hd]      # (P, hd)
            k = qkv[r0:r0 + P, 1 * C + lo:1 * C + lo + hd]      # (P, hd)
            v = qkv[r0:r0 + P, 2 * C + lo:2 * C + lo + hd]      # (P, hd)
            scores = jax.lax.dot_general(
                q.astype(mm_dtype), k.astype(mm_dtype),
                dimension_numbers=(((1,), (1,)), ((), ())),
                preferred_element_type=jnp.float32)             # (P, P)
            scores = scores - jnp.max(scores, axis=-1, keepdims=True)
            p = jnp.exp(scores)
            p = p * pl.reciprocal(jnp.sum(p, axis=-1, keepdims=True),
                                  approx=True)
            head_outs.append(jnp.dot(p.astype(mm_dtype), v.astype(mm_dtype),
                                     preferred_element_type=jnp.float32))
        sample_outs.append(head_outs[0] if H == 1
                           else jnp.concatenate(head_outs, axis=-1))  # (P, C)
    attn_out = (sample_outs[0] if tb == 1
                else jnp.concatenate(sample_outs, axis=0))            # (M, C)

    # Single (M, C) x (C, C) out-projection on the MXU.
    mha = jnp.dot(attn_out.astype(mm_dtype), wout_ref[...],
                  preferred_element_type=jnp.float32) + bout_ref[...]
    x1 = x + mha                 # residual 1 (dropout = identity)

    # ---- pre-norm FFN branch ---------------------------------------------
    mu2 = jnp.mean(x1, axis=-1, keepdims=True)
    var2 = jnp.mean(jnp.square(x1 - mu2), axis=-1, keepdims=True)
    yn = (x1 - mu2) * jax.lax.rsqrt(var2 + eps)
    yn = yn * ln2g_ref[...] + ln2b_ref[...]

    h1 = jnp.dot(yn.astype(mm_dtype), w1_ref[...],
                 preferred_element_type=jnp.float32) + b1_ref[...]   # (M, F)
    h1 = h1 * jax.nn.sigmoid(h1)                                     # SiLU, f32
    h2 = jnp.dot(h1.astype(mm_dtype), w2_ref[...],
                 preferred_element_type=jnp.float32) + b2_ref[...]   # (M, C)

    # TODO(synk): for production C not a multiple of 128, pack the output
    # lane-dense (flat (N, P*C) slab) to avoid masked vst partial stores.
    o_ref[...] = (x1 + h2).reshape(tb, P, C).astype(o_ref.dtype)


def _pick_tb(n, p, target_rows=256):
    """Largest divisor of n with tb*p rows ~filling the MXU M dimension."""
    cap = max(1, target_rows // max(p, 1))
    tb = 1
    for d in range(1, n + 1):
        if n % d == 0 and d <= cap:
            tb = d
    return tb


def transformer_encoder(x, params, *, num_heads,
                        matmul_dtype=jnp.bfloat16, tb=None):
    """x: (N, P, C) float32.  params: dict of PyTorch-convention weights."""
    N, P, C = x.shape
    F = params["w1"].shape[0]                 # ffn_latent_dim
    head_dim = C // num_heads
    scaling = head_dim ** -0.5

    if tb is None:
        tb = _pick_tb(N, P)
    assert N % tb == 0, "batch must be divisible by the per-step batch tile"

    # ---- one-time weight glue: (out,in) -> (in,out), fold q scaling, cast.
    wqkv = jnp.asarray(params["wqkv"], jnp.float32).T        # (C, 3C)
    wqkv = wqkv.at[:, :C].multiply(scaling)
    bqkv = jnp.asarray(params["bqkv"], jnp.float32)
    bqkv = bqkv.at[:C].multiply(scaling).reshape(1, -1)
    wqkv = wqkv.astype(matmul_dtype)
    wout = jnp.asarray(params["wout"], jnp.float32).T.astype(matmul_dtype)
    w1 = jnp.asarray(params["w1"], jnp.float32).T.astype(matmul_dtype)
    w2 = jnp.asarray(params["w2"], jnp.float32).T.astype(matmul_dtype)
    bout = jnp.asarray(params["bout"], jnp.float32).reshape(1, -1)
    b1 = jnp.asarray(params["b1"], jnp.float32).reshape(1, -1)
    b2 = jnp.asarray(params["b2"], jnp.float32).reshape(1, -1)
    ln1g = jnp.asarray(params["ln1_g"], jnp.float32).reshape(1, -1)
    ln1b = jnp.asarray(params["ln1_b"], jnp.float32).reshape(1, -1)
    ln2g = jnp.asarray(params["ln2_g"], jnp.float32).reshape(1, -1)
    ln2b = jnp.asarray(params["ln2_b"], jnp.float32).reshape(1, -1)

    kernel = functools.partial(_encoder_kernel, tb=tb, num_patches=P,
                               num_heads=num_heads, head_dim=head_dim)

    def full(arr):
        nd = arr.ndim
        return pl.BlockSpec(arr.shape, lambda b, _nd=nd: (0,) * _nd)

    # ---- explicit VMEM budget (v7x has only 64 MiB physical VMEM) --------
    m_rows = tb * P
    wbytes = jnp.dtype(matmul_dtype).itemsize
    working_set = (
        4 * 4 * m_rows * C                                     # x/out, 2x buffered
        + 2 * wbytes * (3 * C * C + C * C + C * F + F * C)     # weight buffers
        + 2 * 4 * (3 * C + C + 2 * F + 4 * C)                  # bias / LN buffers
        + 4 * (m_rows * (3 * C + F + 4 * C) + 2 * P * P)       # f32 intermediates
    )
    vmem_limit = int(min(max(4 * working_set, 32 << 20), 48 << 20))

    return pl.pallas_call(
        kernel,
        out_shape=jax.ShapeDtypeStruct((N, P, C), x.dtype),
        grid_spec=pltpu.PrefetchScalarGridSpec(
            num_scalar_prefetch=0,
            grid=(N // tb,),
            in_specs=[
                pl.BlockSpec((tb, P, C), lambda b: (b, 0, 0)),   # x
                full(ln1g), full(ln1b),
                full(wqkv), full(bqkv),
                full(wout), full(bout),
                full(ln2g), full(ln2b),
                full(w1), full(b1),
                full(w2), full(b2),
            ],
            out_specs=pl.BlockSpec((tb, P, C), lambda b: (b, 0, 0)),
            scratch_shapes=[],
        ),
        compiler_params=pltpu.CompilerParams(
            dimension_semantics=("parallel",),
            vmem_limit_bytes=vmem_limit),
    )(x, ln1g, ln1b, wqkv, bqkv, wout, bout, ln2g, ln2b, w1, b1, w2, b2)


def _reference(x, params, *, num_heads):
    """Pure-JAX f32 reference mirroring the PyTorch forward (dropout = id)."""
    N, P, C = x.shape
    hd = C // num_heads
    eps = 1e-5

    def ln(y, g, b):
        mu = jnp.mean(y, axis=-1, keepdims=True)
        var = jnp.mean((y - mu) ** 2, axis=-1, keepdims=True)
        return (y - mu) / jnp.sqrt(var + eps) * g + b

    xn = ln(x, params["ln1_g"], params["ln1_b"])
    qkv = xn @ params["wqkv"].T + params["bqkv"]             # (N, P, 3C)
    qkv = qkv.reshape(N, P, 3, num_heads, hd).transpose(0, 3, 2, 1, 4)
    q, k, v = qkv[:, :, 0], qkv[:, :, 1], qkv[:, :, 2]       # (N, H, P, hd)
    attn = jax.nn.softmax((q * hd ** -0.5) @ jnp.swapaxes(k, -1, -2), axis=-1)
    out = (attn @ v).transpose(0, 2, 1, 3).reshape(N, P, C)
    mha = out @ params["wout"].T + params["bout"]
    x1 = x + mha

    yn = ln(x1, params["ln2_g"], params["ln2_b"])
    h1 = yn @ params["w1"].T + params["b1"]
    h1 = h1 * jax.nn.sigmoid(h1)
    h2 = h1 @ params["w2"].T + params["b2"]
    return x1 + h2


if __name__ == "__main__":
    N, P, C = 8, 64, 32
    num_heads = 4
    ffn_dim = 64

    key = jax.random.PRNGKey(0)
    keys = jax.random.split(key, 9)

    params = {
        "ln1_g": jnp.ones((C,), jnp.float32),
        "ln1_b": jnp.zeros((C,), jnp.float32),
        "wqkv": 0.05 * jax.random.normal(keys[0], (3 * C, C), jnp.float32),
        "bqkv": 0.01 * jax.random.normal(keys[1], (3 * C,), jnp.float32),
        "wout": 0.05 * jax.random.normal(keys[2], (C, C), jnp.float32),
        "bout": 0.01 * jax.random.normal(keys[3], (C,), jnp.float32),
        "ln2_g": jnp.ones((C,), jnp.float32),
        "ln2_b": jnp.zeros((C,), jnp.float32),
        "w1": 0.05 * jax.random.normal(keys[4], (ffn_dim, C), jnp.float32),
        "b1": 0.01 * jax.random.normal(keys[5], (ffn_dim,), jnp.float32),
        "w2": 0.05 * jax.random.normal(keys[6], (C, ffn_dim), jnp.float32),
        "b2": 0.01 * jax.random.normal(keys[7], (C,), jnp.float32),
    }

    x = jax.random.normal(keys[8], (N, P, C), jnp.float32)

    out = transformer_encoder(x, params, num_heads=num_heads)
    out = jax.block_until_ready(out)

    ref = _reference(x, params, num_heads=num_heads)
    assert out.shape == (N, P, C)
    # bf16 MXU operands + approx reciprocal in the softmax denominator =>
    # looser tolerance than pure-f32 (observed error is ~1e-3).
    max_err = float(jnp.max(jnp.abs(out - ref)))
    assert jnp.allclose(out, ref, atol=2e-2, rtol=2e-2), \
        f"max abs err {max_err}"

    print("KERNEL_OK")
</pallas_src>

<mosaic_0001>
module attributes {stable_mosaic.version = 11 : i64} {
  func.func @_encoder_kernel(%arg0: i32, %arg1: memref<4x64x32xf32, #tpu.memory_space<vmem>>, %arg2: memref<1x32xf32, #tpu.memory_space<vmem>>, %arg3: memref<1x32xf32, #tpu.memory_space<vmem>>, %arg4: memref<32x96xbf16, #tpu.memory_space<vmem>>, %arg5: memref<1x96xf32, #tpu.memory_space<vmem>>, %arg6: memref<32x32xbf16, #tpu.memory_space<vmem>>, %arg7: memref<1x32xf32, #tpu.memory_space<vmem>>, %arg8: memref<1x32xf32, #tpu.memory_space<vmem>>, %arg9: memref<1x32xf32, #tpu.memory_space<vmem>>, %arg10: memref<32x64xbf16, #tpu.memory_space<vmem>>, %arg11: memref<1x64xf32, #tpu.memory_space<vmem>>, %arg12: memref<64x32xbf16, #tpu.memory_space<vmem>>, %arg13: memref<1x32xf32, #tpu.memory_space<vmem>>, %arg14: memref<4x64x32xf32, #tpu.memory_space<vmem>>) attributes {dimension_semantics = [#tpu.dimension_semantics<parallel>], iteration_bounds = array<i64: 2>, scalar_prefetch = 0 : i64, scratch_operands = 0 : i64, tpu.core_type = #tpu.core_type<tc>, window_params = [{transform_indices = @transform_0, window_bounds = array<i64: 4, 64, 32>}, {pipeline_mode = #tpu.pipeline_mode<synchronous>, transform_indices = @transform_1, window_bounds = array<i64: 1, 32>}, {pipeline_mode = #tpu.pipeline_mode<synchronous>, transform_indices = @transform_2, window_bounds = array<i64: 1, 32>}, {pipeline_mode = #tpu.pipeline_mode<synchronous>, transform_indices = @transform_3, window_bounds = array<i64: 32, 96>}, {pipeline_mode = #tpu.pipeline_mode<synchronous>, transform_indices = @transform_4, window_bounds = array<i64: 1, 96>}, {pipeline_mode = #tpu.pipeline_mode<synchronous>, transform_indices = @transform_5, window_bounds = array<i64: 32, 32>}, {pipeline_mode = #tpu.pipeline_mode<synchronous>, transform_indices = @transform_6, window_bounds = array<i64: 1, 32>}, {pipeline_mode = #tpu.pipeline_mode<synchronous>, transform_indices = @transform_7, window_bounds = array<i64: 1, 32>}, {pipeline_mode = #tpu.pipeline_mode<synchronous>, transform_indices = @transform_8, window_bounds = array<i64: 1, 32>}, {pipeline_mode = #tpu.pipeline_mode<synchronous>, transform_indices = @transform_9, window_bounds = array<i64: 32, 64>}, {pipeline_mode = #tpu.pipeline_mode<synchronous>, transform_indices = @transform_10, window_bounds = array<i64: 1, 64>}, {pipeline_mode = #tpu.pipeline_mode<synchronous>, transform_indices = @transform_11, window_bounds = array<i64: 64, 32>}, {pipeline_mode = #tpu.pipeline_mode<synchronous>, transform_indices = @transform_12, window_bounds = array<i64: 1, 32>}, {transform_indices = @transform_13, window_bounds = array<i64: 4, 64, 32>}]} {
    %c0 = arith.constant 0 : index
    %c0_0 = arith.constant 0 : index
    %c0_1 = arith.constant 0 : index
    %0 = vector.load %arg1[%c0, %c0_0, %c0_1] : memref<4x64x32xf32, #tpu.memory_space<vmem>>, vector<4x64x32xf32>
    %1 = vector.shape_cast %0 : vector<4x64x32xf32> to vector<256x32xf32>
    %cst = arith.constant dense<0.000000e+00> : vector<256xf32>
    %2 = vector.multi_reduction <add>, %1, %cst [1] : vector<256x32xf32> to vector<256xf32>
    %3 = vector.shape_cast %2 : vector<256xf32> to vector<256x1xf32>
    %cst_2 = arith.constant 3.200000e+01 : f32
    %4 = vector.broadcast %cst_2 : f32 to vector<256x1xf32>
    %5 = arith.divf %3, %4 : vector<256x1xf32>
    %6 = vector.broadcast %5 : vector<256x1xf32> to vector<256x32xf32>
    %7 = arith.subf %1, %6 : vector<256x32xf32>
    %8 = arith.mulf %7, %7 : vector<256x32xf32>
    %cst_3 = arith.constant dense<0.000000e+00> : vector<256xf32>
    %9 = vector.multi_reduction <add>, %8, %cst_3 [1] : vector<256x32xf32> to vector<256xf32>
    %10 = vector.shape_cast %9 : vector<256xf32> to vector<256x1xf32>
    %cst_4 = arith.constant 3.200000e+01 : f32
    %11 = vector.broadcast %cst_4 : f32 to vector<256x1xf32>
    %12 = arith.divf %10, %11 : vector<256x1xf32>
    %13 = vector.broadcast %5 : vector<256x1xf32> to vector<256x32xf32>
    %14 = arith.subf %1, %13 : vector<256x32xf32>
    %cst_5 = arith.constant 9.99999974E-6 : f32
    %15 = vector.broadcast %cst_5 : f32 to vector<256x1xf32>
    %16 = arith.addf %12, %15 : vector<256x1xf32>
    %17 = math.rsqrt %16 : vector<256x1xf32>
    %18 = vector.broadcast %17 : vector<256x1xf32> to vector<256x32xf32>
    %19 = arith.mulf %14, %18 : vector<256x32xf32>
    %c0_6 = arith.constant 0 : index
    %c0_7 = arith.constant 0 : index
    %20 = vector.load %arg2[%c0_6, %c0_7] : memref<1x32xf32, #tpu.memory_space<vmem>>, vector<1x32xf32>
    %21 = vector.broadcast %20 : vector<1x32xf32> to vector<256x32xf32>
    %22 = arith.mulf %19, %21 : vector<256x32xf32>
    %c0_8 = arith.constant 0 : index
    %c0_9 = arith.constant 0 : index
    %23 = vector.load %arg3[%c0_8, %c0_9] : memref<1x32xf32, #tpu.memory_space<vmem>>, vector<1x32xf32>
    %24 = vector.broadcast %23 : vector<1x32xf32> to vector<256x32xf32>
    %25 = arith.addf %22, %24 : vector<256x32xf32>
    %26 = arith.truncf %25 : vector<256x32xf32> to vector<256x32xbf16>
    %c0_10 = arith.constant 0 : index
    %c0_11 = arith.constant 0 : index
    %27 = vector.load %arg4[%c0_10, %c0_11] : memref<32x96xbf16, #tpu.memory_space<vmem>>, vector<32x96xbf16>
    %cst_12 = arith.constant dense<0.000000e+00> : vector<256x96xf32>
    %28 = tpu.matmul %26, %27, %cst_12 {dimension_numbers = #tpu.dot_dimension_numbers<[1], [0], [0], [1], [0, 0, 1, 1], [], []>} : vector<256x32xbf16>, vector<32x96xbf16>, vector<256x96xf32> -> vector<256x96xf32>
    %c0_13 = arith.constant 0 : index
    %c0_14 = arith.constant 0 : index
    %29 = vector.load %arg5[%c0_13, %c0_14] : memref<1x96xf32, #tpu.memory_space<vmem>>, vector<1x96xf32>
    %30 = vector.broadcast %29 : vector<1x96xf32> to vector<256x96xf32>
    %31 = arith.addf %28, %30 : vector<256x96xf32>
    %32 = vector.extract_strided_slice %31 {offsets = [0, 0], sizes = [64, 8], strides = [1, 1]} : vector<256x96xf32> to vector<64x8xf32>
    %33 = vector.extract_strided_slice %31 {offsets = [0, 32], sizes = [64, 8], strides = [1, 1]} : vector<256x96xf32> to vector<64x8xf32>
    %34 = vector.extract_strided_slice %31 {offsets = [0, 64], sizes = [64, 8], strides = [1, 1]} : vector<256x96xf32> to vector<64x8xf32>
    %35 = arith.truncf %32 : vector<64x8xf32> to vector<64x8xbf16>
    %36 = arith.truncf %33 : vector<64x8xf32> to vector<64x8xbf16>
    %cst_15 = arith.constant dense<0.000000e+00> : vector<64x64xf32>
    %37 = tpu.matmul %35, %36, %cst_15 {dimension_numbers = #tpu.dot_dimension_numbers<[1], [1], [0], [0], [0, 0, 1, 0], [], []>} : vector<64x8xbf16>, vector<64x8xbf16>, vector<64x64xf32> -> vector<64x64xf32>
    %cst_16 = arith.constant dense<0xFF800000> : vector<64xf32>
    %38 = vector.multi_reduction <maximumf>, %37, %cst_16 [1] : vector<64x64xf32> to vector<64xf32>
    %39 = vector.shape_cast %38 : vector<64xf32> to vector<64x1xf32>
    %40 = vector.broadcast %39 : vector<64x1xf32> to vector<64x64xf32>
    %41 = arith.subf %37, %40 : vector<64x64xf32>
    %42 = math.exp %41 : vector<64x64xf32>
    %cst_17 = arith.constant dense<0.000000e+00> : vector<64xf32>
    %43 = vector.multi_reduction <add>, %42, %cst_17 [1] : vector<64x64xf32> to vector<64xf32>
    %44 = vector.shape_cast %43 : vector<64xf32> to vector<64x1xf32>
    %45 = tpu.reciprocal %44 {approx = true} : vector<64x1xf32> -> vector<64x1xf32>
    %46 = vector.broadcast %45 : vector<64x1xf32> to vector<64x64xf32>
    %47 = arith.mulf %42, %46 : vector<64x64xf32>
    %48 = arith.truncf %47 : vector<64x64xf32> to vector<64x64xbf16>
    %49 = arith.truncf %34 : vector<64x8xf32> to vector<64x8xbf16>
    %cst_18 = arith.constant dense<0.000000e+00> : vector<64x8xf32>
    %50 = tpu.matmul %48, %49, %cst_18 {dimension_numbers = #tpu.dot_dimension_numbers<[1], [0], [0], [1], [0, 0, 1, 1], [], []>} : vector<64x64xbf16>, vector<64x8xbf16>, vector<64x8xf32> -> vector<64x8xf32>
    %51 = vector.extract_strided_slice %31 {offsets = [0, 8], sizes = [64, 8], strides = [1, 1]} : vector<256x96xf32> to vector<64x8xf32>
    %52 = vector.extract_strided_slice %31 {offsets = [0, 40], sizes = [64, 8], strides = [1, 1]} : vector<256x96xf32> to vector<64x8xf32>
    %53 = vector.extract_strided_slice %31 {offsets = [0, 72], sizes = [64, 8], strides = [1, 1]} : vector<256x96xf32> to vector<64x8xf32>
    %54 = arith.truncf %51 : vector<64x8xf32> to vector<64x8xbf16>
    %55 = arith.truncf %52 : vector<64x8xf32> to vector<64x8xbf16>
    %cst_19 = arith.constant dense<0.000000e+00> : vector<64x64xf32>
    %56 = tpu.matmul %54, %55, %cst_19 {dimension_numbers = #tpu.dot_dimension_numbers<[1], [1], [0], [0], [0, 0, 1, 0], [], []>} : vector<64x8xbf16>, vector<64x8xbf16>, vector<64x64xf32> -> vector<64x64xf32>
    %cst_20 = arith.constant dense<0xFF800000> : vector<64xf32>
    %57 = vector.multi_reduction <maximumf>, %56, %cst_20 [1] : vector<64x64xf32> to vector<64xf32>
    %58 = vector.shape_cast %57 : vector<64xf32> to vector<64x1xf32>
    %59 = vector.broadcast %58 : vector<64x1xf32> to vector<64x64xf32>
    %60 = arith.subf %56, %59 : vector<64x64xf32>
    %61 = math.exp %60 : vector<64x64xf32>
    %cst_21 = arith.constant dense<0.000000e+00> : vector<64xf32>
    %62 = vector.multi_reduction <add>, %61, %cst_21 [1] : vector<64x64xf32> to vector<64xf32>
    %63 = vector.shape_cast %62 : vector<64xf32> to vector<64x1xf32>
    %64 = tpu.reciprocal %63 {approx = true} : vector<64x1xf32> -> vector<64x1xf32>
    %65 = vector.broadcast %64 : vector<64x1xf32> to vector<64x64xf32>
    %66 = arith.mulf %61, %65 : vector<64x64xf32>
    %67 = arith.truncf %66 : vector<64x64xf32> to vector<64x64xbf16>
    %68 = arith.truncf %53 : vector<64x8xf32> to vector<64x8xbf16>
    %cst_22 = arith.constant dense<0.000000e+00> : vector<64x8xf32>
    %69 = tpu.matmul %67, %68, %cst_22 {dimension_numbers = #tpu.dot_dimension_numbers<[1], [0], [0], [1], [0, 0, 1, 1], [], []>} : vector<64x64xbf16>, vector<64x8xbf16>, vector<64x8xf32> -> vector<64x8xf32>
    %70 = vector.extract_strided_slice %31 {offsets = [0, 16], sizes = [64, 8], strides = [1, 1]} : vector<256x96xf32> to vector<64x8xf32>
    %71 = vector.extract_strided_slice %31 {offsets = [0, 48], sizes = [64, 8], strides = [1, 1]} : vector<256x96xf32> to vector<64x8xf32>
    %72 = vector.extract_strided_slice %31 {offsets = [0, 80], sizes = [64, 8], strides = [1, 1]} : vector<256x96xf32> to vector<64x8xf32>
    %73 = arith.truncf %70 : vector<64x8xf32> to vector<64x8xbf16>
    %74 = arith.truncf %71 : vector<64x8xf32> to vector<64x8xbf16>
    %cst_23 = arith.constant dense<0.000000e+00> : vector<64x64xf32>
    %75 = tpu.matmul %73, %74, %cst_23 {dimension_numbers = #tpu.dot_dimension_numbers<[1], [1], [0], [0], [0, 0, 1, 0], [], []>} : vector<64x8xbf16>, vector<64x8xbf16>, vector<64x64xf32> -> vector<64x64xf32>
    %cst_24 = arith.constant dense<0xFF800000> : vector<64xf32>
    %76 = vector.multi_reduction <maximumf>, %75, %cst_24 [1] : vector<64x64xf32> to vector<64xf32>
    %77 = vector.shape_cast %76 : vector<64xf32> to vector<64x1xf32>
    %78 = vector.broadcast %77 : vector<64x1xf32> to vector<64x64xf32>
    %79 = arith.subf %75, %78 : vector<64x64xf32>
    %80 = math.exp %79 : vector<64x64xf32>
    %cst_25 = arith.constant dense<0.000000e+00> : vector<64xf32>
    %81 = vector.multi_reduction <add>, %80, %cst_25 [1] : vector<64x64xf32> to vector<64xf32>
    %82 = vector.shape_cast %81 : vector<64xf32> to vector<64x1xf32>
    %83 = tpu.reciprocal %82 {approx = true} : vector<64x1xf32> -> vector<64x1xf32>
    %84 = vector.broadcast %83 : vector<64x1xf32> to vector<64x64xf32>
    %85 = arith.mulf %80, %84 : vector<64x64xf32>
    %86 = arith.truncf %85 : vector<64x64xf32> to vector<64x64xbf16>
    %87 = arith.truncf %72 : vector<64x8xf32> to vector<64x8xbf16>
    %cst_26 = arith.constant dense<0.000000e+00> : vector<64x8xf32>
    %88 = tpu.matmul %86, %87, %cst_26 {dimension_numbers = #tpu.dot_dimension_numbers<[1], [0], [0], [1], [0, 0, 1, 1], [], []>} : vector<64x64xbf16>, vector<64x8xbf16>, vector<64x8xf32> -> vector<64x8xf32>
    %89 = vector.extract_strided_slice %31 {offsets = [0, 24], sizes = [64, 8], strides = [1, 1]} : vector<256x96xf32> to vector<64x8xf32>
    %90 = vector.extract_strided_slice %31 {offsets = [0, 56], sizes = [64, 8], strides = [1, 1]} : vector<256x96xf32> to vector<64x8xf32>
    %91 = vector.extract_strided_slice %31 {offsets = [0, 88], sizes = [64, 8], strides = [1, 1]} : vector<256x96xf32> to vector<64x8xf32>
    %92 = arith.truncf %89 : vector<64x8xf32> to vector<64x8xbf16>
    %93 = arith.truncf %90 : vector<64x8xf32> to vector<64x8xbf16>
    %cst_27 = arith.constant dense<0.000000e+00> : vector<64x64xf32>
    %94 = tpu.matmul %92, %93, %cst_27 {dimension_numbers = #tpu.dot_dimension_numbers<[1], [1], [0], [0], [0, 0, 1, 0], [], []>} : vector<64x8xbf16>, vector<64x8xbf16>, vector<64x64xf32> -> vector<64x64xf32>
    %cst_28 = arith.constant dense<0xFF800000> : vector<64xf32>
    %95 = vector.multi_reduction <maximumf>, %94, %cst_28 [1] : vector<64x64xf32> to vector<64xf32>
    %96 = vector.shape_cast %95 : vector<64xf32> to vector<64x1xf32>
    %97 = vector.broadcast %96 : vector<64x1xf32> to vector<64x64xf32>
    %98 = arith.subf %94, %97 : vector<64x64xf32>
    %99 = math.exp %98 : vector<64x64xf32>
    %cst_29 = arith.constant dense<0.000000e+00> : vector<64xf32>
    %100 = vector.multi_reduction <add>, %99, %cst_29 [1] : vector<64x64xf32> to vector<64xf32>
    %101 = vector.shape_cast %100 : vector<64xf32> to vector<64x1xf32>
    %102 = tpu.reciprocal %101 {approx = true} : vector<64x1xf32> -> vector<64x1xf32>
    %103 = vector.broadcast %102 : vector<64x1xf32> to vector<64x64xf32>
    %104 = arith.mulf %99, %103 : vector<64x64xf32>
    %105 = arith.truncf %104 : vector<64x64xf32> to vector<64x64xbf16>
    %106 = arith.truncf %91 : vector<64x8xf32> to vector<64x8xbf16>
    %cst_30 = arith.constant dense<0.000000e+00> : vector<64x8xf32>
    %107 = tpu.matmul %105, %106, %cst_30 {dimension_numbers = #tpu.dot_dimension_numbers<[1], [0], [0], [1], [0, 0, 1, 1], [], []>} : vector<64x64xbf16>, vector<64x8xbf16>, vector<64x8xf32> -> vector<64x8xf32>
    %108 = tpu.concatenate %50, %69, %88, %107 in 1 : vector<64x8xf32>, vector<64x8xf32>, vector<64x8xf32>, vector<64x8xf32> -> vector<64x32xf32>
    %109 = vector.extract_strided_slice %31 {offsets = [64, 0], sizes = [64, 8], strides = [1, 1]} : vector<256x96xf32> to vector<64x8xf32>
    %110 = vector.extract_strided_slice %31 {offsets = [64, 32], sizes = [64, 8], strides = [1, 1]} : vector<256x96xf32> to vector<64x8xf32>
    %111 = vector.extract_strided_slice %31 {offsets = [64, 64], sizes = [64, 8], strides = [1, 1]} : vector<256x96xf32> to vector<64x8xf32>
    %112 = arith.truncf %109 : vector<64x8xf32> to vector<64x8xbf16>
    %113 = arith.truncf %110 : vector<64x8xf32> to vector<64x8xbf16>
    %cst_31 = arith.constant dense<0.000000e+00> : vector<64x64xf32>
    %114 = tpu.matmul %112, %113, %cst_31 {dimension_numbers = #tpu.dot_dimension_numbers<[1], [1], [0], [0], [0, 0, 1, 0], [], []>} : vector<64x8xbf16>, vector<64x8xbf16>, vector<64x64xf32> -> vector<64x64xf32>
    %cst_32 = arith.constant dense<0xFF800000> : vector<64xf32>
    %115 = vector.multi_reduction <maximumf>, %114, %cst_32 [1] : vector<64x64xf32> to vector<64xf32>
    %116 = vector.shape_cast %115 : vector<64xf32> to vector<64x1xf32>
    %117 = vector.broadcast %116 : vector<64x1xf32> to vector<64x64xf32>
    %118 = arith.subf %114, %117 : vector<64x64xf32>
    %119 = math.exp %118 : vector<64x64xf32>
    %cst_33 = arith.constant dense<0.000000e+00> : vector<64xf32>
    %120 = vector.multi_reduction <add>, %119, %cst_33 [1] : vector<64x64xf32> to vector<64xf32>
    %121 = vector.shape_cast %120 : vector<64xf32> to vector<64x1xf32>
    %122 = tpu.reciprocal %121 {approx = true} : vector<64x1xf32> -> vector<64x1xf32>
    %123 = vector.broadcast %122 : vector<64x1xf32> to vector<64x64xf32>
    %124 = arith.mulf %119, %123 : vector<64x64xf32>
    %125 = arith.truncf %124 : vector<64x64xf32> to vector<64x64xbf16>
    %126 = arith.truncf %111 : vector<64x8xf32> to vector<64x8xbf16>
    %cst_34 = arith.constant dense<0.000000e+00> : vector<64x8xf32>
    %127 = tpu.matmul %125, %126, %cst_34 {dimension_numbers = #tpu.dot_dimension_numbers<[1], [0], [0], [1], [0, 0, 1, 1], [], []>} : vector<64x64xbf16>, vector<64x8xbf16>, vector<64x8xf32> -> vector<64x8xf32>
    %128 = vector.extract_strided_slice %31 {offsets = [64, 8], sizes = [64, 8], strides = [1, 1]} : vector<256x96xf32> to vector<64x8xf32>
    %129 = vector.extract_strided_slice %31 {offsets = [64, 40], sizes = [64, 8], strides = [1, 1]} : vector<256x96xf32> to vector<64x8xf32>
    %130 = vector.extract_strided_slice %31 {offsets = [64, 72], sizes = [64, 8], strides = [1, 1]} : vector<256x96xf32> to vector<64x8xf32>
    %131 = arith.truncf %128 : vector<64x8xf32> to vector<64x8xbf16>
    %132 = arith.truncf %129 : vector<64x8xf32> to vector<64x8xbf16>
    %cst_35 = arith.constant dense<0.000000e+00> : vector<64x64xf32>
    %133 = tpu.matmul %131, %132, %cst_35 {dimension_numbers = #tpu.dot_dimension_numbers<[1], [1], [0], [0], [0, 0, 1, 0], [], []>} : vector<64x8xbf16>, vector<64x8xbf16>, vector<64x64xf32> -> vector<64x64xf32>
    %cst_36 = arith.constant dense<0xFF800000> : vector<64xf32>
    %134 = vector.multi_reduction <maximumf>, %133, %cst_36 [1] : vector<64x64xf32> to vector<64xf32>
    %135 = vector.shape_cast %134 : vector<64xf32> to vector<64x1xf32>
    %136 = vector.broadcast %135 : vector<64x1xf32> to vector<64x64xf32>
    %137 = arith.subf %133, %136 : vector<64x64xf32>
    %138 = math.exp %137 : vector<64x64xf32>
    %cst_37 = arith.constant dense<0.000000e+00> : vector<64xf32>
    %139 = vector.multi_reduction <add>, %138, %cst_37 [1] : vector<64x64xf32> to vector<64xf32>
    %140 = vector.shape_cast %139 : vector<64xf32> to vector<64x1xf32>
    %141 = tpu.reciprocal %140 {approx = true} : vector<64x1xf32> -> vector<64x1xf32>
    %142 = vector.broadcast %141 : vector<64x1xf32> to vector<64x64xf32>
    %143 = arith.mulf %138, %142 : vector<64x64xf32>
    %144 = arith.truncf %143 : vector<64x64xf32> to vector<64x64xbf16>
    %145 = arith.truncf %130 : vector<64x8xf32> to vector<64x8xbf16>
    %cst_38 = arith.constant dense<0.000000e+00> : vector<64x8xf32>
    %146 = tpu.matmul %144, %145, %cst_38 {dimension_numbers = #tpu.dot_dimension_numbers<[1], [0], [0], [1], [0, 0, 1, 1], [], []>} : vector<64x64xbf16>, vector<64x8xbf16>, vector<64x8xf32> -> vector<64x8xf32>
    %147 = vector.extract_strided_slice %31 {offsets = [64, 16], sizes = [64, 8], strides = [1, 1]} : vector<256x96xf32> to vector<64x8xf32>
    %148 = vector.extract_strided_slice %31 {offsets = [64, 48], sizes = [64, 8], strides = [1, 1]} : vector<256x96xf32> to vector<64x8xf32>
    %149 = vector.extract_strided_slice %31 {offsets = [64, 80], sizes = [64, 8], strides = [1, 1]} : vector<256x96xf32> to vector<64x8xf32>
    %150 = arith.truncf %147 : vector<64x8xf32> to vector<64x8xbf16>
    %151 = arith.truncf %148 : vector<64x8xf32> to vector<64x8xbf16>
    %cst_39 = arith.constant dense<0.000000e+00> : vector<64x64xf32>
    %152 = tpu.matmul %150, %151, %cst_39 {dimension_numbers = #tpu.dot_dimension_numbers<[1], [1], [0], [0], [0, 0, 1, 0], [], []>} : vector<64x8xbf16>, vector<64x8xbf16>, vector<64x64xf32> -> vector<64x64xf32>
    %cst_40 = arith.constant dense<0xFF800000> : vector<64xf32>
    %153 = vector.multi_reduction <maximumf>, %152, %cst_40 [1] : vector<64x64xf32> to vector<64xf32>
    %154 = vector.shape_cast %153 : vector<64xf32> to vector<64x1xf32>
    %155 = vector.broadcast %154 : vector<64x1xf32> to vector<64x64xf32>
    %156 = arith.subf %152, %155 : vector<64x64xf32>
    %157 = math.exp %156 : vector<64x64xf32>
    %cst_41 = arith.constant dense<0.000000e+00> : vector<64xf32>
    %158 = vector.multi_reduction <add>, %157, %cst_41 [1] : vector<64x64xf32> to vector<64xf32>
    %159 = vector.shape_cast %158 : vector<64xf32> to vector<64x1xf32>
    %160 = tpu.reciprocal %159 {approx = true} : vector<64x1xf32> -> vector<64x1xf32>
    %161 = vector.broadcast %160 : vector<64x1xf32> to vector<64x64xf32>
    %162 = arith.mulf %157, %161 : vector<64x64xf32>
    %163 = arith.truncf %162 : vector<64x64xf32> to vector<64x64xbf16>
    %164 = arith.truncf %149 : vector<64x8xf32> to vector<64x8xbf16>
    %cst_42 = arith.constant dense<0.000000e+00> : vector<64x8xf32>
    %165 = tpu.matmul %163, %164, %cst_42 {dimension_numbers = #tpu.dot_dimension_numbers<[1], [0], [0], [1], [0, 0, 1, 1], [], []>} : vector<64x64xbf16>, vector<64x8xbf16>, vector<64x8xf32> -> vector<64x8xf32>
    %166 = vector.extract_strided_slice %31 {offsets = [64, 24], sizes = [64, 8], strides = [1, 1]} : vector<256x96xf32> to vector<64x8xf32>
    %167 = vector.extract_strided_slice %31 {offsets = [64, 56], sizes = [64, 8], strides = [1, 1]} : vector<256x96xf32> to vector<64x8xf32>
    %168 = vector.extract_strided_slice %31 {offsets = [64, 88], sizes = [64, 8], strides = [1, 1]} : vector<256x96xf32> to vector<64x8xf32>
    %169 = arith.truncf %166 : vector<64x8xf32> to vector<64x8xbf16>
    %170 = arith.truncf %167 : vector<64x8xf32> to vector<64x8xbf16>
    %cst_43 = arith.constant dense<0.000000e+00> : vector<64x64xf32>
    %171 = tpu.matmul %169, %170, %cst_43 {dimension_numbers = #tpu.dot_dimension_numbers<[1], [1], [0], [0], [0, 0, 1, 0], [], []>} : vector<64x8xbf16>, vector<64x8xbf16>, vector<64x64xf32> -> vector<64x64xf32>
    %cst_44 = arith.constant dense<0xFF800000> : vector<64xf32>
    %172 = vector.multi_reduction <maximumf>, %171, %cst_44 [1] : vector<64x64xf32> to vector<64xf32>
    %173 = vector.shape_cast %172 : vector<64xf32> to vector<64x1xf32>
    %174 = vector.broadcast %173 : vector<64x1xf32> to vector<64x64xf32>
    %175 = arith.subf %171, %174 : vector<64x64xf32>
    %176 = math.exp %175 : vector<64x64xf32>
    %cst_45 = arith.constant dense<0.000000e+00> : vector<64xf32>
    %177 = vector.multi_reduction <add>, %176, %cst_45 [1] : vector<64x64xf32> to vector<64xf32>
    %178 = vector.shape_cast %177 : vector<64xf32> to vector<64x1xf32>
    %179 = tpu.reciprocal %178 {approx = true} : vector<64x1xf32> -> vector<64x1xf32>
    %180 = vector.broadcast %179 : vector<64x1xf32> to vector<64x64xf32>
    %181 = arith.mulf %176, %180 : vector<64x64xf32>
    %182 = arith.truncf %181 : vector<64x64xf32> to vector<64x64xbf16>
    %183 = arith.truncf %168 : vector<64x8xf32> to vector<64x8xbf16>
    %cst_46 = arith.constant dense<0.000000e+00> : vector<64x8xf32>
    %184 = tpu.matmul %182, %183, %cst_46 {dimension_numbers = #tpu.dot_dimension_numbers<[1], [0], [0], [1], [0, 0, 1, 1], [], []>} : vector<64x64xbf16>, vector<64x8xbf16>, vector<64x8xf32> -> vector<64x8xf32>
    %185 = tpu.concatenate %127, %146, %165, %184 in 1 : vector<64x8xf32>, vector<64x8xf32>, vector<64x8xf32>, vector<64x8xf32> -> vector<64x32xf32>
    %186 = vector.extract_strided_slice %31 {offsets = [128, 0], sizes = [64, 8], strides = [1, 1]} : vector<256x96xf32> to vector<64x8xf32>
    %187 = vector.extract_strided_slice %31 {offsets = [128, 32], sizes = [64, 8], strides = [1, 1]} : vector<256x96xf32> to vector<64x8xf32>
    %188 = vector.extract_strided_slice %31 {offsets = [128, 64], sizes = [64, 8], strides = [1, 1]} : vector<256x96xf32> to vector<64x8xf32>
    %189 = arith.truncf %186 : vector<64x8xf32> to vector<64x8xbf16>
    %190 = arith.truncf %187 : vector<64x8xf32> to vector<64x8xbf16>
    %cst_47 = arith.constant dense<0.000000e+00> : vector<64x64xf32>
    %191 = tpu.matmul %189, %190, %cst_47 {dimension_numbers = #tpu.dot_dimension_numbers<[1], [1], [0], [0], [0, 0, 1, 0], [], []>} : vector<64x8xbf16>, vector<64x8xbf16>, vector<64x64xf32> -> vector<64x64xf32>
    %cst_48 = arith.constant dense<0xFF800000> : vector<64xf32>
    %192 = vector.multi_reduction <maximumf>, %191, %cst_48 [1] : vector<64x64xf32> to vector<64xf32>
    %193 = vector.shape_cast %192 : vector<64xf32> to vector<64x1xf32>
    %194 = vector.broadcast %193 : vector<64x1xf32> to vector<64x64xf32>
    %195 = arith.subf %191, %194 : vector<64x64xf32>
    %196 = math.exp %195 : vector<64x64xf32>
    %cst_49 = arith.constant dense<0.000000e+00> : vector<64xf32>
    %197 = vector.multi_reduction <add>, %196, %cst_49 [1] : vector<64x64xf32> to vector<64xf32>
    %198 = vector.shape_cast %197 : vector<64xf32> to vector<64x1xf32>
    %199 = tpu.reciprocal %198 {approx = true} : vector<64x1xf32> -> vector<64x1xf32>
    %200 = vector.broadcast %199 : vector<64x1xf32> to vector<64x64xf32>
    %201 = arith.mulf %196, %200 : vector<64x64xf32>
    %202 = arith.truncf %201 : vector<64x64xf32> to vector<64x64xbf16>
    %203 = arith.truncf %188 : vector<64x8xf32> to vector<64x8xbf16>
    %cst_50 = arith.constant dense<0.000000e+00> : vector<64x8xf32>
    %204 = tpu.matmul %202, %203, %cst_50 {dimension_numbers = #tpu.dot_dimension_numbers<[1], [0], [0], [1], [0, 0, 1, 1], [], []>} : vector<64x64xbf16>, vector<64x8xbf16>, vector<64x8xf32> -> vector<64x8xf32>
    %205 = vector.extract_strided_slice %31 {offsets = [128, 8], sizes = [64, 8], strides = [1, 1]} : vector<256x96xf32> to vector<64x8xf32>
    %206 = vector.extract_strided_slice %31 {offsets = [128, 40], sizes = [64, 8], strides = [1, 1]} : vector<256x96xf32> to vector<64x8xf32>
    %207 = vector.extract_strided_slice %31 {offsets = [128, 72], sizes = [64, 8], strides = [1, 1]} : vector<256x96xf32> to vector<64x8xf32>
    %208 = arith.truncf %205 : vector<64x8xf32> to vector<64x8xbf16>
    %209 = arith.truncf %206 : vector<64x8xf32> to vector<64x8xbf16>
    %cst_51 = arith.constant dense<0.000000e+00> : vector<64x64xf32>
    %210 = tpu.matmul %208, %209, %cst_51 {dimension_numbers = #tpu.dot_dimension_numbers<[1], [1], [0], [0], [0, 0, 1, 0], [], []>} : vector<64x8xbf16>, vector<64x8xbf16>, vector<64x64xf32> -> vector<64x64xf32>
    %cst_52 = arith.constant dense<0xFF800000> : vector<64xf32>
    %211 = vector.multi_reduction <maximumf>, %210, %cst_52 [1] : vector<64x64xf32> to vector<64xf32>
    %212 = vector.shape_cast %211 : vector<64xf32> to vector<64x1xf32>
    %213 = vector.broadcast %212 : vector<64x1xf32> to vector<64x64xf32>
    %214 = arith.subf %210, %213 : vector<64x64xf32>
    %215 = math.exp %214 : vector<64x64xf32>
    %cst_53 = arith.constant dense<0.000000e+00> : vector<64xf32>
    %216 = vector.multi_reduction <add>, %215, %cst_53 [1] : vector<64x64xf32> to vector<64xf32>
    %217 = vector.shape_cast %216 : vector<64xf32> to vector<64x1xf32>
    %218 = tpu.reciprocal %217 {approx = true} : vector<64x1xf32> -> vector<64x1xf32>
    %219 = vector.broadcast %218 : vector<64x1xf32> to vector<64x64xf32>
    %220 = arith.mulf %215, %219 : vector<64x64xf32>
    %221 = arith.truncf %220 : vector<64x64xf32> to vector<64x64xbf16>
    %222 = arith.truncf %207 : vector<64x8xf32> to vector<64x8xbf16>
    %cst_54 = arith.constant dense<0.000000e+00> : vector<64x8xf32>
    %223 = tpu.matmul %221, %222, %cst_54 {dimension_numbers = #tpu.dot_dimension_numbers<[1], [0], [0], [1], [0, 0, 1, 1], [], []>} : vector<64x64xbf16>, vector<64x8xbf16>, vector<64x8xf32> -> vector<64x8xf32>
    %224 = vector.extract_strided_slice %31 {offsets = [128, 16], sizes = [64, 8], strides = [1, 1]} : vector<256x96xf32> to vector<64x8xf32>
    %225 = vector.extract_strided_slice %31 {offsets = [128, 48], sizes = [64, 8], strides = [1, 1]} : vector<256x96xf32> to vector<64x8xf32>
    %226 = vector.extract_strided_slice %31 {offsets = [128, 80], sizes = [64, 8], strides = [1, 1]} : vector<256x96xf32> to vector<64x8xf32>
    %227 = arith.truncf %224 : vector<64x8xf32> to vector<64x8xbf16>
    %228 = arith.truncf %225 : vector<64x8xf32> to vector<64x8xbf16>
    %cst_55 = arith.constant dense<0.000000e+00> : vector<64x64xf32>
    %229 = tpu.matmul %227, %228, %cst_55 {dimension_numbers = #tpu.dot_dimension_numbers<[1], [1], [0], [0], [0, 0, 1, 0], [], []>} : vector<64x8xbf16>, vector<64x8xbf16>, vector<64x64xf32> -> vector<64x64xf32>
    %cst_56 = arith.constant dense<0xFF800000> : vector<64xf32>
    %230 = vector.multi_reduction <maximumf>, %229, %cst_56 [1] : vector<64x64xf32> to vector<64xf32>
    %231 = vector.shape_cast %230 : vector<64xf32> to vector<64x1xf32>
    %232 = vector.broadcast %231 : vector<64x1xf32> to vector<64x64xf32>
    %233 = arith.subf %229, %232 : vector<64x64xf32>
    %234 = math.exp %233 : vector<64x64xf32>
    %cst_57 = arith.constant dense<0.000000e+00> : vector<64xf32>
    %235 = vector.multi_reduction <add>, %234, %cst_57 [1] : vector<64x64xf32> to vector<64xf32>
    %236 = vector.shape_cast %235 : vector<64xf32> to vector<64x1xf32>
    %237 = tpu.reciprocal %236 {approx = true} : vector<64x1xf32> -> vector<64x1xf32>
    %238 = vector.broadcast %237 : vector<64x1xf32> to vector<64x64xf32>
    %239 = arith.mulf %234, %238 : vector<64x64xf32>
    %240 = arith.truncf %239 : vector<64x64xf32> to vector<64x64xbf16>
    %241 = arith.truncf %226 : vector<64x8xf32> to vector<64x8xbf16>
    %cst_58 = arith.constant dense<0.000000e+00> : vector<64x8xf32>
    %242 = tpu.matmul %240, %241, %cst_58 {dimension_numbers = #tpu.dot_dimension_numbers<[1], [0], [0], [1], [0, 0, 1, 1], [], []>} : vector<64x64xbf16>, vector<64x8xbf16>, vector<64x8xf32> -> vector<64x8xf32>
    %243 = vector.extract_strided_slice %31 {offsets = [128, 24], sizes = [64, 8], strides = [1, 1]} : vector<256x96xf32> to vector<64x8xf32>
    %244 = vector.extract_strided_slice %31 {offsets = [128, 56], sizes = [64, 8], strides = [1, 1]} : vector<256x96xf32> to vector<64x8xf32>
    %245 = vector.extract_strided_slice %31 {offsets = [128, 88], sizes = [64, 8], strides = [1, 1]} : vector<256x96xf32> to vector<64x8xf32>
    %246 = arith.truncf %243 : vector<64x8xf32> to vector<64x8xbf16>
    %247 = arith.truncf %244 : vector<64x8xf32> to vector<64x8xbf16>
    %cst_59 = arith.constant dense<0.000000e+00> : vector<64x64xf32>
    %248 = tpu.matmul %246, %247, %cst_59 {dimension_numbers = #tpu.dot_dimension_numbers<[1], [1], [0], [0], [0, 0, 1, 0], [], []>} : vector<64x8xbf16>, vector<64x8xbf16>, vector<64x64xf32> -> vector<64x64xf32>
    %cst_60 = arith.constant dense<0xFF800000> : vector<64xf32>
    %249 = vector.multi_reduction <maximumf>, %248, %cst_60 [1] : vector<64x64xf32> to vector<64xf32>
    %250 = vector.shape_cast %249 : vector<64xf32> to vector<64x1xf32>
    %251 = vector.broadcast %250 : vector<64x1xf32> to vector<64x64xf32>
    %252 = arith.subf %248, %251 : vector<64x64xf32>
    %253 = math.exp %252 : vector<64x64xf32>
    %cst_61 = arith.constant dense<0.000000e+00> : vector<64xf32>
    %254 = vector.multi_reduction <add>, %253, %cst_61 [1] : vector<64x64xf32> to vector<64xf32>
    %255 = vector.shape_cast %254 : vector<64xf32> to vector<64x1xf32>
    %256 = tpu.reciprocal %255 {approx = true} : vector<64x1xf32> -> vector<64x1xf32>
    %257 = vector.broadcast %256 : vector<64x1xf32> to vector<64x64xf32>
    %258 = arith.mulf %253, %257 : vector<64x64xf32>
    %259 = arith.truncf %258 : vector<64x64xf32> to vector<64x64xbf16>
    %260 = arith.truncf %245 : vector<64x8xf32> to vector<64x8xbf16>
    %cst_62 = arith.constant dense<0.000000e+00> : vector<64x8xf32>
    %261 = tpu.matmul %259, %260, %cst_62 {dimension_numbers = #tpu.dot_dimension_numbers<[1], [0], [0], [1], [0, 0, 1, 1], [], []>} : vector<64x64xbf16>, vector<64x8xbf16>, vector<64x8xf32> -> vector<64x8xf32>
    %262 = tpu.concatenate %204, %223, %242, %261 in 1 : vector<64x8xf32>, vector<64x8xf32>, vector<64x8xf32>, vector<64x8xf32> -> vector<64x32xf32>
    %263 = vector.extract_strided_slice %31 {offsets = [192, 0], sizes = [64, 8], strides = [1, 1]} : vector<256x96xf32> to vector<64x8xf32>
    %264 = vector.extract_strided_slice %31 {offsets = [192, 32], sizes = [64, 8], strides = [1, 1]} : vector<256x96xf32> to vector<64x8xf32>
    %265 = vector.extract_strided_slice %31 {offsets = [192, 64], sizes = [64, 8], strides = [1, 1]} : vector<256x96xf32> to vector<64x8xf32>
    %266 = arith.truncf %263 : vector<64x8xf32> to vector<64x8xbf16>
    %267 = arith.truncf %264 : vector<64x8xf32> to vector<64x8xbf16>
    %cst_63 = arith.constant dense<0.000000e+00> : vector<64x64xf32>
    %268 = tpu.matmul %266, %267, %cst_63 {dimension_numbers = #tpu.dot_dimension_numbers<[1], [1], [0], [0], [0, 0, 1, 0], [], []>} : vector<64x8xbf16>, vector<64x8xbf16>, vector<64x64xf32> -> vector<64x64xf32>
    %cst_64 = arith.constant dense<0xFF800000> : vector<64xf32>
    %269 = vector.multi_reduction <maximumf>, %268, %cst_64 [1] : vector<64x64xf32> to vector<64xf32>
    %270 = vector.shape_cast %269 : vector<64xf32> to vector<64x1xf32>
    %271 = vector.broadcast %270 : vector<64x1xf32> to vector<64x64xf32>
    %272 = arith.subf %268, %271 : vector<64x64xf32>
    %273 = math.exp %272 : vector<64x64xf32>
    %cst_65 = arith.constant dense<0.000000e+00> : vector<64xf32>
    %274 = vector.multi_reduction <add>, %273, %cst_65 [1] : vector<64x64xf32> to vector<64xf32>
    %275 = vector.shape_cast %274 : vector<64xf32> to vector<64x1xf32>
    %276 = tpu.reciprocal %275 {approx = true} : vector<64x1xf32> -> vector<64x1xf32>
    %277 = vector.broadcast %276 : vector<64x1xf32> to vector<64x64xf32>
    %278 = arith.mulf %273, %277 : vector<64x64xf32>
    %279 = arith.truncf %278 : vector<64x64xf32> to vector<64x64xbf16>
    %280 = arith.truncf %265 : vector<64x8xf32> to vector<64x8xbf16>
    %cst_66 = arith.constant dense<0.000000e+00> : vector<64x8xf32>
    %281 = tpu.matmul %279, %280, %cst_66 {dimension_numbers = #tpu.dot_dimension_numbers<[1], [0], [0], [1], [0, 0, 1, 1], [], []>} : vector<64x64xbf16>, vector<64x8xbf16>, vector<64x8xf32> -> vector<64x8xf32>
    %282 = vector.extract_strided_slice %31 {offsets = [192, 8], sizes = [64, 8], strides = [1, 1]} : vector<256x96xf32> to vector<64x8xf32>
    %283 = vector.extract_strided_slice %31 {offsets = [192, 40], sizes = [64, 8], strides = [1, 1]} : vector<256x96xf32> to vector<64x8xf32>
    %284 = vector.extract_strided_slice %31 {offsets = [192, 72], sizes = [64, 8], strides = [1, 1]} : vector<256x96xf32> to vector<64x8xf32>
    %285 = arith.truncf %282 : vector<64x8xf32> to vector<64x8xbf16>
    %286 = arith.truncf %283 : vector<64x8xf32> to vector<64x8xbf16>
    %cst_67 = arith.constant dense<0.000000e+00> : vector<64x64xf32>
    %287 = tpu.matmul %285, %286, %cst_67 {dimension_numbers = #tpu.dot_dimension_numbers<[1], [1], [0], [0], [0, 0, 1, 0], [], []>} : vector<64x8xbf16>, vector<64x8xbf16>, vector<64x64xf32> -> vector<64x64xf32>
    %cst_68 = arith.constant dense<0xFF800000> : vector<64xf32>
    %288 = vector.multi_reduction <maximumf>, %287, %cst_68 [1] : vector<64x64xf32> to vector<64xf32>
    %289 = vector.shape_cast %288 : vector<64xf32> to vector<64x1xf32>
    %290 = vector.broadcast %289 : vector<64x1xf32> to vector<64x64xf32>
    %291 = arith.subf %287, %290 : vector<64x64xf32>
    %292 = math.exp %291 : vector<64x64xf32>
    %cst_69 = arith.constant dense<0.000000e+00> : vector<64xf32>
    %293 = vector.multi_reduction <add>, %292, %cst_69 [1] : vector<64x64xf32> to vector<64xf32>
    %294 = vector.shape_cast %293 : vector<64xf32> to vector<64x1xf32>
    %295 = tpu.reciprocal %294 {approx = true} : vector<64x1xf32> -> vector<64x1xf32>
    %296 = vector.broadcast %295 : vector<64x1xf32> to vector<64x64xf32>
    %297 = arith.mulf %292, %296 : vector<64x64xf32>
    %298 = arith.truncf %297 : vector<64x64xf32> to vector<64x64xbf16>
    %299 = arith.truncf %284 : vector<64x8xf32> to vector<64x8xbf16>
    %cst_70 = arith.constant dense<0.000000e+00> : vector<64x8xf32>
    %300 = tpu.matmul %298, %299, %cst_70 {dimension_numbers = #tpu.dot_dimension_numbers<[1], [0], [0], [1], [0, 0, 1, 1], [], []>} : vector<64x64xbf16>, vector<64x8xbf16>, vector<64x8xf32> -> vector<64x8xf32>
    %301 = vector.extract_strided_slice %31 {offsets = [192, 16], sizes = [64, 8], strides = [1, 1]} : vector<256x96xf32> to vector<64x8xf32>
    %302 = vector.extract_strided_slice %31 {offsets = [192, 48], sizes = [64, 8], strides = [1, 1]} : vector<256x96xf32> to vector<64x8xf32>
    %303 = vector.extract_strided_slice %31 {offsets = [192, 80], sizes = [64, 8], strides = [1, 1]} : vector<256x96xf32> to vector<64x8xf32>
    %304 = arith.truncf %301 : vector<64x8xf32> to vector<64x8xbf16>
    %305 = arith.truncf %302 : vector<64x8xf32> to vector<64x8xbf16>
    %cst_71 = arith.constant dense<0.000000e+00> : vector<64x64xf32>
    %306 = tpu.matmul %304, %305, %cst_71 {dimension_numbers = #tpu.dot_dimension_numbers<[1], [1], [0], [0], [0, 0, 1, 0], [], []>} : vector<64x8xbf16>, vector<64x8xbf16>, vector<64x64xf32> -> vector<64x64xf32>
    %cst_72 = arith.constant dense<0xFF800000> : vector<64xf32>
    %307 = vector.multi_reduction <maximumf>, %306, %cst_72 [1] : vector<64x64xf32> to vector<64xf32>
    %308 = vector.shape_cast %307 : vector<64xf32> to vector<64x1xf32>
    %309 = vector.broadcast %308 : vector<64x1xf32> to vector<64x64xf32>
    %310 = arith.subf %306, %309 : vector<64x64xf32>
    %311 = math.exp %310 : vector<64x64xf32>
    %cst_73 = arith.constant dense<0.000000e+00> : vector<64xf32>
    %312 = vector.multi_reduction <add>, %311, %cst_73 [1] : vector<64x64xf32> to vector<64xf32>
    %313 = vector.shape_cast %312 : vector<64xf32> to vector<64x1xf32>
    %314 = tpu.reciprocal %313 {approx = true} : vector<64x1xf32> -> vector<64x1xf32>
    %315 = vector.broadcast %314 : vector<64x1xf32> to vector<64x64xf32>
    %316 = arith.mulf %311, %315 : vector<64x64xf32>
    %317 = arith.truncf %316 : vector<64x64xf32> to vector<64x64xbf16>
    %318 = arith.truncf %303 : vector<64x8xf32> to vector<64x8xbf16>
    %cst_74 = arith.constant dense<0.000000e+00> : vector<64x8xf32>
    %319 = tpu.matmul %317, %318, %cst_74 {dimension_numbers = #tpu.dot_dimension_numbers<[1], [0], [0], [1], [0, 0, 1, 1], [], []>} : vector<64x64xbf16>, vector<64x8xbf16>, vector<64x8xf32> -> vector<64x8xf32>
    %320 = vector.extract_strided_slice %31 {offsets = [192, 24], sizes = [64, 8], strides = [1, 1]} : vector<256x96xf32> to vector<64x8xf32>
    %321 = vector.extract_strided_slice %31 {offsets = [192, 56], sizes = [64, 8], strides = [1, 1]} : vector<256x96xf32> to vector<64x8xf32>
    %322 = vector.extract_strided_slice %31 {offsets = [192, 88], sizes = [64, 8], strides = [1, 1]} : vector<256x96xf32> to vector<64x8xf32>
    %323 = arith.truncf %320 : vector<64x8xf32> to vector<64x8xbf16>
    %324 = arith.truncf %321 : vector<64x8xf32> to vector<64x8xbf16>
    %cst_75 = arith.constant dense<0.000000e+00> : vector<64x64xf32>
    %325 = tpu.matmul %323, %324, %cst_75 {dimension_numbers = #tpu.dot_dimension_numbers<[1], [1], [0], [0], [0, 0, 1, 0], [], []>} : vector<64x8xbf16>, vector<64x8xbf16>, vector<64x64xf32> -> vector<64x64xf32>
    %cst_76 = arith.constant dense<0xFF800000> : vector<64xf32>
    %326 = vector.multi_reduction <maximumf>, %325, %cst_76 [1] : vector<64x64xf32> to vector<64xf32>
    %327 = vector.shape_cast %326 : vector<64xf32> to vector<64x1xf32>
    %328 = vector.broadcast %327 : vector<64x1xf32> to vector<64x64xf32>
    %329 = arith.subf %325, %328 : vector<64x64xf32>
    %330 = math.exp %329 : vector<64x64xf32>
    %cst_77 = arith.constant dense<0.000000e+00> : vector<64xf32>
    %331 = vector.multi_reduction <add>, %330, %cst_77 [1] : vector<64x64xf32> to vector<64xf32>
    %332 = vector.shape_cast %331 : vector<64xf32> to vector<64x1xf32>
    %333 = tpu.reciprocal %332 {approx = true} : vector<64x1xf32> -> vector<64x1xf32>
    %334 = vector.broadcast %333 : vector<64x1xf32> to vector<64x64xf32>
    %335 = arith.mulf %330, %334 : vector<64x64xf32>
    %336 = arith.truncf %335 : vector<64x64xf32> to vector<64x64xbf16>
    %337 = arith.truncf %322 : vector<64x8xf32> to vector<64x8xbf16>
    %cst_78 = arith.constant dense<0.000000e+00> : vector<64x8xf32>
    %338 = tpu.matmul %336, %337, %cst_78 {dimension_numbers = #tpu.dot_dimension_numbers<[1], [0], [0], [1], [0, 0, 1, 1], [], []>} : vector<64x64xbf16>, vector<64x8xbf16>, vector<64x8xf32> -> vector<64x8xf32>
    %339 = tpu.concatenate %281, %300, %319, %338 in 1 : vector<64x8xf32>, vector<64x8xf32>, vector<64x8xf32>, vector<64x8xf32> -> vector<64x32xf32>
    %340 = tpu.concatenate %108, %185, %262, %339 in 0 : vector<64x32xf32>, vector<64x32xf32>, vector<64x32xf32>, vector<64x32xf32> -> vector<256x32xf32>
    %341 = arith.truncf %340 : vector<256x32xf32> to vector<256x32xbf16>
    %c0_79 = arith.constant 0 : index
    %c0_80 = arith.constant 0 : index
    %342 = vector.load %arg6[%c0_79, %c0_80] : memref<32x32xbf16, #tpu.memory_space<vmem>>, vector<32x32xbf16>
    %cst_81 = arith.constant dense<0.000000e+00> : vector<256x32xf32>
    %343 = tpu.matmul %341, %342, %cst_81 {dimension_numbers = #tpu.dot_dimension_numbers<[1], [0], [0], [1], [0, 0, 1, 1], [], []>} : vector<256x32xbf16>, vector<32x32xbf16>, vector<256x32xf32> -> vector<256x32xf32>
    %c0_82 = arith.constant 0 : index
    %c0_83 = arith.constant 0 : index
    %344 = vector.load %arg7[%c0_82, %c0_83] : memref<1x32xf32, #tpu.memory_space<vmem>>, vector<1x32xf32>
    %345 = vector.broadcast %344 : vector<1x32xf32> to vector<256x32xf32>
    %346 = arith.addf %343, %345 : vector<256x32xf32>
    %347 = arith.addf %1, %346 : vector<256x32xf32>
    %cst_84 = arith.constant dense<0.000000e+00> : vector<256xf32>
    %348 = vector.multi_reduction <add>, %347, %cst_84 [1] : vector<256x32xf32> to vector<256xf32>
    %349 = vector.shape_cast %348 : vector<256xf32> to vector<256x1xf32>
    %cst_85 = arith.constant 3.200000e+01 : f32
    %350 = vector.broadcast %cst_85 : f32 to vector<256x1xf32>
    %351 = arith.divf %349, %350 : vector<256x1xf32>
    %352 = vector.broadcast %351 : vector<256x1xf32> to vector<256x32xf32>
    %353 = arith.subf %347, %352 : vector<256x32xf32>
    %354 = arith.mulf %353, %353 : vector<256x32xf32>
    %cst_86 = arith.constant dense<0.000000e+00> : vector<256xf32>
    %355 = vector.multi_reduction <add>, %354, %cst_86 [1] : vector<256x32xf32> to vector<256xf32>
    %356 = vector.shape_cast %355 : vector<256xf32> to vector<256x1xf32>
    %cst_87 = arith.constant 3.200000e+01 : f32
    %357 = vector.broadcast %cst_87 : f32 to vector<256x1xf32>
    %358 = arith.divf %356, %357 : vector<256x1xf32>
    %359 = vector.broadcast %351 : vector<256x1xf32> to vector<256x32xf32>
    %360 = arith.subf %347, %359 : vector<256x32xf32>
    %cst_88 = arith.constant 9.99999974E-6 : f32
    %361 = vector.broadcast %cst_88 : f32 to vector<256x1xf32>
    %362 = arith.addf %358, %361 : vector<256x1xf32>
    %363 = math.rsqrt %362 : vector<256x1xf32>
    %364 = vector.broadcast %363 : vector<256x1xf32> to vector<256x32xf32>
    %365 = arith.mulf %360, %364 : vector<256x32xf32>
    %c0_89 = arith.constant 0 : index
    %c0_90 = arith.constant 0 : index
    %366 = vector.load %arg8[%c0_89, %c0_90] : memref<1x32xf32, #tpu.memory_space<vmem>>, vector<1x32xf32>
    %367 = vector.broadcast %366 : vector<1x32xf32> to vector<256x32xf32>
    %368 = arith.mulf %365, %367 : vector<256x32xf32>
    %c0_91 = arith.constant 0 : index
    %c0_92 = arith.constant 0 : index
    %369 = vector.load %arg9[%c0_91, %c0_92] : memref<1x32xf32, #tpu.memory_space<vmem>>, vector<1x32xf32>
    %370 = vector.broadcast %369 : vector<1x32xf32> to vector<256x32xf32>
    %371 = arith.addf %368, %370 : vector<256x32xf32>
    %372 = arith.truncf %371 : vector<256x32xf32> to vector<256x32xbf16>
    %c0_93 = arith.constant 0 : index
    %c0_94 = arith.constant 0 : index
    %373 = vector.load %arg10[%c0_93, %c0_94] : memref<32x64xbf16, #tpu.memory_space<vmem>>, vector<32x64xbf16>
    %cst_95 = arith.constant dense<0.000000e+00> : vector<256x64xf32>
    %374 = tpu.matmul %372, %373, %cst_95 {dimension_numbers = #tpu.dot_dimension_numbers<[1], [0], [0], [1], [0, 0, 1, 1], [], []>} : vector<256x32xbf16>, vector<32x64xbf16>, vector<256x64xf32> -> vector<256x64xf32>
    %c0_96 = arith.constant 0 : index
    %c0_97 = arith.constant 0 : index
    %375 = vector.load %arg11[%c0_96, %c0_97] : memref<1x64xf32, #tpu.memory_space<vmem>>, vector<1x64xf32>
    %376 = vector.broadcast %375 : vector<1x64xf32> to vector<256x64xf32>
    %377 = arith.addf %374, %376 : vector<256x64xf32>
    %378 = arith.negf %377 : vector<256x64xf32>
    %379 = math.exp %378 : vector<256x64xf32>
    %cst_98 = arith.constant 1.000000e+00 : f32
    %380 = vector.broadcast %cst_98 : f32 to vector<256x64xf32>
    %381 = arith.addf %380, %379 : vector<256x64xf32>
    %382 = arith.divf %380, %381 : vector<256x64xf32>
    %383 = arith.mulf %377, %382 : vector<256x64xf32>
    %384 = arith.truncf %383 : vector<256x64xf32> to vector<256x64xbf16>
    %c0_99 = arith.constant 0 : index
    %c0_100 = arith.constant 0 : index
    %385 = vector.load %arg12[%c0_99, %c0_100] : memref<64x32xbf16, #tpu.memory_space<vmem>>, vector<64x32xbf16>
    %cst_101 = arith.constant dense<0.000000e+00> : vector<256x32xf32>
    %386 = tpu.matmul %384, %385, %cst_101 {dimension_numbers = #tpu.dot_dimension_numbers<[1], [0], [0], [1], [0, 0, 1, 1], [], []>} : vector<256x64xbf16>, vector<64x32xbf16>, vector<256x32xf32> -> vector<256x32xf32>
    %c0_102 = arith.constant 0 : index
    %c0_103 = arith.constant 0 : index
    %387 = vector.load %arg13[%c0_102, %c0_103] : memref<1x32xf32, #tpu.memory_space<vmem>>, vector<1x32xf32>
    %388 = vector.broadcast %387 : vector<1x32xf32> to vector<256x32xf32>
    %389 = arith.addf %386, %388 : vector<256x32xf32>
    %390 = arith.addf %347, %389 : vector<256x32xf32>
    %391 = vector.shape_cast %390 : vector<256x32xf32> to vector<4x64x32xf32>
    %c0_104 = arith.constant 0 : index
    %c0_105 = arith.constant 0 : index
    %c0_106 = arith.constant 0 : index
    %392 = vector.load %arg14[%c0_104, %c0_105, %c0_106] : memref<4x64x32xf32, #tpu.memory_space<vmem>>, vector<4x64x32xf32>
    tpu.vector_store %arg14[%c0_104, %c0_105, %c0_106], %391 {strides = array<i32>} : memref<4x64x32xf32, #tpu.memory_space<vmem>>, vector<4x64x32xf32>,
    return
  }
  func.func @transform_0(%arg0: i32) -> (i32, i32, i32) {
    %c0_i32 = arith.constant 0 : i32
    %c0_i32_0 = arith.constant 0 : i32
    %c0_i32_1 = arith.constant 0 : i32
    return %arg0, %c0_i32, %c0_i32_0 : i32, i32, i32
  }
  func.func @transform_1(%arg0: i32) -> (i32, i32) {
    %c0_i32 = arith.constant 0 : i32
    %c0_i32_0 = arith.constant 0 : i32
    %c0_i32_1 = arith.constant 0 : i32
    return %c0_i32, %c0_i32_0 : i32, i32
  }
  func.func @transform_2(%arg0: i32) -> (i32, i32) {
    %c0_i32 = arith.constant 0 : i32
    %c0_i32_0 = arith.constant 0 : i32
    %c0_i32_1 = arith.constant 0 : i32
    return %c0_i32, %c0_i32_0 : i32, i32
  }
  func.func @transform_3(%arg0: i32) -> (i32, i32) {
    %c0_i32 = arith.constant 0 : i32
    %c0_i32_0 = arith.constant 0 : i32
    %c0_i32_1 = arith.constant 0 : i32
    return %c0_i32, %c0_i32_0 : i32, i32
  }
  func.func @transform_4(%arg0: i32) -> (i32, i32) {
    %c0_i32 = arith.constant 0 : i32
    %c0_i32_0 = arith.constant 0 : i32
    %c0_i32_1 = arith.constant 0 : i32
    return %c0_i32, %c0_i32_0 : i32, i32
  }
  func.func @transform_5(%arg0: i32) -> (i32, i32) {
    %c0_i32 = arith.constant 0 : i32
    %c0_i32_0 = arith.constant 0 : i32
    %c0_i32_1 = arith.constant 0 : i32
    return %c0_i32, %c0_i32_0 : i32, i32
  }
  func.func @transform_6(%arg0: i32) -> (i32, i32) {
    %c0_i32 = arith.constant 0 : i32
    %c0_i32_0 = arith.constant 0 : i32
    %c0_i32_1 = arith.constant 0 : i32
    return %c0_i32, %c0_i32_0 : i32, i32
  }
  func.func @transform_7(%arg0: i32) -> (i32, i32) {
    %c0_i32 = arith.constant 0 : i32
    %c0_i32_0 = arith.constant 0 : i32
    %c0_i32_1 = arith.constant 0 : i32
    return %c0_i32, %c0_i32_0 : i32, i32
  }
  func.func @transform_8(%arg0: i32) -> (i32, i32) {
    %c0_i32 = arith.constant 0 : i32
    %c0_i32_0 = arith.constant 0 : i32
    %c0_i32_1 = arith.constant 0 : i32
    return %c0_i32, %c0_i32_0 : i32, i32
  }
  func.func @transform_9(%arg0: i32) -> (i32, i32) {
    %c0_i32 = arith.constant 0 : i32
    %c0_i32_0 = arith.constant 0 : i32
    %c0_i32_1 = arith.constant 0 : i32
    return %c0_i32, %c0_i32_0 : i32, i32
  }
  func.func @transform_10(%arg0: i32) -> (i32, i32) {
    %c0_i32 = arith.constant 0 : i32
    %c0_i32_0 = arith.constant 0 : i32
    %c0_i32_1 = arith.constant 0 : i32
    return %c0_i32, %c0_i32_0 : i32, i32
  }
  func.func @transform_11(%arg0: i32) -> (i32, i32) {
    %c0_i32 = arith.constant 0 : i32
    %c0_i32_0 = arith.constant 0 : i32
    %c0_i32_1 = arith.constant 0 : i32
    return %c0_i32, %c0_i32_0 : i32, i32
  }
  func.func @transform_12(%arg0: i32) -> (i32, i32) {
    %c0_i32 = arith.constant 0 : i32
    %c0_i32_0 = arith.constant 0 : i32
    %c0_i32_1 = arith.constant 0 : i32
    return %c0_i32, %c0_i32_0 : i32, i32
  }
  func.func @transform_13(%arg0: i32) -> (i32, i32, i32) {
    %c0_i32 = arith.constant 0 : i32
    %c0_i32_0 = arith.constant 0 : i32
    %c0_i32_1 = arith.constant 0 : i32
    return %arg0, %c0_i32, %c0_i32_0 : i32, i32, i32
  }
}

</mosaic_0001>

<bundles_post_ra>
// kernel: tpu_custom_call.1
= control target key start
LH: loop header
LB: loop body
LE: loop exit
PB: predicated region body
PF: predicated region fallthrough
CT: control target
= control target key end

     0   :  { %s10393_s25 = smov 0   ;;  %s13829_s0 = inlined_call_operand.vmem [shape: f32[8,64,32], index: 0, kind: input, shape index: {}]   ;;  %s13830_s1 = inlined_call_operand.vmem [shape: f32[1,32], index: 1, kind: input, shape index: {}]   ;;  %s13831_s2 = inlined_call_operand.vmem [shape: f32[1,32], index: 2, kind: input, shape index: {}]   ;;  %s13832_s3 = inlined_call_operand.vmem [shape: bf16[32,96], index: 3, kind: input, shape index: {}]   ;;  %s13833_s4 = inlined_call_operand.vmem [shape: f32[1,96], index: 4, kind: input, shape index: {}]   ;;  %s13834_s5 = inlined_call_operand.vmem [shape: bf16[32,32], index: 5, kind: input, shape index: {}]   ;;  %s13835_s6 = inlined_call_operand.vmem [shape: f32[1,32], index: 6, kind: input, shape index: {}]   ;;  %s13836_s7 = inlined_call_operand.vmem [shape: f32[1,32], index: 7, kind: input, shape index: {}]   ;;  %s13837_s8 = inlined_call_operand.vmem [shape: f32[1,32], index: 8, kind: input, shape index: {}]   ;;  %s13838_s9 = inlined_call_operand.vmem [shape: bf16[32,64], index: 9, kind: input, shape index: {}]   ;;  %s13839_s10 = inlined_call_operand.vmem [shape: f32[1,64], index: 10, kind: input, shape index: {}]   ;;  %s13840_s11 = inlined_call_operand.vmem [shape: bf16[64,32], index: 11, kind: input, shape index: {}]   ;;  %s13841_s12 = inlined_call_operand.vmem [shape: f32[1,32], index: 12, kind: input, shape index: {}]   ;;  %s13842_s13 = inlined_call_operand.vmem [shape: f32[8,64,32], index: 13, kind: output, shape index: {}]  }
   0x1 LB: > { %s7918_s26 = sadd.s32 4294967295, %s10307_s25   ;;  %p7922_p0 = scmp.ge.s32.totalorder %s10307_s25, 1  ;;  %s10307_s25 = sphi %s10393_s25, %s23_s25  }
   0x2   : > { %p389_p1 = scmp.lt.s32.totalorder %s10307_s25, 3 }
   0x4   : > { %p390_p2 = pnand %p7922_p0, %p389_p1 }
   0x6   : > { %393 = sbr.rel (%p390_p2) target bundleno = 11218 (0x2bd2), region = 72 }
   0xd   : > { %s7923_s27 = sshll.u32 %s7918_s26, 2  ;;  %vm482_vm0 = vcmask 261120   ;;  %vm1242_vm1 = vcmask 64512   ;;  %s10309_s26 = smov 96   ;;  %vm1332_vm2 = vcmask 523264   ;;  %vm2476_vm3 = vcmask 130048  }
   0xe   : > { %p436_p3 = scmp.lt.s32.totalorder %s7923_s27, 7  ;;  %s10310_s29 = smov 88   ;;  %vm2485_vm4 = vcmask 195584  }
   0xf   : > { %s10311_s30 = smov 120   ;;  %s10312_s15 = smov 64  }
  0x10   : > { %s14168_s27 = smov (!%p436_p3, %s7923_s27), 7  ;;  %s10313_s16 = smov 56  }
  0x11   : > { %s8173_s28 = sshll.u32 %s14168_s27, 6  ;;  %s10314_s17 = smov 80  }
  0x12   : > { %s10409_s14 = scalar_lea.vmem %s13829_s0, %s8173_s28  ;;  %s10315_s18 = smov 112  }
  0x13   : > { %v450_v0 = vld [vmem:[%s10409_s14] sm:$0xff]  ;;  %v452_v1 = vld [vmem:[%s10409_s14 + $0x10] sm:$0xff]  ;;  %v451_v2 = vld [vmem:[%s10409_s14 + $0x8] sm:$0xff]  ;;  %s10316_s19 = smov 48   ;;  %s10317_s20 = smov 72  }
  0x14   : > { %v483_v3 = vsel %vm482_vm0, %v450_v0, 0.0  ;;  %v489_v4 = vsel %vm482_vm0, %v452_v1, 0.0  ;;  %v453_v5 = vld [vmem:[%s10409_s14 + $0x18] sm:$0xff]  ;;  %v486_v6 = vsel %vm482_vm0, %v451_v2, 0.0  ;;  %v454_v8 = vld [vmem:[%s10409_s14 + $0x20] sm:$0xff]  ;;  %v455_v9 = vld [vmem:[%s10409_s14 + $0x28] sm:$0xff] }
  0x15   : > { %484 = vadd.xlane.f32.xlu0 %v483_v3  ;;  %490 = vadd.xlane.f32.xlu1 %v489_v4  ;;  %v492_v7 = vsel %vm482_vm0, %v453_v5, 0.0  ;;  %v495_v10 = vsel %vm482_vm0, %v454_v8, 0.0  ;;  %v498_v11 = vsel %vm482_vm0, %v455_v9, 0.0  ;;  %v456_v12 = vld [vmem:[%s10409_s14 + $0x30] sm:$0xff]  ;;  %v457_v13 = vld [vmem:[%s10409_s14 + $0x38] sm:$0xff]  ;;  %v10466_v54 = vld [vmem:[%s10409_s14 + $0x40] sm:$0xff] }
  0x16   : > { %v501_v14 = vsel %vm482_vm0, %v456_v12, 0.0  ;;  %v504_v15 = vsel %vm482_vm0, %v457_v13, 0.0  ;;  %v507_v57 = vsel %vm482_vm0, %v10466_v54, 0.0  ;;  %v10473_v58 = vld [vmem:[%s10409_s14 + $0x48] sm:$0xff]  ;;  %v10476_v59 = vld [vmem:[%s10409_s14 + $0x50] sm:$0xff]  ;;  %v10483_v62 = vld [vmem:[%s10409_s14 + $0x58] sm:$0xff] }
  0x17   : > { %v510_v60 = vsel %vm482_vm0, %v10473_v58, 0.0  ;;  %v513_v61 = vsel %vm482_vm0, %v10476_v59, 0.0  ;;  %v10486_v63 = vld [vmem:[%s10409_s14 + $0x60] sm:$0xff]  ;;  %v10496_v3 = vld [vmem:[%s10409_s14 + $0x70] sm:$0xff]  ;;  %s10318_s21 = smov 104   ;;  %s10319_s22 = smov 40  }
  0x18   : > { %s10320_s23 = smov 8   ;;  %s10321_s24 = smov 16  }
  0x19   : > { %487 = vadd.xlane.f32.xlu0 %v486_v6  ;;  %493 = vadd.xlane.f32.xlu1 %v492_v7  ;;  %v10503_v6 = vld [vmem:[%s10409_s14 + $0x78] sm:$0xff]  ;;  %v10506_v7 = vld [vmem:[%s10409_s14 + $0x80] sm:$0xff] }
  0x1d   : > { %496 = vadd.xlane.f32.xlu0 %v495_v10  ;;  %499 = vadd.xlane.f32.xlu1 %v498_v11  ;;  %v10513_v10 = vld [vmem:[%s10409_s14 + $0x88] sm:$0xff]  ;;  %v10516_v11 = vld [vmem:[%s10409_s14 + $0x90] sm:$0xff] }
  0x21   : > { %502 = vadd.xlane.f32.xlu0 %v501_v14  ;;  %505 = vadd.xlane.f32.xlu1 %v504_v15  ;;  %v10523_v14 = vld [vmem:[%s10409_s14 + $0x98] sm:$0xff]  ;;  %v10526_v15 = vld [vmem:[%s10409_s14 + $0xa0] sm:$0xff] }
  0xa2   : > { %v485_v16 = vpop.xlane.xlu0 %484  ;;  %v491_v17 = vpop.xlane.xlu1 %490 }
  0xa3   : > { %v580_v18 = vmul.f32 0.03125, %v485_v16  ;;  %v582_v19 = vmul.f32 0.03125, %v491_v17  ;;  %v9491_v16 = vld [vmem:[%s13832_s3] sm:$0xff]   ;;  %v540_v17 = vsel %vm482_vm0, %v10523_v14, 0.0 }
  0xa4   : > { %8505 = vmatprep.subr.bf16.mxu0 %v9491_v16 }
  0xa5   : > { %v10427_v20 = vsub.f32 %v450_v0, %v580_v18  ;;  %v10429_v21 = vsub.f32 %v452_v1, %v582_v19  ;;  %v516_v0 = vsel %vm482_vm0, %v10483_v62, 0.0  ;;  %v519_v1 = vsel %vm482_vm0, %v10486_v63, 0.0  ;;  %v10536_v19 = vld [vmem:[%s10409_s14 + $0xa8] sm:$0xff]  ;;  %8506 = vmatpush3.bf16.msra.mxu0 %v9491_v16 }
  0xa6   : > { %v488_v22 = vpop.xlane.xlu0 %487  ;;  %v494_v23 = vpop.xlane.xlu1 %493  ;;  %v543_v18 = vsel %vm482_vm0, %v10526_v15, 0.0 }
  0xa7   : > { %v581_v24 = vmul.f32 0.03125, %v488_v22  ;;  %v583_v25 = vmul.f32 0.03125, %v494_v23  ;;  %v644_v26 = vmul.f32 %v10427_v20, %v10427_v20  ;;  %v646_v27 = vmul.f32 %v10429_v21, %v10429_v21  ;;  %v10539_v22 = vld [vmem:[%s10409_s14 + $0xb0] sm:$0xff]  ;;  %v9492_v23 = vld [vmem:[%s13832_s3 + $0x8] sm:$0xff]  }
  0xa8   : > { %8507 = vmatprep.subr.bf16.mxu0 %v9492_v23 }
  0xa9   : > { %v10435_v28 = vsub.f32 %v451_v2, %v581_v24  ;;  %v10437_v29 = vsub.f32 %v453_v5, %v583_v25  ;;  %v676_v30 = vsel %vm482_vm0, %v644_v26, 0.0  ;;  %v682_v33 = vsel %vm482_vm0, %v646_v27, 0.0  ;;  %v10493_v2 = vld [vmem:[%s10409_s14 + $0x68] sm:$0xff]  ;;  %v10549_v26 = vld [vmem:[%s10409_s14 + $0xb8] sm:$0xff]  ;;  %v10552_v27 = vld [vmem:[%s10409_s14 + $0xc0] sm:$0xff]  ;;  %8508 = vmatpush3.bf16.msra.mxu0 %v9492_v23 }
  0xaa   : > { %677 = vadd.xlane.f32.xlu0 %v676_v30  ;;  %v497_v31 = vpop.xlane.xlu0 %496  ;;  %v500_v32 = vpop.xlane.xlu1 %499  ;;  %v522_v4 = vsel %vm482_vm0, %v10493_v2, 0.0  ;;  %v525_v5 = vsel %vm482_vm0, %v10496_v3, 0.0  ;;  %v546_v24 = vsel %vm482_vm0, %v10536_v19, 0.0  ;;  %v549_v25 = vsel %vm482_vm0, %v10539_v22, 0.0 }
  0xab   : > { %v584_v34 = vmul.f32 0.03125, %v497_v31  ;;  %v585_v35 = vmul.f32 0.03125, %v500_v32  ;;  %v645_v36 = vmul.f32 %v10435_v28, %v10435_v28  ;;  %v647_v37 = vmul.f32 %v10437_v29, %v10437_v29  ;;  %v10559_v32 = vld [vmem:[%s10409_s14 + $0xc8] sm:$0xff] }
  0xac   : > { %v552_v30 = vsel %vm482_vm0, %v10549_v26, 0.0  ;;  %v555_v31 = vsel %vm482_vm0, %v10552_v27, 0.0 }
  0xad   : > { %v10445_v38 = vsub.f32 %v454_v8, %v584_v34  ;;  %v10447_v39 = vsub.f32 %v455_v9, %v585_v35  ;;  %v679_v40 = vsel %vm482_vm0, %v645_v36, 0.0  ;;  %v685_v43 = vsel %vm482_vm0, %v647_v37, 0.0  ;;  %v10569_v36 = vld [vmem:[%s10409_s14 + $0xd8] sm:$0xff]  ;;  %v10572_v37 = vld [vmem:[%s10409_s14 + $0xe0] sm:$0xff] }
  0xae   : > { %683 = vadd.xlane.f32.xlu0 %v682_v33  ;;  %680 = vadd.xlane.f32.xlu1 %v679_v40  ;;  %v503_v41 = vpop.xlane.xlu0 %502  ;;  %v506_v42 = vpop.xlane.xlu1 %505  ;;  %v528_v8 = vsel %vm482_vm0, %v10503_v6, 0.0  ;;  %v531_v9 = vsel %vm482_vm0, %v10506_v7, 0.0  ;;  %v10562_v33 = vld [vmem:[%s10409_s14 + $0xd0] sm:$0xff]  ;;  %v558_v34 = vsel %vm482_vm0, %v10559_v32, 0.0  ;;  %v564_v40 = vsel %vm482_vm0, %v10569_v36, 0.0 }
  0xaf   : > { %v586_v44 = vmul.f32 0.03125, %v503_v41  ;;  %v587_v45 = vmul.f32 0.03125, %v506_v42  ;;  %v648_v46 = vmul.f32 %v10445_v38, %v10445_v38  ;;  %v649_v47 = vmul.f32 %v10447_v39, %v10447_v39  ;;  %v10579_v42 = vld [vmem:[%s10409_s14 + $0xe8] sm:$0xff] }
  0xb0   : > { %v561_v35 = vsel %vm482_vm0, %v10562_v33, 0.0  ;;  %v567_v41 = vsel %vm482_vm0, %v10572_v37, 0.0 }
  0xb1   : > { %v10455_v48 = vsub.f32 %v456_v12, %v586_v44  ;;  %v10457_v49 = vsub.f32 %v457_v13, %v587_v45  ;;  %v688_v50 = vsel %vm482_vm0, %v648_v46, 0.0  ;;  %v691_v51 = vsel %vm482_vm0, %v649_v47, 0.0  ;;  %v10589_v46 = vld [vmem:[%s10409_s14 + $0xf8] sm:$0xff] }
  0xb2   : > { %686 = vadd.xlane.f32.xlu1 %v685_v43  ;;  %689 = vadd.xlane.f32.xlu0 %v688_v50  ;;  %v534_v12 = vsel %vm482_vm0, %v10513_v10, 0.0  ;;  %v537_v13 = vsel %vm482_vm0, %v10516_v11, 0.0  ;;  %v10582_v43 = vld [vmem:[%s10409_s14 + $0xf0] sm:$0xff]  ;;  %v570_v44 = vsel %vm482_vm0, %v10579_v42, 0.0  ;;  %v576_v47 = vsel %vm482_vm0, %v10589_v46, 0.0 }
  0xb3   : > { %v650_v52 = vmul.f32 %v10455_v48, %v10455_v48  ;;  %v651_v53 = vmul.f32 %v10457_v49, %v10457_v49  ;;  %v573_v45 = vsel %vm482_vm0, %v10582_v43, 0.0 }
  0xb5   : > { %v694_v55 = vsel %vm482_vm0, %v650_v52, 0.0  ;;  %v697_v56 = vsel %vm482_vm0, %v651_v53, 0.0 }
  0xb6   : > { %692 = vadd.xlane.f32.xlu1 %v691_v51  ;;  %695 = vadd.xlane.f32.xlu0 %v694_v55 }
  0xba   : > { %698 = vadd.xlane.f32.xlu1 %v697_v56  ;;  %508 = vadd.xlane.f32.xlu0 %v507_v57 }
  0xbe   : > { %511 = vadd.xlane.f32.xlu1 %v510_v60  ;;  %514 = vadd.xlane.f32.xlu0 %v513_v61 }
  0xc2   : > { %517 = vadd.xlane.f32.xlu1 %v516_v0  ;;  %520 = vadd.xlane.f32.xlu0 %v519_v1 }
  0xc6   : > { %523 = vadd.xlane.f32.xlu1 %v522_v4  ;;  %526 = vadd.xlane.f32.xlu0 %v525_v5 }
  0xca   : > { %529 = vadd.xlane.f32.xlu1 %v528_v8  ;;  %532 = vadd.xlane.f32.xlu0 %v531_v9 }
  0xce   : > { %535 = vadd.xlane.f32.xlu1 %v534_v12  ;;  %538 = vadd.xlane.f32.xlu0 %v537_v13 }
  0xd2   : > { %541 = vadd.xlane.f32.xlu1 %v540_v17  ;;  %544 = vadd.xlane.f32.xlu0 %v543_v18 }
  0xd6   : > { %547 = vadd.xlane.f32.xlu1 %v546_v24  ;;  %550 = vadd.xlane.f32.xlu0 %v549_v25 }
  0xda   : > { %553 = vadd.xlane.f32.xlu1 %v552_v30  ;;  %556 = vadd.xlane.f32.xlu0 %v555_v31 }
  0xde   : > { %559 = vadd.xlane.f32.xlu1 %v558_v34  ;;  %562 = vadd.xlane.f32.xlu0 %v561_v35 }
  0xe2   : > { %565 = vadd.xlane.f32.xlu1 %v564_v40  ;;  %568 = vadd.xlane.f32.xlu0 %v567_v41  ;;  %v10597_v40 = vld [vmem:[%s13830_s1] ss:$0 sm:$0xff] }
  0xe6   : > { %571 = vadd.xlane.f32.xlu1 %v570_v44  ;;  %574 = vadd.xlane.f32.xlu0 %v573_v45 }
  0xea   : > { %577 = vadd.xlane.f32.xlu1 %v576_v47 }
 0x137   : > { %v678_v50 = vpop.xlane.xlu0 %677 }
 0x138   : > { %v772_v51 = vmul.f32 0.03125, %v678_v50 }
 0x13a   : > { %v804_v52 = vadd.f32 1e-05, %v772_v51 }
 0x13b   : > { %v681_v53 = vpop.xlane.xlu1 %680  ;;  %v684_v55 = vpop.xlane.xlu0 %683 }
 0x13c   : > { %9501 = vrsqrt.f32 %v804_v52  ;;  %v773_v56 = vmul.f32 0.03125, %v681_v53  ;;  %v774_v57 = vmul.f32 0.03125, %v684_v55 }
 0x13e   : > { %v805_v60 = vadd.f32 1e-05, %v773_v56  ;;  %v806_v61 = vadd.f32 1e-05, %v774_v57  ;;  %v10609_v57 = vld [vmem:[%s13831_s2] ss:$0 sm:$0xff] }
 0x13f   : > { %v687_v0 = vpop.xlane.xlu1 %686  ;;  %v690_v1 = vpop.xlane.xlu0 %689 }
 0x140   : > { %9503 = vrsqrt.f32 %v805_v60  ;;  %v775_v4 = vmul.f32 0.03125, %v687_v0  ;;  %v776_v5 = vmul.f32 0.03125, %v690_v1 }
 0x141   : > { %9505 = vrsqrt.f32 %v806_v61 }
 0x142   : > { %v807_v8 = vadd.f32 1e-05, %v775_v4  ;;  %v808_v9 = vadd.f32 1e-05, %v776_v5 }
 0x143   : > { %v693_v12 = vpop.xlane.xlu1 %692  ;;  %v696_v13 = vpop.xlane.xlu0 %695 }
 0x144   : > { %9507 = vrsqrt.f32 %v807_v8  ;;  %v777_v16 = vmul.f32 0.03125, %v693_v12  ;;  %v778_v17 = vmul.f32 0.03125, %v696_v13 }
 0x145   : > { %9509 = vrsqrt.f32 %v808_v9 }
 0x146   : > { %v9502_v18 = vpop.eup %9501  ;;  %v809_v23 = vadd.f32 1e-05, %v777_v16  ;;  %v810_v24 = vadd.f32 1e-05, %v778_v17 }
 0x147   : > { %v699_v25 = vpop.xlane.xlu1 %698  ;;  %v509_v30 = vpop.xlane.xlu0 %508  ;;  %v868_v31 = vmul.f32 %v9502_v18, %v10427_v20 }
 0x148   : > { %9511 = vrsqrt.f32 %v809_v23  ;;  %v779_v34 = vmul.f32 0.03125, %v699_v25  ;;  %v588_v35 = vmul.f32 0.03125, %v509_v30 }
 0x149   : > { %9513 = vrsqrt.f32 %v810_v24  ;;  %v907_v20 = vmul.f32 %v10597_v40, %v868_v31 }
 0x14a   : > { %v9504_v41 = vpop.eup %9503  ;;  %v811_v44 = vadd.f32 1e-05, %v779_v34  ;;  %v10600_v45 = vsub.f32 %v10466_v54, %v588_v35 }
 0x14b   : > { %v9506_v47 = vpop.eup %9505  ;;  %v512_v50 = vpop.xlane.xlu1 %511  ;;  %v869_v52 = vmul.f32 %v9504_v41, %v10435_v28  ;;  %v946_v9 = vadd.f32 %v10609_v57, %v907_v20 }
 0x14c   : > { %v515_v51 = vpop.xlane.xlu0 %514  ;;  %9515 = vrsqrt.f32 %v811_v44  ;;  %v589_v53 = vmul.f32 0.03125, %v512_v50  ;;  %v652_v56 = vmul.f32 %v10600_v45, %v10600_v45  ;;  %v870_v60 = vmul.f32 %v9506_v47, %v10429_v21 }
 0x14d   : > { %v590_v55 = vmul.f32 0.03125, %v515_v51  ;;  %v908_v54 = vmul.f32 %v10597_v40, %v869_v52 }
 0x14e   : > { %v9508_v61 = vpop.eup %9507  ;;  %v10614_v28 = vsub.f32 %v10473_v58, %v589_v53  ;;  %v700_v1 = vsel %vm482_vm0, %v652_v56, 0.0  ;;  %v909_v21 = vmul.f32 %v10597_v40, %v870_v60 }
 0x14f   : > { %v10617_v0 = vsub.f32 %v10476_v59, %v590_v55  ;;  %v9510_v4 = vpop.eup %9509  ;;  %v518_v5 = vpop.xlane.xlu1 %517  ;;  %701 = vadd.xlane.f32.xlu0 %v700_v1  ;;  %v947_v12 = vadd.f32 %v10609_v57, %v908_v54  ;;  %v871_v13 = vmul.f32 %v9508_v61, %v10437_v29 }
 0x150   : > { %v521_v8 = vpop.xlane.xlu0 %520  ;;  %v591_v16 = vmul.f32 0.03125, %v518_v5  ;;  %v653_v59 = vmul.f32 %v10614_v28, %v10614_v28  ;;  %v948_v24 = vadd.f32 %v10609_v57, %v909_v21  ;;  %v872_v25 = vmul.f32 %v9510_v4, %v10445_v38 }
 0x151   : > { %v592_v58 = vmul.f32 0.03125, %v521_v8  ;;  %v654_v17 = vmul.f32 %v10617_v0, %v10617_v0  ;;  %v978_v18 = vpack.c.bf16 %v947_v12, %v946_v9  ;;  %v910_v23 = vmul.f32 %v10597_v40, %v871_v13 }
 0x152   : > { %v9512_v30 = vpop.eup %9511  ;;  %v10632_v29 = vsub.f32 %v10483_v62, %v591_v16  ;;  %v703_v34 = vsel %vm482_vm0, %v653_v59, 0.0  ;;  %v911_v62 = vmul.f32 %v10597_v40, %v872_v25 }
 0x153   : > { %v10635_v31 = vsub.f32 %v10486_v63, %v592_v58  ;;  %v706_v35 = vsel %vm482_vm0, %v654_v17, 0.0  ;;  %v9514_v41 = vpop.eup %9513  ;;  %704 = vadd.xlane.f32.xlu1 %v703_v34  ;;  %v524_v44 = vpop.xlane.xlu1 %523  ;;  %8509 = vmatprep.mubr.msk.bf16.mxu0 %vm482_vm0, %v978_v18  ;;  %v949_v50 = vadd.f32 %v10609_v57, %v910_v23  ;;  %v873_v38 = vmul.f32 %v9512_v30, %v10447_v39 }
 0x154   : > { %v527_v47 = vpop.xlane.xlu0 %526  ;;  %v593_v51 = vmul.f32 0.03125, %v524_v44  ;;  %707 = vadd.xlane.f32.xlu0 %v706_v35  ;;  %v655_v52 = vmul.f32 %v10632_v29, %v10632_v29  ;;  %v950_v56 = vadd.f32 %v10609_v57, %v911_v62  ;;  %v874_v54 = vmul.f32 %v9514_v41, %v10455_v48 }
 0x155   : > { %v594_v63 = vmul.f32 0.03125, %v527_v47  ;;  %v656_v20 = vmul.f32 %v10635_v31, %v10635_v31  ;;  %v979_v53 = vpack.c.bf16 %v949_v50, %v948_v24  ;;  %v912_v55 = vmul.f32 %v10597_v40, %v873_v38 }
 0x156   : > { %v9516_v60 = vpop.eup %9515  ;;  %v10651_v39 = vsub.f32 %v10493_v2, %v593_v51  ;;  %v709_v1 = vsel %vm482_vm0, %v655_v52, 0.0  ;;  %v913_v12 = vmul.f32 %v10597_v40, %v874_v54 }
 0x157   : > { %v10654_v61 = vsub.f32 %v10496_v3, %v594_v63  ;;  %v712_v4 = vsel %vm482_vm0, %v656_v20, 0.0  ;;  %710 = vadd.xlane.f32.xlu1 %v709_v1  ;;  %v530_v5 = vpop.xlane.xlu1 %529  ;;  %8510 = vmatmul.mubr.msk.bf16.vlgmr.msra.gmra.mrb[0].mxu0 %vm482_vm0, %v979_v53  ;;  %v951_v9 = vadd.f32 %v10609_v57, %v912_v55  ;;  %v875_v48 = vmul.f32 %v9516_v60, %v10457_v49 }
 0x158   : > { %v533_v8 = vpop.xlane.xlu0 %532  ;;  %v595_v2 = vmul.f32 0.03125, %v530_v5  ;;  %713 = vadd.xlane.f32.xlu0 %v712_v4  ;;  %v657_v3 = vmul.f32 %v10651_v39, %v10651_v39  ;;  %v952_v25 = vadd.f32 %v10609_v57, %v913_v12 }
 0x159   : > { %v596_v13 = vmul.f32 0.03125, %v533_v8  ;;  %v658_v21 = vmul.f32 %v10654_v61, %v10654_v61  ;;  %v980_v16 = vpack.c.bf16 %v951_v9, %v950_v56  ;;  %v914_v58 = vmul.f32 %v10597_v40, %v875_v48 }
 0x15a   : > { %v10668_v59 = vsub.f32 %v10503_v6, %v595_v2  ;;  %v715_v49 = vsel %vm482_vm0, %v657_v3, 0.0 }
 0x15b   : > { %v10671_v17 = vsub.f32 %v10506_v7, %v596_v13  ;;  %v718_v18 = vsel %vm482_vm0, %v658_v21, 0.0  ;;  %716 = vadd.xlane.f32.xlu1 %v715_v49  ;;  %v536_v23 = vpop.xlane.xlu1 %535  ;;  %8513 = vmatprep.mubr.msk.bf16.mxu0 %vm482_vm0, %v980_v16  ;;  %v953_v30 = vadd.f32 %v10609_v57, %v914_v58 }
 0x15c   : > { %v539_v24 = vpop.xlane.xlu0 %538  ;;  %v597_v34 = vmul.f32 0.03125, %v536_v23  ;;  %719 = vadd.xlane.f32.xlu0 %v718_v18  ;;  %v659_v7 = vmul.f32 %v10668_v59, %v10668_v59 }
 0x15d   : > { %v598_v6 = vmul.f32 0.03125, %v539_v24  ;;  %v660_v35 = vmul.f32 %v10671_v17, %v10671_v17  ;;  %v981_v41 = vpack.c.bf16 %v953_v30, %v952_v25 }
 0x15e   : > { %v10683_v44 = vsub.f32 %v10513_v10, %v597_v34  ;;  %v721_v50 = vsel %vm482_vm0, %v659_v7, 0.0 }
 0x15f   : > { %v10686_v47 = vsub.f32 %v10516_v11, %v598_v6  ;;  %v724_v38 = vsel %vm482_vm0, %v660_v35, 0.0  ;;  %722 = vadd.xlane.f32.xlu1 %v721_v50  ;;  %v542_v62 = vpop.xlane.xlu1 %541  ;;  %8514 = vmatmul.mubr.msk.bf16.gmra.mrb[4].mxu0 %vm482_vm0, %v981_v41 }
 0x160   : > { %v545_v51 = vpop.xlane.xlu0 %544  ;;  %v599_v63 = vmul.f32 0.03125, %v542_v62  ;;  %725 = vadd.xlane.f32.xlu0 %v724_v38  ;;  %v661_v20 = vmul.f32 %v10683_v44, %v10683_v44 }
 0x161   : > { %v600_v52 = vmul.f32 0.03125, %v545_v51  ;;  %v662_v10 = vmul.f32 %v10686_v47, %v10686_v47 }
 0x162   : > { %v10696_v11 = vsub.f32 %v10523_v14, %v599_v63  ;;  %v727_v55 = vsel %vm482_vm0, %v661_v20, 0.0 }
 0x163   : > { %v10699_v53 = vsub.f32 %v10526_v15, %v600_v52  ;;  %v730_v56 = vsel %vm482_vm0, %v662_v10, 0.0  ;;  %728 = vadd.xlane.f32.xlu1 %v727_v55  ;;  %v548_v54 = vpop.xlane.xlu1 %547 }
 0x164   : > { %v551_v60 = vpop.xlane.xlu0 %550  ;;  %v601_v1 = vmul.f32 0.03125, %v548_v54  ;;  %731 = vadd.xlane.f32.xlu0 %v730_v56  ;;  %v663_v5 = vmul.f32 %v10696_v11, %v10696_v11 }
 0x165   : > { %v602_v4 = vmul.f32 0.03125, %v551_v60  ;;  %v664_v14 = vmul.f32 %v10699_v53, %v10699_v53 }
 0x166   : > { %v10708_v8 = vsub.f32 %v10536_v19, %v601_v1  ;;  %v733_v9 = vsel %vm482_vm0, %v663_v5, 0.0 }
 0x167   : > { %v10711_v15 = vsub.f32 %v10539_v22, %v602_v4  ;;  %v736_v48 = vsel %vm482_vm0, %v664_v14, 0.0  ;;  %734 = vadd.xlane.f32.xlu1 %v733_v9  ;;  %v554_v12 = vpop.xlane.xlu1 %553 }
 0x168   : > { %v557_v2 = vpop.xlane.xlu0 %556  ;;  %v603_v13 = vmul.f32 0.03125, %v554_v12  ;;  %737 = vadd.xlane.f32.xlu0 %v736_v48  ;;  %v665_v21 = vmul.f32 %v10708_v8, %v10708_v8 }
 0x169   : > { %v604_v3 = vmul.f32 0.03125, %v557_v2  ;;  %v666_v19 = vmul.f32 %v10711_v15, %v10711_v15 }
 0x16a   : > { %v10720_v16 = vsub.f32 %v10549_v26, %v603_v13  ;;  %v739_v58 = vsel %vm482_vm0, %v665_v21, 0.0 }
 0x16b   : > { %v10723_v22 = vsub.f32 %v10552_v27, %v604_v3  ;;  %v742_v49 = vsel %vm482_vm0, %v666_v19, 0.0  ;;  %740 = vadd.xlane.f32.xlu1 %v739_v58  ;;  %v560_v18 = vpop.xlane.xlu1 %559 }
 0x16c   : > { %v563_v23 = vpop.xlane.xlu0 %562  ;;  %v605_v24 = vmul.f32 0.03125, %v560_v18  ;;  %743 = vadd.xlane.f32.xlu0 %v742_v49  ;;  %v667_v30 = vmul.f32 %v10720_v16, %v10720_v16 }
 0x16d   : > { %v606_v25 = vmul.f32 0.03125, %v563_v23  ;;  %v668_v26 = vmul.f32 %v10723_v22, %v10723_v22 }
 0x16e   : > { %v10732_v34 = vsub.f32 %v10559_v32, %v605_v24  ;;  %v745_v6 = vsel %vm482_vm0, %v667_v30, 0.0 }
 0x16f   : > { %v10735_v27 = vsub.f32 %v10562_v33, %v606_v25  ;;  %v748_v7 = vsel %vm482_vm0, %v668_v26, 0.0  ;;  %746 = vadd.xlane.f32.xlu1 %v745_v6  ;;  %v566_v35 = vpop.xlane.xlu1 %565 }
 0x170   : > { %v569_v41 = vpop.xlane.xlu0 %568  ;;  %v607_v50 = vmul.f32 0.03125, %v566_v35  ;;  %749 = vadd.xlane.f32.xlu0 %v748_v7  ;;  %v669_v62 = vmul.f32 %v10732_v34, %v10732_v34 }
 0x171   : > { %v608_v38 = vmul.f32 0.03125, %v569_v41  ;;  %v670_v32 = vmul.f32 %v10735_v27, %v10735_v27 }
 0x172   : > { %v10744_v51 = vsub.f32 %v10569_v36, %v607_v50  ;;  %v751_v63 = vsel %vm482_vm0, %v669_v62, 0.0 }
 0x173   : > { %v10747_v33 = vsub.f32 %v10572_v37, %v608_v38  ;;  %v754_v52 = vsel %vm482_vm0, %v670_v32, 0.0  ;;  %752 = vadd.xlane.f32.xlu1 %v751_v63  ;;  %v572_v20 = vpop.xlane.xlu1 %571 }
 0x174   : > { %v575_v10 = vpop.xlane.xlu0 %574  ;;  %v609_v55 = vmul.f32 0.03125, %v572_v20  ;;  %755 = vadd.xlane.f32.xlu0 %v754_v52  ;;  %v671_v54 = vmul.f32 %v10744_v51, %v10744_v51 }
 0x175   : > { %v610_v56 = vmul.f32 0.03125, %v575_v10  ;;  %v672_v36 = vmul.f32 %v10747_v33, %v10747_v33 }
 0x176   : > { %v10756_v60 = vsub.f32 %v10579_v42, %v609_v55  ;;  %v757_v1 = vsel %vm482_vm0, %v671_v54, 0.0 }
 0x177   : > { %v10759_v37 = vsub.f32 %v10582_v43, %v610_v56  ;;  %v760_v4 = vsel %vm482_vm0, %v672_v36, 0.0  ;;  %758 = vadd.xlane.f32.xlu1 %v757_v1  ;;  %v578_v5 = vpop.xlane.xlu1 %577 }
 0x178   : > { %v611_v14 = vmul.f32 0.03125, %v578_v5  ;;  %761 = vadd.xlane.f32.xlu0 %v760_v4  ;;  %v673_v9 = vmul.f32 %v10756_v60, %v10756_v60 }
 0x179   : > { %v674_v48 = vmul.f32 %v10759_v37, %v10759_v37 }
 0x17a   : > { %v10768_v42 = vsub.f32 %v10589_v46, %v611_v14  ;;  %v763_v43 = vsel %vm482_vm0, %v673_v9, 0.0 }
 0x17b   : > { %v766_v12 = vsel %vm482_vm0, %v674_v48, 0.0  ;;  %764 = vadd.xlane.f32.xlu1 %v763_v43 }
 0x17c   : > { %767 = vadd.xlane.f32.xlu0 %v766_v12  ;;  %v675_v2 = vmul.f32 %v10768_v42, %v10768_v42 }
 0x17e   : > { %v769_v13 = vsel %vm482_vm0, %v675_v2, 0.0 }
 0x17f   : > { %770 = vadd.xlane.f32.xlu1 %v769_v13 }
 0x1dc   : > { %v702_v3 = vpop.xlane.xlu0 %701 }
 0x1dd   : > { %v780_v21 = vmul.f32 0.03125, %v702_v3 }
 0x1df   : > { %v812_v19 = vadd.f32 1e-05, %v780_v21 }
 0x1e0   : > { %v705_v58 = vpop.xlane.xlu1 %704 }
 0x1e1   : > { %9517 = vrsqrt.f32 %v812_v19  ;;  %v781_v49 = vmul.f32 0.03125, %v705_v58  ;;  %v708_v46 = vpop.xlane.xlu0 %707 }
 0x1e2   : > { %v782_v18 = vmul.f32 0.03125, %v708_v46 }
 0x1e3   : > { %v813_v23 = vadd.f32 1e-05, %v781_v49 }
 0x1e4   : > { %v814_v24 = vadd.f32 1e-05, %v782_v18  ;;  %v711_v25 = vpop.xlane.xlu1 %710 }
 0x1e5   : > { %9519 = vrsqrt.f32 %v813_v23  ;;  %v783_v30 = vmul.f32 0.03125, %v711_v25  ;;  %v714_v26 = vpop.xlane.xlu0 %713 }
 0x1e6   : > { %9521 = vrsqrt.f32 %v814_v24  ;;  %v784_v6 = vmul.f32 0.03125, %v714_v26 }
 0x1e7   : > { %v815_v7 = vadd.f32 1e-05, %v783_v30 }
 0x1e8   : > { %v816_v35 = vadd.f32 1e-05, %v784_v6  ;;  %v717_v41 = vpop.xlane.xlu1 %716 }
 0x1e9   : > { %9523 = vrsqrt.f32 %v815_v7  ;;  %v785_v50 = vmul.f32 0.03125, %v717_v41  ;;  %v720_v38 = vpop.xlane.xlu0 %719 }
 0x1ea   : > { %9525 = vrsqrt.f32 %v816_v35  ;;  %v786_v62 = vmul.f32 0.03125, %v720_v38 }
 0x1eb   : > { %v9518_v32 = vpop.eup %9517  ;;  %v817_v63 = vadd.f32 1e-05, %v785_v50 }
 0x1ec   : > { %v818_v52 = vadd.f32 1e-05, %v786_v62  ;;  %v723_v20 = vpop.xlane.xlu1 %722  ;;  %v876_v10 = vmul.f32 %v9518_v32, %v10600_v45 }
 0x1ed   : > { %9527 = vrsqrt.f32 %v817_v63  ;;  %v787_v55 = vmul.f32 0.03125, %v723_v20  ;;  %v726_v56 = vpop.xlane.xlu0 %725 }
 0x1ee   : > { %9529 = vrsqrt.f32 %v818_v52  ;;  %v788_v54 = vmul.f32 0.03125, %v726_v56  ;;  %v915_v4 = vmul.f32 %v10597_v40, %v876_v10 }
 0x1ef   : > { %v9520_v36 = vpop.eup %9519  ;;  %v819_v1 = vadd.f32 1e-05, %v787_v55 }
 0x1f0   : > { %v9522_v5 = vpop.eup %9521  ;;  %v820_v14 = vadd.f32 1e-05, %v788_v54  ;;  %v729_v9 = vpop.xlane.xlu1 %728  ;;  %v877_v48 = vmul.f32 %v9520_v36, %v10614_v28  ;;  %v954_v19 = vadd.f32 %v10609_v57, %v915_v4 }
 0x1f1   : > { %9531 = vrsqrt.f32 %v819_v1  ;;  %v789_v43 = vmul.f32 0.03125, %v729_v9  ;;  %v732_v12 = vpop.xlane.xlu0 %731  ;;  %v878_v2 = vmul.f32 %v9522_v5, %v10617_v0 }
 0x1f2   : > { %9533 = vrsqrt.f32 %v820_v14  ;;  %v790_v45 = vmul.f32 0.03125, %v732_v12  ;;  %v916_v13 = vmul.f32 %v10597_v40, %v877_v48 }
 0x1f3   : > { %v9524_v3 = vpop.eup %9523  ;;  %v821_v21 = vadd.f32 1e-05, %v789_v43  ;;  %v917_v23 = vmul.f32 %v10597_v40, %v878_v2 }
 0x1f4   : > { %v9526_v58 = vpop.eup %9525  ;;  %v822_v49 = vadd.f32 1e-05, %v790_v45  ;;  %v735_v46 = vpop.xlane.xlu1 %734  ;;  %v955_v18 = vadd.f32 %v10609_v57, %v916_v13  ;;  %v879_v28 = vmul.f32 %v9524_v3, %v10632_v29 }
 0x1f5   : > { %9535 = vrsqrt.f32 %v821_v21  ;;  %v791_v24 = vmul.f32 0.03125, %v735_v46  ;;  %v738_v0 = vpop.xlane.xlu0 %737  ;;  %v880_v25 = vmul.f32 %v9526_v58, %v10635_v31  ;;  %v956_v29 = vadd.f32 %v10609_v57, %v917_v23 }
 0x1f6   : > { %9537 = vrsqrt.f32 %v822_v49  ;;  %v792_v30 = vmul.f32 0.03125, %v738_v0  ;;  %v982_v26 = vpack.c.bf16 %v955_v18, %v954_v19  ;;  %v918_v6 = vmul.f32 %v10597_v40, %v879_v28 }
 0x1f7   : > { %v9528_v7 = vpop.eup %9527  ;;  %v823_v35 = vadd.f32 1e-05, %v791_v24  ;;  %v919_v41 = vmul.f32 %v10597_v40, %v880_v25 }
 0x1f8   : > { %v9530_v50 = vpop.eup %9529  ;;  %v824_v38 = vadd.f32 1e-05, %v792_v30  ;;  %v741_v62 = vpop.xlane.xlu1 %740  ;;  %8517 = vmatprep.mubr.msk.bf16.mxu0 %vm482_vm0, %v982_v26  ;;  %v957_v32 = vadd.f32 %v10609_v57, %v918_v6  ;;  %v881_v31 = vmul.f32 %v9528_v7, %v10651_v39 }
 0x1f9   : > { %9539 = vrsqrt.f32 %v823_v35  ;;  %v793_v63 = vmul.f32 0.03125, %v741_v62  ;;  %v744_v52 = vpop.xlane.xlu0 %743  ;;  %v882_v20 = vmul.f32 %v9530_v50, %v10654_v61  ;;  %v958_v1 = vadd.f32 %v10609_v57, %v919_v41 }
 0x1fa   : > { %9541 = vrsqrt.f32 %v824_v38  ;;  %v794_v10 = vmul.f32 0.03125, %v744_v52  ;;  %v983_v55 = vpack.c.bf16 %v957_v32, %v956_v29  ;;  %v920_v56 = vmul.f32 %v10597_v40, %v881_v31 }
 0x1fb   : > { %v9532_v54 = vpop.eup %9531  ;;  %v825_v36 = vadd.f32 1e-05, %v793_v63  ;;  %v921_v61 = vmul.f32 %v10597_v40, %v882_v20 }
 0x1fc   : > { %v9534_v4 = vpop.eup %9533  ;;  %v826_v5 = vadd.f32 1e-05, %v794_v10  ;;  %v747_v14 = vpop.xlane.xlu1 %746  ;;  %8518 = vmatmul.mubr.msk.bf16.gmra.mrb[8].mxu0 %vm482_vm0, %v983_v55  ;;  %v959_v39 = vadd.f32 %v10609_v57, %v920_v56  ;;  %v883_v9 = vmul.f32 %v9532_v54, %v10668_v59 }
 0x1fd   : > { %9543 = vrsqrt.f32 %v825_v36  ;;  %v795_v48 = vmul.f32 0.03125, %v747_v14  ;;  %v750_v43 = vpop.xlane.xlu0 %749  ;;  %v884_v12 = vmul.f32 %v9534_v4, %v10671_v17  ;;  %v960_v59 = vadd.f32 %v10609_v57, %v921_v61 }
 0x1fe   : > { %9545 = vrsqrt.f32 %v826_v5  ;;  %v796_v2 = vmul.f32 0.03125, %v750_v43  ;;  %v984_v45 = vpack.c.bf16 %v959_v39, %v958_v1  ;;  %v922_v13 = vmul.f32 %v10597_v40, %v883_v9 }
 0x1ff   : > { %v9536_v3 = vpop.eup %9535  ;;  %v827_v21 = vadd.f32 1e-05, %v795_v48  ;;  %v923_v19 = vmul.f32 %v10597_v40, %v884_v12 }
 0x200   : > { %v9538_v58 = vpop.eup %9537  ;;  %v828_v49 = vadd.f32 1e-05, %v796_v2  ;;  %v753_v46 = vpop.xlane.xlu1 %752  ;;  %8521 = vmatprep.mubr.msk.bf16.mxu0 %vm482_vm0, %v984_v45  ;;  %v961_v18 = vadd.f32 %v10609_v57, %v922_v13  ;;  %v885_v17 = vmul.f32 %v9536_v3, %v10683_v44 }
 0x201   : > { %9547 = vrsqrt.f32 %v827_v21  ;;  %v797_v28 = vmul.f32 0.03125, %v753_v46  ;;  %v756_v23 = vpop.xlane.xlu0 %755  ;;  %v886_v24 = vmul.f32 %v9538_v58, %v10686_v47  ;;  %v962_v7 = vadd.f32 %v10609_v57, %v923_v19 }
 0x202   : > { %9549 = vrsqrt.f32 %v828_v49  ;;  %v798_v0 = vmul.f32 0.03125, %v756_v23  ;;  %v985_v25 = vpack.c.bf16 %v961_v18, %v960_v59  ;;  %v924_v30 = vmul.f32 %v10597_v40, %v885_v17 }
 0x203   : > { %v9540_v26 = vpop.eup %9539  ;;  %v829_v6 = vadd.f32 1e-05, %v797_v28  ;;  %v925_v47 = vmul.f32 %v10597_v40, %v886_v24 }
 0x204   : > { %v9542_v35 = vpop.eup %9541  ;;  %v830_v41 = vadd.f32 1e-05, %v798_v0  ;;  %v759_v50 = vpop.xlane.xlu1 %758  ;;  %8522 = vmatmul.mubr.msk.bf16.gmra.mrb[12].mxu0 %vm482_vm0, %v985_v25  ;;  %v963_v44 = vadd.f32 %v10609_v57, %v924_v30  ;;  %v887_v38 = vmul.f32 %v9540_v26, %v10696_v11 }
 0x205   : > { %9551 = vrsqrt.f32 %v829_v6  ;;  %v799_v62 = vmul.f32 0.03125, %v759_v50  ;;  %v762_v29 = vpop.xlane.xlu0 %761  ;;  %v888_v32 = vmul.f32 %v9542_v35, %v10699_v53  ;;  %v964_v11 = vadd.f32 %v10609_v57, %v925_v47 }
 0x206   : > { %9553 = vrsqrt.f32 %v830_v41  ;;  %v800_v31 = vmul.f32 0.03125, %v762_v29  ;;  %v986_v63 = vpack.c.bf16 %v963_v44, %v962_v7  ;;  %v926_v52 = vmul.f32 %v10597_v40, %v887_v38 }
 0x207   : > { %v9544_v20 = vpop.eup %9543  ;;  %v831_v10 = vadd.f32 1e-05, %v799_v62  ;;  %v927_v55 = vmul.f32 %v10597_v40, %v888_v32 }
 0x208   : > { %v9546_v56 = vpop.eup %9545  ;;  %v832_v54 = vadd.f32 1e-05, %v800_v31  ;;  %v765_v36 = vpop.xlane.xlu1 %764  ;;  %8525 = vmatprep.mubr.msk.bf16.mxu0 %vm482_vm0, %v986_v63  ;;  %v965_v1 = vadd.f32 %v10609_v57, %v926_v52  ;;  %v889_v53 = vmul.f32 %v9544_v20, %v10708_v8 }
 0x209   : > { %9555 = vrsqrt.f32 %v831_v10  ;;  %v801_v4 = vmul.f32 0.03125, %v765_v36  ;;  %v768_v5 = vpop.xlane.xlu0 %767  ;;  %v890_v14 = vmul.f32 %v9546_v56, %v10711_v15  ;;  %v966_v12 = vadd.f32 %v10609_v57, %v927_v55 }
 0x20a   : > { %9557 = vrsqrt.f32 %v832_v54  ;;  %v802_v39 = vmul.f32 0.03125, %v768_v5  ;;  %v987_v9 = vpack.c.bf16 %v965_v1, %v964_v11  ;;  %v928_v61 = vmul.f32 %v10597_v40, %v889_v53  ;;  %v10862_v11 = vld [vmem:[%s13833_s4] ss:$0 sm:$0xff] }
 0x20b   : > { %v9548_v48 = vpop.eup %9547  ;;  %v833_v43 = vadd.f32 1e-05, %v801_v4  ;;  %v929_v15 = vmul.f32 %v10597_v40, %v890_v14 }
 0x20c   : > { %v9550_v2 = vpop.eup %9549  ;;  %v834_v45 = vadd.f32 1e-05, %v802_v39  ;;  %v771_v13 = vpop.xlane.xlu1 %770  ;;  %8526 = vmatmul.mubr.msk.bf16.gmra.mrb[16].mxu0 %vm482_vm0, %v987_v9  ;;  %v967_v8 = vadd.f32 %v10609_v57, %v928_v61  ;;  %v891_v3 = vmul.f32 %v9548_v48, %v10720_v16 }
 0x20d   : > { %9559 = vrsqrt.f32 %v833_v43  ;;  %v803_v21 = vmul.f32 0.03125, %v771_v13  ;;  %v892_v19 = vmul.f32 %v9550_v2, %v10723_v22  ;;  %v968_v17 = vadd.f32 %v10609_v57, %v929_v15 }
 0x20e   : > { %9561 = vrsqrt.f32 %v834_v45  ;;  %v988_v58 = vpack.c.bf16 %v967_v8, %v966_v12  ;;  %v930_v49 = vmul.f32 %v10597_v40, %v891_v3 }
 0x20f   : > { %v9552_v46 = vpop.eup %9551  ;;  %v835_v59 = vadd.f32 1e-05, %v803_v21  ;;  %v931_v23 = vmul.f32 %v10597_v40, %v892_v19 }
 0x210   : > { %v9554_v18 = vpop.eup %9553  ;;  %8529 = vmatprep.mubr.msk.bf16.mxu0 %vm482_vm0, %v988_v58  ;;  %v969_v28 = vadd.f32 %v10609_v57, %v930_v49  ;;  %v893_v16 = vmul.f32 %v9552_v46, %v10732_v34 }
 0x211   : > { %9563 = vrsqrt.f32 %v835_v59  ;;  %v894_v22 = vmul.f32 %v9554_v18, %v10735_v27  ;;  %v970_v26 = vadd.f32 %v10609_v57, %v931_v23 }
 0x212   : > { %v989_v24 = vpack.c.bf16 %v969_v28, %v968_v17  ;;  %v932_v0 = vmul.f32 %v10597_v40, %v893_v16 }
 0x213   : > { %v9556_v25 = vpop.eup %9555  ;;  %v933_v34 = vmul.f32 %v10597_v40, %v894_v22 }
 0x214   : > { %v9558_v30 = vpop.eup %9557  ;;  %8530 = vmatmul.mubr.msk.bf16.gmra.mrb[20].mxu0 %vm482_vm0, %v989_v24  ;;  %v971_v6 = vadd.f32 %v10609_v57, %v932_v0  ;;  %v895_v7 = vmul.f32 %v9556_v25, %v10744_v51 }
 0x215   : > { %v896_v35 = vmul.f32 %v9558_v30, %v10747_v33  ;;  %v972_v38 = vadd.f32 %v10609_v57, %v933_v34 }
 0x216   : > { %v990_v41 = vpack.c.bf16 %v971_v6, %v970_v26  ;;  %v934_v27 = vmul.f32 %v10597_v40, %v895_v7 }
 0x217   : > { %v9560_v50 = vpop.eup %9559  ;;  %v935_v29 = vmul.f32 %v10597_v40, %v896_v35 }
 0x218   : > { %v9562_v44 = vpop.eup %9561  ;;  %8533 = vmatprep.mubr.msk.bf16.mxu0 %vm482_vm0, %v990_v41  ;;  %v973_v47 = vadd.f32 %v10609_v57, %v934_v27  ;;  %v897_v62 = vmul.f32 %v9560_v50, %v10756_v60 }
 0x219   : > { %v898_v51 = vmul.f32 %v9562_v44, %v10759_v37  ;;  %v974_v63 = vadd.f32 %v10609_v57, %v935_v29 }
 0x21a   : > { %v991_v32 = vpack.c.bf16 %v973_v47, %v972_v38  ;;  %v936_v33 = vmul.f32 %v10597_v40, %v897_v62 }
 0x21b   : > { %v9564_v31 = vpop.eup %9563  ;;  %v937_v10 = vmul.f32 %v10597_v40, %v898_v51 }
 0x21c   : > { %8534 = vmatmul.mubr.msk.bf16.gmra.mrb[24].mxu0 %vm482_vm0, %v991_v32  ;;  %v975_v52 = vadd.f32 %v10609_v57, %v936_v33  ;;  %v899_v20 = vmul.f32 %v9564_v31, %v10768_v42 }
 0x21d   : > { %v976_v37 = vadd.f32 %v10609_v57, %v937_v10 }
 0x21e   : > { %v992_v55 = vpack.c.bf16 %v975_v52, %v974_v63  ;;  %v938_v60 = vmul.f32 %v10597_v40, %v899_v20 }
 0x220   : > { %8537 = vmatprep.mubr.msk.bf16.mxu0 %vm482_vm0, %v992_v55  ;;  %v977_v56 = vadd.f32 %v10609_v57, %v938_v60 }
 0x222   : > { %v993_v54 = vpack.c.bf16 %v977_v56, %v976_v37 }
 0x224   : > { %8538 = vmatmul.mubr.msk.bf16.gmra.mrb[28].mxu0 %vm482_vm0, %v993_v54 }
 0x22a   : > { %v8511_v36 = vpop.f32.mrb[0].mxu0 }
 0x22b   : > { %v1099_v42 = vpop.f32.mrb[1].mxu0  ;;  %v1108_v53 = vadd.f32 %v8511_v36, %v10862_v11 }
 0x22c   : > { %v8512_v1 = vpop.f32.mrb[2].mxu0  ;;  %v1100_v5 = vadd.f32 %v10862_v11, %v1099_v42 }
 0x22d   : > { %v1111_v40 = vadd.f32 %v8512_v1, %v10862_v11  ;;  %v1102_v4 = vpop.f32.mrb[3].mxu0 }
 0x22e   : > { %v1103_v57 = vadd.f32 %v10862_v11, %v1102_v4 }
 0x22f   : > { %v10868_v14 = vpack.c.bf16 %v1111_v40, %v1108_v53 }
 0x230   : > { %v10870_v39 = vpack.c.bf16 %v1103_v57, %v1100_v5 }
 0x231   : > { %1236 = vrot.lane.b32.xlu1 %v10868_v14, %s10309_s26 }
 0x232   : > { %v8515_v9 = vpop.f32.mrb[4].mxu0  ;;  %1234 = vrot.lane.b32.xlu0 %v10870_v39, %s10309_s26  ;;  %8549 = vmatprep.mubr.msk.bf16.mxu0 %vm1242_vm1, %v10870_v39 }
 0x233   : > { %v1115_v61 = vpop.f32.mrb[5].mxu0  ;;  %v1124_v43 = vadd.f32 %v8515_v9, %v10862_v11 }
 0x234   : > { %v8516_v48 = vpop.f32.mrb[6].mxu0  ;;  %v1116_v45 = vadd.f32 %v10862_v11, %v1115_v61 }
 0x235   : > { %v1127_v12 = vadd.f32 %v8516_v48, %v10862_v11  ;;  %v1118_v2 = vpop.f32.mrb[7].mxu0 }
 0x236   : > { %v1119_v13 = vadd.f32 %v10862_v11, %v1118_v2  ;;  %1522 = vrot.lane.b32.xlu0 %v10870_v39, %s10310_s29 }
 0x237   : > { %v10884_v8 = vpack.c.bf16 %v1127_v12, %v1124_v43 }
 0x238   : > { %v10886_v3 = vpack.c.bf16 %v1119_v13, %v1116_v45 }
 0x23a   : > { %1238 = vrot.lane.b32.xlu1 %v10886_v3, %s10309_s26  ;;  %1526 = vrot.lane.b32.xlu0 %v10886_v3, %s10310_s29 }
 0x23e   : > { %1240 = vrot.lane.b32.xlu1 %v10884_v8, %s10309_s26  ;;  %1514 = vrot.lane.b32.xlu0 %v10870_v39, %s10311_s30 }
 0x242   : > { %1524 = vrot.lane.b32.xlu1 %v10868_v14, %s10310_s29  ;;  %1518 = vrot.lane.b32.xlu0 %v10886_v3, %s10311_s30 }
 0x246   : > { %1528 = vrot.lane.b32.xlu1 %v10884_v8, %s10310_s29  ;;  %1425 = vrot.lane.b32.xlu0 %v10870_v39, %s10312_s15 }
 0x24a   : > { %1516 = vrot.lane.b32.xlu1 %v10868_v14, %s10311_s30  ;;  %1429 = vrot.lane.b32.xlu0 %v10886_v3, %s10312_s15 }
 0x24e   : > { %1520 = vrot.lane.b32.xlu1 %v10884_v8, %s10311_s30 }
 0x252   : > { %1427 = vrot.lane.b32.xlu1 %v10868_v14, %s10312_s15 }
 0x256   : > { %1431 = vrot.lane.b32.xlu1 %v10884_v8, %s10312_s15 }
 0x2a3   : > { %v1237_v19 = vpop.permute.xlu1 %1236 }
 0x2a4   : > { %v1235_v15 = vpop.permute.xlu0 %1234  ;;  %v1259_v59 = vsel %vm1242_vm1, %v1237_v19, 0 }
 0x2a5   : > { %9165 = vmatprep.subr.msk.bf16.mxu0 %vm1242_vm1, %v1235_v15  ;;  %v1256_v21 = vsel %vm1242_vm1, %v1235_v15, 0 }
 0x2a6   : > { %8542 = vmatpush3.bf16.xpose.msra.mxu0 %v1256_v21 }
 0x2a7   : > { %9166 = vmatprep.subr.msk.bf16.mxu0 %vm1242_vm1, %v1237_v19 }
 0x2a8   : > { %v1523_v58 = vpop.permute.xlu0 %1522 }
 0x2a9   : > { %v1543_v7 = vsel %vm1242_vm1, %v1523_v58, 0 }
 0x2ac   : > { %v1239_v49 = vpop.permute.xlu1 %1238  ;;  %v1527_v46 = vpop.permute.xlu0 %1526 }
 0x2ad   : > { %v1262_v23 = vsel %vm1242_vm1, %v1239_v49, 0  ;;  %v1549_v33 = vsel %vm1242_vm1, %v1527_v46, 0 }
 0x2ae   : > { %8544 = vmatpush3.bf16.xpose.msra.mxu0 %v1259_v59 }
 0x2af   : > { %9167 = vmatprep.subr.msk.bf16.mxu0 %vm1242_vm1, %v1239_v49 }
 0x2b0   : > { %v1241_v18 = vpop.permute.xlu1 %1240  ;;  %v1515_v17 = vpop.permute.xlu0 %1514 }
 0x2b1   : > { %v1265_v25 = vsel %vm1242_vm1, %v1241_v18, 0 }
 0x2b4   : > { %v1525_v28 = vpop.permute.xlu1 %1524  ;;  %v10919_v16 = vpop.permute.xlu0 %1518 }
 0x2b5   : > { %v1546_v35 = vsel %vm1242_vm1, %v1525_v28, 0 }
 0x2b6   : > { %8546 = vmatpush3.bf16.xpose.msra.mxu0 %v1262_v23 }
 0x2b7   : > { %9168 = vmatprep.subr.msk.bf16.mxu0 %vm1242_vm1, %v1241_v18 }
 0x2b8   : > { %v1529_v22 = vpop.permute.xlu1 %1528  ;;  %v1426_v24 = vpop.permute.xlu0 %1425 }
 0x2b9   : > { %8557 = vmatprep.subr.bf16.mxu1 %v1426_v24  ;;  %v1552_v36 = vsel %vm1242_vm1, %v1529_v22, 0 }
 0x2ba   : > { %8558 = vmatpush3.bf16.msra.mxu1 %v1426_v24 }
 0x2bc   : > { %v1517_v0 = vpop.permute.xlu1 %1516  ;;  %v1430_v6 = vpop.permute.xlu0 %1429 }
 0x2be   : > { %8548 = vmatpush3.bf16.xpose.msra.mxu0 %v1265_v25 }
 0x2bf   : > { %9169 = vmatprep.subr.msk.bf16.mxu0 %vm1242_vm1, %v1523_v58 }
 0x2c0   : > { %v10925_v30 = vpop.permute.xlu1 %1520 }
 0x2c4   : > { %v1428_v26 = vpop.permute.xlu1 %1427 }
 0x2c5   : > { %8550 = vmatmul.mubr.msk.bf16.vlgmr.msra.gmra.mrb[32].mxu0 %vm1242_vm1, %v10868_v14  ;;  %8559 = vmatprep.subr.bf16.mxu1 %v1428_v26 }
 0x2c6   : > { %8553 = vmatprep.mubr.msk.bf16.mxu0 %vm1242_vm1, %v10886_v3  ;;  %8560 = vmatpush3.bf16.msra.mxu1 %v1428_v26 }
 0x2c7   : > { %8574 = vmatpush3.bf16.xpose.msra.mxu0 %v1543_v7  ;;  %8561 = vmatprep.subr.bf16.mxu1 %v1430_v6 }
 0x2c8   : > { %9170 = vmatprep.subr.msk.bf16.mxu0 %vm1242_vm1, %v1525_v28  ;;  %v1432_v34 = vpop.permute.xlu1 %1431 }
 0x2ca   : > { %8562 = vmatpush3.bf16.msra.mxu1 %v1430_v6 }
 0x2cb   : > { %8563 = vmatprep.subr.bf16.mxu1 %v1432_v34 }
 0x2cd   : > { %8554 = vmatmul.mubr.msk.bf16.gmra.mrb[36].mxu0 %vm1242_vm1, %v10884_v8 }
 0x2ce   : > { %8564 = vmatpush3.bf16.msra.mxu1 %v1432_v34  ;;  %8581 = vmatprep.mubr.msk.bf16.mxu0 %vm1242_vm1, %v1515_v17 }
 0x2cf   : > { %8576 = vmatpush3.bf16.xpose.msra.mxu0 %v1546_v35  ;;  %v8519_v41 = vpop.f32.mrb[8].mxu0 }
 0x2d0   : > { %9171 = vmatprep.subr.msk.bf16.mxu0 %vm1242_vm1, %v1527_v46  ;;  %v1131_v27 = vpop.f32.mrb[9].mxu0  ;;  %v1140_v44 = vadd.f32 %v8519_v41, %v10862_v11 }
 0x2d1   : > { %v8520_v50 = vpop.f32.mrb[10].mxu0  ;;  %v1132_v62 = vadd.f32 %v10862_v11, %v1131_v27 }
 0x2d2   : > { %v1143_v38 = vadd.f32 %v8520_v50, %v10862_v11  ;;  %v1134_v47 = vpop.f32.mrb[11].mxu0 }
 0x2d3   : > { %v1135_v29 = vadd.f32 %v10862_v11, %v1134_v47 }
 0x2d4   : > { %v10942_v51 = vpack.c.bf16 %v1143_v38, %v1140_v44 }
 0x2d5   : > { %v10944_v32 = vpack.c.bf16 %v1135_v29, %v1132_v62 }
 0x2d7   : > { %8578 = vmatpush3.bf16.xpose.msra.mxu0 %v1549_v33  ;;  %v8523_v31 = vpop.f32.mrb[12].mxu0 }
 0x2d8   : > { %9172 = vmatprep.subr.msk.bf16.mxu0 %vm1242_vm1, %v1529_v22  ;;  %v1147_v63 = vpop.f32.mrb[13].mxu0  ;;  %v1156_v20 = vadd.f32 %v8523_v31, %v10862_v11 }
 0x2d9   : > { %v8524_v52 = vpop.f32.mrb[14].mxu0  ;;  %v1148_v60 = vadd.f32 %v10862_v11, %v1147_v63 }
 0x2da   : > { %v1159_v10 = vadd.f32 %v8524_v52, %v10862_v11  ;;  %v1150_v55 = vpop.f32.mrb[15].mxu0 }
 0x2db   : > { %v1151_v37 = vadd.f32 %v10862_v11, %v1150_v55 }
 0x2dc   : > { %v10952_v56 = vpack.c.bf16 %v1159_v10, %v1156_v20 }
 0x2dd   : > { %v10954_v54 = vpack.c.bf16 %v1151_v37, %v1148_v60 }
 0x2df   : > { %8580 = vmatpush3.bf16.xpose.msra.mxu0 %v1552_v36  ;;  %v8527_v42 = vpop.f32.mrb[16].mxu0 }
 0x2e0   : > { %v1163_v1 = vpop.f32.mrb[17].mxu0  ;;  %v1172_v40 = vadd.f32 %v8527_v42, %v10862_v11 }
 0x2e1   : > { %v8528_v53 = vpop.f32.mrb[18].mxu0  ;;  %v1164_v57 = vadd.f32 %v10862_v11, %v1163_v1 }
 0x2e2   : > { %v1175_v4 = vadd.f32 %v8528_v53, %v10862_v11  ;;  %v1166_v5 = vpop.f32.mrb[19].mxu0 }
 0x2e3   : > { %v1167_v9 = vadd.f32 %v10862_v11, %v1166_v5 }
 0x2e4   : > { %v10961_v61 = vpack.c.bf16 %v1175_v4, %v1172_v40 }
 0x2e5   : > { %v10963_v48 = vpack.c.bf16 %v1167_v9, %v1164_v57 }
 0x2e6   : > { %8582 = vmatmul.mubr.msk.bf16.vlgmr.msra.gmra.mrb[40].mxu0 %vm1242_vm1, %v1517_v0 }
 0x2e7   : > { %8585 = vmatprep.mubr.msk.bf16.mxu0 %vm1242_vm1, %v10919_v16  ;;  %v8531_v43 = vpop.f32.mrb[20].mxu0 }
 0x2e8   : > { %v1179_v12 = vpop.f32.mrb[21].mxu0  ;;  %v1188_v45 = vadd.f32 %v8531_v43, %v10862_v11 }
 0x2e9   : > { %v8532_v2 = vpop.f32.mrb[22].mxu0  ;;  %v1180_v21 = vadd.f32 %v10862_v11, %v1179_v12 }
 0x2ea   : > { %v1191_v13 = vadd.f32 %v8532_v2, %v10862_v11  ;;  %v1182_v15 = vpop.f32.mrb[23].mxu0 }
 0x2eb   : > { %v1183_v19 = vadd.f32 %v10862_v11, %v1182_v15 }
 0x2ec   : > { %v10972_v58 = vpack.c.bf16 %v1191_v13, %v1188_v45 }
 0x2ed   : > { %v10974_v49 = vpack.c.bf16 %v1183_v19, %v1180_v21 }
 0x2ee   : > { %8586 = vmatmul.mubr.msk.bf16.gmra.mrb[44].mxu0 %vm1242_vm1, %v10925_v30 }
 0x2ef   : > { %v8535_v46 = vpop.f32.mrb[24].mxu0 }
 0x2f0   : > { %v1195_v59 = vpop.f32.mrb[25].mxu0  ;;  %v1204_v17 = vadd.f32 %v8535_v46, %v10862_v11 }
 0x2f1   : > { %v8536_v18 = vpop.f32.mrb[26].mxu0  ;;  %v1196_v23 = vadd.f32 %v10862_v11, %v1195_v59 }
 0x2f2   : > { %v1207_v28 = vadd.f32 %v8536_v18, %v10862_v11  ;;  %v1198_v16 = vpop.f32.mrb[27].mxu0 }
 0x2f3   : > { %v1199_v22 = vadd.f32 %v10862_v11, %v1198_v16 }
 0x2f4   : > { %v10982_v24 = vpack.c.bf16 %v1207_v28, %v1204_v17 }
 0x2f5   : > { %v10984_v0 = vpack.c.bf16 %v1199_v22, %v1196_v23 }
 0x2f7   : > { %v8539_v25 = vpop.f32.mrb[28].mxu0 }
 0x2f8   : > { %v1211_v26 = vpop.f32.mrb[29].mxu0  ;;  %v1220_v30 = vadd.f32 %v8539_v25, %v10862_v11 }
 0x2f9   : > { %v8540_v6 = vpop.f32.mrb[30].mxu0  ;;  %v1212_v35 = vadd.f32 %v10862_v11, %v1211_v26 }
 0x2fa   : > { %v1223_v7 = vadd.f32 %v8540_v6, %v10862_v11  ;;  %v1214_v34 = vpop.f32.mrb[31].mxu0 }
 0x2fb   : > { %v1215_v41 = vadd.f32 %v10862_v11, %v1214_v34 }
 0x2fc   : > { %v10990_v27 = vpack.c.bf16 %v1223_v7, %v1220_v30 }
 0x2fd   : > { %v10992_v50 = vpack.c.bf16 %v1215_v41, %v1212_v35 }
 0x398   : > { %v8551_v44 = vpop.f32.mrb[32].mxu0 }
 0x399   : > { %v1301_v38 = vpop.f32.mrb[33].mxu0  ;;  %v1339_v47 = vsel %vm1332_vm2, %v8551_v44, -inf }
 0x39a   : > { %1340 = vmax.xlane.f32.xlu0 %v1339_v47  ;;  %v10995_v62 = vpop.f32.mrb[34].mxu0  ;;  %v1333_v31 = vsel %vm1332_vm2, %v1301_v38, -inf }
 0x39b   : > { %v1304_v29 = vpop.f32.mrb[35].mxu0  ;;  %v1342_v52 = vsel %vm1332_vm2, %v10995_v62, -inf }
 0x39c   : > { %v1336_v33 = vsel %vm1332_vm2, %v1304_v29, -inf }
 0x39d   : > { %1337 = vmax.xlane.f32.xlu1 %v1336_v33 }
 0x39e   : > { %1334 = vmax.xlane.f32.xlu0 %v1333_v31 }
 0x3a0   : > { %v10999_v11 = vpop.f32.mrb[36].mxu0 }
 0x3a1   : > { %v11001_v63 = vpop.f32.mrb[37].mxu0  ;;  %v1351_v60 = vsel %vm1332_vm2, %v10999_v11, -inf }
 0x3a2   : > { %1343 = vmax.xlane.f32.xlu0 %v1342_v52  ;;  %v11005_v20 = vpop.f32.mrb[38].mxu0  ;;  %v1345_v36 = vsel %vm1332_vm2, %v11001_v63, -inf }
 0x3a3   : > { %v11007_v10 = vpop.f32.mrb[39].mxu0  ;;  %v1354_v55 = vsel %vm1332_vm2, %v11005_v20, -inf }
 0x3a4   : > { %1355 = vmax.xlane.f32.xlu1 %v1354_v55  ;;  %v1348_v37 = vsel %vm1332_vm2, %v11007_v10, -inf }
 0x3a6   : > { %1352 = vmax.xlane.f32.xlu0 %v1351_v60 }
 0x3a8   : > { %1349 = vmax.xlane.f32.xlu1 %v1348_v37 }
 0x3aa   : > { %1346 = vmax.xlane.f32.xlu0 %v1345_v36 }
 0x3b9   : > { %v11017_v42 = vpop.f32.mrb[40].mxu0 }
 0x3ba   : > { %v11019_v1 = vpop.f32.mrb[41].mxu0  ;;  %v1625_v53 = vsel %vm1332_vm2, %v11017_v42, -inf }
 0x3bb   : > { %1626 = vmax.xlane.f32.xlu0 %v1625_v53  ;;  %v11023_v40 = vpop.f32.mrb[42].mxu0  ;;  %v1619_v57 = vsel %vm1332_vm2, %v11019_v1, -inf }
 0x3bc   : > { %v11025_v4 = vpop.f32.mrb[43].mxu0  ;;  %v1628_v5 = vsel %vm1332_vm2, %v11023_v40, -inf }
 0x3bd   : > { %1629 = vmax.xlane.f32.xlu1 %v1628_v5  ;;  %v1622_v9 = vsel %vm1332_vm2, %v11025_v4, -inf }
 0x3bf   : > { %1620 = vmax.xlane.f32.xlu0 %v1619_v57 }
 0x3c1   : > { %1623 = vmax.xlane.f32.xlu1 %v1622_v9  ;;  %v11033_v43 = vpop.f32.mrb[44].mxu0 }
 0x3c2   : > { %v11035_v12 = vpop.f32.mrb[45].mxu0  ;;  %v1637_v2 = vsel %vm1332_vm2, %v11033_v43, -inf }
 0x3c3   : > { %1638 = vmax.xlane.f32.xlu0 %v1637_v2  ;;  %v11039_v45 = vpop.f32.mrb[46].mxu0  ;;  %v1631_v15 = vsel %vm1332_vm2, %v11035_v12, -inf }
 0x3c4   : > { %v11041_v13 = vpop.f32.mrb[47].mxu0  ;;  %v1640_v21 = vsel %vm1332_vm2, %v11039_v45, -inf }
 0x3c5   : > { %v1634_v19 = vsel %vm1332_vm2, %v11041_v13, -inf }
 0x3c7   : > { %1632 = vmax.xlane.f32.xlu0 %v1631_v15 }
 0x3d2   : > { %1713 = vrot.lane.b32.xlu1 %v10868_v14, %s10313_s16 }
 0x3d6   : > { %1715 = vrot.lane.b32.xlu1 %v10886_v3, %s10313_s16 }
 0x3dd   : > { %1711 = vrot.lane.b32.xlu0 %v10870_v39, %s10313_s16 }
 0x3fa   : > { %1641 = vmax.xlane.f32.xlu1 %v1640_v21 }
 0x3fe   : > { %1635 = vmax.xlane.f32.xlu1 %v1634_v19 }
 0x40f   : > { %1717 = vrot.lane.b32.xlu1 %v10884_v8, %s10313_s16 }
 0x427   : > { %v1341_v46 = vpop.xlane.xlu0 %1340 }
 0x428   : > { %v1359_v59 = vsub.f32 %v8551_v44, %v1341_v46 }
 0x42a   : > { %v1369_v18 = vmul.f32 1.442695, %v1359_v59  ;;  %v1338_v17 = vpop.xlane.xlu1 %1337 }
 0x42b   : > { %v1335_v28 = vpop.xlane.xlu0 %1334  ;;  %v1358_v23 = vsub.f32 %v1304_v29, %v1338_v17 }
 0x42c   : > { %9565 = vpow2.f32 %v1369_v18  ;;  %v1357_v16 = vsub.f32 %v1301_v38, %v1335_v28 }
 0x42d   : > { %v1367_v30 = vmul.f32 1.442695, %v1358_v23 }
 0x42e   : > { %v1365_v22 = vmul.f32 1.442695, %v1357_v16 }
 0x42f   : > { %v1344_v25 = vpop.xlane.xlu0 %1343 }
 0x430   : > { %9567 = vpow2.f32 %v1365_v22  ;;  %v1360_v26 = vsub.f32 %v10995_v62, %v1344_v25 }
 0x431   : > { %v1356_v6 = vpop.xlane.xlu1 %1355 }
 0x432   : > { %v1371_v7 = vmul.f32 1.442695, %v1360_v26  ;;  %v1364_v44 = vsub.f32 %v11005_v20, %v1356_v6 }
 0x433   : > { %v1353_v34 = vpop.xlane.xlu0 %1352 }
 0x434   : > { %9569 = vpow2.f32 %v1371_v7  ;;  %v1363_v35 = vsub.f32 %v10999_v11, %v1353_v34  ;;  %v1379_v52 = vmul.f32 1.442695, %v1364_v44 }
 0x435   : > { %9571 = vpow2.f32 %v1367_v30  ;;  %v1350_v38 = vpop.xlane.xlu1 %1349 }
 0x436   : > { %v11059_v41 = vpop.eup %9565  ;;  %v1377_v47 = vmul.f32 1.442695, %v1363_v35  ;;  %v1362_v11 = vsub.f32 %v11007_v10, %v1350_v38 }
 0x437   : > { %v1347_v29 = vpop.xlane.xlu0 %1346  ;;  %v1387_v33 = vsel %vm1332_vm2, %v11059_v41, 0.0 }
 0x438   : > { %v1361_v62 = vsub.f32 %v11001_v63, %v1347_v29  ;;  %1388 = vadd.xlane.f32.xlu0 %v1387_v33  ;;  %9573 = vpow2.f32 %v1377_v47  ;;  %v1375_v37 = vmul.f32 1.442695, %v1362_v11 }
 0x43a   : > { %v11065_v31 = vpop.eup %9567  ;;  %v1373_v55 = vmul.f32 1.442695, %v1361_v62 }
 0x43b   : > { %v1381_v60 = vsel %vm1332_vm2, %v11065_v31, 0.0 }
 0x43c   : > { %9575 = vpow2.f32 %v1373_v55  ;;  %1382 = vadd.xlane.f32.xlu0 %v1381_v60 }
 0x43d   : > { %9577 = vpow2.f32 %v1379_v52 }
 0x43e   : > { %v11070_v20 = vpop.eup %9569  ;;  %9579 = vpow2.f32 %v1375_v37 }
 0x43f   : > { %v1390_v63 = vsel %vm1332_vm2, %v11070_v20, 0.0  ;;  %v11074_v36 = vpop.eup %9571 }
 0x440   : > { %1391 = vadd.xlane.f32.xlu1 %v1390_v63  ;;  %v1384_v10 = vsel %vm1332_vm2, %v11074_v36, 0.0 }
 0x442   : > { %v11078_v53 = vpop.eup %9573 }
 0x443   : > { %v1399_v57 = vsel %vm1332_vm2, %v11078_v53, 0.0 }
 0x444   : > { %1385 = vadd.xlane.f32.xlu1 %v1384_v10 }
 0x446   : > { %v11080_v5 = vpop.eup %9575 }
 0x447   : > { %v1393_v9 = vsel %vm1332_vm2, %v11080_v5, 0.0  ;;  %v11086_v2 = vpop.eup %9577 }
 0x448   : > { %v1627_v15 = vpop.xlane.xlu0 %1626  ;;  %1400 = vadd.xlane.f32.xlu1 %v1399_v57  ;;  %1394 = vadd.xlane.f32.xlu0 %v1393_v9  ;;  %v1402_v18 = vsel %vm1332_vm2, %v11086_v2, 0.0  ;;  %v11092_v17 = vpop.eup %9579 }
 0x449   : > { %v1645_v21 = vsub.f32 %v11017_v42, %v1627_v15  ;;  %v1396_v26 = vsel %vm1332_vm2, %v11092_v17, 0.0 }
 0x44a   : > { %v1630_v19 = vpop.xlane.xlu1 %1629 }
 0x44b   : > { %v1655_v46 = vmul.f32 1.442695, %v1645_v21  ;;  %v1646_v59 = vsub.f32 %v11023_v40, %v1630_v19 }
 0x44c   : > { %v1621_v28 = vpop.xlane.xlu0 %1620  ;;  %1403 = vadd.xlane.f32.xlu1 %v1402_v18 }
 0x44d   : > { %9581 = vpow2.f32 %v1655_v46  ;;  %v1657_v16 = vmul.f32 1.442695, %v1646_v59  ;;  %v1643_v23 = vsub.f32 %v11019_v1, %v1621_v28 }
 0x44e   : > { %v1624_v22 = vpop.xlane.xlu1 %1623 }
 0x44f   : > { %9583 = vpow2.f32 %v1657_v16  ;;  %v1651_v25 = vmul.f32 1.442695, %v1643_v23  ;;  %v1644_v42 = vsub.f32 %v11025_v4, %v1624_v22 }
 0x450   : > { %v1639_v40 = vpop.xlane.xlu0 %1638  ;;  %1397 = vadd.xlane.f32.xlu1 %v1396_v26 }
 0x451   : > { %9585 = vpow2.f32 %v1651_v25  ;;  %v1653_v6 = vmul.f32 1.442695, %v1644_v42  ;;  %v1649_v30 = vsub.f32 %v11033_v43, %v1639_v40 }
 0x452   : > { %v1714_v37 = vpop.permute.xlu1 %1713 }
 0x453   : > { %9587 = vpow2.f32 %v1653_v6  ;;  %v1663_v7 = vmul.f32 1.442695, %v1649_v30 }
 0x454   : > { %v1633_v34 = vpop.xlane.xlu0 %1632 }
 0x455   : > { %v1647_v35 = vsub.f32 %v11035_v12, %v1633_v34  ;;  %9589 = vpow2.f32 %v1663_v7 }
 0x456   : > { %v11131_v63 = vpop.permute.xlu1 %1715 }
 0x457   : > { %v11100_v1 = vpop.eup %9581  ;;  %v1659_v44 = vmul.f32 1.442695, %v1647_v35 }
 0x458   : > { %v11102_v47 = vpop.permute.xlu0 %1711  ;;  %v1673_v4 = vsel %vm1332_vm2, %v11100_v1, 0.0 }
 0x459   : > { %v11106_v38 = vpop.eup %9583  ;;  %1674 = vadd.xlane.f32.xlu0 %v1673_v4  ;;  %8589 = vmatprep.subr.bf16.mxu1 %v11102_v47  ;;  %9591 = vpow2.f32 %v1659_v44 }
 0x45a   : > { %v1676_v12 = vsel %vm1332_vm2, %v11106_v38, 0.0 }
 0x45b   : > { %v11109_v43 = vpop.eup %9585 }
 0x45c   : > { %v1667_v29 = vsel %vm1332_vm2, %v11109_v43, 0.0 }
 0x45d   : > { %v11115_v33 = vpop.eup %9587  ;;  %1677 = vadd.xlane.f32.xlu0 %v1676_v12  ;;  %1668 = vadd.xlane.f32.xlu1 %v1667_v29 }
 0x45e   : > { %v1670_v62 = vsel %vm1332_vm2, %v11115_v33, 0.0 }
 0x45f   : > { %v11119_v52 = vpop.eup %9589 }
 0x460   : > { %v1685_v11 = vsel %vm1332_vm2, %v11119_v52, 0.0 }
 0x461   : > { %1671 = vadd.xlane.f32.xlu0 %v1670_v62 }
 0x463   : > { %v11123_v55 = vpop.eup %9591 }
 0x464   : > { %v1679_v60 = vsel %vm1332_vm2, %v11123_v55, 0.0 }
 0x465   : > { %1686 = vadd.xlane.f32.xlu0 %v1685_v11 }
 0x469   : > { %1680 = vadd.xlane.f32.xlu0 %v1679_v60 }
 0x46e   : > { %1810 = vrot.lane.b32.xlu1 %v10868_v14, %s10314_s17 }
 0x472   : > { %1812 = vrot.lane.b32.xlu1 %v10886_v3, %s10314_s17 }
 0x487   : > { %v1642_v10 = vpop.xlane.xlu1 %1641 }
 0x488   : > { %v1650_v57 = vsub.f32 %v11039_v45, %v1642_v10 }
 0x48a   : > { %v1665_v9 = vmul.f32 1.442695, %v1650_v57 }
 0x48b   : > { %v1636_v15 = vpop.xlane.xlu1 %1635 }
 0x48c   : > { %9593 = vpow2.f32 %v1665_v9  ;;  %v1648_v21 = vsub.f32 %v11041_v13, %v1636_v15 }
 0x48e   : > { %v1661_v19 = vmul.f32 1.442695, %v1648_v21 }
 0x48f   : > { %v1718_v13 = vpop.permute.xlu1 %1717 }
 0x490   : > { %9595 = vpow2.f32 %v1661_v19 }
 0x496   : > { %v11135_v46 = vpop.eup %9593 }
 0x497   : > { %v1688_v59 = vsel %vm1332_vm2, %v11135_v46, 0.0 }
 0x498   : > { %1689 = vadd.xlane.f32.xlu0 %v1688_v59 }
 0x49a   : > { %v11139_v18 = vpop.eup %9595 }
 0x49b   : > { %v1682_v28 = vsel %vm1332_vm2, %v11139_v18, 0.0 }
 0x49c   : > { %1683 = vadd.xlane.f32.xlu1 %v1682_v28 }
 0x4ad   : > { %1814 = vrot.lane.b32.xlu1 %v10884_v8, %s10314_s17 }
 0x4ae   : > { %1808 = vrot.lane.b32.xlu0 %v10870_v39, %s10314_s17 }
 0x4b1   : > { %1802 = vrot.lane.b32.xlu1 %v10868_v14, %s10315_s18 }
 0x4b2   : > { %1800 = vrot.lane.b32.xlu0 %v10870_v39, %s10315_s18 }
 0x4b5   : > { %1806 = vrot.lane.b32.xlu1 %v10884_v8, %s10315_s18 }
 0x4b6   : > { %1804 = vrot.lane.b32.xlu0 %v10886_v3, %s10315_s18 }
 0x4c5   : > { %v1389_v45 = vpop.xlane.xlu0 %1388 }
 0x4c9   : > { %v1383_v16 = vpop.xlane.xlu0 %1382 }
 0x4cd   : > { %v1392_v23 = vpop.xlane.xlu1 %1391 }
 0x4ce   : > { %9597 = vrcp.f32 %v1392_v23 }
 0x4cf   : > { %9599 = vrcp.f32 %v1383_v16 }
 0x4d0   : > { %9601 = vrcp.f32 %v1389_v45 }
 0x4d1   : > { %v1386_v22 = vpop.xlane.xlu1 %1385 }
 0x4d2   : > { %9603 = vrcp.f32 %v1386_v22 }
 0x4d5   : > { %v1401_v25 = vpop.xlane.xlu1 %1400  ;;  %v1395_v26 = vpop.xlane.xlu0 %1394 }
 0x4d8   : > { %v9598_v42 = vpop.eup %9597 }
 0x4d9   : > { %v1404_v40 = vpop.xlane.xlu1 %1403  ;;  %v9600_v6 = vpop.eup %9599  ;;  %v1416_v34 = vmul.f32 %v9598_v42, %v11070_v20 }
 0x4da   : > { %v9602_v30 = vpop.eup %9601  ;;  %9605 = vrcp.f32 %v1404_v40  ;;  %v1413_v44 = vmul.f32 %v9600_v6, %v11065_v31 }
 0x4db   : > { %9607 = vrcp.f32 %v1395_v26  ;;  %v1415_v12 = vmul.f32 %v9602_v30, %v11059_v41 }
 0x4dc   : > { %v9604_v7 = vpop.eup %9603  ;;  %9609 = vrcp.f32 %v1401_v25 }
 0x4dd   : > { %v1398_v35 = vpop.xlane.xlu1 %1397  ;;  %v1414_v4 = vmul.f32 %v9604_v7, %v11074_v36  ;;  %v1422_v62 = vpack.c.bf16 %v1416_v34, %v1415_v12 }
 0x4de   : > { %9611 = vrcp.f32 %v1398_v35 }
 0x4df   : > { %v1421_v29 = vpack.c.bf16 %v1414_v4, %v1413_v44 }
 0x4e1   : > { %8565 = vmatprep.mubr.msk.bf16.mxu1 %vm1332_vm2, %v1421_v29 }
 0x4e2   : > { %8566 = vmatmul.mubr.msk.bf16.vlgmr.msra.gmra.mrb[0].mxu1 %vm1332_vm2, %v1422_v62 }
 0x4e3   : > { %8590 = vmatpush3.bf16.msra.mxu1 %v11102_v47 }
 0x4e4   : > { %8591 = vmatprep.subr.bf16.mxu1 %v1714_v37  ;;  %v9606_v11 = vpop.eup %9605 }
 0x4e5   : > { %v9608_v20 = vpop.eup %9607  ;;  %v1420_v36 = vmul.f32 %v9606_v11, %v11086_v2 }
 0x4e6   : > { %v1675_v60 = vpop.xlane.xlu0 %1674  ;;  %v9610_v10 = vpop.eup %9609  ;;  %v1417_v41 = vmul.f32 %v9608_v20, %v11080_v5 }
 0x4e7   : > { %8592 = vmatpush3.bf16.msra.mxu1 %v1714_v37  ;;  %v1419_v21 = vmul.f32 %v9610_v10, %v11078_v53 }
 0x4e8   : > { %v9612_v31 = vpop.eup %9611  ;;  %8593 = vmatprep.subr.bf16.mxu1 %v11131_v63 }
 0x4e9   : > { %v1418_v57 = vmul.f32 %v9612_v31, %v11092_v17  ;;  %v1424_v19 = vpack.c.bf16 %v1420_v36, %v1419_v21 }
 0x4ea   : > { %v1669_v9 = vpop.xlane.xlu1 %1668  ;;  %v1678_v15 = vpop.xlane.xlu0 %1677 }
 0x4eb   : > { %8594 = vmatpush3.bf16.msra.mxu1 %v11131_v63  ;;  %v1423_v47 = vpack.c.bf16 %v1418_v57, %v1417_v41  ;;  %9613 = vrcp.f32 %v1678_v15 }
 0x4ec   : > { %8595 = vmatprep.subr.bf16.mxu1 %v1718_v13  ;;  %9615 = vrcp.f32 %v1669_v9 }
 0x4ed   : > { %8569 = vmatprep.mubr.msk.bf16.mxu1 %vm1332_vm2, %v1423_v47  ;;  %9617 = vrcp.f32 %v1675_v60 }
 0x4ee   : > { %v1672_v37 = vpop.xlane.xlu0 %1671  ;;  %8570 = vmatmul.mubr.msk.bf16.gmra.mrb[4].mxu1 %vm1332_vm2, %v1424_v19 }
 0x4ef   : > { %9619 = vrcp.f32 %v1672_v37  ;;  %8596 = vmatpush3.bf16.msra.mxu1 %v1718_v13  ;;  %v1811_v13 = vpop.permute.xlu1 %1810 }
 0x4f0   : > { %v1832_v6 = vsel %vm1242_vm1, %v1811_v13, 0 }
 0x4f2   : > { %v1687_v22 = vpop.xlane.xlu0 %1686 }
 0x4f3   : > { %v1813_v42 = vpop.permute.xlu1 %1812 }
 0x4f4   : > { %v1835_v11 = vsel %vm1242_vm1, %v1813_v42, 0 }
 0x4f5   : > { %v9614_v5 = vpop.eup %9613 }
 0x4f6   : > { %v9616_v2 = vpop.eup %9615  ;;  %v1702_v53 = vmul.f32 %v9614_v5, %v11106_v38  ;;  %v1681_v25 = vpop.xlane.xlu0 %1680 }
 0x4f7   : > { %v9618_v17 = vpop.eup %9617  ;;  %v1699_v63 = vmul.f32 %v9616_v2, %v11109_v43 }
 0x4f8   : > { %v1701_v45 = vmul.f32 %v9618_v17, %v11100_v1 }
 0x4f9   : > { %v9620_v59 = vpop.eup %9619 }
 0x4fa   : > { %v1700_v28 = vmul.f32 %v9620_v59, %v11115_v33  ;;  %v1708_v23 = vpack.c.bf16 %v1702_v53, %v1701_v45 }
 0x4fc   : > { %v1707_v16 = vpack.c.bf16 %v1700_v28, %v1699_v63 }
 0x4fe   : > { %8597 = vmatprep.mubr.msk.bf16.mxu1 %vm1332_vm2, %v1707_v16 }
 0x4ff   : > { %8598 = vmatmul.mubr.msk.bf16.vlgmr.msra.gmra.mrb[8].mxu1 %vm1332_vm2, %v1708_v23 }
 0x525   : > { %v1690_v26 = vpop.xlane.xlu0 %1689 }
 0x526   : > { %9621 = vrcp.f32 %v1690_v26 }
 0x527   : > { %9623 = vrcp.f32 %v1681_v25 }
 0x528   : > { %9625 = vrcp.f32 %v1687_v22 }
 0x529   : > { %v1684_v38 = vpop.xlane.xlu1 %1683  ;;  %v1809_v43 = vpop.permute.xlu0 %1808 }
 0x52a   : > { %9627 = vrcp.f32 %v1684_v38  ;;  %9173 = vmatprep.subr.msk.bf16.mxu1 %vm1242_vm1, %v1809_v43  ;;  %v1829_v1 = vsel %vm1242_vm1, %v1809_v43, 0 }
 0x52b   : > { %8606 = vmatpush3.bf16.xpose.msra.mxu1 %v1829_v1 }
 0x52c   : > { %9174 = vmatprep.subr.msk.bf16.mxu1 %vm1242_vm1, %v1811_v13 }
 0x52d   : > { %v1801_v62 = vpop.permute.xlu0 %1800  ;;  %v1815_v20 = vpop.permute.xlu1 %1814 }
 0x530   : > { %v9622_v33 = vpop.eup %9621 }
 0x531   : > { %v9624_v40 = vpop.eup %9623  ;;  %v1706_v34 = vmul.f32 %v9622_v33, %v11135_v46  ;;  %v1803_v46 = vpop.permute.xlu1 %1802 }
 0x532   : > { %v9626_v30 = vpop.eup %9625  ;;  %v1703_v35 = vmul.f32 %v9624_v40, %v11123_v55  ;;  %v1838_v55 = vsel %vm1242_vm1, %v1815_v20, 0 }
 0x533   : > { %8608 = vmatpush3.bf16.xpose.msra.mxu1 %v1832_v6  ;;  %v1705_v4 = vmul.f32 %v9626_v30, %v11119_v52  ;;  %v1805_v52 = vpop.permute.xlu0 %1804 }
 0x534   : > { %v9628_v7 = vpop.eup %9627  ;;  %9175 = vmatprep.subr.msk.bf16.mxu1 %vm1242_vm1, %v1813_v42 }
 0x535   : > { %v1704_v44 = vmul.f32 %v9628_v7, %v11139_v18  ;;  %v1710_v29 = vpack.c.bf16 %v1706_v34, %v1705_v4  ;;  %v1807_v18 = vpop.permute.xlu1 %1806 }
 0x537   : > { %v1709_v12 = vpack.c.bf16 %v1704_v44, %v1703_v35 }
 0x539   : > { %8601 = vmatprep.mubr.msk.bf16.mxu1 %vm1332_vm2, %v1709_v12 }
 0x53a   : > { %8602 = vmatmul.mubr.msk.bf16.gmra.mrb[12].mxu1 %vm1332_vm2, %v1710_v29 }
 0x53b   : > { %8610 = vmatpush3.bf16.xpose.msra.mxu1 %v1835_v11  ;;  %8613 = vmatprep.mubr.msk.bf16.mxu1 %vm1242_vm1, %v1801_v62 }
 0x53c   : > { %9176 = vmatprep.subr.msk.bf16.mxu1 %vm1242_vm1, %v1815_v20 }
 0x543   : > { %8612 = vmatpush3.bf16.xpose.msra.mxu1 %v1838_v55 }
 0x54a   : > { %8614 = vmatmul.mubr.msk.bf16.vlgmr.msra.gmra.mrb[16].mxu1 %vm1242_vm1, %v1803_v46 }
 0x54b   : > { %8617 = vmatprep.mubr.msk.bf16.mxu1 %vm1242_vm1, %v1805_v52 }
 0x552   : > { %8618 = vmatmul.mubr.msk.bf16.gmra.mrb[20].mxu1 %vm1242_vm1, %v1807_v18 }
 0x5b5   : > { %v11194_v60 = vpop.f32.mrb[0].mxu1 }
 0x5b6   : > { %13915 = vst [vmem:[#allocation2_spill] sm:$0xff] %v11194_v60  ;;  %v11196_v10 = vpop.f32.mrb[1].mxu1 }
 0x5b7   : > { %13916 = vst [vmem:[#allocation3_spill] sm:$0xff] %v11196_v10  ;;  %v11198_v31 = vpop.f32.mrb[2].mxu1 }
 0x5b8   : > { %13917 = vst [vmem:[#allocation4_spill] sm:$0xff] %v11198_v31  ;;  %v11200_v36 = vpop.f32.mrb[3].mxu1 }
 0x5b9   : > { %13918 = vst [vmem:[#allocation5_spill] sm:$0xff] %v11200_v36 }
 0x5c1   : > { %v11202_v41 = vpop.f32.mrb[4].mxu1 }
 0x5c2   : > { %13919 = vst [vmem:[#allocation6_spill] sm:$0xff] %v11202_v41  ;;  %v11204_v57 = vpop.f32.mrb[5].mxu1 }
 0x5c3   : > { %13920 = vst [vmem:[#allocation7_spill] sm:$0xff] %v11204_v57  ;;  %v11206_v9 = vpop.f32.mrb[6].mxu1 }
 0x5c4   : > { %13921 = vst [vmem:[#allocation8_spill] sm:$0xff] %v11206_v9  ;;  %v11208_v15 = vpop.f32.mrb[7].mxu1 }
 0x5c5   : > { %13922 = vst [vmem:[#allocation9_spill] sm:$0xff] %v11208_v15 }
 0x5d2   : > { %v11210_v21 = vpop.f32.mrb[8].mxu1 }
 0x5d3   : > { %v11212_v47 = vpop.f32.mrb[9].mxu1 }
 0x5d4   : > { %v11214_v19 = vpop.f32.mrb[10].mxu1 }
 0x5d5   : > { %v11218_v5 = vpop.f32.mrb[11].mxu1 }
 0x60d   : > { %v11222_v17 = vpop.f32.mrb[12].mxu1 }
 0x60e   : > { %13923 = vst [vmem:[#allocation10_spill] sm:$0xff] %v11222_v17  ;;  %v11224_v59 = vpop.f32.mrb[13].mxu1 }
 0x60f   : > { %v11226_v53 = vpop.f32.mrb[14].mxu1 }
 0x610   : > { %13924 = vst [vmem:[#allocation11_spill] sm:$0xff] %v11226_v53  ;;  %v11230_v28 = vpop.f32.mrb[15].mxu1 }
 0x61d   : > { %v8615_v16 = vpop.f32.mrb[16].mxu1 }
 0x61e   : > { %v1874_v23 = vpop.f32.mrb[17].mxu1  ;;  %v1911_v22 = vsel %vm1332_vm2, %v8615_v16, -inf }
 0x61f   : > { %1912 = vmax.xlane.f32.xlu0 %v1911_v22  ;;  %v8616_v13 = vpop.f32.mrb[18].mxu1  ;;  %v1905_v26 = vsel %vm1332_vm2, %v1874_v23, -inf }
 0x620   : > { %v1877_v25 = vpop.f32.mrb[19].mxu1  ;;  %v1914_v1 = vsel %vm1332_vm2, %v8616_v13, -inf }
 0x621   : > { %v1908_v42 = vsel %vm1332_vm2, %v1877_v25, -inf }
 0x622   : > { %1909 = vmax.xlane.f32.xlu1 %v1908_v42 }
 0x623   : > { %1906 = vmax.xlane.f32.xlu0 %v1905_v26 }
 0x625   : > { %v8619_v38 = vpop.f32.mrb[20].mxu1 }
 0x626   : > { %v1890_v43 = vpop.f32.mrb[21].mxu1  ;;  %v1923_v6 = vsel %vm1332_vm2, %v8619_v38, -inf }
 0x627   : > { %1915 = vmax.xlane.f32.xlu0 %v1914_v1  ;;  %v11238_v33 = vpop.f32.mrb[22].mxu1  ;;  %v1917_v30 = vsel %vm1332_vm2, %v1890_v43, -inf }
 0x628   : > { %v11240_v40 = vpop.f32.mrb[23].mxu1  ;;  %v1926_v7 = vsel %vm1332_vm2, %v11238_v33, -inf }
 0x629   : > { %v1920_v34 = vsel %vm1332_vm2, %v11240_v40, -inf }
 0x62b   : > { %1924 = vmax.xlane.f32.xlu0 %v1923_v6 }
 0x62f   : > { %1918 = vmax.xlane.f32.xlu0 %v1917_v30 }
 0x633   : > { %1999 = vrot.lane.b32.xlu1 %v10868_v14, %s10316_s19 }
 0x637   : > { %2001 = vrot.lane.b32.xlu1 %v10886_v3, %s10316_s19 }
 0x645   : > { %1997 = vrot.lane.b32.xlu0 %v10870_v39, %s10316_s19 }
 0x65b   : > { %1927 = vmax.xlane.f32.xlu1 %v1926_v7 }
 0x65f   : > { %1921 = vmax.xlane.f32.xlu1 %v1920_v34 }
 0x670   : > { %2003 = vrot.lane.b32.xlu1 %v10884_v8, %s10316_s19 }
 0x6ac   : > { %v1913_v35 = vpop.xlane.xlu0 %1912 }
 0x6ad   : > { %v1931_v44 = vsub.f32 %v8615_v16, %v1913_v35 }
 0x6af   : > { %v1941_v4 = vmul.f32 1.442695, %v1931_v44  ;;  %v1910_v12 = vpop.xlane.xlu1 %1909 }
 0x6b0   : > { %v1907_v29 = vpop.xlane.xlu0 %1906  ;;  %v1930_v11 = vsub.f32 %v1877_v25, %v1910_v12 }
 0x6b1   : > { %9629 = vpow2.f32 %v1941_v4  ;;  %v1929_v62 = vsub.f32 %v1874_v23, %v1907_v29 }
 0x6b2   : > { %v1939_v52 = vmul.f32 1.442695, %v1930_v11 }
 0x6b3   : > { %v1937_v20 = vmul.f32 1.442695, %v1929_v62 }
 0x6b4   : > { %v1916_v55 = vpop.xlane.xlu0 %1915 }
 0x6b5   : > { %9631 = vpow2.f32 %v1937_v20  ;;  %v1932_v46 = vsub.f32 %v8616_v13, %v1916_v55  ;;  %v2000_v13 = vpop.permute.xlu1 %1999 }
 0x6b7   : > { %v1943_v18 = vmul.f32 1.442695, %v1932_v46 }
 0x6b8   : > { %v1925_v22 = vpop.xlane.xlu0 %1924 }
 0x6b9   : > { %9633 = vpow2.f32 %v1943_v18  ;;  %v1935_v42 = vsub.f32 %v8619_v38, %v1925_v22 }
 0x6ba   : > { %9635 = vpow2.f32 %v1939_v52 }
 0x6bb   : > { %v11256_v26 = vpop.eup %9629  ;;  %v1949_v1 = vmul.f32 1.442695, %v1935_v42 }
 0x6bc   : > { %v1919_v16 = vpop.xlane.xlu0 %1918  ;;  %v1959_v6 = vsel %vm1332_vm2, %v11256_v26, 0.0 }
 0x6bd   : > { %9637 = vpow2.f32 %v1949_v1  ;;  %v1933_v23 = vsub.f32 %v1890_v43, %v1919_v16  ;;  %1960 = vadd.xlane.f32.xlu0 %v1959_v6  ;;  %v2002_v43 = vpop.permute.xlu1 %2001 }
 0x6bf   : > { %v11260_v25 = vpop.eup %9631  ;;  %v1945_v30 = vmul.f32 1.442695, %v1933_v23 }
 0x6c0   : > { %v1998_v7 = vpop.permute.xlu0 %1997  ;;  %v1953_v34 = vsel %vm1332_vm2, %v11260_v25, 0.0 }
 0x6c1   : > { %9639 = vpow2.f32 %v1945_v30  ;;  %1954 = vadd.xlane.f32.xlu0 %v1953_v34  ;;  %8621 = vmatprep.subr.bf16.mxu0 %v1998_v7 }
 0x6c2   : > { %8622 = vmatpush3.bf16.msra.mxu0 %v1998_v7 }
 0x6c3   : > { %v9634_v38 = vpop.eup %9633  ;;  %8623 = vmatprep.subr.bf16.mxu0 %v2000_v13 }
 0x6c4   : > { %v1962_v35 = vsel %vm1332_vm2, %v9634_v38, 0.0  ;;  %v9636_v44 = vpop.eup %9635 }
 0x6c5   : > { %1963 = vadd.xlane.f32.xlu1 %v1962_v35  ;;  %v1956_v12 = vsel %vm1332_vm2, %v9636_v44, 0.0 }
 0x6c6   : > { %8624 = vmatpush3.bf16.msra.mxu0 %v2000_v13 }
 0x6c7   : > { %v11265_v4 = vpop.eup %9637  ;;  %8625 = vmatprep.subr.bf16.mxu0 %v2002_v43 }
 0x6c8   : > { %v1971_v29 = vsel %vm1332_vm2, %v11265_v4, 0.0 }
 0x6c9   : > { %1957 = vadd.xlane.f32.xlu1 %v1956_v12  ;;  %1972 = vadd.xlane.f32.xlu0 %v1971_v29 }
 0x6ca   : > { %8626 = vmatpush3.bf16.msra.mxu0 %v2002_v43 }
 0x6cb   : > { %v11270_v62 = vpop.eup %9639 }
 0x6cc   : > { %v1965_v11 = vsel %vm1332_vm2, %v11270_v62, 0.0 }
 0x6cd   : > { %1966 = vadd.xlane.f32.xlu0 %v1965_v11 }
 0x6da   : > { %2096 = vrot.lane.b32.xlu1 %v10868_v14, %s10317_s20 }
 0x6de   : > { %2098 = vrot.lane.b32.xlu1 %v10886_v3, %s10317_s20 }
 0x6e8   : > { %v1928_v20 = vpop.xlane.xlu1 %1927 }
 0x6e9   : > { %v1936_v55 = vsub.f32 %v11238_v33, %v1928_v20 }
 0x6eb   : > { %v1951_v46 = vmul.f32 1.442695, %v1936_v55 }
 0x6ec   : > { %v1922_v52 = vpop.xlane.xlu1 %1921 }
 0x6ed   : > { %9641 = vpow2.f32 %v1951_v46  ;;  %v1934_v18 = vsub.f32 %v11240_v40, %v1922_v52 }
 0x6ef   : > { %v1947_v22 = vmul.f32 1.442695, %v1934_v18 }
 0x6f0   : > { %v2004_v42 = vpop.permute.xlu1 %2003 }
 0x6f1   : > { %8627 = vmatprep.subr.bf16.mxu0 %v2004_v42  ;;  %9643 = vpow2.f32 %v1947_v22 }
 0x6f2   : > { %8628 = vmatpush3.bf16.msra.mxu0 %v2004_v42 }
 0x6f7   : > { %v9642_v1 = vpop.eup %9641 }
 0x6f8   : > { %v1974_v16 = vsel %vm1332_vm2, %v9642_v1, 0.0 }
 0x6f9   : > { %1975 = vadd.xlane.f32.xlu0 %v1974_v16 }
 0x6fb   : > { %v9644_v6 = vpop.eup %9643 }
 0x6fc   : > { %v1968_v23 = vsel %vm1332_vm2, %v9644_v6, 0.0 }
 0x702   : > { %1969 = vadd.xlane.f32.xlu1 %v1968_v23 }
 0x70f   : > { %2094 = vrot.lane.b32.xlu0 %v10870_v39, %s10317_s20 }
 0x713   : > { %2100 = vrot.lane.b32.xlu1 %v10884_v8, %s10317_s20  ;;  %2086 = vrot.lane.b32.xlu0 %v10870_v39, %s10318_s21 }
 0x717   : > { %2088 = vrot.lane.b32.xlu1 %v10868_v14, %s10318_s21  ;;  %2090 = vrot.lane.b32.xlu0 %v10886_v3, %s10318_s21 }
 0x71b   : > { %2092 = vrot.lane.b32.xlu1 %v10884_v8, %s10318_s21 }
 0x74a   : > { %v1961_v33 = vpop.xlane.xlu0 %1960 }
 0x74e   : > { %v1955_v40 = vpop.xlane.xlu0 %1954 }
 0x752   : > { %v1964_v30 = vpop.xlane.xlu1 %1963 }
 0x753   : > { %9645 = vrcp.f32 %v1964_v30 }
 0x754   : > { %9647 = vrcp.f32 %v1955_v40 }
 0x755   : > { %9649 = vrcp.f32 %v1961_v33 }
 0x756   : > { %v1958_v13 = vpop.xlane.xlu1 %1957  ;;  %v1973_v52 = vpop.xlane.xlu0 %1972 }
 0x757   : > { %9651 = vrcp.f32 %v1958_v13 }
 0x75a   : > { %v1967_v18 = vpop.xlane.xlu0 %1966  ;;  %v2097_v22 = vpop.permute.xlu1 %2096 }
 0x75d   : > { %v9646_v7 = vpop.eup %9645 }
 0x75e   : > { %v9648_v34 = vpop.eup %9647  ;;  %v1988_v12 = vmul.f32 %v9646_v7, %v9634_v38  ;;  %v2099_v23 = vpop.permute.xlu1 %2098 }
 0x75f   : > { %v9650_v35 = vpop.eup %9649  ;;  %v1985_v29 = vmul.f32 %v9648_v34, %v11260_v25  ;;  %v2118_v25 = vsel %vm1242_vm1, %v2097_v22, 0  ;;  %v2121_v7 = vsel %vm1242_vm1, %v2099_v23, 0 }
 0x760   : > { %v1987_v20 = vmul.f32 %v9650_v35, %v11256_v26 }
 0x761   : > { %v9652_v43 = vpop.eup %9651 }
 0x762   : > { %v1986_v11 = vmul.f32 %v9652_v43, %v9636_v44  ;;  %v1994_v46 = vpack.c.bf16 %v1988_v12, %v1987_v20 }
 0x764   : > { %v1993_v55 = vpack.c.bf16 %v1986_v11, %v1985_v29 }
 0x766   : > { %8629 = vmatprep.mubr.msk.bf16.mxu0 %vm1332_vm2, %v1993_v55 }
 0x767   : > { %8630 = vmatmul.mubr.msk.bf16.vlgmr.msra.gmra.mrb[48].mxu0 %vm1332_vm2, %v1994_v46 }
 0x786   : > { %v1976_v42 = vpop.xlane.xlu0 %1975 }
 0x787   : > { %9653 = vrcp.f32 %v1976_v42 }
 0x788   : > { %9655 = vrcp.f32 %v1967_v18 }
 0x789   : > { %9657 = vrcp.f32 %v1973_v52 }
 0x78a   : > { %v2095_v16 = vpop.permute.xlu0 %2094 }
 0x78b   : > { %9177 = vmatprep.subr.msk.bf16.mxu0 %vm1242_vm1, %v2095_v16  ;;  %v2115_v38 = vsel %vm1242_vm1, %v2095_v16, 0 }
 0x78c   : > { %8638 = vmatpush3.bf16.xpose.msra.mxu0 %v2115_v38 }
 0x78d   : > { %9178 = vmatprep.subr.msk.bf16.mxu0 %vm1242_vm1, %v2097_v22 }
 0x78e   : > { %v2087_v20 = vpop.permute.xlu0 %2086 }
 0x78f   : > { %v1970_v26 = vpop.xlane.xlu1 %1969 }
 0x790   : > { %9659 = vrcp.f32 %v1970_v26 }
 0x791   : > { %v9654_v44 = vpop.eup %9653 }
 0x792   : > { %v9656_v33 = vpop.eup %9655  ;;  %v1992_v13 = vmul.f32 %v9654_v44, %v9642_v1 }
 0x793   : > { %v9658_v40 = vpop.eup %9657  ;;  %v1989_v34 = vmul.f32 %v9656_v33, %v11270_v62  ;;  %v2101_v43 = vpop.permute.xlu1 %2100 }
 0x794   : > { %8640 = vmatpush3.bf16.xpose.msra.mxu0 %v2118_v25  ;;  %v1991_v12 = vmul.f32 %v9658_v40, %v11265_v4  ;;  %v2124_v1 = vsel %vm1242_vm1, %v2101_v43, 0 }
 0x795   : > { %9179 = vmatprep.subr.msk.bf16.mxu0 %vm1242_vm1, %v2099_v23 }
 0x796   : > { %v1996_v11 = vpack.c.bf16 %v1992_v13, %v1991_v12 }
 0x797   : > { %v2089_v62 = vpop.permute.xlu1 %2088 }
 0x79a   : > { %v9660_v30 = vpop.eup %9659 }
 0x79b   : > { %v1990_v35 = vmul.f32 %v9660_v30, %v9644_v6  ;;  %v2091_v6 = vpop.permute.xlu0 %2090  ;;  %v2093_v4 = vpop.permute.xlu1 %2092 }
 0x79c   : > { %8642 = vmatpush3.bf16.xpose.msra.mxu0 %v2121_v7 }
 0x79d   : > { %9180 = vmatprep.subr.msk.bf16.mxu0 %vm1242_vm1, %v2101_v43  ;;  %v1995_v29 = vpack.c.bf16 %v1990_v35, %v1989_v34 }
 0x79f   : > { %8633 = vmatprep.mubr.msk.bf16.mxu0 %vm1332_vm2, %v1995_v29 }
 0x7a0   : > { %8634 = vmatmul.mubr.msk.bf16.gmra.mrb[52].mxu0 %vm1332_vm2, %v1996_v11 }
 0x7a1   : > { %8645 = vmatprep.mubr.msk.bf16.mxu0 %vm1242_vm1, %v2087_v20 }
 0x7a4   : > { %8644 = vmatpush3.bf16.xpose.msra.mxu0 %v2124_v1 }
 0x7ab   : > { %8646 = vmatmul.mubr.msk.bf16.vlgmr.msra.gmra.mrb[56].mxu0 %vm1242_vm1, %v2089_v62 }
 0x7ac   : > { %8649 = vmatprep.mubr.msk.bf16.mxu0 %vm1242_vm1, %v2091_v6 }
 0x7b3   : > { %8650 = vmatmul.mubr.msk.bf16.gmra.mrb[60].mxu0 %vm1242_vm1, %v2093_v4 }
 0x83a   : > { %v11314_v55 = vpop.f32.mrb[48].mxu0 }
 0x83b   : > { %v11316_v46 = vpop.f32.mrb[49].mxu0 }
 0x83c   : > { %v11318_v52 = vpop.f32.mrb[50].mxu0 }
 0x83d   : > { %v11322_v22 = vpop.f32.mrb[51].mxu0 }
 0x873   : > { %v11326_v16 = vpop.f32.mrb[52].mxu0 }
 0x874   : > { %13925 = vst [vmem:[#allocation12_spill] sm:$0xff] %v11326_v16  ;;  %v11328_v23 = vpop.f32.mrb[53].mxu0 }
 0x875   : > { %v11330_v38 = vpop.f32.mrb[54].mxu0 }
 0x876   : > { %13926 = vst [vmem:[#allocation13_spill] sm:$0xff] %v11330_v38  ;;  %v11334_v25 = vpop.f32.mrb[55].mxu0 }
 0x87e   : > { %v8647_v33 = vpop.f32.mrb[56].mxu0 }
 0x87f   : > { %v2160_v40 = vpop.f32.mrb[57].mxu0  ;;  %v2197_v30 = vsel %vm1332_vm2, %v8647_v33, -inf }
 0x880   : > { %2198 = vmax.xlane.f32.xlu0 %v2197_v30  ;;  %v8648_v13 = vpop.f32.mrb[58].mxu0  ;;  %v2191_v35 = vsel %vm1332_vm2, %v2160_v40, -inf }
 0x881   : > { %v2163_v7 = vpop.f32.mrb[59].mxu0  ;;  %v2200_v29 = vsel %vm1332_vm2, %v8648_v13, -inf }
 0x882   : > { %v2194_v34 = vsel %vm1332_vm2, %v2163_v7, -inf }
 0x883   : > { %2195 = vmax.xlane.f32.xlu1 %v2194_v34 }
 0x884   : > { %2192 = vmax.xlane.f32.xlu0 %v2191_v35 }
 0x886   : > { %v8651_v43 = vpop.f32.mrb[60].mxu0 }
 0x887   : > { %v2176_v12 = vpop.f32.mrb[61].mxu0  ;;  %v2209_v1 = vsel %vm1332_vm2, %v8651_v43, -inf }
 0x888   : > { %2201 = vmax.xlane.f32.xlu0 %v2200_v29  ;;  %v11342_v11 = vpop.f32.mrb[62].mxu0  ;;  %v2203_v62 = vsel %vm1332_vm2, %v2176_v12, -inf }
 0x889   : > { %v11344_v20 = vpop.f32.mrb[63].mxu0  ;;  %v2212_v6 = vsel %vm1332_vm2, %v11342_v11, -inf }
 0x88a   : > { %v2206_v4 = vsel %vm1332_vm2, %v11344_v20, -inf }
 0x88c   : > { %2210 = vmax.xlane.f32.xlu0 %v2209_v1 }
 0x890   : > { %2204 = vmax.xlane.f32.xlu0 %v2203_v62 }
 0x894   : > { %2285 = vrot.lane.b32.xlu1 %v10868_v14, %s10319_s22 }
 0x898   : > { %2287 = vrot.lane.b32.xlu1 %v10886_v3, %s10319_s22 }
 0x8a6   : > { %2283 = vrot.lane.b32.xlu0 %v10870_v39, %s10319_s22 }
 0x8bc   : > { %2213 = vmax.xlane.f32.xlu1 %v2212_v6 }
 0x8c0   : > { %2207 = vmax.xlane.f32.xlu1 %v2206_v4 }
 0x8d1   : > { %2289 = vrot.lane.b32.xlu1 %v10884_v8, %s10319_s22 }
 0x90d   : > { %v2199_v30 = vpop.xlane.xlu0 %2198 }
 0x90e   : > { %v2217_v34 = vsub.f32 %v8647_v33, %v2199_v30 }
 0x910   : > { %v2227_v14 = vmul.f32 1.442695, %v2217_v34  ;;  %v2196_v35 = vpop.xlane.xlu1 %2195 }
 0x911   : > { %v2193_v29 = vpop.xlane.xlu0 %2192  ;;  %v2216_v1 = vsub.f32 %v2163_v7, %v2196_v35 }
 0x912   : > { %9661 = vpow2.f32 %v2227_v14  ;;  %v2215_v3 = vsub.f32 %v2160_v40, %v2193_v29 }
 0x913   : > { %v2225_v6 = vmul.f32 1.442695, %v2216_v1 }
 0x914   : > { %v2223_v39 = vmul.f32 1.442695, %v2215_v3  ;;  %v2286_v14 = vpop.permute.xlu1 %2285 }
 0x915   : > { %v2202_v62 = vpop.xlane.xlu0 %2201 }
 0x916   : > { %9663 = vpow2.f32 %v2223_v39  ;;  %v2218_v26 = vsub.f32 %v8648_v13, %v2202_v62 }
 0x918   : > { %v2229_v63 = vmul.f32 1.442695, %v2218_v26  ;;  %v2288_v35 = vpop.permute.xlu1 %2287 }
 0x919   : > { %v2211_v18 = vpop.xlane.xlu0 %2210 }
 0x91a   : > { %9665 = vpow2.f32 %v2229_v63  ;;  %v2221_v4 = vsub.f32 %v8651_v43, %v2211_v18 }
 0x91b   : > { %9667 = vpow2.f32 %v2225_v6 }
 0x91c   : > { %v11360_v37 = vpop.eup %9661  ;;  %v2235_v8 = vmul.f32 1.442695, %v2221_v4 }
 0x91d   : > { %v2205_v33 = vpop.xlane.xlu0 %2204  ;;  %v2245_v30 = vsel %vm1332_vm2, %v11360_v37, 0.0 }
 0x91e   : > { %9669 = vpow2.f32 %v2235_v8  ;;  %v2219_v40 = vsub.f32 %v2176_v12, %v2205_v33  ;;  %2246 = vadd.xlane.f32.xlu0 %v2245_v30 }
 0x920   : > { %v9664_v7 = vpop.eup %9663  ;;  %v2231_v34 = vmul.f32 1.442695, %v2219_v40 }
 0x921   : > { %v2284_v13 = vpop.permute.xlu0 %2283  ;;  %v2239_v26 = vsel %vm1332_vm2, %v9664_v7, 0.0 }
 0x922   : > { %9671 = vpow2.f32 %v2231_v34  ;;  %2240 = vadd.xlane.f32.xlu0 %v2239_v26  ;;  %8653 = vmatprep.subr.bf16.mxu1 %v2284_v13 }
 0x923   : > { %8654 = vmatpush3.bf16.msra.mxu1 %v2284_v13 }
 0x924   : > { %v9666_v63 = vpop.eup %9665  ;;  %8655 = vmatprep.subr.bf16.mxu1 %v2286_v14 }
 0x925   : > { %v2248_v18 = vsel %vm1332_vm2, %v9666_v63, 0.0  ;;  %v9668_v43 = vpop.eup %9667 }
 0x926   : > { %2249 = vadd.xlane.f32.xlu1 %v2248_v18  ;;  %v2242_v29 = vsel %vm1332_vm2, %v9668_v43, 0.0 }
 0x927   : > { %8656 = vmatpush3.bf16.msra.mxu1 %v2286_v14 }
 0x928   : > { %v11366_v12 = vpop.eup %9669  ;;  %8657 = vmatprep.subr.bf16.mxu1 %v2288_v35 }
 0x929   : > { %v2257_v3 = vsel %vm1332_vm2, %v11366_v12, 0.0 }
 0x92a   : > { %2243 = vadd.xlane.f32.xlu1 %v2242_v29  ;;  %2258 = vadd.xlane.f32.xlu0 %v2257_v3 }
 0x92b   : > { %8658 = vmatpush3.bf16.msra.mxu1 %v2288_v35 }
 0x92c   : > { %v11371_v1 = vpop.eup %9671 }
 0x92d   : > { %v2251_v39 = vsel %vm1332_vm2, %v11371_v1, 0.0 }
 0x92e   : > { %2252 = vadd.xlane.f32.xlu0 %v2251_v39 }
 0x93b   : > { %2504 = vrot.lane.b32.xlu1 %v10942_v51, %s10309_s26 }
 0x93f   : > { %2506 = vrot.lane.b32.xlu1 %v10954_v54, %s10309_s26 }
 0x949   : > { %v2214_v62 = vpop.xlane.xlu1 %2213 }
 0x94a   : > { %v2222_v6 = vsub.f32 %v11342_v11, %v2214_v62 }
 0x94c   : > { %v2237_v4 = vmul.f32 1.442695, %v2222_v6 }
 0x94d   : > { %v2208_v8 = vpop.xlane.xlu1 %2207 }
 0x94e   : > { %9673 = vpow2.f32 %v2237_v4  ;;  %v2220_v33 = vsub.f32 %v11344_v20, %v2208_v8 }
 0x950   : > { %v2233_v30 = vmul.f32 1.442695, %v2220_v33 }
 0x951   : > { %v2290_v40 = vpop.permute.xlu1 %2289 }
 0x952   : > { %8659 = vmatprep.subr.bf16.mxu1 %v2290_v40  ;;  %9675 = vpow2.f32 %v2233_v30 }
 0x953   : > { %8660 = vmatpush3.bf16.msra.mxu1 %v2290_v40 }
 0x958   : > { %v9674_v34 = vpop.eup %9673 }
 0x959   : > { %v2260_v14 = vsel %vm1332_vm2, %v9674_v34, 0.0 }
 0x95a   : > { %2261 = vadd.xlane.f32.xlu0 %v2260_v14 }
 0x95c   : > { %v9676_v13 = vpop.eup %9675 }
 0x95d   : > { %v2254_v26 = vsel %vm1332_vm2, %v9676_v13, 0.0 }
 0x963   : > { %2255 = vadd.xlane.f32.xlu1 %v2254_v26 }
 0x970   : > { %2502 = vrot.lane.b32.xlu0 %v10944_v32, %s10309_s26 }
 0x974   : > { %2508 = vrot.lane.b32.xlu1 %v10952_v56, %s10309_s26 }
 0x9ab   : > { %v2247_v11 = vpop.xlane.xlu0 %2246 }
 0x9af   : > { %v2241_v20 = vpop.xlane.xlu0 %2240 }
 0x9b3   : > { %v2250_v18 = vpop.xlane.xlu1 %2249 }
 0x9b4   : > { %9677 = vrcp.f32 %v2250_v18 }
 0x9b5   : > { %9679 = vrcp.f32 %v2241_v20 }
 0x9b6   : > { %9681 = vrcp.f32 %v2247_v11 }
 0x9b7   : > { %v2244_v35 = vpop.xlane.xlu1 %2243  ;;  %v2259_v14 = vpop.xlane.xlu0 %2258 }
 0x9b8   : > { %9683 = vrcp.f32 %v2244_v35 }
 0x9bb   : > { %v2253_v26 = vpop.xlane.xlu0 %2252  ;;  %v2505_v11 = vpop.permute.xlu1 %2504 }
 0x9be   : > { %v9678_v29 = vpop.eup %9677 }
 0x9bf   : > { %v9680_v3 = vpop.eup %9679  ;;  %v2274_v6 = vmul.f32 %v9678_v29, %v9666_v63  ;;  %v2507_v35 = vpop.permute.xlu1 %2506 }
 0x9c0   : > { %v9682_v39 = vpop.eup %9681  ;;  %v2271_v4 = vmul.f32 %v9680_v3, %v9664_v7  ;;  %v2526_v7 = vsel %vm1242_vm1, %v2505_v11, 0 }
 0x9c1   : > { %v2273_v33 = vmul.f32 %v9682_v39, %v11360_v37 }
 0x9c2   : > { %v9684_v62 = vpop.eup %9683 }
 0x9c3   : > { %v2272_v8 = vmul.f32 %v9684_v62, %v9668_v43  ;;  %v2280_v40 = vpack.c.bf16 %v2274_v6, %v2273_v33  ;;  %v2529_v6 = vsel %vm1242_vm1, %v2507_v35, 0 }
 0x9c5   : > { %v2279_v30 = vpack.c.bf16 %v2272_v8, %v2271_v4 }
 0x9c7   : > { %8661 = vmatprep.mubr.msk.bf16.mxu1 %vm1332_vm2, %v2279_v30 }
 0x9c8   : > { %8662 = vmatmul.mubr.msk.bf16.vlgmr.msra.gmra.mrb[24].mxu1 %vm1332_vm2, %v2280_v40 }
 0x9e7   : > { %v2262_v20 = vpop.xlane.xlu0 %2261 }
 0x9e8   : > { %9685 = vrcp.f32 %v2262_v20 }
 0x9e9   : > { %9687 = vrcp.f32 %v2253_v26 }
 0x9ea   : > { %9689 = vrcp.f32 %v2259_v14 }
 0x9eb   : > { %v2503_v18 = vpop.permute.xlu0 %2502 }
 0x9ec   : > { %9181 = vmatprep.subr.msk.bf16.mxu1 %vm1242_vm1, %v2503_v18  ;;  %v2523_v63 = vsel %vm1242_vm1, %v2503_v18, 0 }
 0x9ed   : > { %8670 = vmatpush3.bf16.xpose.msra.mxu1 %v2523_v63 }
 0x9ee   : > { %9182 = vmatprep.subr.msk.bf16.mxu1 %vm1242_vm1, %v2505_v11 }
 0x9f0   : > { %v2256_v37 = vpop.xlane.xlu1 %2255 }
 0x9f1   : > { %9691 = vrcp.f32 %v2256_v37 }
 0x9f2   : > { %v9686_v43 = vpop.eup %9685 }
 0x9f3   : > { %v9688_v29 = vpop.eup %9687  ;;  %v2278_v62 = vmul.f32 %v9686_v43, %v9674_v34 }
 0x9f4   : > { %v9690_v3 = vpop.eup %9689  ;;  %v2275_v4 = vmul.f32 %v9688_v29, %v11371_v1  ;;  %v2509_v33 = vpop.permute.xlu1 %2508 }
 0x9f5   : > { %8672 = vmatpush3.bf16.xpose.msra.mxu1 %v2526_v7  ;;  %v2277_v30 = vmul.f32 %v9690_v3, %v11366_v12  ;;  %v2532_v34 = vsel %vm1242_vm1, %v2509_v33, 0 }
 0x9f6   : > { %9183 = vmatprep.subr.msk.bf16.mxu1 %vm1242_vm1, %v2507_v35 }
 0x9f7   : > { %v2282_v14 = vpack.c.bf16 %v2278_v62, %v2277_v30 }
 0x9fb   : > { %v9692_v39 = vpop.eup %9691 }
 0x9fc   : > { %v2276_v8 = vmul.f32 %v9692_v39, %v9676_v13 }
 0x9fd   : > { %8674 = vmatpush3.bf16.xpose.msra.mxu1 %v2529_v6 }
 0x9fe   : > { %9184 = vmatprep.subr.msk.bf16.mxu1 %vm1242_vm1, %v2509_v33  ;;  %v2281_v40 = vpack.c.bf16 %v2276_v8, %v2275_v4 }
 0xa00   : > { %8665 = vmatprep.mubr.msk.bf16.mxu1 %vm1332_vm2, %v2281_v40 }
 0xa01   : > { %8666 = vmatmul.mubr.msk.bf16.gmra.mrb[28].mxu1 %vm1332_vm2, %v2282_v14 }
 0xa02   : > { %8677 = vmatprep.mubr.msk.bf16.mxu1 %vm1242_vm1, %v10944_v32 }
 0xa05   : > { %8676 = vmatpush3.bf16.xpose.msra.mxu1 %v2532_v34 }
 0xa0c   : > { %8678 = vmatmul.mubr.msk.bf16.vlgmr.msra.gmra.mrb[32].mxu1 %vm1242_vm1, %v10942_v51 }
 0xa0d   : > { %8681 = vmatprep.mubr.msk.bf16.mxu1 %vm1242_vm1, %v10954_v54 }
 0xa14   : > { %8682 = vmatmul.mubr.msk.bf16.gmra.mrb[36].mxu1 %vm1242_vm1, %v10952_v56 }
 0xa9b   : > { %v11410_v12 = vpop.f32.mrb[24].mxu1 }
 0xa9c   : > { %13927 = vst [vmem:[#allocation14_spill] sm:$0xff] %v11410_v12  ;;  %v11412_v1 = vpop.f32.mrb[25].mxu1 }
 0xa9d   : > { %v11414_v13 = vpop.f32.mrb[26].mxu1 }
 0xa9e   : > { %v11418_v11 = vpop.f32.mrb[27].mxu1 }
 0xad4   : > { %v11422_v18 = vpop.f32.mrb[28].mxu1 }
 0xad5   : > { %13928 = vst [vmem:[#allocation15_spill] sm:$0xff] %v11422_v18  ;;  %v11424_v35 = vpop.f32.mrb[29].mxu1 }
 0xad6   : > { %v11426_v63 = vpop.f32.mrb[30].mxu1 }
 0xad7   : > { %13929 = vst [vmem:[#allocation16_spill] sm:$0xff] %v11426_v63  ;;  %v11430_v7 = vpop.f32.mrb[31].mxu1 }
 0xadf   : > { %v8679_v29 = vpop.f32.mrb[32].mxu1 }
 0xae0   : > { %v2568_v3 = vpop.f32.mrb[33].mxu1  ;;  %v2605_v39 = vsel %vm1332_vm2, %v8679_v29, -inf }
 0xae1   : > { %2606 = vmax.xlane.f32.xlu0 %v2605_v39  ;;  %v8680_v62 = vpop.f32.mrb[34].mxu1  ;;  %v2599_v8 = vsel %vm1332_vm2, %v2568_v3, -inf }
 0xae2   : > { %v2571_v6 = vpop.f32.mrb[35].mxu1  ;;  %v2608_v40 = vsel %vm1332_vm2, %v8680_v62, -inf }
 0xae3   : > { %v2602_v4 = vsel %vm1332_vm2, %v2571_v6, -inf }
 0xae4   : > { %2603 = vmax.xlane.f32.xlu1 %v2602_v4 }
 0xae5   : > { %2600 = vmax.xlane.f32.xlu0 %v2599_v8 }
 0xae7   : > { %v8683_v33 = vpop.f32.mrb[36].mxu1 }
 0xae8   : > { %v2584_v30 = vpop.f32.mrb[37].mxu1  ;;  %v2617_v37 = vsel %vm1332_vm2, %v8683_v33, -inf }
 0xae9   : > { %2609 = vmax.xlane.f32.xlu0 %v2608_v40  ;;  %v11438_v14 = vpop.f32.mrb[38].mxu1  ;;  %v2611_v39 = vsel %vm1332_vm2, %v2584_v30, -inf }
 0xaea   : > { %v11440_v34 = vpop.f32.mrb[39].mxu1  ;;  %v2620_v4 = vsel %vm1332_vm2, %v11438_v14, -inf }
 0xaeb   : > { %v2614_v8 = vsel %vm1332_vm2, %v11440_v34, -inf }
 0xaed   : > { %2618 = vmax.xlane.f32.xlu0 %v2617_v37 }
 0xaf1   : > { %2612 = vmax.xlane.f32.xlu0 %v2611_v39 }
 0xaf5   : > { %2693 = vrot.lane.b32.xlu1 %v10942_v51, %s10312_s15 }
 0xaf9   : > { %2695 = vrot.lane.b32.xlu1 %v10954_v54, %s10312_s15 }
 0xb07   : > { %2691 = vrot.lane.b32.xlu0 %v10944_v32, %s10312_s15 }
 0xb1d   : > { %2621 = vmax.xlane.f32.xlu1 %v2620_v4 }
 0xb21   : > { %2615 = vmax.xlane.f32.xlu1 %v2614_v8 }
 0xb32   : > { %2697 = vrot.lane.b32.xlu1 %v10952_v56, %s10312_s15 }
 0xb6e   : > { %v2607_v37 = vpop.xlane.xlu0 %2606 }
 0xb6f   : > { %v2625_v40 = vsub.f32 %v8679_v29, %v2607_v37 }
 0xb71   : > { %v2635_v39 = vmul.f32 1.442695, %v2625_v40  ;;  %v2604_v26 = vpop.xlane.xlu1 %2603 }
 0xb72   : > { %v2601_v43 = vpop.xlane.xlu0 %2600  ;;  %v2624_v45 = vsub.f32 %v2571_v6, %v2604_v26 }
 0xb73   : > { %9693 = vpow2.f32 %v2635_v39  ;;  %v2623_v44 = vsub.f32 %v2568_v3, %v2601_v43 }
 0xb74   : > { %v2633_v4 = vmul.f32 1.442695, %v2624_v45 }
 0xb75   : > { %v2631_v20 = vmul.f32 1.442695, %v2623_v44 }
 0xb76   : > { %v2610_v42 = vpop.xlane.xlu0 %2609 }
 0xb77   : > { %9695 = vpow2.f32 %v2631_v20  ;;  %v2626_v2 = vsub.f32 %v8680_v62, %v2610_v42  ;;  %v2694_v42 = vpop.permute.xlu1 %2693 }
 0xb79   : > { %v2637_v41 = vmul.f32 1.442695, %v2626_v2 }
 0xb7a   : > { %v2619_v9 = vpop.xlane.xlu0 %2618 }
 0xb7b   : > { %9697 = vpow2.f32 %v2637_v41  ;;  %v2629_v8 = vsub.f32 %v8683_v33, %v2619_v9 }
 0xb7c   : > { %9699 = vpow2.f32 %v2633_v4 }
 0xb7d   : > { %v11456_v60 = vpop.eup %9693  ;;  %v2643_v31 = vmul.f32 1.442695, %v2629_v8 }
 0xb7e   : > { %v2613_v29 = vpop.xlane.xlu0 %2612  ;;  %v2653_v37 = vsel %vm1332_vm2, %v11456_v60, 0.0 }
 0xb7f   : > { %9701 = vpow2.f32 %v2643_v31  ;;  %v2627_v43 = vsub.f32 %v2584_v30, %v2613_v29  ;;  %2654 = vadd.xlane.f32.xlu0 %v2653_v37  ;;  %v2696_v31 = vpop.permute.xlu1 %2695 }
 0xb81   : > { %v11460_v44 = vpop.eup %9695  ;;  %v2639_v26 = vmul.f32 1.442695, %v2627_v43 }
 0xb82   : > { %v2692_v45 = vpop.permute.xlu0 %2691  ;;  %v2647_v41 = vsel %vm1332_vm2, %v11460_v44, 0.0 }
 0xb83   : > { %9703 = vpow2.f32 %v2639_v26  ;;  %2648 = vadd.xlane.f32.xlu0 %v2647_v41  ;;  %8685 = vmatprep.subr.bf16.mxu0 %v2692_v45 }
 0xb84   : > { %8686 = vmatpush3.bf16.msra.mxu0 %v2692_v45 }
 0xb85   : > { %v9698_v9 = vpop.eup %9697  ;;  %8687 = vmatprep.subr.bf16.mxu0 %v2694_v42 }
 0xb86   : > { %v2656_v2 = vsel %vm1332_vm2, %v9698_v9, 0.0  ;;  %v9700_v20 = vpop.eup %9699 }
 0xb87   : > { %2657 = vadd.xlane.f32.xlu1 %v2656_v2  ;;  %v2650_v6 = vsel %vm1332_vm2, %v9700_v20, 0.0 }
 0xb88   : > { %8688 = vmatpush3.bf16.msra.mxu0 %v2694_v42 }
 0xb89   : > { %v11465_v3 = vpop.eup %9701  ;;  %8689 = vmatprep.subr.bf16.mxu0 %v2696_v31 }
 0xb8a   : > { %v2665_v62 = vsel %vm1332_vm2, %v11465_v3, 0.0 }
 0xb8b   : > { %2666 = vadd.xlane.f32.xlu0 %v2665_v62  ;;  %2651 = vadd.xlane.f32.xlu1 %v2650_v6 }
 0xb8c   : > { %8690 = vmatpush3.bf16.msra.mxu0 %v2696_v31 }
 0xb8d   : > { %v11470_v33 = vpop.eup %9703 }
 0xb8e   : > { %v2659_v30 = vsel %vm1332_vm2, %v11470_v33, 0.0 }
 0xb8f   : > { %2660 = vadd.xlane.f32.xlu0 %v2659_v30 }
 0xb9c   : > { %2790 = vrot.lane.b32.xlu1 %v10942_v51, %s10310_s29 }
 0xba0   : > { %2792 = vrot.lane.b32.xlu1 %v10954_v54, %s10310_s29 }
 0xbaa   : > { %v2622_v40 = vpop.xlane.xlu1 %2621 }
 0xbab   : > { %v2630_v39 = vsub.f32 %v11438_v14, %v2622_v40 }
 0xbad   : > { %v2645_v4 = vmul.f32 1.442695, %v2630_v39 }
 0xbae   : > { %v2616_v8 = vpop.xlane.xlu1 %2615 }
 0xbaf   : > { %9705 = vpow2.f32 %v2645_v4  ;;  %v2628_v29 = vsub.f32 %v11440_v34, %v2616_v8 }
 0xbb1   : > { %v2641_v37 = vmul.f32 1.442695, %v2628_v29 }
 0xbb2   : > { %v2698_v43 = vpop.permute.xlu1 %2697 }
 0xbb3   : > { %8691 = vmatprep.subr.bf16.mxu0 %v2698_v43  ;;  %9707 = vpow2.f32 %v2641_v37 }
 0xbb4   : > { %8692 = vmatpush3.bf16.msra.mxu0 %v2698_v43 }
 0xbb9   : > { %v9706_v26 = vpop.eup %9705 }
 0xbba   : > { %v2668_v42 = vsel %vm1332_vm2, %v9706_v26, 0.0 }
 0xbbb   : > { %2669 = vadd.xlane.f32.xlu0 %v2668_v42 }
 0xbbd   : > { %v9708_v45 = vpop.eup %9707 }
 0xbbe   : > { %v2662_v41 = vsel %vm1332_vm2, %v9708_v45, 0.0 }
 0xbc4   : > { %2663 = vadd.xlane.f32.xlu1 %v2662_v41 }
 0xbd1   : > { %2788 = vrot.lane.b32.xlu0 %v10944_v32, %s10310_s29 }
 0xbd5   : > { %2780 = vrot.lane.b32.xlu0 %v10944_v32, %s10311_s30  ;;  %2794 = vrot.lane.b32.xlu1 %v10952_v56, %s10310_s29 }
 0xbd9   : > { %2784 = vrot.lane.b32.xlu0 %v10954_v54, %s10311_s30  ;;  %2782 = vrot.lane.b32.xlu1 %v10942_v51, %s10311_s30 }
 0xbdd   : > { %2786 = vrot.lane.b32.xlu1 %v10952_v56, %s10311_s30 }
 0xc0c   : > { %v2655_v14 = vpop.xlane.xlu0 %2654 }
 0xc10   : > { %v2649_v2 = vpop.xlane.xlu0 %2648 }
 0xc14   : > { %v2658_v34 = vpop.xlane.xlu1 %2657 }
 0xc15   : > { %9709 = vrcp.f32 %v2658_v34 }
 0xc16   : > { %9711 = vrcp.f32 %v2649_v2 }
 0xc17   : > { %9713 = vrcp.f32 %v2655_v14 }
 0xc18   : > { %v2652_v31 = vpop.xlane.xlu1 %2651  ;;  %v2667_v42 = vpop.xlane.xlu0 %2666 }
 0xc19   : > { %9715 = vrcp.f32 %v2652_v31 }
 0xc1c   : > { %v2661_v41 = vpop.xlane.xlu0 %2660  ;;  %v2791_v14 = vpop.permute.xlu1 %2790 }
 0xc1f   : > { %v9710_v62 = vpop.eup %9709 }
 0xc20   : > { %v9712_v6 = vpop.eup %9711  ;;  %v2682_v39 = vmul.f32 %v9710_v62, %v9698_v9  ;;  %v2793_v31 = vpop.permute.xlu1 %2792 }
 0xc21   : > { %v9714_v30 = vpop.eup %9713  ;;  %v2679_v4 = vmul.f32 %v9712_v6, %v11460_v44  ;;  %v2812_v44 = vsel %vm1242_vm1, %v2791_v14, 0 }
 0xc22   : > { %v2681_v29 = vmul.f32 %v9714_v30, %v11456_v60 }
 0xc23   : > { %v9716_v40 = vpop.eup %9715 }
 0xc24   : > { %v2680_v8 = vmul.f32 %v9716_v40, %v9700_v20  ;;  %v2688_v43 = vpack.c.bf16 %v2682_v39, %v2681_v29  ;;  %v2815_v39 = vsel %vm1242_vm1, %v2793_v31, 0 }
 0xc26   : > { %v2687_v37 = vpack.c.bf16 %v2680_v8, %v2679_v4 }
 0xc28   : > { %8693 = vmatprep.mubr.msk.bf16.mxu0 %vm1332_vm2, %v2687_v37 }
 0xc29   : > { %8694 = vmatmul.mubr.msk.bf16.vlgmr.msra.gmra.mrb[64].mxu0 %vm1332_vm2, %v2688_v43 }
 0xc48   : > { %v2670_v34 = vpop.xlane.xlu0 %2669 }
 0xc49   : > { %9717 = vrcp.f32 %v2670_v34 }
 0xc4a   : > { %9719 = vrcp.f32 %v2661_v41 }
 0xc4b   : > { %9721 = vrcp.f32 %v2667_v42 }
 0xc4c   : > { %v2789_v2 = vpop.permute.xlu0 %2788 }
 0xc4d   : > { %9185 = vmatprep.subr.msk.bf16.mxu0 %vm1242_vm1, %v2789_v2  ;;  %v2809_v9 = vsel %vm1242_vm1, %v2789_v2, 0 }
 0xc4e   : > { %8702 = vmatpush3.bf16.xpose.msra.mxu0 %v2809_v9 }
 0xc4f   : > { %9186 = vmatprep.subr.msk.bf16.mxu0 %vm1242_vm1, %v2791_v14 }
 0xc50   : > { %v2781_v41 = vpop.permute.xlu0 %2780 }
 0xc51   : > { %v2664_v60 = vpop.xlane.xlu1 %2663 }
 0xc52   : > { %9723 = vrcp.f32 %v2664_v60 }
 0xc53   : > { %v9718_v20 = vpop.eup %9717 }
 0xc54   : > { %v9720_v62 = vpop.eup %9719  ;;  %v2686_v40 = vmul.f32 %v9718_v20, %v9706_v26 }
 0xc55   : > { %v9722_v6 = vpop.eup %9721  ;;  %v2683_v4 = vmul.f32 %v9720_v62, %v11470_v33  ;;  %v2795_v29 = vpop.permute.xlu1 %2794 }
 0xc56   : > { %8704 = vmatpush3.bf16.xpose.msra.mxu0 %v2812_v44  ;;  %v2685_v37 = vmul.f32 %v9722_v6, %v11465_v3  ;;  %v2818_v26 = vsel %vm1242_vm1, %v2795_v29, 0 }
 0xc57   : > { %9187 = vmatprep.subr.msk.bf16.mxu0 %vm1242_vm1, %v2793_v31 }
 0xc58   : > { %v2690_v42 = vpack.c.bf16 %v2686_v40, %v2685_v37 }
 0xc59   : > { %v2783_v33 = vpop.permute.xlu1 %2782 }
 0xc5c   : > { %v9724_v30 = vpop.eup %9723 }
 0xc5d   : > { %v2684_v8 = vmul.f32 %v9724_v30, %v9708_v45  ;;  %v2785_v45 = vpop.permute.xlu0 %2784  ;;  %v2787_v3 = vpop.permute.xlu1 %2786 }
 0xc5e   : > { %8706 = vmatpush3.bf16.xpose.msra.mxu0 %v2815_v39 }
 0xc5f   : > { %9188 = vmatprep.subr.msk.bf16.mxu0 %vm1242_vm1, %v2795_v29  ;;  %v2689_v43 = vpack.c.bf16 %v2684_v8, %v2683_v4 }
 0xc61   : > { %8697 = vmatprep.mubr.msk.bf16.mxu0 %vm1332_vm2, %v2689_v43 }
 0xc62   : > { %8698 = vmatmul.mubr.msk.bf16.gmra.mrb[68].mxu0 %vm1332_vm2, %v2690_v42 }
 0xc63   : > { %8709 = vmatprep.mubr.msk.bf16.mxu0 %vm1242_vm1, %v2781_v41 }
 0xc66   : > { %8708 = vmatpush3.bf16.xpose.msra.mxu0 %v2818_v26 }
 0xc6d   : > { %8710 = vmatmul.mubr.msk.bf16.vlgmr.msra.gmra.mrb[72].mxu0 %vm1242_vm1, %v2783_v33 }
 0xc6e   : > { %8713 = vmatprep.mubr.msk.bf16.mxu0 %vm1242_vm1, %v2785_v45 }
 0xc75   : > { %8714 = vmatmul.mubr.msk.bf16.gmra.mrb[76].mxu0 %vm1242_vm1, %v2787_v3 }
 0xcfc   : > { %v11514_v14 = vpop.f32.mrb[64].mxu0 }
 0xcfd   : > { %13930 = vst [vmem:[#allocation17_spill] sm:$0xff] %v11514_v14  ;;  %v11516_v34 = vpop.f32.mrb[65].mxu0 }
 0xcfe   : > { %13931 = vst [vmem:[#allocation18_spill] sm:$0xff] %v11516_v34  ;;  %v11518_v2 = vpop.f32.mrb[66].mxu0 }
 0xcff   : > { %13932 = vst [vmem:[#allocation19_spill] sm:$0xff] %v11518_v2  ;;  %v11520_v31 = vpop.f32.mrb[67].mxu0 }
 0xd00   : > { %13933 = vst [vmem:[#allocation20_spill] sm:$0xff] %v11520_v31 }
 0xd35   : > { %v11522_v9 = vpop.f32.mrb[68].mxu0 }
 0xd36   : > { %13934 = vst [vmem:[#allocation21_spill] sm:$0xff] %v11522_v9  ;;  %v11524_v60 = vpop.f32.mrb[69].mxu0 }
 0xd37   : > { %13935 = vst [vmem:[#allocation22_spill] sm:$0xff] %v11524_v60  ;;  %v11526_v44 = vpop.f32.mrb[70].mxu0 }
 0xd38   : > { %13936 = vst [vmem:[#allocation23_spill] sm:$0xff] %v11526_v44  ;;  %v11528_v20 = vpop.f32.mrb[71].mxu0 }
 0xd39   : > { %13937 = vst [vmem:[#allocation24_spill] sm:$0xff] %v11528_v20 }
 0xd40   : > { %v8711_v62 = vpop.f32.mrb[72].mxu0 }
 0xd41   : > { %v2854_v6 = vpop.f32.mrb[73].mxu0  ;;  %v2891_v30 = vsel %vm1332_vm2, %v8711_v62, -inf }
 0xd42   : > { %2892 = vmax.xlane.f32.xlu0 %v2891_v30  ;;  %v8712_v40 = vpop.f32.mrb[74].mxu0  ;;  %v2885_v8 = vsel %vm1332_vm2, %v2854_v6, -inf }
 0xd43   : > { %v2857_v39 = vpop.f32.mrb[75].mxu0  ;;  %v2894_v43 = vsel %vm1332_vm2, %v8712_v40, -inf }
 0xd44   : > { %v2888_v4 = vsel %vm1332_vm2, %v2857_v39, -inf }
 0xd45   : > { %2889 = vmax.xlane.f32.xlu1 %v2888_v4 }
 0xd46   : > { %2886 = vmax.xlane.f32.xlu0 %v2885_v8 }
 0xd48   : > { %v8715_v29 = vpop.f32.mrb[76].mxu0 }
 0xd49   : > { %v2870_v37 = vpop.f32.mrb[77].mxu0  ;;  %v2903_v26 = vsel %vm1332_vm2, %v8715_v29, -inf }
 0xd4a   : > { %2895 = vmax.xlane.f32.xlu0 %v2894_v43  ;;  %v11534_v42 = vpop.f32.mrb[78].mxu0  ;;  %v2897_v33 = vsel %vm1332_vm2, %v2870_v37, -inf }
 0xd4b   : > { %v11536_v41 = vpop.f32.mrb[79].mxu0  ;;  %v2906_v45 = vsel %vm1332_vm2, %v11534_v42, -inf }
 0xd4c   : > { %v2900_v3 = vsel %vm1332_vm2, %v11536_v41, -inf }
 0xd4e   : > { %2904 = vmax.xlane.f32.xlu0 %v2903_v26 }
 0xd52   : > { %2898 = vmax.xlane.f32.xlu0 %v2897_v33 }
 0xd56   : > { %2979 = vrot.lane.b32.xlu1 %v10942_v51, %s10313_s16 }
 0xd5a   : > { %2981 = vrot.lane.b32.xlu1 %v10954_v54, %s10313_s16 }
 0xd68   : > { %2977 = vrot.lane.b32.xlu0 %v10944_v32, %s10313_s16 }
 0xd7e   : > { %2907 = vmax.xlane.f32.xlu1 %v2906_v45 }
 0xd82   : > { %2901 = vmax.xlane.f32.xlu1 %v2900_v3 }
 0xd93   : > { %2983 = vrot.lane.b32.xlu1 %v10952_v56, %s10313_s16 }
 0xdcf   : > { %v2893_v30 = vpop.xlane.xlu0 %2892 }
 0xdd0   : > { %v2911_v4 = vsub.f32 %v8711_v62, %v2893_v30 }
 0xdd2   : > { %v2921_v8 = vmul.f32 1.442695, %v2911_v4  ;;  %v2890_v43 = vpop.xlane.xlu1 %2889 }
 0xdd3   : > { %v2887_v26 = vpop.xlane.xlu0 %2886  ;;  %v2910_v9 = vsub.f32 %v2857_v39, %v2890_v43 }
 0xdd4   : > { %9725 = vpow2.f32 %v2921_v8  ;;  %v2909_v33 = vsub.f32 %v2854_v6, %v2887_v26 }
 0xdd5   : > { %v2919_v45 = vmul.f32 1.442695, %v2910_v9 }
 0xdd6   : > { %v2917_v44 = vmul.f32 1.442695, %v2909_v33 }
 0xdd7   : > { %v2896_v14 = vpop.xlane.xlu0 %2895 }
 0xdd8   : > { %9727 = vpow2.f32 %v2917_v44  ;;  %v2912_v2 = vsub.f32 %v8712_v40, %v2896_v14  ;;  %v2980_v14 = vpop.permute.xlu1 %2979 }
 0xdda   : > { %v2923_v60 = vmul.f32 1.442695, %v2912_v2 }
 0xddb   : > { %v2905_v20 = vpop.xlane.xlu0 %2904 }
 0xddc   : > { %9729 = vpow2.f32 %v2923_v60  ;;  %v2915_v3 = vsub.f32 %v8715_v29, %v2905_v20 }
 0xddd   : > { %9731 = vpow2.f32 %v2919_v45 }
 0xdde   : > { %v11552_v34 = vpop.eup %9725  ;;  %v2929_v31 = vmul.f32 1.442695, %v2915_v3 }
 0xddf   : > { %v2899_v62 = vpop.xlane.xlu0 %2898  ;;  %v2939_v30 = vsel %vm1332_vm2, %v11552_v34, 0.0 }
 0xde0   : > { %9733 = vpow2.f32 %v2929_v31  ;;  %v2913_v6 = vsub.f32 %v2870_v37, %v2899_v62  ;;  %2940 = vadd.xlane.f32.xlu0 %v2939_v30  ;;  %v2982_v31 = vpop.permute.xlu1 %2981 }
 0xde2   : > { %v11556_v39 = vpop.eup %9727  ;;  %v2925_v44 = vmul.f32 1.442695, %v2913_v6 }
 0xde3   : > { %v2978_v9 = vpop.permute.xlu0 %2977  ;;  %v2933_v2 = vsel %vm1332_vm2, %v11556_v39, 0.0 }
 0xde4   : > { %9735 = vpow2.f32 %v2925_v44  ;;  %2934 = vadd.xlane.f32.xlu0 %v2933_v2  ;;  %8717 = vmatprep.subr.bf16.mxu1 %v2978_v9 }
 0xde5   : > { %8718 = vmatpush3.bf16.msra.mxu1 %v2978_v9 }
 0xde6   : > { %v9730_v60 = vpop.eup %9729  ;;  %8719 = vmatprep.subr.bf16.mxu1 %v2980_v14 }
 0xde7   : > { %v2942_v20 = vsel %vm1332_vm2, %v9730_v60, 0.0  ;;  %v9732_v40 = vpop.eup %9731 }
 0xde8   : > { %2943 = vadd.xlane.f32.xlu1 %v2942_v20  ;;  %v2936_v4 = vsel %vm1332_vm2, %v9732_v40, 0.0 }
 0xde9   : > { %8720 = vmatpush3.bf16.msra.mxu1 %v2980_v14 }
 0xdea   : > { %v11561_v29 = vpop.eup %9733  ;;  %8721 = vmatprep.subr.bf16.mxu1 %v2982_v31 }
 0xdeb   : > { %v2951_v37 = vsel %vm1332_vm2, %v11561_v29, 0.0 }
 0xdec   : > { %2952 = vadd.xlane.f32.xlu0 %v2951_v37  ;;  %2937 = vadd.xlane.f32.xlu1 %v2936_v4 }
 0xded   : > { %8722 = vmatpush3.bf16.msra.mxu1 %v2982_v31 }
 0xdee   : > { %v11566_v8 = vpop.eup %9735 }
 0xdef   : > { %v2945_v43 = vsel %vm1332_vm2, %v11566_v8, 0.0 }
 0xdf0   : > { %2946 = vadd.xlane.f32.xlu0 %v2945_v43 }
 0xdfd   : > { %3076 = vrot.lane.b32.xlu1 %v10942_v51, %s10314_s17 }
 0xe01   : > { %3078 = vrot.lane.b32.xlu1 %v10954_v54, %s10314_s17 }
 0xe0b   : > { %v2908_v26 = vpop.xlane.xlu1 %2907 }
 0xe0c   : > { %v2916_v33 = vsub.f32 %v11534_v42, %v2908_v26 }
 0xe0e   : > { %v2931_v45 = vmul.f32 1.442695, %v2916_v33 }
 0xe0f   : > { %v2902_v3 = vpop.xlane.xlu1 %2901 }
 0xe10   : > { %9737 = vpow2.f32 %v2931_v45  ;;  %v2914_v62 = vsub.f32 %v11536_v41, %v2902_v3 }
 0xe12   : > { %v2927_v30 = vmul.f32 1.442695, %v2914_v62 }
 0xe13   : > { %v2984_v6 = vpop.permute.xlu1 %2983 }
 0xe14   : > { %8723 = vmatprep.subr.bf16.mxu1 %v2984_v6  ;;  %9739 = vpow2.f32 %v2927_v30 }
 0xe15   : > { %8724 = vmatpush3.bf16.msra.mxu1 %v2984_v6 }
 0xe1a   : > { %v9738_v44 = vpop.eup %9737 }
 0xe1b   : > { %v2954_v14 = vsel %vm1332_vm2, %v9738_v44, 0.0 }
 0xe1c   : > { %2955 = vadd.xlane.f32.xlu0 %v2954_v14 }
 0xe1e   : > { %v9740_v9 = vpop.eup %9739 }
 0xe1f   : > { %v2948_v2 = vsel %vm1332_vm2, %v9740_v9, 0.0 }
 0xe25   : > { %2949 = vadd.xlane.f32.xlu1 %v2948_v2 }
 0xe32   : > { %3074 = vrot.lane.b32.xlu0 %v10944_v32, %s10314_s17 }
 0xe36   : > { %3066 = vrot.lane.b32.xlu0 %v10944_v32, %s10315_s18  ;;  %3080 = vrot.lane.b32.xlu1 %v10952_v56, %s10314_s17 }
 0xe3a   : > { %3070 = vrot.lane.b32.xlu0 %v10954_v54, %s10315_s18  ;;  %3068 = vrot.lane.b32.xlu1 %v10942_v51, %s10315_s18 }
 0xe3e   : > { %3072 = vrot.lane.b32.xlu1 %v10952_v56, %s10315_s18 }
 0xe6d   : > { %v2941_v42 = vpop.xlane.xlu0 %2940 }
 0xe71   : > { %v2935_v20 = vpop.xlane.xlu0 %2934 }
 0xe75   : > { %v2944_v41 = vpop.xlane.xlu1 %2943 }
 0xe76   : > { %9741 = vrcp.f32 %v2944_v41 }
 0xe77   : > { %9743 = vrcp.f32 %v2935_v20 }
 0xe78   : > { %9745 = vrcp.f32 %v2941_v42 }
 0xe79   : > { %v2938_v31 = vpop.xlane.xlu1 %2937  ;;  %v2953_v14 = vpop.xlane.xlu0 %2952 }
 0xe7a   : > { %9747 = vrcp.f32 %v2938_v31 }
 0xe7d   : > { %v2947_v2 = vpop.xlane.xlu0 %2946  ;;  %v3077_v42 = vpop.permute.xlu1 %3076 }
 0xe80   : > { %v9742_v37 = vpop.eup %9741 }
 0xe81   : > { %v9744_v4 = vpop.eup %9743  ;;  %v2968_v33 = vmul.f32 %v9742_v37, %v9730_v60  ;;  %v3079_v31 = vpop.permute.xlu1 %3078 }
 0xe82   : > { %v9746_v43 = vpop.eup %9745  ;;  %v2965_v45 = vmul.f32 %v9744_v4, %v11556_v39  ;;  %v3098_v39 = vsel %vm1242_vm1, %v3077_v42, 0 }
 0xe83   : > { %v2967_v62 = vmul.f32 %v9746_v43, %v11552_v34 }
 0xe84   : > { %v9748_v26 = vpop.eup %9747 }
 0xe85   : > { %v2966_v3 = vmul.f32 %v9748_v26, %v9732_v40  ;;  %v2974_v6 = vpack.c.bf16 %v2968_v33, %v2967_v62  ;;  %v3101_v33 = vsel %vm1242_vm1, %v3079_v31, 0 }
 0xe87   : > { %v2973_v30 = vpack.c.bf16 %v2966_v3, %v2965_v45 }
 0xe89   : > { %8725 = vmatprep.mubr.msk.bf16.mxu1 %vm1332_vm2, %v2973_v30 }
 0xe8a   : > { %8726 = vmatmul.mubr.msk.bf16.vlgmr.msra.gmra.mrb[40].mxu1 %vm1332_vm2, %v2974_v6 }
 0xea9   : > { %v2956_v41 = vpop.xlane.xlu0 %2955 }
 0xeaa   : > { %9749 = vrcp.f32 %v2956_v41 }
 0xeab   : > { %9751 = vrcp.f32 %v2947_v2 }
 0xeac   : > { %9753 = vrcp.f32 %v2953_v14 }
 0xead   : > { %v3075_v20 = vpop.permute.xlu0 %3074 }
 0xeae   : > { %9189 = vmatprep.subr.msk.bf16.mxu1 %vm1242_vm1, %v3075_v20  ;;  %v3095_v60 = vsel %vm1242_vm1, %v3075_v20, 0 }
 0xeaf   : > { %8734 = vmatpush3.bf16.xpose.msra.mxu1 %v3095_v60 }
 0xeb0   : > { %9190 = vmatprep.subr.msk.bf16.mxu1 %vm1242_vm1, %v3077_v42 }
 0xeb1   : > { %v3067_v2 = vpop.permute.xlu0 %3066 }
 0xeb2   : > { %v2950_v34 = vpop.xlane.xlu1 %2949 }
 0xeb3   : > { %9755 = vrcp.f32 %v2950_v34 }
 0xeb4   : > { %v9750_v40 = vpop.eup %9749 }
 0xeb5   : > { %v9752_v37 = vpop.eup %9751  ;;  %v2972_v26 = vmul.f32 %v9750_v40, %v9738_v44 }
 0xeb6   : > { %v9754_v4 = vpop.eup %9753  ;;  %v2969_v45 = vmul.f32 %v9752_v37, %v11566_v8  ;;  %v3081_v62 = vpop.permute.xlu1 %3080 }
 0xeb7   : > { %8736 = vmatpush3.bf16.xpose.msra.mxu1 %v3098_v39  ;;  %v2971_v30 = vmul.f32 %v9754_v4, %v11561_v29  ;;  %v3104_v44 = vsel %vm1242_vm1, %v3081_v62, 0 }
 0xeb8   : > { %9191 = vmatprep.subr.msk.bf16.mxu1 %vm1242_vm1, %v3079_v31 }
 0xeb9   : > { %v2976_v14 = vpack.c.bf16 %v2972_v26, %v2971_v30 }
 0xeba   : > { %v3069_v8 = vpop.permute.xlu1 %3068 }
 0xebd   : > { %v9756_v43 = vpop.eup %9755 }
 0xebe   : > { %v2970_v3 = vmul.f32 %v9756_v43, %v9740_v9  ;;  %v3071_v9 = vpop.permute.xlu0 %3070  ;;  %v3073_v29 = vpop.permute.xlu1 %3072 }
 0xebf   : > { %8738 = vmatpush3.bf16.xpose.msra.mxu1 %v3101_v33 }
 0xec0   : > { %9192 = vmatprep.subr.msk.bf16.mxu1 %vm1242_vm1, %v3081_v62  ;;  %v2975_v6 = vpack.c.bf16 %v2970_v3, %v2969_v45 }
 0xec2   : > { %8729 = vmatprep.mubr.msk.bf16.mxu1 %vm1332_vm2, %v2975_v6 }
 0xec3   : > { %8730 = vmatmul.mubr.msk.bf16.gmra.mrb[44].mxu1 %vm1332_vm2, %v2976_v14 }
 0xec4   : > { %8741 = vmatprep.mubr.msk.bf16.mxu1 %vm1242_vm1, %v3067_v2 }
 0xec7   : > { %8740 = vmatpush3.bf16.xpose.msra.mxu1 %v3104_v44 }
 0xece   : > { %8742 = vmatmul.mubr.msk.bf16.vlgmr.msra.gmra.mrb[48].mxu1 %vm1242_vm1, %v3069_v8 }
 0xecf   : > { %8745 = vmatprep.mubr.msk.bf16.mxu1 %vm1242_vm1, %v3071_v9 }
 0xed6   : > { %8746 = vmatmul.mubr.msk.bf16.gmra.mrb[52].mxu1 %vm1242_vm1, %v3073_v29 }
 0xf5d   : > { %v11610_v42 = vpop.f32.mrb[40].mxu1 }
 0xf5e   : > { %13938 = vst [vmem:[#allocation25_spill] sm:$0xff] %v11610_v42  ;;  %v11612_v41 = vpop.f32.mrb[41].mxu1 }
 0xf5f   : > { %v11614_v20 = vpop.f32.mrb[42].mxu1 }
 0xf60   : > { %13939 = vst [vmem:[#allocation26_spill] sm:$0xff] %v11614_v20  ;;  %v11618_v60 = vpop.f32.mrb[43].mxu1 }
 0xf96   : > { %v11622_v39 = vpop.f32.mrb[44].mxu1 }
 0xf97   : > { %13940 = vst [vmem:[#allocation27_spill] sm:$0xff] %v11622_v39  ;;  %v11624_v40 = vpop.f32.mrb[45].mxu1 }
 0xf98   : > { %v11626_v37 = vpop.f32.mrb[46].mxu1 }
 0xf99   : > { %13941 = vst [vmem:[#allocation28_spill] sm:$0xff] %v11626_v37  ;;  %v11630_v43 = vpop.f32.mrb[47].mxu1 }
 0xfa1   : > { %v8743_v33 = vpop.f32.mrb[48].mxu1 }
 0xfa2   : > { %v3140_v45 = vpop.f32.mrb[49].mxu1  ;;  %v3177_v3 = vsel %vm1332_vm2, %v8743_v33, -inf }
 0xfa3   : > { %3178 = vmax.xlane.f32.xlu0 %v3177_v3  ;;  %v8744_v62 = vpop.f32.mrb[50].mxu1  ;;  %v3171_v14 = vsel %vm1332_vm2, %v3140_v45, -inf }
 0xfa4   : > { %v3143_v30 = vpop.f32.mrb[51].mxu1  ;;  %v3180_v8 = vsel %vm1332_vm2, %v8744_v62, -inf }
 0xfa5   : > { %v3174_v6 = vsel %vm1332_vm2, %v3143_v30, -inf }
 0xfa6   : > { %3175 = vmax.xlane.f32.xlu1 %v3174_v6 }
 0xfa7   : > { %3172 = vmax.xlane.f32.xlu0 %v3171_v14 }
 0xfa9   : > { %v8747_v2 = vpop.f32.mrb[52].mxu1 }
 0xfaa   : > { %v3156_v44 = vpop.f32.mrb[53].mxu1  ;;  %v3189_v4 = vsel %vm1332_vm2, %v8747_v2, -inf }
 0xfab   : > { %3181 = vmax.xlane.f32.xlu0 %v3180_v8  ;;  %v11638_v9 = vpop.f32.mrb[54].mxu1  ;;  %v3183_v3 = vsel %vm1332_vm2, %v3156_v44, -inf }
 0xfac   : > { %v11640_v29 = vpop.f32.mrb[55].mxu1  ;;  %v3192_v6 = vsel %vm1332_vm2, %v11638_v9, -inf }
 0xfad   : > { %v3186_v14 = vsel %vm1332_vm2, %v11640_v29, -inf }
 0xfaf   : > { %3190 = vmax.xlane.f32.xlu0 %v3189_v4 }
 0xfb3   : > { %3184 = vmax.xlane.f32.xlu0 %v3183_v3 }
 0xfb7   : > { %3265 = vrot.lane.b32.xlu1 %v10942_v51, %s10316_s19 }
 0xfbb   : > { %3267 = vrot.lane.b32.xlu1 %v10954_v54, %s10316_s19 }
 0xfc9   : > { %3263 = vrot.lane.b32.xlu0 %v10944_v32, %s10316_s19 }
 0xfdf   : > { %3193 = vmax.xlane.f32.xlu1 %v3192_v6 }
 0xfe3   : > { %3187 = vmax.xlane.f32.xlu1 %v3186_v14 }
 0xff4   : > { %3269 = vrot.lane.b32.xlu1 %v10952_v56, %s10316_s19 }
0x1030   : > { %v3179_v4 = vpop.xlane.xlu0 %3178 }
0x1031   : > { %v3197_v8 = vsub.f32 %v8743_v33, %v3179_v4 }
0x1033   : > { %v3207_v3 = vmul.f32 1.442695, %v3197_v8  ;;  %v3176_v31 = vpop.xlane.xlu1 %3175 }
0x1034   : > { %v3173_v26 = vpop.xlane.xlu0 %3172  ;;  %v3196_v57 = vsub.f32 %v3143_v30, %v3176_v31 }
0x1035   : > { %9757 = vpow2.f32 %v3207_v3  ;;  %v3195_v34 = vsub.f32 %v3140_v45, %v3173_v26 }
0x1036   : > { %v3205_v6 = vmul.f32 1.442695, %v3196_v57 }
0x1037   : > { %v3203_v15 = vmul.f32 1.442695, %v3195_v34 }
0x1038   : > { %v3182_v10 = vpop.xlane.xlu0 %3181 }
0x1039   : > { %9759 = vpow2.f32 %v3203_v15  ;;  %v3198_v36 = vsub.f32 %v8744_v62, %v3182_v10  ;;  %v3266_v10 = vpop.permute.xlu1 %3265 }
0x103b   : > { %v3209_v39 = vmul.f32 1.442695, %v3198_v36 }
0x103c   : > { %v3191_v37 = vpop.xlane.xlu0 %3190 }
0x103d   : > { %9761 = vpow2.f32 %v3209_v39  ;;  %v3201_v14 = vsub.f32 %v8747_v2, %v3191_v37 }
0x103e   : > { %9763 = vpow2.f32 %v3205_v6 }
0x103f   : > { %v11656_v42 = vpop.eup %9757  ;;  %v3215_v20 = vmul.f32 1.442695, %v3201_v14 }
0x1040   : > { %v3185_v33 = vpop.xlane.xlu0 %3184  ;;  %v3225_v4 = vsel %vm1332_vm2, %v11656_v42, 0.0 }
0x1041   : > { %9765 = vpow2.f32 %v3215_v20  ;;  %v3199_v26 = vsub.f32 %v3156_v44, %v3185_v33  ;;  %3226 = vadd.xlane.f32.xlu0 %v3225_v4  ;;  %v3268_v20 = vpop.permute.xlu1 %3267 }
0x1043   : > { %v11660_v31 = vpop.eup %9759  ;;  %v3211_v15 = vmul.f32 1.442695, %v3199_v26 }
0x1044   : > { %v3264_v57 = vpop.permute.xlu0 %3263  ;;  %v3219_v36 = vsel %vm1332_vm2, %v11660_v31, 0.0 }
0x1045   : > { %9767 = vpow2.f32 %v3211_v15  ;;  %3220 = vadd.xlane.f32.xlu0 %v3219_v36  ;;  %8749 = vmatprep.subr.bf16.mxu0 %v3264_v57 }
0x1046   : > { %8750 = vmatpush3.bf16.msra.mxu0 %v3264_v57 }
0x1047   : > { %v9762_v34 = vpop.eup %9761  ;;  %8751 = vmatprep.subr.bf16.mxu0 %v3266_v10 }
0x1048   : > { %v3228_v39 = vsel %vm1332_vm2, %v9762_v34, 0.0  ;;  %v9764_v37 = vpop.eup %9763 }
0x1049   : > { %3229 = vadd.xlane.f32.xlu1 %v3228_v39  ;;  %v3222_v30 = vsel %vm1332_vm2, %v9764_v37, 0.0 }
0x104a   : > { %8752 = vmatpush3.bf16.msra.mxu0 %v3266_v10 }
0x104b   : > { %v11665_v45 = vpop.eup %9765  ;;  %8753 = vmatprep.subr.bf16.mxu0 %v3268_v20 }
0x104c   : > { %v3237_v62 = vsel %vm1332_vm2, %v11665_v45, 0.0 }
0x104d   : > { %3238 = vadd.xlane.f32.xlu0 %v3237_v62  ;;  %3223 = vadd.xlane.f32.xlu1 %v3222_v30 }
0x104e   : > { %8754 = vmatpush3.bf16.msra.mxu0 %v3268_v20 }
0x104f   : > { %v11670_v2 = vpop.eup %9767 }
0x1050   : > { %v3231_v44 = vsel %vm1332_vm2, %v11670_v2, 0.0 }
0x1051   : > { %3232 = vadd.xlane.f32.xlu0 %v3231_v44 }
0x105e   : > { %3362 = vrot.lane.b32.xlu1 %v10942_v51, %s10317_s20 }
0x1062   : > { %3364 = vrot.lane.b32.xlu1 %v10954_v54, %s10317_s20 }
0x106c   : > { %v3194_v8 = vpop.xlane.xlu1 %3193 }
0x106d   : > { %v3202_v3 = vsub.f32 %v11638_v9, %v3194_v8 }
0x106f   : > { %v3217_v6 = vmul.f32 1.442695, %v3202_v3 }
0x1070   : > { %v3188_v14 = vpop.xlane.xlu1 %3187 }
0x1071   : > { %9769 = vpow2.f32 %v3217_v6  ;;  %v3200_v33 = vsub.f32 %v11640_v29, %v3188_v14 }
0x1073   : > { %v3213_v4 = vmul.f32 1.442695, %v3200_v33 }
0x1074   : > { %v3270_v26 = vpop.permute.xlu1 %3269 }
0x1075   : > { %8755 = vmatprep.subr.bf16.mxu0 %v3270_v26  ;;  %9771 = vpow2.f32 %v3213_v4 }
0x1076   : > { %8756 = vmatpush3.bf16.msra.mxu0 %v3270_v26 }
0x107b   : > { %v9770_v15 = vpop.eup %9769 }
0x107c   : > { %v3240_v10 = vsel %vm1332_vm2, %v9770_v15, 0.0 }
0x107d   : > { %3241 = vadd.xlane.f32.xlu0 %v3240_v10 }
0x107f   : > { %v9772_v57 = vpop.eup %9771 }
0x1080   : > { %v3234_v36 = vsel %vm1332_vm2, %v9772_v57, 0.0 }
0x1086   : > { %3235 = vadd.xlane.f32.xlu1 %v3234_v36 }
0x1093   : > { %3360 = vrot.lane.b32.xlu0 %v10944_v32, %s10317_s20 }
0x1097   : > { %3352 = vrot.lane.b32.xlu0 %v10944_v32, %s10318_s21  ;;  %3366 = vrot.lane.b32.xlu1 %v10952_v56, %s10317_s20 }
0x109b   : > { %3356 = vrot.lane.b32.xlu0 %v10954_v54, %s10318_s21  ;;  %3354 = vrot.lane.b32.xlu1 %v10942_v51, %s10318_s21 }
0x109f   : > { %3358 = vrot.lane.b32.xlu1 %v10952_v56, %s10318_s21 }
0x10ce   : > { %v3227_v9 = vpop.xlane.xlu0 %3226 }
0x10d2   : > { %v3221_v39 = vpop.xlane.xlu0 %3220 }
0x10d6   : > { %v3230_v29 = vpop.xlane.xlu1 %3229 }
0x10d7   : > { %9773 = vrcp.f32 %v3230_v29 }
0x10d8   : > { %9775 = vrcp.f32 %v3221_v39 }
0x10d9   : > { %9777 = vrcp.f32 %v3227_v9 }
0x10da   : > { %v3224_v20 = vpop.xlane.xlu1 %3223  ;;  %v3239_v10 = vpop.xlane.xlu0 %3238 }
0x10db   : > { %9779 = vrcp.f32 %v3224_v20 }
0x10de   : > { %v3233_v36 = vpop.xlane.xlu0 %3232  ;;  %v3363_v9 = vpop.permute.xlu1 %3362 }
0x10e1   : > { %v9774_v62 = vpop.eup %9773 }
0x10e2   : > { %v9776_v30 = vpop.eup %9775  ;;  %v3254_v3 = vmul.f32 %v9774_v62, %v9762_v34  ;;  %v3365_v20 = vpop.permute.xlu1 %3364 }
0x10e3   : > { %v9778_v44 = vpop.eup %9777  ;;  %v3251_v6 = vmul.f32 %v9776_v30, %v11660_v31  ;;  %v3384_v31 = vsel %vm1242_vm1, %v3363_v9, 0 }
0x10e4   : > { %v3253_v33 = vmul.f32 %v9778_v44, %v11656_v42 }
0x10e5   : > { %v9780_v8 = vpop.eup %9779 }
0x10e6   : > { %v3252_v14 = vmul.f32 %v9780_v8, %v9764_v37  ;;  %v3260_v26 = vpack.c.bf16 %v3254_v3, %v3253_v33  ;;  %v3387_v3 = vsel %vm1242_vm1, %v3365_v20, 0 }
0x10e8   : > { %v3259_v4 = vpack.c.bf16 %v3252_v14, %v3251_v6 }
0x10ea   : > { %8757 = vmatprep.mubr.msk.bf16.mxu0 %vm1332_vm2, %v3259_v4 }
0x10eb   : > { %8758 = vmatmul.mubr.msk.bf16.vlgmr.msra.gmra.mrb[80].mxu0 %vm1332_vm2, %v3260_v26 }
0x110a   : > { %v3242_v29 = vpop.xlane.xlu0 %3241 }
0x110b   : > { %9781 = vrcp.f32 %v3242_v29 }
0x110c   : > { %9783 = vrcp.f32 %v3233_v36 }
0x110d   : > { %9785 = vrcp.f32 %v3239_v10 }
0x110e   : > { %v3361_v39 = vpop.permute.xlu0 %3360 }
0x110f   : > { %9193 = vmatprep.subr.msk.bf16.mxu0 %vm1242_vm1, %v3361_v39  ;;  %v3381_v34 = vsel %vm1242_vm1, %v3361_v39, 0 }
0x1110   : > { %8766 = vmatpush3.bf16.xpose.msra.mxu0 %v3381_v34 }
0x1111   : > { %9194 = vmatprep.subr.msk.bf16.mxu0 %vm1242_vm1, %v3363_v9 }
0x1112   : > { %v3353_v36 = vpop.permute.xlu0 %3352 }
0x1113   : > { %v3236_v42 = vpop.xlane.xlu1 %3235 }
0x1114   : > { %9787 = vrcp.f32 %v3236_v42 }
0x1115   : > { %v9782_v37 = vpop.eup %9781 }
0x1116   : > { %v9784_v62 = vpop.eup %9783  ;;  %v3258_v8 = vmul.f32 %v9782_v37, %v9770_v15 }
0x1117   : > { %v9786_v30 = vpop.eup %9785  ;;  %v3255_v6 = vmul.f32 %v9784_v62, %v11670_v2  ;;  %v3367_v33 = vpop.permute.xlu1 %3366 }
0x1118   : > { %8768 = vmatpush3.bf16.xpose.msra.mxu0 %v3384_v31  ;;  %v3257_v4 = vmul.f32 %v9786_v30, %v11665_v45  ;;  %v3390_v15 = vsel %vm1242_vm1, %v3367_v33, 0 }
0x1119   : > { %9195 = vmatprep.subr.msk.bf16.mxu0 %vm1242_vm1, %v3365_v20 }
0x111a   : > { %v3262_v10 = vpack.c.bf16 %v3258_v8, %v3257_v4 }
0x111b   : > { %v3355_v2 = vpop.permute.xlu1 %3354 }
0x111e   : > { %v9788_v44 = vpop.eup %9787 }
0x111f   : > { %v3256_v14 = vmul.f32 %v9788_v44, %v9772_v57  ;;  %v3357_v57 = vpop.permute.xlu0 %3356  ;;  %v3359_v45 = vpop.permute.xlu1 %3358 }
0x1120   : > { %8770 = vmatpush3.bf16.xpose.msra.mxu0 %v3387_v3 }
0x1121   : > { %9196 = vmatprep.subr.msk.bf16.mxu0 %vm1242_vm1, %v3367_v33  ;;  %v3261_v26 = vpack.c.bf16 %v3256_v14, %v3255_v6 }
0x1123   : > { %8761 = vmatprep.mubr.msk.bf16.mxu0 %vm1332_vm2, %v3261_v26 }
0x1124   : > { %8762 = vmatmul.mubr.msk.bf16.gmra.mrb[84].mxu0 %vm1332_vm2, %v3262_v10 }
0x1125   : > { %8773 = vmatprep.mubr.msk.bf16.mxu0 %vm1242_vm1, %v3353_v36 }
0x1128   : > { %8772 = vmatpush3.bf16.xpose.msra.mxu0 %v3390_v15 }
0x112f   : > { %8774 = vmatmul.mubr.msk.bf16.vlgmr.msra.gmra.mrb[88].mxu0 %vm1242_vm1, %v3355_v2 }
0x1130   : > { %8777 = vmatprep.mubr.msk.bf16.mxu0 %vm1242_vm1, %v3357_v57 }
0x1137   : > { %8778 = vmatmul.mubr.msk.bf16.gmra.mrb[92].mxu0 %vm1242_vm1, %v3359_v45 }
0x11be   : > { %v11714_v9 = vpop.f32.mrb[80].mxu0 }
0x11bf   : > { %13942 = vst [vmem:[#allocation29_spill] sm:$0xff] %v11714_v9  ;;  %v11716_v29 = vpop.f32.mrb[81].mxu0 }
0x11c0   : > { %v11718_v39 = vpop.f32.mrb[82].mxu0 }
0x11c1   : > { %13943 = vst [vmem:[#allocation30_spill] sm:$0xff] %v11718_v39  ;;  %v11722_v34 = vpop.f32.mrb[83].mxu0 }
0x11f7   : > { %v11726_v31 = vpop.f32.mrb[84].mxu0 }
0x11f8   : > { %13944 = vst [vmem:[#allocation31_spill] sm:$0xff] %v11726_v31  ;;  %v11728_v37 = vpop.f32.mrb[85].mxu0 }
0x11f9   : > { %v11730_v62 = vpop.f32.mrb[86].mxu0 }
0x11fa   : > { %13945 = vst [vmem:[#allocation32_spill] sm:$0xff] %v11730_v62  ;;  %v11734_v44 = vpop.f32.mrb[87].mxu0 }
0x1202   : > { %v8775_v3 = vpop.f32.mrb[88].mxu0 }
0x1203   : > { %v3426_v6 = vpop.f32.mrb[89].mxu0  ;;  %v3463_v14 = vsel %vm1332_vm2, %v8775_v3, -inf }
0x1204   : > { %3464 = vmax.xlane.f32.xlu0 %v3463_v14  ;;  %v8776_v33 = vpop.f32.mrb[90].mxu0  ;;  %v3457_v10 = vsel %vm1332_vm2, %v3426_v6, -inf }
0x1205   : > { %v3429_v4 = vpop.f32.mrb[91].mxu0  ;;  %v3466_v2 = vsel %vm1332_vm2, %v8776_v33, -inf }
0x1206   : > { %v3460_v26 = vsel %vm1332_vm2, %v3429_v4, -inf }
0x1207   : > { %3461 = vmax.xlane.f32.xlu1 %v3460_v26 }
0x1208   : > { %3458 = vmax.xlane.f32.xlu0 %v3457_v10 }
0x120a   : > { %v8779_v36 = vpop.f32.mrb[92].mxu0 }
0x120b   : > { %v3442_v15 = vpop.f32.mrb[93].mxu0  ;;  %v3475_v30 = vsel %vm1332_vm2, %v8779_v36, -inf }
0x120c   : > { %3467 = vmax.xlane.f32.xlu0 %v3466_v2  ;;  %v11742_v57 = vpop.f32.mrb[94].mxu0  ;;  %v3469_v14 = vsel %vm1332_vm2, %v3442_v15, -inf }
0x120d   : > { %v11744_v45 = vpop.f32.mrb[95].mxu0  ;;  %v3478_v26 = vsel %vm1332_vm2, %v11742_v57, -inf }
0x120e   : > { %v3472_v10 = vsel %vm1332_vm2, %v11744_v45, -inf }
0x1210   : > { %3476 = vmax.xlane.f32.xlu0 %v3475_v30 }
0x1214   : > { %3470 = vmax.xlane.f32.xlu0 %v3469_v14 }
0x1218   : > { %3551 = vrot.lane.b32.xlu1 %v10942_v51, %s10319_s22 }
0x121c   : > { %3553 = vrot.lane.b32.xlu1 %v10954_v54, %s10319_s22 }
0x122a   : > { %3549 = vrot.lane.b32.xlu0 %v10944_v32, %s10319_s22 }
0x1240   : > { %3479 = vmax.xlane.f32.xlu1 %v3478_v26 }
0x1244   : > { %3473 = vmax.xlane.f32.xlu1 %v3472_v10 }
0x1255   : > { %3555 = vrot.lane.b32.xlu1 %v10952_v56, %s10319_s22 }
0x1291   : > { %v3465_v30 = vpop.xlane.xlu0 %3464 }
0x1292   : > { %v3483_v2 = vsub.f32 %v8775_v3, %v3465_v30 }
0x1294   : > { %v3493_v51 = vmul.f32 1.442695, %v3483_v2  ;;  %v3462_v14 = vpop.xlane.xlu1 %3461 }
0x1295   : > { %v3459_v20 = vpop.xlane.xlu0 %3458  ;;  %v3482_v8 = vsub.f32 %v3429_v4, %v3462_v14 }
0x1296   : > { %9789 = vpow2.f32 %v3493_v51  ;;  %v3481_v54 = vsub.f32 %v3426_v6, %v3459_v20 }
0x1297   : > { %v3491_v26 = vmul.f32 1.442695, %v3482_v8 }
0x1298   : > { %v3489_v32 = vmul.f32 1.442695, %v3481_v54  ;;  %v3552_v2 = vpop.permute.xlu1 %3551 }
0x1299   : > { %v3468_v42 = vpop.xlane.xlu0 %3467 }
0x129a   : > { %9791 = vpow2.f32 %v3489_v32  ;;  %v3484_v31 = vsub.f32 %v8776_v33, %v3468_v42 }
0x129c   : > { %v3495_v62 = vmul.f32 1.442695, %v3484_v31  ;;  %v3554_v33 = vpop.permute.xlu1 %3553 }
0x129d   : > { %v3477_v9 = vpop.xlane.xlu0 %3476 }
0x129e   : > { %9793 = vpow2.f32 %v3495_v62  ;;  %v3487_v10 = vsub.f32 %v8779_v36, %v3477_v9 }
0x129f   : > { %9795 = vpow2.f32 %v3491_v26 }
0x12a0   : > { %v11760_v39 = vpop.eup %9789  ;;  %v3501_v56 = vmul.f32 1.442695, %v3487_v10 }
0x12a1   : > { %v3471_v3 = vpop.xlane.xlu0 %3470  ;;  %v3511_v30 = vsel %vm1332_vm2, %v11760_v39, 0.0 }
0x12a2   : > { %9797 = vpow2.f32 %v3501_v56  ;;  %v3485_v20 = vsub.f32 %v3442_v15, %v3471_v3  ;;  %3512 = vadd.xlane.f32.xlu0 %v3511_v30 }
0x12a4   : > { %v9792_v6 = vpop.eup %9791  ;;  %v3497_v4 = vmul.f32 1.442695, %v3485_v20 }
0x12a5   : > { %v3550_v42 = vpop.permute.xlu0 %3549  ;;  %v3505_v31 = vsel %vm1332_vm2, %v9792_v6, 0.0 }
0x12a6   : > { %9799 = vpow2.f32 %v3497_v4  ;;  %3506 = vadd.xlane.f32.xlu0 %v3505_v31  ;;  %8781 = vmatprep.subr.bf16.mxu1 %v3550_v42 }
0x12a7   : > { %8782 = vmatpush3.bf16.msra.mxu1 %v3550_v42 }
0x12a8   : > { %v9794_v9 = vpop.eup %9793  ;;  %8783 = vmatprep.subr.bf16.mxu1 %v3552_v2 }
0x12a9   : > { %v3514_v62 = vsel %vm1332_vm2, %v9794_v9, 0.0  ;;  %v9796_v8 = vpop.eup %9795 }
0x12aa   : > { %3515 = vadd.xlane.f32.xlu1 %v3514_v62  ;;  %v3508_v51 = vsel %vm1332_vm2, %v9796_v8, 0.0 }
0x12ab   : > { %8784 = vmatpush3.bf16.msra.mxu1 %v3552_v2 }
0x12ac   : > { %v11766_v36 = vpop.eup %9797  ;;  %8785 = vmatprep.subr.bf16.mxu1 %v3554_v33 }
0x12ad   : > { %v3523_v15 = vsel %vm1332_vm2, %v11766_v36, 0.0 }
0x12ae   : > { %3524 = vadd.xlane.f32.xlu0 %v3523_v15  ;;  %3509 = vadd.xlane.f32.xlu1 %v3508_v51 }
0x12af   : > { %8786 = vmatpush3.bf16.msra.mxu1 %v3554_v33 }
0x12b0   : > { %v11771_v14 = vpop.eup %9799 }
0x12b1   : > { %v3517_v54 = vsel %vm1332_vm2, %v11771_v14, 0.0 }
0x12b2   : > { %3518 = vadd.xlane.f32.xlu0 %v3517_v54 }
0x12bf   : > { %3768 = vrot.lane.b32.xlu1 %v10961_v61, %s10309_s26 }
0x12c3   : > { %3770 = vrot.lane.b32.xlu1 %v10974_v49, %s10309_s26 }
0x12cd   : > { %v3480_v32 = vpop.xlane.xlu1 %3479 }
0x12ce   : > { %v3488_v26 = vsub.f32 %v11742_v57, %v3480_v32 }
0x12d0   : > { %v3503_v10 = vmul.f32 1.442695, %v3488_v26 }
0x12d1   : > { %v3474_v56 = vpop.xlane.xlu1 %3473 }
0x12d2   : > { %9801 = vpow2.f32 %v3503_v10  ;;  %v3486_v3 = vsub.f32 %v11744_v45, %v3474_v56 }
0x12d4   : > { %v3499_v30 = vmul.f32 1.442695, %v3486_v3 }
0x12d5   : > { %v3556_v20 = vpop.permute.xlu1 %3555 }
0x12d6   : > { %8787 = vmatprep.subr.bf16.mxu1 %v3556_v20  ;;  %9803 = vpow2.f32 %v3499_v30 }
0x12d7   : > { %8788 = vmatpush3.bf16.msra.mxu1 %v3556_v20 }
0x12dc   : > { %v9802_v4 = vpop.eup %9801 }
0x12dd   : > { %v3526_v2 = vsel %vm1332_vm2, %v9802_v4, 0.0 }
0x12de   : > { %3527 = vadd.xlane.f32.xlu0 %v3526_v2 }
0x12e0   : > { %v9804_v42 = vpop.eup %9803 }
0x12e1   : > { %v3520_v31 = vsel %vm1332_vm2, %v9804_v42, 0.0 }
0x12e7   : > { %3521 = vadd.xlane.f32.xlu1 %v3520_v31 }
0x12f4   : > { %3766 = vrot.lane.b32.xlu0 %v10963_v48, %s10309_s26 }
0x12f8   : > { %3772 = vrot.lane.b32.xlu1 %v10972_v58, %s10309_s26 }
0x132f   : > { %v3513_v57 = vpop.xlane.xlu0 %3512 }
0x1333   : > { %v3507_v62 = vpop.xlane.xlu0 %3506 }
0x1337   : > { %v3516_v45 = vpop.xlane.xlu1 %3515 }
0x1338   : > { %9805 = vrcp.f32 %v3516_v45 }
0x1339   : > { %9807 = vrcp.f32 %v3507_v62 }
0x133a   : > { %9809 = vrcp.f32 %v3513_v57 }
0x133b   : > { %v3510_v33 = vpop.xlane.xlu1 %3509  ;;  %v3525_v2 = vpop.xlane.xlu0 %3524 }
0x133c   : > { %9811 = vrcp.f32 %v3510_v33 }
0x133f   : > { %v3519_v31 = vpop.xlane.xlu0 %3518  ;;  %v3769_v45 = vpop.permute.xlu1 %3768 }
0x1342   : > { %v9806_v15 = vpop.eup %9805 }
0x1343   : > { %v9808_v51 = vpop.eup %9807  ;;  %v3540_v26 = vmul.f32 %v9806_v15, %v9794_v9  ;;  %v3771_v33 = vpop.permute.xlu1 %3770 }
0x1344   : > { %v9810_v54 = vpop.eup %9809  ;;  %v3537_v10 = vmul.f32 %v9808_v51, %v9792_v6  ;;  %v3790_v6 = vsel %vm1242_vm1, %v3769_v45, 0 }
0x1345   : > { %v3539_v3 = vmul.f32 %v9810_v54, %v11760_v39 }
0x1346   : > { %v9812_v32 = vpop.eup %9811 }
0x1347   : > { %v3538_v56 = vmul.f32 %v9812_v32, %v9796_v8  ;;  %v3546_v20 = vpack.c.bf16 %v3540_v26, %v3539_v3  ;;  %v3793_v26 = vsel %vm1242_vm1, %v3771_v33, 0 }
0x1349   : > { %v3545_v30 = vpack.c.bf16 %v3538_v56, %v3537_v10 }
0x134b   : > { %8789 = vmatprep.mubr.msk.bf16.mxu1 %vm1332_vm2, %v3545_v30 }
0x134c   : > { %8790 = vmatmul.mubr.msk.bf16.vlgmr.msra.gmra.mrb[56].mxu1 %vm1332_vm2, %v3546_v20 }
0x136b   : > { %v3528_v57 = vpop.xlane.xlu0 %3527 }
0x136c   : > { %9813 = vrcp.f32 %v3528_v57 }
0x136d   : > { %9815 = vrcp.f32 %v3519_v31 }
0x136e   : > { %9817 = vrcp.f32 %v3525_v2 }
0x136f   : > { %v3767_v62 = vpop.permute.xlu0 %3766 }
0x1370   : > { %9197 = vmatprep.subr.msk.bf16.mxu1 %vm1242_vm1, %v3767_v62  ;;  %v3787_v9 = vsel %vm1242_vm1, %v3767_v62, 0 }
0x1371   : > { %8798 = vmatpush3.bf16.xpose.msra.mxu1 %v3787_v9 }
0x1372   : > { %9198 = vmatprep.subr.msk.bf16.mxu1 %vm1242_vm1, %v3769_v45 }
0x1374   : > { %v3522_v39 = vpop.xlane.xlu1 %3521 }
0x1375   : > { %9819 = vrcp.f32 %v3522_v39 }
0x1376   : > { %v9814_v8 = vpop.eup %9813 }
0x1377   : > { %v9816_v15 = vpop.eup %9815  ;;  %v3544_v32 = vmul.f32 %v9814_v8, %v9802_v4 }
0x1378   : > { %v9818_v51 = vpop.eup %9817  ;;  %v3541_v10 = vmul.f32 %v9816_v15, %v11771_v14  ;;  %v3773_v3 = vpop.permute.xlu1 %3772 }
0x1379   : > { %8800 = vmatpush3.bf16.xpose.msra.mxu1 %v3790_v6  ;;  %v3543_v30 = vmul.f32 %v9818_v51, %v11766_v36  ;;  %v3796_v4 = vsel %vm1242_vm1, %v3773_v3, 0 }
0x137a   : > { %9199 = vmatprep.subr.msk.bf16.mxu1 %vm1242_vm1, %v3771_v33 }
0x137b   : > { %v3548_v2 = vpack.c.bf16 %v3544_v32, %v3543_v30 }
0x137f   : > { %v9820_v54 = vpop.eup %9819 }
0x1380   : > { %v3542_v56 = vmul.f32 %v9820_v54, %v9804_v42 }
0x1381   : > { %8802 = vmatpush3.bf16.xpose.msra.mxu1 %v3793_v26 }
0x1382   : > { %9200 = vmatprep.subr.msk.bf16.mxu1 %vm1242_vm1, %v3773_v3  ;;  %v3547_v20 = vpack.c.bf16 %v3542_v56, %v3541_v10 }
0x1384   : > { %8793 = vmatprep.mubr.msk.bf16.mxu1 %vm1332_vm2, %v3547_v20 }
0x1385   : > { %8794 = vmatmul.mubr.msk.bf16.gmra.mrb[60].mxu1 %vm1332_vm2, %v3548_v2 }
0x1386   : > { %8805 = vmatprep.mubr.msk.bf16.mxu1 %vm1242_vm1, %v10963_v48 }
0x1389   : > { %8804 = vmatpush3.bf16.xpose.msra.mxu1 %v3796_v4 }
0x1390   : > { %8806 = vmatmul.mubr.msk.bf16.vlgmr.msra.gmra.mrb[64].mxu1 %vm1242_vm1, %v10961_v61 }
0x1391   : > { %8809 = vmatprep.mubr.msk.bf16.mxu1 %vm1242_vm1, %v10974_v49 }
0x1398   : > { %8810 = vmatmul.mubr.msk.bf16.gmra.mrb[68].mxu1 %vm1242_vm1, %v10972_v58 }
0x141f   : > { %v11810_v36 = vpop.f32.mrb[56].mxu1 }
0x1420   : > { %13946 = vst [vmem:[#allocation33_spill] sm:$0xff] %v11810_v36  ;;  %v11812_v14 = vpop.f32.mrb[57].mxu1 }
0x1421   : > { %v11814_v42 = vpop.f32.mrb[58].mxu1 }
0x1422   : > { %13947 = vst [vmem:[#allocation34_spill] sm:$0xff] %v11814_v42  ;;  %v11818_v45 = vpop.f32.mrb[59].mxu1 }
0x1458   : > { %v11822_v62 = vpop.f32.mrb[60].mxu1 }
0x1459   : > { %13948 = vst [vmem:[#allocation35_spill] sm:$0xff] %v11822_v62  ;;  %v11824_v33 = vpop.f32.mrb[61].mxu1 }
0x145a   : > { %v11826_v9 = vpop.f32.mrb[62].mxu1 }
0x145b   : > { %13949 = vst [vmem:[#allocation36_spill] sm:$0xff] %v11826_v9  ;;  %v11830_v6 = vpop.f32.mrb[63].mxu1 }
0x1463   : > { %v8807_v15 = vpop.f32.mrb[64].mxu1 }
0x1464   : > { %v3832_v51 = vpop.f32.mrb[65].mxu1  ;;  %v3869_v54 = vsel %vm1332_vm2, %v8807_v15, -inf }
0x1465   : > { %3870 = vmax.xlane.f32.xlu0 %v3869_v54  ;;  %v8808_v32 = vpop.f32.mrb[66].mxu1  ;;  %v3863_v56 = vsel %vm1332_vm2, %v3832_v51, -inf }
0x1466   : > { %v3835_v26 = vpop.f32.mrb[67].mxu1  ;;  %v3872_v20 = vsel %vm1332_vm2, %v8808_v32, -inf }
0x1467   : > { %v3866_v10 = vsel %vm1332_vm2, %v3835_v26, -inf }
0x1468   : > { %3867 = vmax.xlane.f32.xlu1 %v3866_v10 }
0x1469   : > { %3864 = vmax.xlane.f32.xlu0 %v3863_v56 }
0x146b   : > { %v8811_v3 = vpop.f32.mrb[68].mxu1 }
0x146c   : > { %v3848_v30 = vpop.f32.mrb[69].mxu1  ;;  %v3881_v39 = vsel %vm1332_vm2, %v8811_v3, -inf }
0x146d   : > { %3873 = vmax.xlane.f32.xlu0 %v3872_v20  ;;  %v11838_v2 = vpop.f32.mrb[70].mxu1  ;;  %v3875_v54 = vsel %vm1332_vm2, %v3848_v30, -inf }
0x146e   : > { %v11840_v4 = vpop.f32.mrb[71].mxu1  ;;  %v3884_v10 = vsel %vm1332_vm2, %v11838_v2, -inf }
0x146f   : > { %v3878_v56 = vsel %vm1332_vm2, %v11840_v4, -inf }
0x1471   : > { %3882 = vmax.xlane.f32.xlu0 %v3881_v39 }
0x1475   : > { %3876 = vmax.xlane.f32.xlu0 %v3875_v54 }
0x1479   : > { %3957 = vrot.lane.b32.xlu1 %v10961_v61, %s10312_s15 }
0x147d   : > { %3959 = vrot.lane.b32.xlu1 %v10974_v49, %s10312_s15 }
0x148b   : > { %3955 = vrot.lane.b32.xlu0 %v10963_v48, %s10312_s15 }
0x14a1   : > { %3885 = vmax.xlane.f32.xlu1 %v3884_v10 }
0x14a5   : > { %3879 = vmax.xlane.f32.xlu1 %v3878_v56 }
0x14b6   : > { %3961 = vrot.lane.b32.xlu1 %v10972_v58, %s10312_s15 }
0x14f2   : > { %v3871_v39 = vpop.xlane.xlu0 %3870 }
0x14f3   : > { %v3889_v20 = vsub.f32 %v8807_v15, %v3871_v39 }
0x14f5   : > { %v3899_v54 = vmul.f32 1.442695, %v3889_v20  ;;  %v3868_v31 = vpop.xlane.xlu1 %3867 }
0x14f6   : > { %v3865_v8 = vpop.xlane.xlu0 %3864  ;;  %v3888_v62 = vsub.f32 %v3835_v26, %v3868_v31 }
0x14f7   : > { %9821 = vpow2.f32 %v3899_v54  ;;  %v3887_v57 = vsub.f32 %v3832_v51, %v3865_v8 }
0x14f8   : > { %v3897_v10 = vmul.f32 1.442695, %v3888_v62 }
0x14f9   : > { %v3895_v9 = vmul.f32 1.442695, %v3887_v57 }
0x14fa   : > { %v3874_v36 = vpop.xlane.xlu0 %3873 }
0x14fb   : > { %9823 = vpow2.f32 %v3895_v9  ;;  %v3890_v42 = vsub.f32 %v8808_v32, %v3874_v36  ;;  %v3958_v36 = vpop.permute.xlu1 %3957 }
0x14fd   : > { %v3901_v18 = vmul.f32 1.442695, %v3890_v42 }
0x14fe   : > { %v3883_v63 = vpop.xlane.xlu0 %3882 }
0x14ff   : > { %9825 = vpow2.f32 %v3901_v18  ;;  %v3893_v56 = vsub.f32 %v8811_v3, %v3883_v63 }
0x1500   : > { %9827 = vpow2.f32 %v3897_v10 }
0x1501   : > { %v11856_v16 = vpop.eup %9821  ;;  %v3907_v38 = vmul.f32 1.442695, %v3893_v56 }
0x1502   : > { %v3877_v15 = vpop.xlane.xlu0 %3876  ;;  %v3917_v39 = vsel %vm1332_vm2, %v11856_v16, 0.0 }
0x1503   : > { %9829 = vpow2.f32 %v3907_v38  ;;  %v3891_v8 = vsub.f32 %v3848_v30, %v3877_v15  ;;  %3918 = vadd.xlane.f32.xlu0 %v3917_v39  ;;  %v3960_v38 = vpop.permute.xlu1 %3959 }
0x1505   : > { %v11860_v31 = vpop.eup %9823  ;;  %v3903_v57 = vmul.f32 1.442695, %v3891_v8 }
0x1506   : > { %v3956_v62 = vpop.permute.xlu0 %3955  ;;  %v3911_v18 = vsel %vm1332_vm2, %v11860_v31, 0.0 }
0x1507   : > { %9831 = vpow2.f32 %v3903_v57  ;;  %3912 = vadd.xlane.f32.xlu0 %v3911_v18  ;;  %8813 = vmatprep.subr.bf16.mxu0 %v3956_v62 }
0x1508   : > { %8814 = vmatpush3.bf16.msra.mxu0 %v3956_v62 }
0x1509   : > { %v9826_v63 = vpop.eup %9825  ;;  %8815 = vmatprep.subr.bf16.mxu0 %v3958_v36 }
0x150a   : > { %v3920_v42 = vsel %vm1332_vm2, %v9826_v63, 0.0  ;;  %v9828_v9 = vpop.eup %9827 }
0x150b   : > { %3921 = vadd.xlane.f32.xlu1 %v3920_v42  ;;  %v3914_v26 = vsel %vm1332_vm2, %v9828_v9, 0.0 }
0x150c   : > { %8816 = vmatpush3.bf16.msra.mxu0 %v3958_v36 }
0x150d   : > { %v11865_v51 = vpop.eup %9829  ;;  %8817 = vmatprep.subr.bf16.mxu0 %v3960_v38 }
0x150e   : > { %v3929_v32 = vsel %vm1332_vm2, %v11865_v51, 0.0 }
0x150f   : > { %3930 = vadd.xlane.f32.xlu0 %v3929_v32  ;;  %3915 = vadd.xlane.f32.xlu1 %v3914_v26 }
0x1510   : > { %8818 = vmatpush3.bf16.msra.mxu0 %v3960_v38 }
0x1511   : > { %v11870_v3 = vpop.eup %9831 }
0x1512   : > { %v3923_v30 = vsel %vm1332_vm2, %v11870_v3, 0.0 }
0x1513   : > { %3924 = vadd.xlane.f32.xlu0 %v3923_v30 }
0x1520   : > { %4054 = vrot.lane.b32.xlu1 %v10961_v61, %s10310_s29 }
0x1524   : > { %4056 = vrot.lane.b32.xlu1 %v10974_v49, %s10310_s29 }
0x152e   : > { %v3886_v20 = vpop.xlane.xlu1 %3885 }
0x152f   : > { %v3894_v54 = vsub.f32 %v11838_v2, %v3886_v20 }
0x1531   : > { %v3909_v10 = vmul.f32 1.442695, %v3894_v54 }
0x1532   : > { %v3880_v56 = vpop.xlane.xlu1 %3879 }
0x1533   : > { %9833 = vpow2.f32 %v3909_v10  ;;  %v3892_v15 = vsub.f32 %v11840_v4, %v3880_v56 }
0x1535   : > { %v3905_v39 = vmul.f32 1.442695, %v3892_v15 }
0x1536   : > { %v3962_v8 = vpop.permute.xlu1 %3961 }
0x1537   : > { %8819 = vmatprep.subr.bf16.mxu0 %v3962_v8  ;;  %9835 = vpow2.f32 %v3905_v39 }
0x1538   : > { %8820 = vmatpush3.bf16.msra.mxu0 %v3962_v8 }
0x153d   : > { %v9834_v57 = vpop.eup %9833 }
0x153e   : > { %v3932_v36 = vsel %vm1332_vm2, %v9834_v57, 0.0 }
0x153f   : > { %3933 = vadd.xlane.f32.xlu0 %v3932_v36 }
0x1541   : > { %v9836_v62 = vpop.eup %9835 }
0x1542   : > { %v3926_v18 = vsel %vm1332_vm2, %v9836_v62, 0.0 }
0x1548   : > { %3927 = vadd.xlane.f32.xlu1 %v3926_v18 }
0x1555   : > { %4052 = vrot.lane.b32.xlu0 %v10963_v48, %s10310_s29 }
0x1559   : > { %4044 = vrot.lane.b32.xlu0 %v10963_v48, %s10311_s30  ;;  %4058 = vrot.lane.b32.xlu1 %v10972_v58, %s10310_s29 }
0x155d   : > { %4048 = vrot.lane.b32.xlu0 %v10974_v49, %s10311_s30  ;;  %4046 = vrot.lane.b32.xlu1 %v10961_v61, %s10311_s30 }
0x1561   : > { %4050 = vrot.lane.b32.xlu1 %v10972_v58, %s10311_s30 }
0x1590   : > { %v3919_v2 = vpop.xlane.xlu0 %3918 }
0x1594   : > { %v3913_v42 = vpop.xlane.xlu0 %3912 }
0x1598   : > { %v3922_v4 = vpop.xlane.xlu1 %3921 }
0x1599   : > { %9837 = vrcp.f32 %v3922_v4 }
0x159a   : > { %9839 = vrcp.f32 %v3913_v42 }
0x159b   : > { %9841 = vrcp.f32 %v3919_v2 }
0x159c   : > { %v3916_v38 = vpop.xlane.xlu1 %3915  ;;  %v3931_v36 = vpop.xlane.xlu0 %3930 }
0x159d   : > { %9843 = vrcp.f32 %v3916_v38 }
0x15a0   : > { %v3925_v18 = vpop.xlane.xlu0 %3924  ;;  %v4055_v2 = vpop.permute.xlu1 %4054 }
0x15a3   : > { %v9838_v32 = vpop.eup %9837 }
0x15a4   : > { %v9840_v26 = vpop.eup %9839  ;;  %v3946_v54 = vmul.f32 %v9838_v32, %v9826_v63  ;;  %v4057_v38 = vpop.permute.xlu1 %4056 }
0x15a5   : > { %v9842_v30 = vpop.eup %9841  ;;  %v3943_v10 = vmul.f32 %v9840_v26, %v11860_v31  ;;  %v4076_v31 = vsel %vm1242_vm1, %v4055_v2, 0 }
0x15a6   : > { %v3945_v15 = vmul.f32 %v9842_v30, %v11856_v16 }
0x15a7   : > { %v9844_v20 = vpop.eup %9843 }
0x15a8   : > { %v3944_v56 = vmul.f32 %v9844_v20, %v9828_v9  ;;  %v3952_v8 = vpack.c.bf16 %v3946_v54, %v3945_v15  ;;  %v4079_v54 = vsel %vm1242_vm1, %v4057_v38, 0 }
0x15aa   : > { %v3951_v39 = vpack.c.bf16 %v3944_v56, %v3943_v10 }
0x15ac   : > { %8821 = vmatprep.mubr.msk.bf16.mxu0 %vm1332_vm2, %v3951_v39 }
0x15ad   : > { %8822 = vmatmul.mubr.msk.bf16.vlgmr.msra.gmra.mrb[96].mxu0 %vm1332_vm2, %v3952_v8 }
0x15cc   : > { %v3934_v4 = vpop.xlane.xlu0 %3933 }
0x15cd   : > { %9845 = vrcp.f32 %v3934_v4 }
0x15ce   : > { %9847 = vrcp.f32 %v3925_v18 }
0x15cf   : > { %9849 = vrcp.f32 %v3931_v36 }
0x15d0   : > { %v4053_v42 = vpop.permute.xlu0 %4052 }
0x15d1   : > { %9201 = vmatprep.subr.msk.bf16.mxu0 %vm1242_vm1, %v4053_v42  ;;  %v4073_v63 = vsel %vm1242_vm1, %v4053_v42, 0 }
0x15d2   : > { %8830 = vmatpush3.bf16.xpose.msra.mxu0 %v4073_v63 }
0x15d3   : > { %9202 = vmatprep.subr.msk.bf16.mxu0 %vm1242_vm1, %v4055_v2 }
0x15d4   : > { %v4045_v18 = vpop.permute.xlu0 %4044 }
0x15d5   : > { %v3928_v16 = vpop.xlane.xlu1 %3927 }
0x15d6   : > { %9851 = vrcp.f32 %v3928_v16 }
0x15d7   : > { %v9846_v9 = vpop.eup %9845 }
0x15d8   : > { %v9848_v32 = vpop.eup %9847  ;;  %v3950_v20 = vmul.f32 %v9846_v9, %v9834_v57 }
0x15d9   : > { %v9850_v26 = vpop.eup %9849  ;;  %v3947_v10 = vmul.f32 %v9848_v32, %v11870_v3  ;;  %v4059_v15 = vpop.permute.xlu1 %4058 }
0x15da   : > { %8832 = vmatpush3.bf16.xpose.msra.mxu0 %v4076_v31  ;;  %v3949_v39 = vmul.f32 %v9850_v26, %v11865_v51  ;;  %v4082_v57 = vsel %vm1242_vm1, %v4059_v15, 0 }
0x15db   : > { %9203 = vmatprep.subr.msk.bf16.mxu0 %vm1242_vm1, %v4057_v38 }
0x15dc   : > { %v3954_v36 = vpack.c.bf16 %v3950_v20, %v3949_v39 }
0x15dd   : > { %v4047_v3 = vpop.permute.xlu1 %4046 }
0x15e0   : > { %v9852_v30 = vpop.eup %9851 }
0x15e1   : > { %v3948_v56 = vmul.f32 %v9852_v30, %v9836_v62  ;;  %v4049_v62 = vpop.permute.xlu0 %4048  ;;  %v4051_v51 = vpop.permute.xlu1 %4050 }
0x15e2   : > { %8834 = vmatpush3.bf16.xpose.msra.mxu0 %v4079_v54 }
0x15e3   : > { %9204 = vmatprep.subr.msk.bf16.mxu0 %vm1242_vm1, %v4059_v15  ;;  %v3953_v8 = vpack.c.bf16 %v3948_v56, %v3947_v10 }
0x15e5   : > { %8825 = vmatprep.mubr.msk.bf16.mxu0 %vm1332_vm2, %v3953_v8 }
0x15e6   : > { %8826 = vmatmul.mubr.msk.bf16.gmra.mrb[100].mxu0 %vm1332_vm2, %v3954_v36 }
0x15e7   : > { %8837 = vmatprep.mubr.msk.bf16.mxu0 %vm1242_vm1, %v4045_v18 }
0x15ea   : > { %8836 = vmatpush3.bf16.xpose.msra.mxu0 %v4082_v57 }
0x15f1   : > { %8838 = vmatmul.mubr.msk.bf16.vlgmr.msra.gmra.mrb[104].mxu0 %vm1242_vm1, %v4047_v3 }
0x15f2   : > { %8841 = vmatprep.mubr.msk.bf16.mxu0 %vm1242_vm1, %v4049_v62 }
0x15f9   : > { %8842 = vmatmul.mubr.msk.bf16.gmra.mrb[108].mxu0 %vm1242_vm1, %v4051_v51 }
0x1680   : > { %v11914_v2 = vpop.f32.mrb[96].mxu0 }
0x1681   : > { %13950 = vst [vmem:[#allocation37_spill] sm:$0xff] %v11914_v2  ;;  %v11916_v4 = vpop.f32.mrb[97].mxu0 }
0x1682   : > { %13951 = vst [vmem:[#allocation38_spill] sm:$0xff] %v11916_v4  ;;  %v11918_v42 = vpop.f32.mrb[98].mxu0 }
0x1683   : > { %13952 = vst [vmem:[#allocation39_spill] sm:$0xff] %v11918_v42  ;;  %v11920_v38 = vpop.f32.mrb[99].mxu0 }
0x1684   : > { %13953 = vst [vmem:[#allocation40_spill] sm:$0xff] %v11920_v38 }
0x16b9   : > { %v11922_v63 = vpop.f32.mrb[100].mxu0 }
0x16ba   : > { %13954 = vst [vmem:[#allocation41_spill] sm:$0xff] %v11922_v63  ;;  %v11924_v16 = vpop.f32.mrb[101].mxu0 }
0x16bb   : > { %13955 = vst [vmem:[#allocation42_spill] sm:$0xff] %v11924_v16  ;;  %v11926_v31 = vpop.f32.mrb[102].mxu0 }
0x16bc   : > { %13956 = vst [vmem:[#allocation43_spill] sm:$0xff] %v11926_v31  ;;  %v11928_v9 = vpop.f32.mrb[103].mxu0 }
0x16bd   : > { %13957 = vst [vmem:[#allocation44_spill] sm:$0xff] %v11928_v9 }
0x16c4   : > { %v8839_v32 = vpop.f32.mrb[104].mxu0 }
0x16c5   : > { %v4118_v26 = vpop.f32.mrb[105].mxu0  ;;  %v4155_v30 = vsel %vm1332_vm2, %v8839_v32, -inf }
0x16c6   : > { %4156 = vmax.xlane.f32.xlu0 %v4155_v30  ;;  %v8840_v20 = vpop.f32.mrb[106].mxu0  ;;  %v4149_v56 = vsel %vm1332_vm2, %v4118_v26, -inf }
0x16c7   : > { %v4121_v54 = vpop.f32.mrb[107].mxu0  ;;  %v4158_v8 = vsel %vm1332_vm2, %v8840_v20, -inf }
0x16c8   : > { %v4152_v10 = vsel %vm1332_vm2, %v4121_v54, -inf }
0x16c9   : > { %4153 = vmax.xlane.f32.xlu1 %v4152_v10 }
0x16ca   : > { %4150 = vmax.xlane.f32.xlu0 %v4149_v56 }
0x16cc   : > { %v8843_v15 = vpop.f32.mrb[108].mxu0 }
0x16cd   : > { %v4134_v39 = vpop.f32.mrb[109].mxu0  ;;  %v4167_v57 = vsel %vm1332_vm2, %v8843_v15, -inf }
0x16ce   : > { %4159 = vmax.xlane.f32.xlu0 %v4158_v8  ;;  %v11934_v36 = vpop.f32.mrb[110].mxu0  ;;  %v4161_v3 = vsel %vm1332_vm2, %v4134_v39, -inf }
0x16cf   : > { %v11936_v18 = vpop.f32.mrb[111].mxu0  ;;  %v4170_v62 = vsel %vm1332_vm2, %v11934_v36, -inf }
0x16d0   : > { %v4164_v51 = vsel %vm1332_vm2, %v11936_v18, -inf }
0x16d2   : > { %4168 = vmax.xlane.f32.xlu0 %v4167_v57 }
0x16d6   : > { %4162 = vmax.xlane.f32.xlu0 %v4161_v3 }
0x16da   : > { %4243 = vrot.lane.b32.xlu1 %v10961_v61, %s10313_s16 }
0x16de   : > { %4245 = vrot.lane.b32.xlu1 %v10974_v49, %s10313_s16 }
0x16ec   : > { %4241 = vrot.lane.b32.xlu0 %v10963_v48, %s10313_s16 }
0x1702   : > { %4171 = vmax.xlane.f32.xlu1 %v4170_v62 }
0x1706   : > { %4165 = vmax.xlane.f32.xlu1 %v4164_v51 }
0x1717   : > { %4247 = vrot.lane.b32.xlu1 %v10972_v58, %s10313_s16 }
0x1753   : > { %v4157_v30 = vpop.xlane.xlu0 %4156 }
0x1754   : > { %v4175_v10 = vsub.f32 %v8839_v32, %v4157_v30 }
0x1756   : > { %v4185_v56 = vmul.f32 1.442695, %v4175_v10  ;;  %v4154_v8 = vpop.xlane.xlu1 %4153 }
0x1757   : > { %v4151_v57 = vpop.xlane.xlu0 %4150  ;;  %v4174_v63 = vsub.f32 %v4121_v54, %v4154_v8 }
0x1758   : > { %9853 = vpow2.f32 %v4185_v56  ;;  %v4173_v3 = vsub.f32 %v4118_v26, %v4151_v57 }
0x1759   : > { %v4183_v62 = vmul.f32 1.442695, %v4174_v63 }
0x175a   : > { %v4181_v31 = vmul.f32 1.442695, %v4173_v3 }
0x175b   : > { %v4160_v2 = vpop.xlane.xlu0 %4159 }
0x175c   : > { %9855 = vpow2.f32 %v4181_v31  ;;  %v4176_v42 = vsub.f32 %v8840_v20, %v4160_v2  ;;  %v4244_v2 = vpop.permute.xlu1 %4243 }
0x175e   : > { %v4187_v16 = vmul.f32 1.442695, %v4176_v42 }
0x175f   : > { %v4169_v9 = vpop.xlane.xlu0 %4168 }
0x1760   : > { %9857 = vpow2.f32 %v4187_v16  ;;  %v4179_v51 = vsub.f32 %v8843_v15, %v4169_v9 }
0x1761   : > { %9859 = vpow2.f32 %v4183_v62 }
0x1762   : > { %v11952_v4 = vpop.eup %9853  ;;  %v4193_v38 = vmul.f32 1.442695, %v4179_v51 }
0x1763   : > { %v4163_v32 = vpop.xlane.xlu0 %4162  ;;  %v4203_v30 = vsel %vm1332_vm2, %v11952_v4, 0.0 }
0x1764   : > { %9861 = vpow2.f32 %v4193_v38  ;;  %v4177_v26 = vsub.f32 %v4134_v39, %v4163_v32  ;;  %4204 = vadd.xlane.f32.xlu0 %v4203_v30  ;;  %v4246_v38 = vpop.permute.xlu1 %4245 }
0x1766   : > { %v11956_v54 = vpop.eup %9855  ;;  %v4189_v31 = vmul.f32 1.442695, %v4177_v26 }
0x1767   : > { %v4242_v63 = vpop.permute.xlu0 %4241  ;;  %v4197_v42 = vsel %vm1332_vm2, %v11956_v54, 0.0 }
0x1768   : > { %9863 = vpow2.f32 %v4189_v31  ;;  %4198 = vadd.xlane.f32.xlu0 %v4197_v42  ;;  %8845 = vmatprep.subr.bf16.mxu1 %v4242_v63 }
0x1769   : > { %8846 = vmatpush3.bf16.msra.mxu1 %v4242_v63 }
0x176a   : > { %v9858_v16 = vpop.eup %9857  ;;  %8847 = vmatprep.subr.bf16.mxu1 %v4244_v2 }
0x176b   : > { %v4206_v9 = vsel %vm1332_vm2, %v9858_v16, 0.0  ;;  %v9860_v20 = vpop.eup %9859 }
0x176c   : > { %4207 = vadd.xlane.f32.xlu1 %v4206_v9  ;;  %v4200_v10 = vsel %vm1332_vm2, %v9860_v20, 0.0 }
0x176d   : > { %8848 = vmatpush3.bf16.msra.mxu1 %v4244_v2 }
0x176e   : > { %v11961_v15 = vpop.eup %9861  ;;  %8849 = vmatprep.subr.bf16.mxu1 %v4246_v38 }
0x176f   : > { %v4215_v39 = vsel %vm1332_vm2, %v11961_v15, 0.0 }
0x1770   : > { %4216 = vadd.xlane.f32.xlu0 %v4215_v39  ;;  %4201 = vadd.xlane.f32.xlu1 %v4200_v10 }
0x1771   : > { %8850 = vmatpush3.bf16.msra.mxu1 %v4246_v38 }
0x1772   : > { %v11966_v56 = vpop.eup %9863 }
0x1773   : > { %v4209_v8 = vsel %vm1332_vm2, %v11966_v56, 0.0 }
0x1774   : > { %4210 = vadd.xlane.f32.xlu0 %v4209_v8 }
0x1781   : > { %4340 = vrot.lane.b32.xlu1 %v10961_v61, %s10314_s17 }
0x1785   : > { %4342 = vrot.lane.b32.xlu1 %v10974_v49, %s10314_s17 }
0x178f   : > { %v4172_v57 = vpop.xlane.xlu1 %4171 }
0x1790   : > { %v4180_v3 = vsub.f32 %v11934_v36, %v4172_v57 }
0x1792   : > { %v4195_v62 = vmul.f32 1.442695, %v4180_v3 }
0x1793   : > { %v4166_v51 = vpop.xlane.xlu1 %4165 }
0x1794   : > { %9865 = vpow2.f32 %v4195_v62  ;;  %v4178_v32 = vsub.f32 %v11936_v18, %v4166_v51 }
0x1796   : > { %v4191_v30 = vmul.f32 1.442695, %v4178_v32 }
0x1797   : > { %v4248_v26 = vpop.permute.xlu1 %4247 }
0x1798   : > { %8851 = vmatprep.subr.bf16.mxu1 %v4248_v26  ;;  %9867 = vpow2.f32 %v4191_v30 }
0x1799   : > { %8852 = vmatpush3.bf16.msra.mxu1 %v4248_v26 }
0x179e   : > { %v9866_v31 = vpop.eup %9865 }
0x179f   : > { %v4218_v2 = vsel %vm1332_vm2, %v9866_v31, 0.0 }
0x17a0   : > { %4219 = vadd.xlane.f32.xlu0 %v4218_v2 }
0x17a2   : > { %v9868_v63 = vpop.eup %9867 }
0x17a3   : > { %v4212_v42 = vsel %vm1332_vm2, %v9868_v63, 0.0 }
0x17a9   : > { %4213 = vadd.xlane.f32.xlu1 %v4212_v42 }
0x17b6   : > { %4338 = vrot.lane.b32.xlu0 %v10963_v48, %s10314_s17 }
0x17ba   : > { %4330 = vrot.lane.b32.xlu0 %v10963_v48, %s10315_s18  ;;  %4344 = vrot.lane.b32.xlu1 %v10972_v58, %s10314_s17 }
0x17be   : > { %4334 = vrot.lane.b32.xlu0 %v10974_v49, %s10315_s18  ;;  %4332 = vrot.lane.b32.xlu1 %v10961_v61, %s10315_s18 }
0x17c2   : > { %4336 = vrot.lane.b32.xlu1 %v10972_v58, %s10315_s18 }
0x17f1   : > { %v4205_v36 = vpop.xlane.xlu0 %4204 }
0x17f5   : > { %v4199_v9 = vpop.xlane.xlu0 %4198 }
0x17f9   : > { %v4208_v18 = vpop.xlane.xlu1 %4207 }
0x17fa   : > { %9869 = vrcp.f32 %v4208_v18 }
0x17fb   : > { %9871 = vrcp.f32 %v4199_v9 }
0x17fc   : > { %9873 = vrcp.f32 %v4205_v36 }
0x17fd   : > { %v4202_v38 = vpop.xlane.xlu1 %4201  ;;  %v4217_v2 = vpop.xlane.xlu0 %4216 }
0x17fe   : > { %9875 = vrcp.f32 %v4202_v38 }
0x1801   : > { %v4211_v42 = vpop.xlane.xlu0 %4210  ;;  %v4341_v36 = vpop.permute.xlu1 %4340 }
0x1804   : > { %v9870_v39 = vpop.eup %9869 }
0x1805   : > { %v9872_v10 = vpop.eup %9871  ;;  %v4232_v3 = vmul.f32 %v9870_v39, %v9858_v16  ;;  %v4343_v38 = vpop.permute.xlu1 %4342 }
0x1806   : > { %v9874_v8 = vpop.eup %9873  ;;  %v4229_v62 = vmul.f32 %v9872_v10, %v11956_v54  ;;  %v4362_v54 = vsel %vm1242_vm1, %v4341_v36, 0 }
0x1807   : > { %v4231_v32 = vmul.f32 %v9874_v8, %v11952_v4 }
0x1808   : > { %v9876_v57 = vpop.eup %9875 }
0x1809   : > { %v4230_v51 = vmul.f32 %v9876_v57, %v9860_v20  ;;  %v4238_v26 = vpack.c.bf16 %v4232_v3, %v4231_v32  ;;  %v4365_v3 = vsel %vm1242_vm1, %v4343_v38, 0 }
0x180b   : > { %v4237_v30 = vpack.c.bf16 %v4230_v51, %v4229_v62 }
0x180d   : > { %8853 = vmatprep.mubr.msk.bf16.mxu1 %vm1332_vm2, %v4237_v30 }
0x180e   : > { %8854 = vmatmul.mubr.msk.bf16.vlgmr.msra.gmra.mrb[72].mxu1 %vm1332_vm2, %v4238_v26 }
0x182d   : > { %v4220_v18 = vpop.xlane.xlu0 %4219 }
0x182e   : > { %9877 = vrcp.f32 %v4220_v18 }
0x182f   : > { %9879 = vrcp.f32 %v4211_v42 }
0x1830   : > { %9881 = vrcp.f32 %v4217_v2 }
0x1831   : > { %v4339_v9 = vpop.permute.xlu0 %4338 }
0x1832   : > { %9205 = vmatprep.subr.msk.bf16.mxu1 %vm1242_vm1, %v4339_v9  ;;  %v4359_v16 = vsel %vm1242_vm1, %v4339_v9, 0 }
0x1833   : > { %8862 = vmatpush3.bf16.xpose.msra.mxu1 %v4359_v16 }
0x1834   : > { %9206 = vmatprep.subr.msk.bf16.mxu1 %vm1242_vm1, %v4341_v36 }
0x1835   : > { %v4331_v42 = vpop.permute.xlu0 %4330 }
0x1836   : > { %v4214_v4 = vpop.xlane.xlu1 %4213 }
0x1837   : > { %9883 = vrcp.f32 %v4214_v4 }
0x1838   : > { %v9878_v20 = vpop.eup %9877 }
0x1839   : > { %v9880_v39 = vpop.eup %9879  ;;  %v4236_v57 = vmul.f32 %v9878_v20, %v9866_v31 }
0x183a   : > { %v9882_v10 = vpop.eup %9881  ;;  %v4233_v62 = vmul.f32 %v9880_v39, %v11966_v56  ;;  %v4345_v32 = vpop.permute.xlu1 %4344 }
0x183b   : > { %8864 = vmatpush3.bf16.xpose.msra.mxu1 %v4362_v54  ;;  %v4235_v30 = vmul.f32 %v9882_v10, %v11961_v15  ;;  %v4368_v31 = vsel %vm1242_vm1, %v4345_v32, 0 }
0x183c   : > { %9207 = vmatprep.subr.msk.bf16.mxu1 %vm1242_vm1, %v4343_v38 }
0x183d   : > { %v4240_v2 = vpack.c.bf16 %v4236_v57, %v4235_v30 }
0x183e   : > { %v4333_v56 = vpop.permute.xlu1 %4332 }
0x1841   : > { %v9884_v8 = vpop.eup %9883 }
0x1842   : > { %v4234_v51 = vmul.f32 %v9884_v8, %v9868_v63  ;;  %v4335_v63 = vpop.permute.xlu0 %4334  ;;  %v4337_v15 = vpop.permute.xlu1 %4336 }
0x1843   : > { %8866 = vmatpush3.bf16.xpose.msra.mxu1 %v4365_v3 }
0x1844   : > { %9208 = vmatprep.subr.msk.bf16.mxu1 %vm1242_vm1, %v4345_v32  ;;  %v4239_v26 = vpack.c.bf16 %v4234_v51, %v4233_v62 }
0x1846   : > { %8857 = vmatprep.mubr.msk.bf16.mxu1 %vm1332_vm2, %v4239_v26 }
0x1847   : > { %8858 = vmatmul.mubr.msk.bf16.gmra.mrb[76].mxu1 %vm1332_vm2, %v4240_v2 }
0x1848   : > { %8869 = vmatprep.mubr.msk.bf16.mxu1 %vm1242_vm1, %v4331_v42 }
0x184b   : > { %8868 = vmatpush3.bf16.xpose.msra.mxu1 %v4368_v31 }
0x1852   : > { %8870 = vmatmul.mubr.msk.bf16.vlgmr.msra.gmra.mrb[80].mxu1 %vm1242_vm1, %v4333_v56 }
0x1853   : > { %8873 = vmatprep.mubr.msk.bf16.mxu1 %vm1242_vm1, %v4335_v63 }
0x185a   : > { %8874 = vmatmul.mubr.msk.bf16.gmra.mrb[84].mxu1 %vm1242_vm1, %v4337_v15 }
0x18e1   : > { %v12010_v36 = vpop.f32.mrb[72].mxu1 }
0x18e2   : > { %13958 = vst [vmem:[#allocation45_spill] sm:$0xff] %v12010_v36  ;;  %v12012_v18 = vpop.f32.mrb[73].mxu1 }
0x18e3   : > { %v12014_v9 = vpop.f32.mrb[74].mxu1 }
0x18e4   : > { %13959 = vst [vmem:[#allocation46_spill] sm:$0xff] %v12014_v9  ;;  %v12018_v16 = vpop.f32.mrb[75].mxu1 }
0x191a   : > { %v12022_v54 = vpop.f32.mrb[76].mxu1 }
0x191b   : > { %13960 = vst [vmem:[#allocation47_spill] sm:$0xff] %v12022_v54  ;;  %v12024_v20 = vpop.f32.mrb[77].mxu1 }
0x191c   : > { %13961 = vst [vmem:[#allocation48_spill] sm:$0xff] %v12024_v20  ;;  %v12026_v39 = vpop.f32.mrb[78].mxu1 }
0x191d   : > { %13962 = vst [vmem:[#allocation49_spill] sm:$0xff] %v12026_v39  ;;  %v12030_v8 = vpop.f32.mrb[79].mxu1 }
0x191e   : > { %13963 = vst [vmem:[#allocation50_spill] sm:$0xff] %v12030_v8 }
0x1925   : > { %v8871_v3 = vpop.f32.mrb[80].mxu1 }
0x1926   : > { %v4404_v62 = vpop.f32.mrb[81].mxu1  ;;  %v4441_v51 = vsel %vm1332_vm2, %v8871_v3, -inf }
0x1927   : > { %4442 = vmax.xlane.f32.xlu0 %v4441_v51  ;;  %v8872_v32 = vpop.f32.mrb[82].mxu1  ;;  %v4435_v2 = vsel %vm1332_vm2, %v4404_v62, -inf }
0x1928   : > { %v4407_v30 = vpop.f32.mrb[83].mxu1  ;;  %v4444_v56 = vsel %vm1332_vm2, %v8872_v32, -inf }
0x1929   : > { %v4438_v26 = vsel %vm1332_vm2, %v4407_v30, -inf }
0x192a   : > { %4439 = vmax.xlane.f32.xlu1 %v4438_v26 }
0x192b   : > { %4436 = vmax.xlane.f32.xlu0 %v4435_v2 }
0x192d   : > { %v8875_v42 = vpop.f32.mrb[84].mxu1 }
0x192e   : > { %v4420_v31 = vpop.f32.mrb[85].mxu1  ;;  %v4453_v10 = vsel %vm1332_vm2, %v8875_v42, -inf }
0x192f   : > { %4445 = vmax.xlane.f32.xlu0 %v4444_v56  ;;  %v12038_v63 = vpop.f32.mrb[86].mxu1  ;;  %v4447_v51 = vsel %vm1332_vm2, %v4420_v31, -inf }
0x1930   : > { %v12040_v15 = vpop.f32.mrb[87].mxu1  ;;  %v4456_v26 = vsel %vm1332_vm2, %v12038_v63, -inf }
0x1931   : > { %v4450_v2 = vsel %vm1332_vm2, %v12040_v15, -inf }
0x1933   : > { %4454 = vmax.xlane.f32.xlu0 %v4453_v10 }
0x1937   : > { %4448 = vmax.xlane.f32.xlu0 %v4447_v51 }
0x193b   : > { %4529 = vrot.lane.b32.xlu1 %v10961_v61, %s10316_s19 }
0x193f   : > { %4531 = vrot.lane.b32.xlu1 %v10974_v49, %s10316_s19 }
0x194d   : > { %4527 = vrot.lane.b32.xlu0 %v10963_v48, %s10316_s19 }
0x1963   : > { %4457 = vmax.xlane.f32.xlu1 %v4456_v26 }
0x1967   : > { %4451 = vmax.xlane.f32.xlu1 %v4450_v2 }
0x1978   : > { %4533 = vrot.lane.b32.xlu1 %v10972_v58, %s10316_s19 }
0x19b4   : > { %v4443_v10 = vpop.xlane.xlu0 %4442 }
0x19b5   : > { %v4461_v56 = vsub.f32 %v8871_v3, %v4443_v10 }
0x19b7   : > { %v4471_v51 = vmul.f32 1.442695, %v4461_v56  ;;  %v4440_v38 = vpop.xlane.xlu1 %4439 }
0x19b8   : > { %v4437_v57 = vpop.xlane.xlu0 %4436  ;;  %v4460_v54 = vsub.f32 %v4407_v30, %v4440_v38 }
0x19b9   : > { %9885 = vpow2.f32 %v4471_v51  ;;  %v4459_v4 = vsub.f32 %v4404_v62, %v4437_v57 }
0x19ba   : > { %v4469_v26 = vmul.f32 1.442695, %v4460_v54 }
0x19bb   : > { %v4467_v39 = vmul.f32 1.442695, %v4459_v4 }
0x19bc   : > { %v4446_v36 = vpop.xlane.xlu0 %4445 }
0x19bd   : > { %9887 = vpow2.f32 %v4467_v39  ;;  %v4462_v9 = vsub.f32 %v8872_v32, %v4446_v36  ;;  %v4530_v36 = vpop.permute.xlu1 %4529 }
0x19bf   : > { %v4473_v17 = vmul.f32 1.442695, %v4462_v9 }
0x19c0   : > { %v4455_v53 = vpop.xlane.xlu0 %4454 }
0x19c1   : > { %9889 = vpow2.f32 %v4473_v17  ;;  %v4465_v2 = vsub.f32 %v8875_v42, %v4455_v53 }
0x19c2   : > { %9891 = vpow2.f32 %v4469_v26 }
0x19c3   : > { %v12056_v20 = vpop.eup %9885  ;;  %v4479_v8 = vmul.f32 1.442695, %v4465_v2 }
0x19c4   : > { %v4449_v3 = vpop.xlane.xlu0 %4448  ;;  %v4489_v10 = vsel %vm1332_vm2, %v12056_v20, 0.0 }
0x19c5   : > { %9893 = vpow2.f32 %v4479_v8  ;;  %v4463_v57 = vsub.f32 %v4420_v31, %v4449_v3  ;;  %4490 = vadd.xlane.f32.xlu0 %v4489_v10  ;;  %v4532_v8 = vpop.permute.xlu1 %4531 }
0x19c7   : > { %v12060_v38 = vpop.eup %9887  ;;  %v4475_v4 = vmul.f32 1.442695, %v4463_v57 }
0x19c8   : > { %v4528_v54 = vpop.permute.xlu0 %4527  ;;  %v4483_v17 = vsel %vm1332_vm2, %v12060_v38, 0.0 }
0x19c9   : > { %9895 = vpow2.f32 %v4475_v4  ;;  %4484 = vadd.xlane.f32.xlu0 %v4483_v17  ;;  %8877 = vmatprep.subr.bf16.mxu0 %v4528_v54 }
0x19ca   : > { %8878 = vmatpush3.bf16.msra.mxu0 %v4528_v54 }
0x19cb   : > { %v9890_v53 = vpop.eup %9889  ;;  %8879 = vmatprep.subr.bf16.mxu0 %v4530_v36 }
0x19cc   : > { %v4492_v9 = vsel %vm1332_vm2, %v9890_v53, 0.0  ;;  %v9892_v39 = vpop.eup %9891 }
0x19cd   : > { %4493 = vadd.xlane.f32.xlu1 %v4492_v9  ;;  %v4486_v30 = vsel %vm1332_vm2, %v9892_v39, 0.0 }
0x19ce   : > { %8880 = vmatpush3.bf16.msra.mxu0 %v4530_v36 }
0x19cf   : > { %v12065_v62 = vpop.eup %9893  ;;  %8881 = vmatprep.subr.bf16.mxu0 %v4532_v8 }
0x19d0   : > { %v4501_v32 = vsel %vm1332_vm2, %v12065_v62, 0.0 }
0x19d1   : > { %4502 = vadd.xlane.f32.xlu0 %v4501_v32  ;;  %4487 = vadd.xlane.f32.xlu1 %v4486_v30 }
0x19d2   : > { %8882 = vmatpush3.bf16.msra.mxu0 %v4532_v8 }
0x19d3   : > { %v12070_v42 = vpop.eup %9895 }
0x19d4   : > { %v4495_v31 = vsel %vm1332_vm2, %v12070_v42, 0.0 }
0x19d5   : > { %4496 = vadd.xlane.f32.xlu0 %v4495_v31 }
0x19e2   : > { %4626 = vrot.lane.b32.xlu1 %v10961_v61, %s10317_s20 }
0x19e6   : > { %4628 = vrot.lane.b32.xlu1 %v10974_v49, %s10317_s20 }
0x19f0   : > { %v4458_v56 = vpop.xlane.xlu1 %4457 }
0x19f1   : > { %v4466_v51 = vsub.f32 %v12038_v63, %v4458_v56 }
0x19f3   : > { %v4481_v26 = vmul.f32 1.442695, %v4466_v51 }
0x19f4   : > { %v4452_v2 = vpop.xlane.xlu1 %4451 }
0x19f5   : > { %9897 = vpow2.f32 %v4481_v26  ;;  %v4464_v3 = vsub.f32 %v12040_v15, %v4452_v2 }
0x19f7   : > { %v4477_v10 = vmul.f32 1.442695, %v4464_v3 }
0x19f8   : > { %v4534_v57 = vpop.permute.xlu1 %4533 }
0x19f9   : > { %8883 = vmatprep.subr.bf16.mxu0 %v4534_v57  ;;  %9899 = vpow2.f32 %v4477_v10 }
0x19fa   : > { %8884 = vmatpush3.bf16.msra.mxu0 %v4534_v57 }
0x19ff   : > { %v9898_v4 = vpop.eup %9897 }
0x1a00   : > { %v4504_v36 = vsel %vm1332_vm2, %v9898_v4, 0.0 }
0x1a01   : > { %4505 = vadd.xlane.f32.xlu0 %v4504_v36 }
0x1a03   : > { %v9900_v54 = vpop.eup %9899 }
0x1a04   : > { %v4498_v17 = vsel %vm1332_vm2, %v9900_v54, 0.0 }
0x1a0a   : > { %4499 = vadd.xlane.f32.xlu1 %v4498_v17 }
0x1a17   : > { %4624 = vrot.lane.b32.xlu0 %v10963_v48, %s10317_s20 }
0x1a1b   : > { %4616 = vrot.lane.b32.xlu0 %v10963_v48, %s10318_s21  ;;  %4630 = vrot.lane.b32.xlu1 %v10972_v58, %s10317_s20 }
0x1a1f   : > { %4620 = vrot.lane.b32.xlu0 %v10974_v49, %s10318_s21  ;;  %4618 = vrot.lane.b32.xlu1 %v10961_v61, %s10318_s21 }
0x1a23   : > { %4622 = vrot.lane.b32.xlu1 %v10972_v58, %s10318_s21 }
0x1a52   : > { %v4491_v63 = vpop.xlane.xlu0 %4490 }
0x1a56   : > { %v4485_v9 = vpop.xlane.xlu0 %4484 }
0x1a5a   : > { %v4494_v15 = vpop.xlane.xlu1 %4493 }
0x1a5b   : > { %9901 = vrcp.f32 %v4494_v15 }
0x1a5c   : > { %9903 = vrcp.f32 %v4485_v9 }
0x1a5d   : > { %9905 = vrcp.f32 %v4491_v63 }
0x1a5e   : > { %v4488_v8 = vpop.xlane.xlu1 %4487  ;;  %v4503_v36 = vpop.xlane.xlu0 %4502 }
0x1a5f   : > { %9907 = vrcp.f32 %v4488_v8 }
0x1a62   : > { %v4497_v17 = vpop.xlane.xlu0 %4496  ;;  %v4627_v63 = vpop.permute.xlu1 %4626 }
0x1a65   : > { %v9902_v32 = vpop.eup %9901 }
0x1a66   : > { %v9904_v30 = vpop.eup %9903  ;;  %v4518_v51 = vmul.f32 %v9902_v32, %v9890_v53  ;;  %v4629_v8 = vpop.permute.xlu1 %4628 }
0x1a67   : > { %v9906_v31 = vpop.eup %9905  ;;  %v4515_v26 = vmul.f32 %v9904_v30, %v12060_v38  ;;  %v4648_v38 = vsel %vm1242_vm1, %v4627_v63, 0 }
0x1a68   : > { %v4517_v3 = vmul.f32 %v9906_v31, %v12056_v20 }
0x1a69   : > { %v9908_v56 = vpop.eup %9907 }
0x1a6a   : > { %v4516_v2 = vmul.f32 %v9908_v56, %v9892_v39  ;;  %v4524_v57 = vpack.c.bf16 %v4518_v51, %v4517_v3  ;;  %v4651_v51 = vsel %vm1242_vm1, %v4629_v8, 0 }
0x1a6c   : > { %v4523_v10 = vpack.c.bf16 %v4516_v2, %v4515_v26 }
0x1a6e   : > { %8885 = vmatprep.mubr.msk.bf16.mxu0 %vm1332_vm2, %v4523_v10 }
0x1a6f   : > { %8886 = vmatmul.mubr.msk.bf16.vlgmr.msra.gmra.mrb[112].mxu0 %vm1332_vm2, %v4524_v57 }
0x1a8e   : > { %v4506_v15 = vpop.xlane.xlu0 %4505 }
0x1a8f   : > { %9909 = vrcp.f32 %v4506_v15 }
0x1a90   : > { %9911 = vrcp.f32 %v4497_v17 }
0x1a91   : > { %9913 = vrcp.f32 %v4503_v36 }
0x1a92   : > { %v4625_v9 = vpop.permute.xlu0 %4624 }
0x1a93   : > { %9209 = vmatprep.subr.msk.bf16.mxu0 %vm1242_vm1, %v4625_v9  ;;  %v4645_v53 = vsel %vm1242_vm1, %v4625_v9, 0 }
0x1a94   : > { %8894 = vmatpush3.bf16.xpose.msra.mxu0 %v4645_v53 }
0x1a95   : > { %9210 = vmatprep.subr.msk.bf16.mxu0 %vm1242_vm1, %v4627_v63 }
0x1a96   : > { %v4617_v17 = vpop.permute.xlu0 %4616 }
0x1a97   : > { %v4500_v20 = vpop.xlane.xlu1 %4499 }
0x1a98   : > { %9915 = vrcp.f32 %v4500_v20 }
0x1a99   : > { %v9910_v39 = vpop.eup %9909 }
0x1a9a   : > { %v9912_v32 = vpop.eup %9911  ;;  %v4522_v56 = vmul.f32 %v9910_v39, %v9898_v4 }
0x1a9b   : > { %v9914_v30 = vpop.eup %9913  ;;  %v4519_v26 = vmul.f32 %v9912_v32, %v12070_v42  ;;  %v4631_v3 = vpop.permute.xlu1 %4630 }
0x1a9c   : > { %8896 = vmatpush3.bf16.xpose.msra.mxu0 %v4648_v38  ;;  %v4521_v10 = vmul.f32 %v9914_v30, %v12065_v62  ;;  %v4654_v4 = vsel %vm1242_vm1, %v4631_v3, 0 }
0x1a9d   : > { %9211 = vmatprep.subr.msk.bf16.mxu0 %vm1242_vm1, %v4629_v8 }
0x1a9e   : > { %v4526_v36 = vpack.c.bf16 %v4522_v56, %v4521_v10 }
0x1a9f   : > { %v4619_v42 = vpop.permute.xlu1 %4618 }
0x1aa2   : > { %v9916_v31 = vpop.eup %9915 }
0x1aa3   : > { %v4520_v2 = vmul.f32 %v9916_v31, %v9900_v54  ;;  %v4621_v54 = vpop.permute.xlu0 %4620  ;;  %v4623_v62 = vpop.permute.xlu1 %4622 }
0x1aa4   : > { %8898 = vmatpush3.bf16.xpose.msra.mxu0 %v4651_v51 }
0x1aa5   : > { %9212 = vmatprep.subr.msk.bf16.mxu0 %vm1242_vm1, %v4631_v3  ;;  %v4525_v57 = vpack.c.bf16 %v4520_v2, %v4519_v26 }
0x1aa7   : > { %8889 = vmatprep.mubr.msk.bf16.mxu0 %vm1332_vm2, %v4525_v57 }
0x1aa8   : > { %8890 = vmatmul.mubr.msk.bf16.gmra.mrb[116].mxu0 %vm1332_vm2, %v4526_v36 }
0x1aa9   : > { %8901 = vmatprep.mubr.msk.bf16.mxu0 %vm1242_vm1, %v4617_v17 }
0x1aac   : > { %8900 = vmatpush3.bf16.xpose.msra.mxu0 %v4654_v4 }
0x1ab3   : > { %8902 = vmatmul.mubr.msk.bf16.vlgmr.msra.gmra.mrb[120].mxu0 %vm1242_vm1, %v4619_v42 }
0x1ab4   : > { %8905 = vmatprep.mubr.msk.bf16.mxu0 %vm1242_vm1, %v4621_v54 }
0x1abb   : > { %8906 = vmatmul.mubr.msk.bf16.gmra.mrb[124].mxu0 %vm1242_vm1, %v4623_v62 }
0x1b42   : > { %v12114_v63 = vpop.f32.mrb[112].mxu0 }
0x1b43   : > { %13964 = vst [vmem:[#allocation51_spill] sm:$0xff] %v12114_v63  ;;  %v12116_v15 = vpop.f32.mrb[113].mxu0 }
0x1b44   : > { %v12118_v9 = vpop.f32.mrb[114].mxu0 }
0x1b45   : > { %13965 = vst [vmem:[#allocation52_spill] sm:$0xff] %v12118_v9  ;;  %v12122_v53 = vpop.f32.mrb[115].mxu0 }
0x1b7b   : > { %v12126_v38 = vpop.f32.mrb[116].mxu0 }
0x1b7c   : > { %13966 = vst [vmem:[#allocation53_spill] sm:$0xff] %v12126_v38  ;;  %v12128_v39 = vpop.f32.mrb[117].mxu0 }
0x1b7d   : > { %13967 = vst [vmem:[#allocation54_spill] sm:$0xff] %v12128_v39  ;;  %v12130_v32 = vpop.f32.mrb[118].mxu0 }
0x1b7e   : > { %13968 = vst [vmem:[#allocation55_spill] sm:$0xff] %v12130_v32  ;;  %v12134_v31 = vpop.f32.mrb[119].mxu0 }
0x1b7f   : > { %13969 = vst [vmem:[#allocation56_spill] sm:$0xff] %v12134_v31 }
0x1b86   : > { %v8903_v51 = vpop.f32.mrb[120].mxu0 }
0x1b87   : > { %v4690_v26 = vpop.f32.mrb[121].mxu0  ;;  %v4727_v2 = vsel %vm1332_vm2, %v8903_v51, -inf }
0x1b88   : > { %4728 = vmax.xlane.f32.xlu0 %v4727_v2  ;;  %v8904_v3 = vpop.f32.mrb[122].mxu0  ;;  %v4721_v36 = vsel %vm1332_vm2, %v4690_v26, -inf }
0x1b89   : > { %v4693_v10 = vpop.f32.mrb[123].mxu0  ;;  %v4730_v42 = vsel %vm1332_vm2, %v8904_v3, -inf }
0x1b8a   : > { %v4724_v57 = vsel %vm1332_vm2, %v4693_v10, -inf }
0x1b8b   : > { %4725 = vmax.xlane.f32.xlu1 %v4724_v57 }
0x1b8c   : > { %4722 = vmax.xlane.f32.xlu0 %v4721_v36 }
0x1b8e   : > { %v8907_v17 = vpop.f32.mrb[124].mxu0 }
0x1b8f   : > { %v4706_v4 = vpop.f32.mrb[125].mxu0  ;;  %v4739_v30 = vsel %vm1332_vm2, %v8907_v17, -inf }
0x1b90   : > { %4731 = vmax.xlane.f32.xlu0 %v4730_v42  ;;  %v12142_v54 = vpop.f32.mrb[126].mxu0  ;;  %v4733_v2 = vsel %vm1332_vm2, %v4706_v4, -inf }
0x1b91   : > { %v12144_v62 = vpop.f32.mrb[127].mxu0  ;;  %v4742_v57 = vsel %vm1332_vm2, %v12142_v54, -inf }
0x1b92   : > { %v4736_v36 = vsel %vm1332_vm2, %v12144_v62, -inf }
0x1b94   : > { %4740 = vmax.xlane.f32.xlu0 %v4739_v30 }
0x1b98   : > { %4734 = vmax.xlane.f32.xlu0 %v4733_v2 }
0x1b9c   : > { %4815 = vrot.lane.b32.xlu1 %v10961_v61, %s10319_s22 }
0x1ba0   : > { %4817 = vrot.lane.b32.xlu1 %v10974_v49, %s10319_s22 }
0x1bae   : > { %4813 = vrot.lane.b32.xlu0 %v10963_v48, %s10319_s22 }
0x1bc4   : > { %4743 = vmax.xlane.f32.xlu1 %v4742_v57 }
0x1bc8   : > { %4737 = vmax.xlane.f32.xlu1 %v4736_v36 }
0x1bd9   : > { %4819 = vrot.lane.b32.xlu1 %v10972_v58, %s10319_s22 }
0x1c15   : > { %v4729_v30 = vpop.xlane.xlu0 %4728 }
0x1c16   : > { %v4747_v42 = vsub.f32 %v8903_v51, %v4729_v30 }
0x1c18   : > { %v4757_v61 = vmul.f32 1.442695, %v4747_v42  ;;  %v4726_v2 = vpop.xlane.xlu1 %4725 }
0x1c19   : > { %v4723_v8 = vpop.xlane.xlu0 %4722  ;;  %v4746_v56 = vsub.f32 %v4693_v10, %v4726_v2 }
0x1c1a   : > { %9917 = vpow2.f32 %v4757_v61  ;;  %v4745_v49 = vsub.f32 %v4690_v26, %v4723_v8 }
0x1c1b   : > { %v4755_v57 = vmul.f32 1.442695, %v4746_v56 }
0x1c1c   : > { %v4753_v48 = vmul.f32 1.442695, %v4745_v49  ;;  %v4816_v42 = vpop.permute.xlu1 %4815 }
0x1c1d   : > { %v4732_v20 = vpop.xlane.xlu0 %4731 }
0x1c1e   : > { %9919 = vpow2.f32 %v4753_v48  ;;  %v4748_v38 = vsub.f32 %v8904_v3, %v4732_v20 }
0x1c20   : > { %v4759_v32 = vmul.f32 1.442695, %v4748_v38  ;;  %v4818_v3 = vpop.permute.xlu1 %4817 }
0x1c21   : > { %v4741_v63 = vpop.xlane.xlu0 %4740 }
0x1c22   : > { %9921 = vpow2.f32 %v4759_v32  ;;  %v4751_v36 = vsub.f32 %v8907_v17, %v4741_v63 }
0x1c23   : > { %9923 = vpow2.f32 %v4755_v57 }
0x1c24   : > { %v12160_v9 = vpop.eup %9917  ;;  %v4765_v58 = vmul.f32 1.442695, %v4751_v36 }
0x1c25   : > { %v4735_v51 = vpop.xlane.xlu0 %4734  ;;  %v4775_v30 = vsel %vm1332_vm2, %v12160_v9, 0.0 }
0x1c26   : > { %9925 = vpow2.f32 %v4765_v58  ;;  %v4749_v8 = vsub.f32 %v4706_v4, %v4735_v51  ;;  %4776 = vadd.xlane.f32.xlu0 %v4775_v30 }
0x1c28   : > { %v9920_v26 = vpop.eup %9919  ;;  %v4761_v10 = vmul.f32 1.442695, %v4749_v8 }
0x1c29   : > { %v4814_v20 = vpop.permute.xlu0 %4813  ;;  %v4769_v38 = vsel %vm1332_vm2, %v9920_v26, 0.0 }
0x1c2a   : > { %9927 = vpow2.f32 %v4761_v10  ;;  %4770 = vadd.xlane.f32.xlu0 %v4769_v38  ;;  %8909 = vmatprep.subr.bf16.mxu1 %v4814_v20 }
0x1c2b   : > { %8910 = vmatpush3.bf16.msra.mxu1 %v4814_v20 }
0x1c2c   : > { %v9922_v63 = vpop.eup %9921  ;;  %8911 = vmatprep.subr.bf16.mxu1 %v4816_v42 }
0x1c2d   : > { %v4778_v32 = vsel %vm1332_vm2, %v9922_v63, 0.0  ;;  %v9924_v56 = vpop.eup %9923 }
0x1c2e   : > { %4779 = vadd.xlane.f32.xlu1 %v4778_v32  ;;  %v4772_v61 = vsel %vm1332_vm2, %v9924_v56, 0.0 }
0x1c2f   : > { %8912 = vmatpush3.bf16.msra.mxu1 %v4816_v42 }
0x1c30   : > { %v12166_v17 = vpop.eup %9925  ;;  %8913 = vmatprep.subr.bf16.mxu1 %v4818_v3 }
0x1c31   : > { %v4787_v4 = vsel %vm1332_vm2, %v12166_v17, 0.0 }
0x1c32   : > { %4788 = vadd.xlane.f32.xlu0 %v4787_v4  ;;  %4773 = vadd.xlane.f32.xlu1 %v4772_v61 }
0x1c33   : > { %8914 = vmatpush3.bf16.msra.mxu1 %v4818_v3 }
0x1c34   : > { %v12171_v2 = vpop.eup %9927 }
0x1c35   : > { %v4781_v49 = vsel %vm1332_vm2, %v12171_v2, 0.0 }
0x1c36   : > { %4782 = vadd.xlane.f32.xlu0 %v4781_v49 }
0x1c43   : > { %5032 = vrot.lane.b32.xlu1 %v10982_v24, %s10309_s26 }
0x1c47   : > { %5034 = vrot.lane.b32.xlu1 %v10992_v50, %s10309_s26 }
0x1c51   : > { %v4744_v48 = vpop.xlane.xlu1 %4743 }
0x1c52   : > { %v4752_v57 = vsub.f32 %v12142_v54, %v4744_v48 }
0x1c54   : > { %v4767_v36 = vmul.f32 1.442695, %v4752_v57 }
0x1c55   : > { %v4738_v58 = vpop.xlane.xlu1 %4737 }
0x1c56   : > { %9929 = vpow2.f32 %v4767_v36  ;;  %v4750_v51 = vsub.f32 %v12144_v62, %v4738_v58 }
0x1c58   : > { %v4763_v30 = vmul.f32 1.442695, %v4750_v51 }
0x1c59   : > { %v4820_v8 = vpop.permute.xlu1 %4819 }
0x1c5a   : > { %8915 = vmatprep.subr.bf16.mxu1 %v4820_v8  ;;  %9931 = vpow2.f32 %v4763_v30 }
0x1c5b   : > { %8916 = vmatpush3.bf16.msra.mxu1 %v4820_v8 }
0x1c60   : > { %v9930_v10 = vpop.eup %9929 }
0x1c61   : > { %v4790_v42 = vsel %vm1332_vm2, %v9930_v10, 0.0 }
0x1c62   : > { %4791 = vadd.xlane.f32.xlu0 %v4790_v42 }
0x1c64   : > { %v9932_v20 = vpop.eup %9931 }
0x1c65   : > { %v4784_v38 = vsel %vm1332_vm2, %v9932_v20, 0.0 }
0x1c6b   : > { %4785 = vadd.xlane.f32.xlu1 %v4784_v38 }
0x1c78   : > { %5030 = vrot.lane.b32.xlu0 %v10984_v0, %s10309_s26 }
0x1c7c   : > { %5036 = vrot.lane.b32.xlu1 %v10990_v27, %s10309_s26  ;;  %s10322_s26 = smov 24  }
0x1cb3   : > { %v4777_v54 = vpop.xlane.xlu0 %4776 }
0x1cb7   : > { %v4771_v32 = vpop.xlane.xlu0 %4770 }
0x1cbb   : > { %v4780_v62 = vpop.xlane.xlu1 %4779 }
0x1cbc   : > { %9933 = vrcp.f32 %v4780_v62 }
0x1cbd   : > { %9935 = vrcp.f32 %v4771_v32 }
0x1cbe   : > { %9937 = vrcp.f32 %v4777_v54 }
0x1cbf   : > { %v4774_v3 = vpop.xlane.xlu1 %4773  ;;  %v4789_v42 = vpop.xlane.xlu0 %4788 }
0x1cc0   : > { %9939 = vrcp.f32 %v4774_v3 }
0x1cc3   : > { %v4783_v38 = vpop.xlane.xlu0 %4782  ;;  %v5033_v62 = vpop.permute.xlu1 %5032 }
0x1cc6   : > { %v9934_v4 = vpop.eup %9933 }
0x1cc7   : > { %v9936_v61 = vpop.eup %9935  ;;  %v4804_v57 = vmul.f32 %v9934_v4, %v9922_v63  ;;  %v5035_v3 = vpop.permute.xlu1 %5034 }
0x1cc8   : > { %v9938_v49 = vpop.eup %9937  ;;  %v4801_v36 = vmul.f32 %v9936_v61, %v9920_v26  ;;  %v5054_v26 = vsel %vm1242_vm1, %v5033_v62, 0 }
0x1cc9   : > { %v4803_v51 = vmul.f32 %v9938_v49, %v12160_v9 }
0x1cca   : > { %v9940_v48 = vpop.eup %9939 }
0x1ccb   : > { %v4802_v58 = vmul.f32 %v9940_v48, %v9924_v56  ;;  %v4810_v8 = vpack.c.bf16 %v4804_v57, %v4803_v51  ;;  %v5057_v57 = vsel %vm1242_vm1, %v5035_v3, 0 }
0x1ccd   : > { %v4809_v30 = vpack.c.bf16 %v4802_v58, %v4801_v36 }
0x1ccf   : > { %8917 = vmatprep.mubr.msk.bf16.mxu1 %vm1332_vm2, %v4809_v30 }
0x1cd0   : > { %8918 = vmatmul.mubr.msk.bf16.vlgmr.msra.gmra.mrb[88].mxu1 %vm1332_vm2, %v4810_v8 }
0x1cef   : > { %v4792_v54 = vpop.xlane.xlu0 %4791 }
0x1cf0   : > { %9941 = vrcp.f32 %v4792_v54 }
0x1cf1   : > { %9943 = vrcp.f32 %v4783_v38 }
0x1cf2   : > { %9945 = vrcp.f32 %v4789_v42 }
0x1cf3   : > { %v5031_v32 = vpop.permute.xlu0 %5030 }
0x1cf4   : > { %9213 = vmatprep.subr.msk.bf16.mxu1 %vm1242_vm1, %v5031_v32  ;;  %v5051_v63 = vsel %vm1242_vm1, %v5031_v32, 0 }
0x1cf5   : > { %8926 = vmatpush3.bf16.xpose.msra.mxu1 %v5051_v63 }
0x1cf6   : > { %9214 = vmatprep.subr.msk.bf16.mxu1 %vm1242_vm1, %v5033_v62 }
0x1cf8   : > { %v4786_v9 = vpop.xlane.xlu1 %4785 }
0x1cf9   : > { %9947 = vrcp.f32 %v4786_v9 }
0x1cfa   : > { %v9942_v56 = vpop.eup %9941 }
0x1cfb   : > { %v9944_v4 = vpop.eup %9943  ;;  %v4808_v48 = vmul.f32 %v9942_v56, %v9930_v10 }
0x1cfc   : > { %v9946_v61 = vpop.eup %9945  ;;  %v4805_v36 = vmul.f32 %v9944_v4, %v12171_v2  ;;  %v5037_v51 = vpop.permute.xlu1 %5036 }
0x1cfd   : > { %8928 = vmatpush3.bf16.xpose.msra.mxu1 %v5054_v26  ;;  %v4807_v30 = vmul.f32 %v9946_v61, %v12166_v17  ;;  %v5060_v10 = vsel %vm1242_vm1, %v5037_v51, 0 }
0x1cfe   : > { %9215 = vmatprep.subr.msk.bf16.mxu1 %vm1242_vm1, %v5035_v3 }
0x1cff   : > { %v4812_v42 = vpack.c.bf16 %v4808_v48, %v4807_v30 }
0x1d03   : > { %v9948_v49 = vpop.eup %9947 }
0x1d04   : > { %v4806_v58 = vmul.f32 %v9948_v49, %v9932_v20 }
0x1d05   : > { %8930 = vmatpush3.bf16.xpose.msra.mxu1 %v5057_v57 }
0x1d06   : > { %9216 = vmatprep.subr.msk.bf16.mxu1 %vm1242_vm1, %v5037_v51  ;;  %v4811_v8 = vpack.c.bf16 %v4806_v58, %v4805_v36 }
0x1d08   : > { %8921 = vmatprep.mubr.msk.bf16.mxu1 %vm1332_vm2, %v4811_v8 }
0x1d09   : > { %8922 = vmatmul.mubr.msk.bf16.gmra.mrb[92].mxu1 %vm1332_vm2, %v4812_v42 }
0x1d0a   : > { %8933 = vmatprep.mubr.msk.bf16.mxu1 %vm1242_vm1, %v10984_v0 }
0x1d0d   : > { %8932 = vmatpush3.bf16.xpose.msra.mxu1 %v5060_v10 }
0x1d14   : > { %8934 = vmatmul.mubr.msk.bf16.vlgmr.msra.gmra.mrb[96].mxu1 %vm1242_vm1, %v10982_v24 }
0x1d15   : > { %8937 = vmatprep.mubr.msk.bf16.mxu1 %vm1242_vm1, %v10992_v50 }
0x1d1c   : > { %8938 = vmatmul.mubr.msk.bf16.gmra.mrb[100].mxu1 %vm1242_vm1, %v10990_v27 }
0x1da3   : > { %v12210_v17 = vpop.f32.mrb[88].mxu1 }
0x1da4   : > { %13970 = vst [vmem:[#allocation57_spill] sm:$0xff] %v12210_v17  ;;  %v12212_v2 = vpop.f32.mrb[89].mxu1 }
0x1da5   : > { %v12214_v20 = vpop.f32.mrb[90].mxu1 }
0x1da6   : > { %13971 = vst [vmem:[#allocation58_spill] sm:$0xff] %v12214_v20  ;;  %v12218_v62 = vpop.f32.mrb[91].mxu1 }
0x1ddc   : > { %v12222_v32 = vpop.f32.mrb[92].mxu1 }
0x1ddd   : > { %13972 = vst [vmem:[#allocation59_spill] sm:$0xff] %v12222_v32  ;;  %v12224_v3 = vpop.f32.mrb[93].mxu1 }
0x1dde   : > { %13973 = vst [vmem:[#allocation60_spill] sm:$0xff] %v12224_v3  ;;  %v12226_v63 = vpop.f32.mrb[94].mxu1 }
0x1ddf   : > { %13974 = vst [vmem:[#allocation61_spill] sm:$0xff] %v12226_v63  ;;  %v12230_v26 = vpop.f32.mrb[95].mxu1 }
0x1de0   : > { %13975 = vst [vmem:[#allocation62_spill] sm:$0xff] %v12230_v26 }
0x1de7   : > { %v8935_v4 = vpop.f32.mrb[96].mxu1 }
0x1de8   : > { %v5096_v61 = vpop.f32.mrb[97].mxu1  ;;  %v5133_v49 = vsel %vm1332_vm2, %v8935_v4, -inf }
0x1de9   : > { %5134 = vmax.xlane.f32.xlu0 %v5133_v49  ;;  %v8936_v48 = vpop.f32.mrb[98].mxu1  ;;  %v5127_v58 = vsel %vm1332_vm2, %v5096_v61, -inf }
0x1dea   : > { %v5099_v57 = vpop.f32.mrb[99].mxu1  ;;  %v5136_v8 = vsel %vm1332_vm2, %v8936_v48, -inf }
0x1deb   : > { %v5130_v36 = vsel %vm1332_vm2, %v5099_v57, -inf }
0x1dec   : > { %5131 = vmax.xlane.f32.xlu1 %v5130_v36 }
0x1ded   : > { %5128 = vmax.xlane.f32.xlu0 %v5127_v58 }
0x1def   : > { %v8939_v51 = vpop.f32.mrb[100].mxu1 }
0x1df0   : > { %v5112_v30 = vpop.f32.mrb[101].mxu1  ;;  %v5145_v9 = vsel %vm1332_vm2, %v8939_v51, -inf }
0x1df1   : > { %5137 = vmax.xlane.f32.xlu0 %v5136_v8  ;;  %v12238_v42 = vpop.f32.mrb[102].mxu1  ;;  %v5139_v49 = vsel %vm1332_vm2, %v5112_v30, -inf }
0x1df2   : > { %v12240_v10 = vpop.f32.mrb[103].mxu1  ;;  %v5148_v36 = vsel %vm1332_vm2, %v12238_v42, -inf }
0x1df3   : > { %v5142_v58 = vsel %vm1332_vm2, %v12240_v10, -inf }
0x1df5   : > { %5146 = vmax.xlane.f32.xlu0 %v5145_v9 }
0x1df9   : > { %5140 = vmax.xlane.f32.xlu0 %v5139_v49 }
0x1dfd   : > { %5221 = vrot.lane.b32.xlu1 %v10982_v24, %s10312_s15 }
0x1e01   : > { %5223 = vrot.lane.b32.xlu1 %v10992_v50, %s10312_s15 }
0x1e0f   : > { %5219 = vrot.lane.b32.xlu0 %v10984_v0, %s10312_s15 }
0x1e25   : > { %5149 = vmax.xlane.f32.xlu1 %v5148_v36 }
0x1e29   : > { %5143 = vmax.xlane.f32.xlu1 %v5142_v58 }
0x1e3a   : > { %5225 = vrot.lane.b32.xlu1 %v10990_v27, %s10312_s15 }
0x1e76   : > { %v5135_v9 = vpop.xlane.xlu0 %5134 }
0x1e77   : > { %v5153_v8 = vsub.f32 %v8935_v4, %v5135_v9 }
0x1e79   : > { %v5163_v49 = vmul.f32 1.442695, %v5153_v8  ;;  %v5132_v38 = vpop.xlane.xlu1 %5131 }
0x1e7a   : > { %v5129_v56 = vpop.xlane.xlu0 %5128  ;;  %v5152_v32 = vsub.f32 %v5099_v57, %v5132_v38 }
0x1e7b   : > { %9949 = vpow2.f32 %v5163_v49  ;;  %v5151_v54 = vsub.f32 %v5096_v61, %v5129_v56 }
0x1e7c   : > { %v5161_v36 = vmul.f32 1.442695, %v5152_v32 }
0x1e7d   : > { %v5159_v63 = vmul.f32 1.442695, %v5151_v54 }
0x1e7e   : > { %v5138_v17 = vpop.xlane.xlu0 %5137 }
0x1e7f   : > { %9951 = vpow2.f32 %v5159_v63  ;;  %v5154_v20 = vsub.f32 %v8936_v48, %v5138_v17  ;;  %v5222_v17 = vpop.permute.xlu1 %5221 }
0x1e81   : > { %v5165_v3 = vmul.f32 1.442695, %v5154_v20 }
0x1e82   : > { %v5147_v26 = vpop.xlane.xlu0 %5146 }
0x1e83   : > { %9953 = vpow2.f32 %v5165_v3  ;;  %v5157_v58 = vsub.f32 %v8939_v51, %v5147_v26 }
0x1e84   : > { %9955 = vpow2.f32 %v5161_v36 }
0x1e85   : > { %v12256_v39 = vpop.eup %9949  ;;  %v5171_v31 = vmul.f32 1.442695, %v5157_v58 }
0x1e86   : > { %v5141_v4 = vpop.xlane.xlu0 %5140  ;;  %v5181_v9 = vsel %vm1332_vm2, %v12256_v39, 0.0 }
0x1e87   : > { %9957 = vpow2.f32 %v5171_v31  ;;  %v5155_v56 = vsub.f32 %v5112_v30, %v5141_v4  ;;  %5182 = vadd.xlane.f32.xlu0 %v5181_v9  ;;  %v5224_v31 = vpop.permute.xlu1 %5223 }
0x1e89   : > { %v12260_v38 = vpop.eup %9951  ;;  %v5167_v54 = vmul.f32 1.442695, %v5155_v56 }
0x1e8a   : > { %v5220_v32 = vpop.permute.xlu0 %5219  ;;  %v5175_v20 = vsel %vm1332_vm2, %v12260_v38, 0.0 }
0x1e8b   : > { %9959 = vpow2.f32 %v5167_v54  ;;  %5176 = vadd.xlane.f32.xlu0 %v5175_v20  ;;  %8941 = vmatprep.subr.bf16.mxu0 %v5220_v32 }
0x1e8c   : > { %8942 = vmatpush3.bf16.msra.mxu0 %v5220_v32 }
0x1e8d   : > { %v9954_v3 = vpop.eup %9953  ;;  %8943 = vmatprep.subr.bf16.mxu0 %v5222_v17 }
0x1e8e   : > { %v5184_v63 = vsel %vm1332_vm2, %v9954_v3, 0.0  ;;  %v9956_v26 = vpop.eup %9955 }
0x1e8f   : > { %5185 = vadd.xlane.f32.xlu1 %v5184_v63  ;;  %v5178_v57 = vsel %vm1332_vm2, %v9956_v26, 0.0 }
0x1e90   : > { %8944 = vmatpush3.bf16.msra.mxu0 %v5222_v17 }
0x1e91   : > { %v12265_v61 = vpop.eup %9957  ;;  %8945 = vmatprep.subr.bf16.mxu0 %v5224_v31 }
0x1e92   : > { %v5193_v48 = vsel %vm1332_vm2, %v12265_v61, 0.0 }
0x1e93   : > { %5194 = vadd.xlane.f32.xlu0 %v5193_v48  ;;  %5179 = vadd.xlane.f32.xlu1 %v5178_v57 }
0x1e94   : > { %8946 = vmatpush3.bf16.msra.mxu0 %v5224_v31 }
0x1e95   : > { %v12270_v51 = vpop.eup %9959 }
0x1e96   : > { %v5187_v30 = vsel %vm1332_vm2, %v12270_v51, 0.0 }
0x1e97   : > { %5188 = vadd.xlane.f32.xlu0 %v5187_v30 }
0x1ea4   : > { %5318 = vrot.lane.b32.xlu1 %v10982_v24, %s10310_s29 }
0x1ea8   : > { %5320 = vrot.lane.b32.xlu1 %v10992_v50, %s10310_s29 }
0x1eb2   : > { %v5150_v8 = vpop.xlane.xlu1 %5149 }
0x1eb3   : > { %v5158_v49 = vsub.f32 %v12238_v42, %v5150_v8 }
0x1eb5   : > { %v5173_v36 = vmul.f32 1.442695, %v5158_v49 }
0x1eb6   : > { %v5144_v58 = vpop.xlane.xlu1 %5143 }
0x1eb7   : > { %9961 = vpow2.f32 %v5173_v36  ;;  %v5156_v4 = vsub.f32 %v12240_v10, %v5144_v58 }
0x1eb9   : > { %v5169_v9 = vmul.f32 1.442695, %v5156_v4 }
0x1eba   : > { %v5226_v56 = vpop.permute.xlu1 %5225 }
0x1ebb   : > { %8947 = vmatprep.subr.bf16.mxu0 %v5226_v56  ;;  %9963 = vpow2.f32 %v5169_v9 }
0x1ebc   : > { %8948 = vmatpush3.bf16.msra.mxu0 %v5226_v56 }
0x1ec1   : > { %v9962_v54 = vpop.eup %9961 }
0x1ec2   : > { %v5196_v17 = vsel %vm1332_vm2, %v9962_v54, 0.0 }
0x1ec3   : > { %5197 = vadd.xlane.f32.xlu0 %v5196_v17 }
0x1ec5   : > { %v9964_v32 = vpop.eup %9963 }
0x1ec6   : > { %v5190_v20 = vsel %vm1332_vm2, %v9964_v32, 0.0 }
0x1ecc   : > { %5191 = vadd.xlane.f32.xlu1 %v5190_v20 }
0x1ed9   : > { %5316 = vrot.lane.b32.xlu0 %v10984_v0, %s10310_s29 }
0x1edd   : > { %5308 = vrot.lane.b32.xlu0 %v10984_v0, %s10311_s30  ;;  %5322 = vrot.lane.b32.xlu1 %v10990_v27, %s10310_s29  ;;  %s13697_s29 = scalar_lea.vmem %s13842_s13, %s8173_s28 }
0x1ee1   : > { %5312 = vrot.lane.b32.xlu0 %v10992_v50, %s10311_s30  ;;  %5310 = vrot.lane.b32.xlu1 %v10982_v24, %s10311_s30 }
0x1ee5   : > { %5314 = vrot.lane.b32.xlu1 %v10990_v27, %s10311_s30 }
0x1f14   : > { %v5183_v42 = vpop.xlane.xlu0 %5182 }
0x1f18   : > { %v5177_v63 = vpop.xlane.xlu0 %5176 }
0x1f1c   : > { %v5186_v10 = vpop.xlane.xlu1 %5185 }
0x1f1d   : > { %9965 = vrcp.f32 %v5186_v10 }
0x1f1e   : > { %9967 = vrcp.f32 %v5177_v63 }
0x1f1f   : > { %9969 = vrcp.f32 %v5183_v42 }
0x1f20   : > { %v5180_v31 = vpop.xlane.xlu1 %5179  ;;  %v5195_v17 = vpop.xlane.xlu0 %5194 }
0x1f21   : > { %9971 = vrcp.f32 %v5180_v31 }
0x1f24   : > { %v5189_v20 = vpop.xlane.xlu0 %5188  ;;  %v5319_v42 = vpop.permute.xlu1 %5318 }
0x1f27   : > { %v9966_v48 = vpop.eup %9965 }
0x1f28   : > { %v9968_v57 = vpop.eup %9967  ;;  %v5210_v49 = vmul.f32 %v9966_v48, %v9954_v3  ;;  %v5321_v31 = vpop.permute.xlu1 %5320 }
0x1f29   : > { %v9970_v30 = vpop.eup %9969  ;;  %v5207_v36 = vmul.f32 %v9968_v57, %v12260_v38  ;;  %v5340_v38 = vsel %vm1242_vm1, %v5319_v42, 0 }
0x1f2a   : > { %v5209_v4 = vmul.f32 %v9970_v30, %v12256_v39 }
0x1f2b   : > { %v9972_v8 = vpop.eup %9971 }
0x1f2c   : > { %v5208_v58 = vmul.f32 %v9972_v8, %v9956_v26  ;;  %v5216_v56 = vpack.c.bf16 %v5210_v49, %v5209_v4  ;;  %v5343_v49 = vsel %vm1242_vm1, %v5321_v31, 0 }
0x1f2e   : > { %v5215_v9 = vpack.c.bf16 %v5208_v58, %v5207_v36 }
0x1f30   : > { %8949 = vmatprep.mubr.msk.bf16.mxu0 %vm1332_vm2, %v5215_v9 }
0x1f31   : > { %8950 = vmatmul.mubr.msk.bf16.vlgmr.msra.gmra.mrb[128].mxu0 %vm1332_vm2, %v5216_v56 }
0x1f50   : > { %v5198_v10 = vpop.xlane.xlu0 %5197 }
0x1f51   : > { %9973 = vrcp.f32 %v5198_v10 }
0x1f52   : > { %9975 = vrcp.f32 %v5189_v20 }
0x1f53   : > { %9977 = vrcp.f32 %v5195_v17 }
0x1f54   : > { %v5317_v63 = vpop.permute.xlu0 %5316 }
0x1f55   : > { %9217 = vmatprep.subr.msk.bf16.mxu0 %vm1242_vm1, %v5317_v63  ;;  %v5337_v3 = vsel %vm1242_vm1, %v5317_v63, 0 }
0x1f56   : > { %8958 = vmatpush3.bf16.xpose.msra.mxu0 %v5337_v3 }
0x1f57   : > { %9218 = vmatprep.subr.msk.bf16.mxu0 %vm1242_vm1, %v5319_v42 }
0x1f58   : > { %v5309_v20 = vpop.permute.xlu0 %5308 }
0x1f59   : > { %v5192_v39 = vpop.xlane.xlu1 %5191 }
0x1f5a   : > { %9979 = vrcp.f32 %v5192_v39 }
0x1f5b   : > { %v9974_v26 = vpop.eup %9973 }
0x1f5c   : > { %v9976_v48 = vpop.eup %9975  ;;  %v5214_v8 = vmul.f32 %v9974_v26, %v9962_v54 }
0x1f5d   : > { %v9978_v57 = vpop.eup %9977  ;;  %v5211_v36 = vmul.f32 %v9976_v48, %v12270_v51  ;;  %v5323_v4 = vpop.permute.xlu1 %5322 }
0x1f5e   : > { %8960 = vmatpush3.bf16.xpose.msra.mxu0 %v5340_v38  ;;  %v5213_v9 = vmul.f32 %v9978_v57, %v12265_v61  ;;  %v5346_v54 = vsel %vm1242_vm1, %v5323_v4, 0 }
0x1f5f   : > { %9219 = vmatprep.subr.msk.bf16.mxu0 %vm1242_vm1, %v5321_v31 }
0x1f60   : > { %v5218_v17 = vpack.c.bf16 %v5214_v8, %v5213_v9 }
0x1f61   : > { %v5311_v51 = vpop.permute.xlu1 %5310 }
0x1f64   : > { %v9980_v30 = vpop.eup %9979 }
0x1f65   : > { %v5212_v58 = vmul.f32 %v9980_v30, %v9964_v32  ;;  %v5313_v32 = vpop.permute.xlu0 %5312  ;;  %v5315_v61 = vpop.permute.xlu1 %5314 }
0x1f66   : > { %8962 = vmatpush3.bf16.xpose.msra.mxu0 %v5343_v49 }
0x1f67   : > { %9220 = vmatprep.subr.msk.bf16.mxu0 %vm1242_vm1, %v5323_v4  ;;  %v5217_v56 = vpack.c.bf16 %v5212_v58, %v5211_v36 }
0x1f69   : > { %8953 = vmatprep.mubr.msk.bf16.mxu0 %vm1332_vm2, %v5217_v56 }
0x1f6a   : > { %8954 = vmatmul.mubr.msk.bf16.gmra.mrb[132].mxu0 %vm1332_vm2, %v5218_v17 }
0x1f6b   : > { %8965 = vmatprep.mubr.msk.bf16.mxu0 %vm1242_vm1, %v5309_v20 }
0x1f6e   : > { %8964 = vmatpush3.bf16.xpose.msra.mxu0 %v5346_v54 }
0x1f75   : > { %8966 = vmatmul.mubr.msk.bf16.vlgmr.msra.gmra.mrb[136].mxu0 %vm1242_vm1, %v5311_v51 }
0x1f76   : > { %8969 = vmatprep.mubr.msk.bf16.mxu0 %vm1242_vm1, %v5313_v32 }
0x1f7d   : > { %8970 = vmatmul.mubr.msk.bf16.gmra.mrb[140].mxu0 %vm1242_vm1, %v5315_v61 }
0x2004   : > { %v12314_v42 = vpop.f32.mrb[128].mxu0 }
0x2005   : > { %13976 = vst [vmem:[#allocation63_spill] sm:$0xff] %v12314_v42  ;;  %v12316_v10 = vpop.f32.mrb[129].mxu0 }
0x2006   : > { %13977 = vst [vmem:[#allocation64_spill] sm:$0xff] %v12316_v10  ;;  %v12318_v63 = vpop.f32.mrb[130].mxu0 }
0x2007   : > { %13978 = vst [vmem:[#allocation65_spill] sm:$0xff] %v12318_v63  ;;  %v12320_v31 = vpop.f32.mrb[131].mxu0 }
0x2008   : > { %13979 = vst [vmem:[#allocation66_spill] sm:$0xff] %v12320_v31 }
0x203d   : > { %v12322_v3 = vpop.f32.mrb[132].mxu0 }
0x203e   : > { %13980 = vst [vmem:[#allocation67_spill] sm:$0xff] %v12322_v3  ;;  %v12324_v39 = vpop.f32.mrb[133].mxu0 }
0x203f   : > { %13981 = vst [vmem:[#allocation68_spill] sm:$0xff] %v12324_v39  ;;  %v12326_v38 = vpop.f32.mrb[134].mxu0 }
0x2040   : > { %13982 = vst [vmem:[#allocation69_spill] sm:$0xff] %v12326_v38  ;;  %v12328_v26 = vpop.f32.mrb[135].mxu0 }
0x2041   : > { %13983 = vst [vmem:[#allocation70_spill] sm:$0xff] %v12328_v26 }
0x2048   : > { %v8967_v48 = vpop.f32.mrb[136].mxu0 }
0x2049   : > { %v5382_v57 = vpop.f32.mrb[137].mxu0  ;;  %v5419_v30 = vsel %vm1332_vm2, %v8967_v48, -inf }
0x204a   : > { %5420 = vmax.xlane.f32.xlu0 %v5419_v30  ;;  %v8968_v8 = vpop.f32.mrb[138].mxu0  ;;  %v5413_v58 = vsel %vm1332_vm2, %v5382_v57, -inf }
0x204b   : > { %v5385_v49 = vpop.f32.mrb[139].mxu0  ;;  %v5422_v56 = vsel %vm1332_vm2, %v8968_v8, -inf }
0x204c   : > { %v5416_v36 = vsel %vm1332_vm2, %v5385_v49, -inf }
0x204d   : > { %5417 = vmax.xlane.f32.xlu1 %v5416_v36 }
0x204e   : > { %5414 = vmax.xlane.f32.xlu0 %v5413_v58 }
0x2050   : > { %v8971_v4 = vpop.f32.mrb[140].mxu0 }
0x2051   : > { %v5398_v9 = vpop.f32.mrb[141].mxu0  ;;  %v5431_v54 = vsel %vm1332_vm2, %v8971_v4, -inf }
0x2052   : > { %5423 = vmax.xlane.f32.xlu0 %v5422_v56  ;;  %v12334_v17 = vpop.f32.mrb[142].mxu0  ;;  %v5425_v51 = vsel %vm1332_vm2, %v5398_v9, -inf }
0x2053   : > { %v12336_v20 = vpop.f32.mrb[143].mxu0  ;;  %v5434_v32 = vsel %vm1332_vm2, %v12334_v17, -inf }
0x2054   : > { %v5428_v61 = vsel %vm1332_vm2, %v12336_v20, -inf }
0x2056   : > { %5432 = vmax.xlane.f32.xlu0 %v5431_v54 }
0x205a   : > { %5426 = vmax.xlane.f32.xlu0 %v5425_v51 }
0x205e   : > { %5507 = vrot.lane.b32.xlu1 %v10982_v24, %s10313_s16 }
0x2062   : > { %5509 = vrot.lane.b32.xlu1 %v10992_v50, %s10313_s16 }
0x2070   : > { %5505 = vrot.lane.b32.xlu0 %v10984_v0, %s10313_s16 }
0x2086   : > { %5435 = vmax.xlane.f32.xlu1 %v5434_v32 }
0x208a   : > { %5429 = vmax.xlane.f32.xlu1 %v5428_v61 }
0x209b   : > { %5511 = vrot.lane.b32.xlu1 %v10990_v27, %s10313_s16 }
0x20d7   : > { %v5421_v30 = vpop.xlane.xlu0 %5420 }
0x20d8   : > { %v5439_v36 = vsub.f32 %v8967_v48, %v5421_v30 }
0x20da   : > { %v5449_v58 = vmul.f32 1.442695, %v5439_v36  ;;  %v5418_v56 = vpop.xlane.xlu1 %5417 }
0x20db   : > { %v5415_v54 = vpop.xlane.xlu0 %5414  ;;  %v5438_v3 = vsub.f32 %v5385_v49, %v5418_v56 }
0x20dc   : > { %9981 = vpow2.f32 %v5449_v58  ;;  %v5437_v51 = vsub.f32 %v5382_v57, %v5415_v54 }
0x20dd   : > { %v5447_v32 = vmul.f32 1.442695, %v5438_v3 }
0x20de   : > { %v5445_v38 = vmul.f32 1.442695, %v5437_v51 }
0x20df   : > { %v5424_v39 = vpop.xlane.xlu0 %5423 }
0x20e0   : > { %9983 = vpow2.f32 %v5445_v38  ;;  %v5440_v26 = vsub.f32 %v8968_v8, %v5424_v39  ;;  %v5508_v39 = vpop.permute.xlu1 %5507 }
0x20e2   : > { %v5451_v42 = vmul.f32 1.442695, %v5440_v26 }
0x20e3   : > { %v5433_v63 = vpop.xlane.xlu0 %5432 }
0x20e4   : > { %9985 = vpow2.f32 %v5451_v42  ;;  %v5443_v61 = vsub.f32 %v8971_v4, %v5433_v63 }
0x20e5   : > { %9987 = vpow2.f32 %v5447_v32 }
0x20e6   : > { %v12352_v31 = vpop.eup %9981  ;;  %v5457_v10 = vmul.f32 1.442695, %v5443_v61 }
0x20e7   : > { %v5427_v48 = vpop.xlane.xlu0 %5426  ;;  %v5467_v30 = vsel %vm1332_vm2, %v12352_v31, 0.0 }
0x20e8   : > { %9989 = vpow2.f32 %v5457_v10  ;;  %v5441_v57 = vsub.f32 %v5398_v9, %v5427_v48  ;;  %5468 = vadd.xlane.f32.xlu0 %v5467_v30  ;;  %v5510_v10 = vpop.permute.xlu1 %5509 }
0x20ea   : > { %v12356_v49 = vpop.eup %9983  ;;  %v5453_v38 = vmul.f32 1.442695, %v5441_v57 }
0x20eb   : > { %v5506_v3 = vpop.permute.xlu0 %5505  ;;  %v5461_v42 = vsel %vm1332_vm2, %v12356_v49, 0.0 }
0x20ec   : > { %9991 = vpow2.f32 %v5453_v38  ;;  %5462 = vadd.xlane.f32.xlu0 %v5461_v42  ;;  %8973 = vmatprep.subr.bf16.mxu1 %v5506_v3 }
0x20ed   : > { %8974 = vmatpush3.bf16.msra.mxu1 %v5506_v3 }
0x20ee   : > { %v9986_v63 = vpop.eup %9985  ;;  %8975 = vmatprep.subr.bf16.mxu1 %v5508_v39 }
0x20ef   : > { %v5470_v26 = vsel %vm1332_vm2, %v9986_v63, 0.0  ;;  %v9988_v8 = vpop.eup %9987 }
0x20f0   : > { %5471 = vadd.xlane.f32.xlu1 %v5470_v26  ;;  %v5464_v36 = vsel %vm1332_vm2, %v9988_v8, 0.0 }
0x20f1   : > { %8976 = vmatpush3.bf16.msra.mxu1 %v5508_v39 }
0x20f2   : > { %v12361_v4 = vpop.eup %9989  ;;  %8977 = vmatprep.subr.bf16.mxu1 %v5510_v10 }
0x20f3   : > { %v5479_v9 = vsel %vm1332_vm2, %v12361_v4, 0.0 }
0x20f4   : > { %5480 = vadd.xlane.f32.xlu0 %v5479_v9  ;;  %5465 = vadd.xlane.f32.xlu1 %v5464_v36 }
0x20f5   : > { %8978 = vmatpush3.bf16.msra.mxu1 %v5510_v10 }
0x20f6   : > { %v12366_v58 = vpop.eup %9991 }
0x20f7   : > { %v5473_v56 = vsel %vm1332_vm2, %v12366_v58, 0.0 }
0x20f8   : > { %5474 = vadd.xlane.f32.xlu0 %v5473_v56 }
0x2105   : > { %5604 = vrot.lane.b32.xlu1 %v10982_v24, %s10314_s17 }
0x2109   : > { %5606 = vrot.lane.b32.xlu1 %v10992_v50, %s10314_s17 }
0x2113   : > { %v5436_v54 = vpop.xlane.xlu1 %5435 }
0x2114   : > { %v5444_v51 = vsub.f32 %v12334_v17, %v5436_v54 }
0x2116   : > { %v5459_v32 = vmul.f32 1.442695, %v5444_v51 }
0x2117   : > { %v5430_v61 = vpop.xlane.xlu1 %5429 }
0x2118   : > { %9993 = vpow2.f32 %v5459_v32  ;;  %v5442_v48 = vsub.f32 %v12336_v20, %v5430_v61 }
0x211a   : > { %v5455_v30 = vmul.f32 1.442695, %v5442_v48 }
0x211b   : > { %v5512_v57 = vpop.permute.xlu1 %5511 }
0x211c   : > { %8979 = vmatprep.subr.bf16.mxu1 %v5512_v57  ;;  %9995 = vpow2.f32 %v5455_v30 }
0x211d   : > { %8980 = vmatpush3.bf16.msra.mxu1 %v5512_v57 }
0x2122   : > { %v9994_v38 = vpop.eup %9993 }
0x2123   : > { %v5482_v39 = vsel %vm1332_vm2, %v9994_v38, 0.0 }
0x2124   : > { %5483 = vadd.xlane.f32.xlu0 %v5482_v39 }
0x2126   : > { %v9996_v3 = vpop.eup %9995 }
0x2127   : > { %v5476_v42 = vsel %vm1332_vm2, %v9996_v3, 0.0 }
0x212d   : > { %5477 = vadd.xlane.f32.xlu1 %v5476_v42 }
0x213a   : > { %5602 = vrot.lane.b32.xlu0 %v10984_v0, %s10314_s17 }
0x213e   : > { %5594 = vrot.lane.b32.xlu0 %v10984_v0, %s10315_s18  ;;  %5608 = vrot.lane.b32.xlu1 %v10990_v27, %s10314_s17 }
0x2142   : > { %5598 = vrot.lane.b32.xlu0 %v10992_v50, %s10315_s18  ;;  %5596 = vrot.lane.b32.xlu1 %v10982_v24, %s10315_s18 }
0x2146   : > { %5600 = vrot.lane.b32.xlu1 %v10990_v27, %s10315_s18 }
0x2175   : > { %v5469_v17 = vpop.xlane.xlu0 %5468 }
0x2179   : > { %v5463_v26 = vpop.xlane.xlu0 %5462 }
0x217d   : > { %v5472_v20 = vpop.xlane.xlu1 %5471 }
0x217e   : > { %9997 = vrcp.f32 %v5472_v20 }
0x217f   : > { %9999 = vrcp.f32 %v5463_v26 }
0x2180   : > { %10001 = vrcp.f32 %v5469_v17 }
0x2181   : > { %v5466_v10 = vpop.xlane.xlu1 %5465  ;;  %v5481_v39 = vpop.xlane.xlu0 %5480 }
0x2182   : > { %10003 = vrcp.f32 %v5466_v10 }
0x2185   : > { %v5475_v42 = vpop.xlane.xlu0 %5474  ;;  %v5605_v17 = vpop.permute.xlu1 %5604 }
0x2188   : > { %v9998_v9 = vpop.eup %9997 }
0x2189   : > { %v10000_v36 = vpop.eup %9999  ;;  %v5496_v51 = vmul.f32 %v9998_v9, %v9986_v63  ;;  %v5607_v10 = vpop.permute.xlu1 %5606 }
0x218a   : > { %v10002_v56 = vpop.eup %10001  ;;  %v5493_v32 = vmul.f32 %v10000_v36, %v12356_v49  ;;  %v5626_v49 = vsel %vm1242_vm1, %v5605_v17, 0 }
0x218b   : > { %v5495_v48 = vmul.f32 %v10002_v56, %v12352_v31 }
0x218c   : > { %v10004_v54 = vpop.eup %10003 }
0x218d   : > { %v5494_v61 = vmul.f32 %v10004_v54, %v9988_v8  ;;  %v5502_v57 = vpack.c.bf16 %v5496_v51, %v5495_v48  ;;  %v5629_v51 = vsel %vm1242_vm1, %v5607_v10, 0 }
0x218f   : > { %v5501_v30 = vpack.c.bf16 %v5494_v61, %v5493_v32 }
0x2191   : > { %8981 = vmatprep.mubr.msk.bf16.mxu1 %vm1332_vm2, %v5501_v30 }
0x2192   : > { %8982 = vmatmul.mubr.msk.bf16.vlgmr.msra.gmra.mrb[104].mxu1 %vm1332_vm2, %v5502_v57 }
0x21b1   : > { %v5484_v20 = vpop.xlane.xlu0 %5483 }
0x21b2   : > { %10005 = vrcp.f32 %v5484_v20 }
0x21b3   : > { %10007 = vrcp.f32 %v5475_v42 }
0x21b4   : > { %10009 = vrcp.f32 %v5481_v39 }
0x21b5   : > { %v5603_v26 = vpop.permute.xlu0 %5602 }
0x21b6   : > { %9221 = vmatprep.subr.msk.bf16.mxu1 %vm1242_vm1, %v5603_v26  ;;  %v5623_v63 = vsel %vm1242_vm1, %v5603_v26, 0 }
0x21b7   : > { %8990 = vmatpush3.bf16.xpose.msra.mxu1 %v5623_v63 }
0x21b8   : > { %9222 = vmatprep.subr.msk.bf16.mxu1 %vm1242_vm1, %v5605_v17 }
0x21b9   : > { %v5595_v42 = vpop.permute.xlu0 %5594 }
0x21ba   : > { %v5478_v31 = vpop.xlane.xlu1 %5477 }
0x21bb   : > { %10011 = vrcp.f32 %v5478_v31 }
0x21bc   : > { %v10006_v8 = vpop.eup %10005 }
0x21bd   : > { %v10008_v9 = vpop.eup %10007  ;;  %v5500_v54 = vmul.f32 %v10006_v8, %v9994_v38 }
0x21be   : > { %v10010_v36 = vpop.eup %10009  ;;  %v5497_v32 = vmul.f32 %v10008_v9, %v12366_v58  ;;  %v5609_v48 = vpop.permute.xlu1 %5608 }
0x21bf   : > { %8992 = vmatpush3.bf16.xpose.msra.mxu1 %v5626_v49  ;;  %v5499_v30 = vmul.f32 %v10010_v36, %v12361_v4  ;;  %v5632_v38 = vsel %vm1242_vm1, %v5609_v48, 0 }
0x21c0   : > { %9223 = vmatprep.subr.msk.bf16.mxu1 %vm1242_vm1, %v5607_v10 }
0x21c1   : > { %v5504_v39 = vpack.c.bf16 %v5500_v54, %v5499_v30 }
0x21c2   : > { %v5597_v58 = vpop.permute.xlu1 %5596 }
0x21c5   : > { %v10012_v56 = vpop.eup %10011 }
0x21c6   : > { %v5498_v61 = vmul.f32 %v10012_v56, %v9996_v3  ;;  %v5599_v3 = vpop.permute.xlu0 %5598  ;;  %v5601_v4 = vpop.permute.xlu1 %5600 }
0x21c7   : > { %8994 = vmatpush3.bf16.xpose.msra.mxu1 %v5629_v51 }
0x21c8   : > { %9224 = vmatprep.subr.msk.bf16.mxu1 %vm1242_vm1, %v5609_v48  ;;  %v5503_v57 = vpack.c.bf16 %v5498_v61, %v5497_v32 }
0x21ca   : > { %8985 = vmatprep.mubr.msk.bf16.mxu1 %vm1332_vm2, %v5503_v57 }
0x21cb   : > { %8986 = vmatmul.mubr.msk.bf16.gmra.mrb[108].mxu1 %vm1332_vm2, %v5504_v39 }
0x21cc   : > { %8997 = vmatprep.mubr.msk.bf16.mxu1 %vm1242_vm1, %v5595_v42 }
0x21cf   : > { %8996 = vmatpush3.bf16.xpose.msra.mxu1 %v5632_v38 }
0x21d6   : > { %8998 = vmatmul.mubr.msk.bf16.vlgmr.msra.gmra.mrb[112].mxu1 %vm1242_vm1, %v5597_v58 }
0x21d7   : > { %9001 = vmatprep.mubr.msk.bf16.mxu1 %vm1242_vm1, %v5599_v3 }
0x21de   : > { %9002 = vmatmul.mubr.msk.bf16.gmra.mrb[116].mxu1 %vm1242_vm1, %v5601_v4 }
0x2265   : > { %v12410_v17 = vpop.f32.mrb[104].mxu1 }
0x2266   : > { %13984 = vst [vmem:[#allocation71_spill] sm:$0xff] %v12410_v17  ;;  %v12412_v20 = vpop.f32.mrb[105].mxu1 }
0x2267   : > { %13985 = vst [vmem:[#allocation72_spill] sm:$0xff] %v12412_v20  ;;  %v12414_v26 = vpop.f32.mrb[106].mxu1 }
0x2268   : > { %13986 = vst [vmem:[#allocation73_spill] sm:$0xff] %v12414_v26  ;;  %v12418_v63 = vpop.f32.mrb[107].mxu1 }
0x2269   : > { %13987 = vst [vmem:[#allocation74_spill] sm:$0xff] %v12418_v63 }
0x229e   : > { %v12422_v49 = vpop.f32.mrb[108].mxu1 }
0x229f   : > { %13988 = vst [vmem:[#allocation75_spill] sm:$0xff] %v12422_v49  ;;  %v12424_v8 = vpop.f32.mrb[109].mxu1 }
0x22a0   : > { %13989 = vst [vmem:[#allocation76_spill] sm:$0xff] %v12424_v8  ;;  %v12426_v9 = vpop.f32.mrb[110].mxu1 }
0x22a1   : > { %13990 = vst [vmem:[#allocation77_spill] sm:$0xff] %v12426_v9  ;;  %v12430_v56 = vpop.f32.mrb[111].mxu1 }
0x22a2   : > { %13991 = vst [vmem:[#allocation78_spill] sm:$0xff] %v12430_v56 }
0x22a9   : > { %v8999_v51 = vpop.f32.mrb[112].mxu1 }
0x22aa   : > { %v5668_v32 = vpop.f32.mrb[113].mxu1  ;;  %v5705_v61 = vsel %vm1332_vm2, %v8999_v51, -inf }
0x22ab   : > { %5706 = vmax.xlane.f32.xlu0 %v5705_v61  ;;  %v9000_v48 = vpop.f32.mrb[114].mxu1  ;;  %v5699_v39 = vsel %vm1332_vm2, %v5668_v32, -inf }
0x22ac   : > { %v5671_v30 = vpop.f32.mrb[115].mxu1  ;;  %v5708_v58 = vsel %vm1332_vm2, %v9000_v48, -inf }
0x22ad   : > { %v5702_v57 = vsel %vm1332_vm2, %v5671_v30, -inf }
0x22ae   : > { %5703 = vmax.xlane.f32.xlu1 %v5702_v57 }
0x22af   : > { %5700 = vmax.xlane.f32.xlu0 %v5699_v39 }
0x22b1   : > { %v9003_v42 = vpop.f32.mrb[116].mxu1 }
0x22b2   : > { %v5684_v38 = vpop.f32.mrb[117].mxu1  ;;  %v5717_v36 = vsel %vm1332_vm2, %v9003_v42, -inf }
0x22b3   : > { %5709 = vmax.xlane.f32.xlu0 %v5708_v58  ;;  %v12438_v3 = vpop.f32.mrb[118].mxu1  ;;  %v5711_v61 = vsel %vm1332_vm2, %v5684_v38, -inf }
0x22b4   : > { %v12440_v4 = vpop.f32.mrb[119].mxu1  ;;  %v5720_v57 = vsel %vm1332_vm2, %v12438_v3, -inf }
0x22b5   : > { %v5714_v39 = vsel %vm1332_vm2, %v12440_v4, -inf }
0x22b7   : > { %5718 = vmax.xlane.f32.xlu0 %v5717_v36 }
0x22bb   : > { %5712 = vmax.xlane.f32.xlu0 %v5711_v61 }
0x22bf   : > { %5793 = vrot.lane.b32.xlu1 %v10982_v24, %s10316_s19 }
0x22c3   : > { %5795 = vrot.lane.b32.xlu1 %v10992_v50, %s10316_s19 }
0x22d1   : > { %5791 = vrot.lane.b32.xlu0 %v10984_v0, %s10316_s19 }
0x22e7   : > { %5721 = vmax.xlane.f32.xlu1 %v5720_v57 }
0x22eb   : > { %5715 = vmax.xlane.f32.xlu1 %v5714_v39 }
0x22fc   : > { %5797 = vrot.lane.b32.xlu1 %v10990_v27, %s10316_s19 }
0x2338   : > { %v5707_v36 = vpop.xlane.xlu0 %5706 }
0x2339   : > { %v5725_v58 = vsub.f32 %v8999_v51, %v5707_v36 }
0x233b   : > { %v5735_v61 = vmul.f32 1.442695, %v5725_v58  ;;  %v5704_v10 = vpop.xlane.xlu1 %5703 }
0x233c   : > { %v5701_v54 = vpop.xlane.xlu0 %5700  ;;  %v5724_v49 = vsub.f32 %v5671_v30, %v5704_v10 }
0x233d   : > { %10013 = vpow2.f32 %v5735_v61  ;;  %v5723_v31 = vsub.f32 %v5668_v32, %v5701_v54 }
0x233e   : > { %v5733_v57 = vmul.f32 1.442695, %v5724_v49 }
0x233f   : > { %v5731_v9 = vmul.f32 1.442695, %v5723_v31 }
0x2340   : > { %v5710_v17 = vpop.xlane.xlu0 %5709 }
0x2341   : > { %10015 = vpow2.f32 %v5731_v9  ;;  %v5726_v26 = vsub.f32 %v9000_v48, %v5710_v17  ;;  %v5794_v17 = vpop.permute.xlu1 %5793 }
0x2343   : > { %v5737_v8 = vmul.f32 1.442695, %v5726_v26 }
0x2344   : > { %v5719_v56 = vpop.xlane.xlu0 %5718 }
0x2345   : > { %10017 = vpow2.f32 %v5737_v8  ;;  %v5729_v39 = vsub.f32 %v9003_v42, %v5719_v56 }
0x2346   : > { %10019 = vpow2.f32 %v5733_v57 }
0x2347   : > { %v12456_v20 = vpop.eup %10013  ;;  %v5743_v63 = vmul.f32 1.442695, %v5729_v39 }
0x2348   : > { %v5713_v51 = vpop.xlane.xlu0 %5712  ;;  %v5753_v36 = vsel %vm1332_vm2, %v12456_v20, 0.0 }
0x2349   : > { %10021 = vpow2.f32 %v5743_v63  ;;  %v5727_v54 = vsub.f32 %v5684_v38, %v5713_v51  ;;  %5754 = vadd.xlane.f32.xlu0 %v5753_v36  ;;  %v5796_v63 = vpop.permute.xlu1 %5795 }
0x234b   : > { %v12460_v10 = vpop.eup %10015  ;;  %v5739_v31 = vmul.f32 1.442695, %v5727_v54 }
0x234c   : > { %v5792_v49 = vpop.permute.xlu0 %5791  ;;  %v5747_v26 = vsel %vm1332_vm2, %v12460_v10, 0.0 }
0x234d   : > { %10023 = vpow2.f32 %v5739_v31  ;;  %5748 = vadd.xlane.f32.xlu0 %v5747_v26  ;;  %9005 = vmatprep.subr.bf16.mxu0 %v5792_v49 }
0x234e   : > { %9006 = vmatpush3.bf16.msra.mxu0 %v5792_v49 }
0x234f   : > { %v10018_v8 = vpop.eup %10017  ;;  %9007 = vmatprep.subr.bf16.mxu0 %v5794_v17 }
0x2350   : > { %v5756_v9 = vsel %vm1332_vm2, %v10018_v8, 0.0  ;;  %v10020_v56 = vpop.eup %10019 }
0x2351   : > { %5757 = vadd.xlane.f32.xlu1 %v5756_v9  ;;  %v5750_v30 = vsel %vm1332_vm2, %v10020_v56, 0.0 }
0x2352   : > { %9008 = vmatpush3.bf16.msra.mxu0 %v5794_v17 }
0x2353   : > { %v12465_v32 = vpop.eup %10021  ;;  %9009 = vmatprep.subr.bf16.mxu0 %v5796_v63 }
0x2354   : > { %v5765_v48 = vsel %vm1332_vm2, %v12465_v32, 0.0 }
0x2355   : > { %5766 = vadd.xlane.f32.xlu0 %v5765_v48  ;;  %5751 = vadd.xlane.f32.xlu1 %v5750_v30 }
0x2356   : > { %9010 = vmatpush3.bf16.msra.mxu0 %v5796_v63 }
0x2357   : > { %v12470_v42 = vpop.eup %10023 }
0x2358   : > { %v5759_v38 = vsel %vm1332_vm2, %v12470_v42, 0.0 }
0x2359   : > { %5760 = vadd.xlane.f32.xlu0 %v5759_v38 }
0x2366   : > { %5890 = vrot.lane.b32.xlu1 %v10982_v24, %s10317_s20 }
0x236a   : > { %5892 = vrot.lane.b32.xlu1 %v10992_v50, %s10317_s20 }
0x2374   : > { %v5722_v58 = vpop.xlane.xlu1 %5721 }
0x2375   : > { %v5730_v61 = vsub.f32 %v12438_v3, %v5722_v58 }
0x2377   : > { %v5745_v57 = vmul.f32 1.442695, %v5730_v61 }
0x2378   : > { %v5716_v39 = vpop.xlane.xlu1 %5715 }
0x2379   : > { %10025 = vpow2.f32 %v5745_v57  ;;  %v5728_v51 = vsub.f32 %v12440_v4, %v5716_v39 }
0x237b   : > { %v5741_v36 = vmul.f32 1.442695, %v5728_v51 }
0x237c   : > { %v5798_v54 = vpop.permute.xlu1 %5797 }
0x237d   : > { %9011 = vmatprep.subr.bf16.mxu0 %v5798_v54  ;;  %10027 = vpow2.f32 %v5741_v36 }
0x237e   : > { %9012 = vmatpush3.bf16.msra.mxu0 %v5798_v54 }
0x2383   : > { %v10026_v31 = vpop.eup %10025 }
0x2384   : > { %v5768_v17 = vsel %vm1332_vm2, %v10026_v31, 0.0 }
0x2385   : > { %5769 = vadd.xlane.f32.xlu0 %v5768_v17 }
0x2387   : > { %v10028_v49 = vpop.eup %10027 }
0x2388   : > { %v5762_v26 = vsel %vm1332_vm2, %v10028_v49, 0.0 }
0x238e   : > { %5763 = vadd.xlane.f32.xlu1 %v5762_v26 }
0x239b   : > { %5888 = vrot.lane.b32.xlu0 %v10984_v0, %s10317_s20 }
0x239f   : > { %5880 = vrot.lane.b32.xlu0 %v10984_v0, %s10318_s21  ;;  %5894 = vrot.lane.b32.xlu1 %v10990_v27, %s10317_s20 }
0x23a3   : > { %5884 = vrot.lane.b32.xlu0 %v10992_v50, %s10318_s21  ;;  %5882 = vrot.lane.b32.xlu1 %v10982_v24, %s10318_s21 }
0x23a7   : > { %5886 = vrot.lane.b32.xlu1 %v10990_v27, %s10318_s21 }
0x23d6   : > { %v5755_v3 = vpop.xlane.xlu0 %5754 }
0x23da   : > { %v5749_v9 = vpop.xlane.xlu0 %5748 }
0x23de   : > { %v5758_v4 = vpop.xlane.xlu1 %5757 }
0x23df   : > { %10029 = vrcp.f32 %v5758_v4 }
0x23e0   : > { %10031 = vrcp.f32 %v5749_v9 }
0x23e1   : > { %10033 = vrcp.f32 %v5755_v3 }
0x23e2   : > { %v5752_v63 = vpop.xlane.xlu1 %5751  ;;  %v5767_v17 = vpop.xlane.xlu0 %5766 }
0x23e3   : > { %10035 = vrcp.f32 %v5752_v63 }
0x23e6   : > { %v5761_v26 = vpop.xlane.xlu0 %5760  ;;  %v5891_v3 = vpop.permute.xlu1 %5890 }
0x23e9   : > { %v10030_v48 = vpop.eup %10029 }
0x23ea   : > { %v10032_v30 = vpop.eup %10031  ;;  %v5782_v61 = vmul.f32 %v10030_v48, %v10018_v8  ;;  %v5893_v63 = vpop.permute.xlu1 %5892 }
0x23eb   : > { %v10034_v38 = vpop.eup %10033  ;;  %v5779_v57 = vmul.f32 %v10032_v30, %v12460_v10  ;;  %v5912_v10 = vsel %vm1242_vm1, %v5891_v3, 0 }
0x23ec   : > { %v5781_v51 = vmul.f32 %v10034_v38, %v12456_v20 }
0x23ed   : > { %v10036_v58 = vpop.eup %10035 }
0x23ee   : > { %v5780_v39 = vmul.f32 %v10036_v58, %v10020_v56  ;;  %v5788_v54 = vpack.c.bf16 %v5782_v61, %v5781_v51  ;;  %v5915_v61 = vsel %vm1242_vm1, %v5893_v63, 0 }
0x23f0   : > { %v5787_v36 = vpack.c.bf16 %v5780_v39, %v5779_v57 }
0x23f2   : > { %9013 = vmatprep.mubr.msk.bf16.mxu0 %vm1332_vm2, %v5787_v36 }
0x23f3   : > { %9014 = vmatmul.mubr.msk.bf16.vlgmr.msra.gmra.mrb[144].mxu0 %vm1332_vm2, %v5788_v54 }
0x2412   : > { %v5770_v4 = vpop.xlane.xlu0 %5769 }
0x2413   : > { %10037 = vrcp.f32 %v5770_v4 }
0x2414   : > { %10039 = vrcp.f32 %v5761_v26 }
0x2415   : > { %10041 = vrcp.f32 %v5767_v17 }
0x2416   : > { %v5889_v9 = vpop.permute.xlu0 %5888 }
0x2417   : > { %9225 = vmatprep.subr.msk.bf16.mxu0 %vm1242_vm1, %v5889_v9  ;;  %v5909_v8 = vsel %vm1242_vm1, %v5889_v9, 0 }
0x2418   : > { %9022 = vmatpush3.bf16.xpose.msra.mxu0 %v5909_v8 }
0x2419   : > { %9226 = vmatprep.subr.msk.bf16.mxu0 %vm1242_vm1, %v5891_v3 }
0x241a   : > { %v5881_v26 = vpop.permute.xlu0 %5880 }
0x241b   : > { %v5764_v20 = vpop.xlane.xlu1 %5763 }
0x241c   : > { %10043 = vrcp.f32 %v5764_v20 }
0x241d   : > { %v10038_v56 = vpop.eup %10037 }
0x241e   : > { %v10040_v48 = vpop.eup %10039  ;;  %v5786_v58 = vmul.f32 %v10038_v56, %v10026_v31 }
0x241f   : > { %v10042_v30 = vpop.eup %10041  ;;  %v5783_v57 = vmul.f32 %v10040_v48, %v12470_v42  ;;  %v5895_v51 = vpop.permute.xlu1 %5894 }
0x2420   : > { %9024 = vmatpush3.bf16.xpose.msra.mxu0 %v5912_v10  ;;  %v5785_v36 = vmul.f32 %v10042_v30, %v12465_v32  ;;  %v5918_v31 = vsel %vm1242_vm1, %v5895_v51, 0 }
0x2421   : > { %9227 = vmatprep.subr.msk.bf16.mxu0 %vm1242_vm1, %v5893_v63 }
0x2422   : > { %v5790_v17 = vpack.c.bf16 %v5786_v58, %v5785_v36 }
0x2423   : > { %v5883_v42 = vpop.permute.xlu1 %5882 }
0x2426   : > { %v10044_v38 = vpop.eup %10043 }
0x2427   : > { %v5784_v39 = vmul.f32 %v10044_v38, %v10028_v49  ;;  %v5885_v49 = vpop.permute.xlu0 %5884  ;;  %v5887_v32 = vpop.permute.xlu1 %5886 }
0x2428   : > { %9026 = vmatpush3.bf16.xpose.msra.mxu0 %v5915_v61 }
0x2429   : > { %9228 = vmatprep.subr.msk.bf16.mxu0 %vm1242_vm1, %v5895_v51  ;;  %v5789_v54 = vpack.c.bf16 %v5784_v39, %v5783_v57 }
0x242b   : > { %9017 = vmatprep.mubr.msk.bf16.mxu0 %vm1332_vm2, %v5789_v54 }
0x242c   : > { %9018 = vmatmul.mubr.msk.bf16.gmra.mrb[148].mxu0 %vm1332_vm2, %v5790_v17 }
0x242d   : > { %9029 = vmatprep.mubr.msk.bf16.mxu0 %vm1242_vm1, %v5881_v26 }
0x2430   : > { %9028 = vmatpush3.bf16.xpose.msra.mxu0 %v5918_v31 }
0x2437   : > { %9030 = vmatmul.mubr.msk.bf16.vlgmr.msra.gmra.mrb[152].mxu0 %vm1242_vm1, %v5883_v42 }
0x2438   : > { %9033 = vmatprep.mubr.msk.bf16.mxu0 %vm1242_vm1, %v5885_v49 }
0x243f   : > { %9034 = vmatmul.mubr.msk.bf16.gmra.mrb[156].mxu0 %vm1242_vm1, %v5887_v32 }
0x24c6   : > { %v12514_v3 = vpop.f32.mrb[144].mxu0 }
0x24c7   : > { %13992 = vst [vmem:[#allocation79_spill] sm:$0xff] %v12514_v3  ;;  %v12516_v4 = vpop.f32.mrb[145].mxu0 }
0x24c8   : > { %13993 = vst [vmem:[#allocation80_spill] sm:$0xff] %v12516_v4  ;;  %v12518_v9 = vpop.f32.mrb[146].mxu0 }
0x24c9   : > { %13994 = vst [vmem:[#allocation81_spill] sm:$0xff] %v12518_v9  ;;  %v12522_v8 = vpop.f32.mrb[147].mxu0 }
0x24ca   : > { %13995 = vst [vmem:[#allocation82_spill] sm:$0xff] %v12522_v8 }
0x24ff   : > { %v12526_v10 = vpop.f32.mrb[148].mxu0 }
0x2500   : > { %13996 = vst [vmem:[#allocation83_spill] sm:$0xff] %v12526_v10  ;;  %v12528_v56 = vpop.f32.mrb[149].mxu0 }
0x2501   : > { %13997 = vst [vmem:[#allocation84_spill] sm:$0xff] %v12528_v56  ;;  %v12530_v48 = vpop.f32.mrb[150].mxu0 }
0x2502   : > { %13998 = vst [vmem:[#allocation85_spill] sm:$0xff] %v12530_v48  ;;  %v12534_v38 = vpop.f32.mrb[151].mxu0 }
0x2503   : > { %13999 = vst [vmem:[#allocation86_spill] sm:$0xff] %v12534_v38 }
0x250a   : > { %v9031_v61 = vpop.f32.mrb[152].mxu0 }
0x250b   : > { %v5954_v57 = vpop.f32.mrb[153].mxu0  ;;  %v5991_v17 = vsel %vm1332_vm2, %v9031_v61, -inf }
0x250c   : > { %v9032_v39 = vpop.f32.mrb[154].mxu0  ;;  %v5985_v51 = vsel %vm1332_vm2, %v5954_v57, -inf }
0x250d   : > { %5986 = vmax.xlane.f32.xlu0 %v5985_v51  ;;  %v5957_v36 = vpop.f32.mrb[155].mxu0  ;;  %v5994_v49 = vsel %vm1332_vm2, %v9032_v39, -inf }
0x250e   : > { %v5988_v54 = vsel %vm1332_vm2, %v5957_v36, -inf }
0x250f   : > { %5989 = vmax.xlane.f32.xlu1 %v5988_v54 }
0x2511   : > { %5992 = vmax.xlane.f32.xlu0 %v5991_v17 }
0x2512   : > { %v9035_v26 = vpop.f32.mrb[156].mxu0 }
0x2513   : > { %v5970_v31 = vpop.f32.mrb[157].mxu0  ;;  %v6003_v17 = vsel %vm1332_vm2, %v9035_v26, -inf }
0x2514   : > { %v12541_v42 = vpop.f32.mrb[158].mxu0  ;;  %v5997_v51 = vsel %vm1332_vm2, %v5970_v31, -inf }
0x2515   : > { %5995 = vmax.xlane.f32.xlu0 %v5994_v49  ;;  %v12544_v32 = vpop.f32.mrb[159].mxu0  ;;  %v6006_v54 = vsel %vm1332_vm2, %v12541_v42, -inf }
0x2516   : > { %v6000_v58 = vsel %vm1332_vm2, %v12544_v32, -inf }
0x2517   : > { %6001 = vmax.xlane.f32.xlu1 %v6000_v58 }
0x2519   : > { %5998 = vmax.xlane.f32.xlu0 %v5997_v51 }
0x251b   : > { %6007 = vmax.xlane.f32.xlu1 %v6006_v54 }
0x251d   : > { %6004 = vmax.xlane.f32.xlu0 %v6003_v17 }
0x259a   : > { %v5987_v30 = vpop.xlane.xlu0 %5986 }
0x259b   : > { %v6009_v63 = vsub.f32 %v5954_v57, %v5987_v30 }
0x259c   : > { %v5990_v20 = vpop.xlane.xlu1 %5989 }
0x259d   : > { %v6017_v38 = vmul.f32 1.442695, %v6009_v63  ;;  %v6010_v10 = vsub.f32 %v5957_v36, %v5990_v20 }
0x259e   : > { %v5993_v49 = vpop.xlane.xlu0 %5992 }
0x259f   : > { %v6011_v56 = vsub.f32 %v9031_v61, %v5993_v49  ;;  %v6019_v51 = vmul.f32 1.442695, %v6010_v10 }
0x25a1   : > { %v6021_v48 = vmul.f32 1.442695, %v6011_v56 }
0x25a2   : > { %v5996_v3 = vpop.xlane.xlu0 %5995 }
0x25a3   : > { %10045 = vpow2.f32 %v6021_v48  ;;  %v6012_v58 = vsub.f32 %v9032_v39, %v5996_v3 }
0x25a4   : > { %10047 = vpow2.f32 %v6017_v38  ;;  %v6002_v39 = vpop.xlane.xlu1 %6001 }
0x25a5   : > { %v6023_v9 = vmul.f32 1.442695, %v6012_v58 }
0x25a6   : > { %v5999_v4 = vpop.xlane.xlu0 %5998 }
0x25a7   : > { %10049 = vpow2.f32 %v6023_v9  ;;  %v6013_v54 = vsub.f32 %v5970_v31, %v5999_v4 }
0x25a8   : > { %10051 = vpow2.f32 %v6019_v51  ;;  %v6008_v36 = vpop.xlane.xlu1 %6007  ;;  %v14037_v51 = vld [vmem:[#allocation74_spill] sm:$0xff] }
0x25a9   : > { %v6025_v30 = vmul.f32 1.442695, %v6013_v54  ;;  %v6016_v31 = vsub.f32 %v12541_v42, %v6008_v36  ;;  %v14035_v42 = vld [vmem:[#allocation15_spill] sm:$0xff]  ;;  %v14038_v54 = vld [vmem:[#allocation72_spill] sm:$0xff]  ;;  %v14049_v36 = vld [vmem:[#allocation78_spill] sm:$0xff] }
0x25aa   : > { %v6005_v8 = vpop.xlane.xlu0 %6004 }
0x25ab   : > { %v6015_v17 = vsub.f32 %v9035_v26, %v6005_v8  ;;  %v14000_v26 = vpack.i.bf16 %v11218_v5, %v11212_v47  ;;  %v6031_v49 = vmul.f32 1.442695, %v6016_v31  ;;  %v14003_v47 = vpack.i.bf16 %v11230_v28, %v11224_v59 }
0x25ac   : > { %v14004_v5 = vpack.i.bf16 %v11334_v25, %v11328_v23  ;;  %v14006_v59 = vpack.i.bf16 %v11618_v60, %v11612_v41  ;;  %v14007_v23 = vpack.i.bf16 %v11722_v34, %v11716_v29  ;;  %v14008_v25 = vpack.i.bf16 %v11818_v45, %v11812_v14  ;;  %v14017_v34 = vld [vmem:[#allocation14_spill] sm:$0xff]  ;;  %v14022_v14 = vld [vmem:[#allocation11_spill] sm:$0xff] }
0x25ad   : > { %v12552_v12 = vpop.eup %10045  ;;  %v6029_v57 = vmul.f32 1.442695, %v6015_v17  ;;  %v14011_v41 = vpack.i.bf16 %v11830_v6, %v11824_v33  ;;  %v14012_v60 = vpack.i.bf16 %v12018_v16, %v12012_v18  ;;  %v14015_v29 = vpack.i.bf16 %v11318_v52, %v11314_v55  ;;  %v14023_v45 = vld [vmem:[#allocation10_spill] sm:$0xff]  ;;  %v14025_v52 = vld [vmem:[#allocation56_spill] sm:$0xff]  ;;  %v14028_v18 = vld [vmem:[#allocation13_spill] sm:$0xff] }
0x25ae   : > { %v6039_v63 = vsel %vm1332_vm2, %v12552_v12, 0.0  ;;  %v12556_v20 = vpop.eup %10047  ;;  %v14024_v55 = vpack.i.bf16 %v14022_v14, %v14023_v45  ;;  %v14026_v33 = vld [vmem:[#allocation54_spill] sm:$0xff]  ;;  %v14029_v16 = vld [vmem:[#allocation12_spill] sm:$0xff]  ;;  %v14039_v17 = vpack.i.bf16 %v14037_v51, %v14038_v54  ;;  %v14074_v14 = vld [vmem:[#allocation47_spill] sm:$0xff] }
0x25af   : > { %10053 = vpow2.f32 %v6029_v57  ;;  %6040 = vadd.xlane.f32.xlu0 %v6039_v63  ;;  %v6033_v9 = vsel %vm1332_vm2, %v12556_v20, 0.0  ;;  %v14027_v6 = vpack.i.bf16 %v14025_v52, %v14026_v33  ;;  %v14041_v57 = vld [vmem:[#allocation25_spill] sm:$0xff]  ;;  %v14076_v52 = vld [vmem:[#allocation55_spill] sm:$0xff] }
0x25b0   : > { %10055 = vpow2.f32 %v6025_v30  ;;  %v14040_v30 = vld [vmem:[#allocation26_spill] sm:$0xff]  ;;  %v14077_v33 = vld [vmem:[#allocation53_spill] sm:$0xff] }
0x25b1   : > { %v12558_v3 = vpop.eup %10049  ;;  %10057 = vpow2.f32 %v6031_v49  ;;  %v14042_v63 = vpack.i.bf16 %v14040_v30, %v14041_v57  ;;  %v14082_v54 = vld [vmem:[#allocation73_spill] sm:$0xff] }
0x25b2   : > { %v6042_v4 = vsel %vm1332_vm2, %v12558_v3, 0.0  ;;  %v12564_v8 = vpop.eup %10051 }
0x25b3   : > { %6034 = vadd.xlane.f32.xlu0 %v6033_v9  ;;  %6043 = vadd.xlane.f32.xlu1 %v6042_v4  ;;  %v6036_v10 = vsel %vm1332_vm2, %v12564_v8, 0.0  ;;  %v14043_v9 = vld [vmem:[#allocation82_spill] sm:$0xff]  ;;  %v14044_v4 = vld [vmem:[#allocation80_spill] sm:$0xff] }
0x25b7   : > { %6037 = vadd.xlane.f32.xlu1 %v6036_v10  ;;  %v14045_v10 = vpack.i.bf16 %v14043_v9, %v14044_v4  ;;  %v14085_v9 = vld [vmem:[#allocation81_spill] sm:$0xff]  ;;  %v14086_v4 = vld [vmem:[#allocation79_spill] sm:$0xff] }
0x25b9   : > { %v12568_v56 = vpop.eup %10053 }
0x25ba   : > { %v6051_v48 = vsel %vm1332_vm2, %v12568_v56, 0.0  ;;  %v12572_v38 = vpop.eup %10055 }
0x25bb   : > { %6052 = vadd.xlane.f32.xlu0 %v6051_v48  ;;  %v6045_v61 = vsel %vm1332_vm2, %v12572_v38, 0.0  ;;  %v14046_v48 = vld [vmem:[#allocation30_spill] sm:$0xff] }
0x25bf   : > { %6046 = vadd.xlane.f32.xlu0 %v6045_v61  ;;  %v14047_v61 = vld [vmem:[#allocation29_spill] sm:$0xff] }
0x25c8   : > { %6079 = vrot.lane.b32.xlu1 %v10982_v24, %s10319_s22  ;;  %v14001_v24 = vpack.i.bf16 %v11322_v22, %v11316_v46  ;;  %v12604_v46 = vpop.eup %10057  ;;  %v14005_v22 = vpack.i.bf16 %v11430_v7, %v11424_v35  ;;  %v14009_v35 = vpack.i.bf16 %v11630_v43, %v11624_v40  ;;  %v14010_v7 = vpack.i.bf16 %v11734_v44, %v11728_v37  ;;  %v14020_v37 = vld [vmem:[#allocation48_spill] sm:$0xff] }
0x25c9   : > { %v14013_v40 = vpack.i.bf16 %v11214_v19, %v11210_v21  ;;  %v14014_v43 = vpack.i.bf16 %v12122_v53, %v12116_v15  ;;  %v14018_v21 = vpack.i.bf16 %v11414_v13, %v14017_v34  ;;  %v14019_v19 = vld [vmem:[#allocation50_spill] sm:$0xff]  ;;  %v14030_v13 = vpack.i.bf16 %v14028_v18, %v14029_v16  ;;  %v14032_v53 = vld [vmem:[#allocation60_spill] sm:$0xff] }
0x25ca   : > { %v14021_v44 = vpack.i.bf16 %v14019_v19, %v14020_v37  ;;  %v14031_v15 = vld [vmem:[#allocation62_spill] sm:$0xff] }
0x25cb   : > { %v14070_v34 = vld [vmem:[#allocation58_spill] sm:$0xff] }
0x25cc   : > { %6081 = vrot.lane.b32.xlu1 %v10992_v50, %s10319_s22  ;;  %v6014_v50 = vsub.f32 %v12544_v32, %v6002_v39  ;;  %v14048_v39 = vpack.i.bf16 %v14046_v48, %v14047_v61 }
0x25ce   : > { %v6027_v58 = vmul.f32 1.442695, %v6014_v50  ;;  %v14053_v50 = vld [vmem:[#allocation33_spill] sm:$0xff] }
0x25d0   : > { %10059 = vpow2.f32 %v6027_v58  ;;  %v14056_v58 = vld [vmem:[#allocation27_spill] sm:$0xff] }
0x25d5   : > { %6077 = vrot.lane.b32.xlu0 %v10984_v0, %s10319_s22  ;;  %v14002_v0 = vpack.i.bf16 %v11418_v11, %v11412_v1  ;;  %v6054_v1 = vsel %vm1332_vm2, %v12604_v46, 0.0 }
0x25d9   : > { %9252 = vrot.lane.b32.xlu0 %v14000_v26, %s10320_s23  ;;  %v14050_v26 = vld [vmem:[#allocation76_spill] sm:$0xff] }
0x25da   : > { %v12612_v11 = vpop.eup %10059  ;;  %v14051_v31 = vpack.i.bf16 %v14049_v36, %v14050_v26  ;;  %v14089_v36 = vld [vmem:[#allocation75_spill] sm:$0xff] }
0x25db   : > { %v6048_v28 = vsel %vm1332_vm2, %v12612_v11, 0.0 }
0x25dd   : > { %9262 = vrot.lane.b32.xlu0 %v14001_v24, %s10321_s24  ;;  %v14052_v24 = vld [vmem:[#allocation34_spill] sm:$0xff] }
0x25de   : > { %v14054_v49 = vpack.i.bf16 %v14052_v24, %v14053_v50 }
0x25e1   : > { %9272 = vrot.lane.b32.xlu0 %v14002_v0, %s10322_s26  ;;  %v14055_v0 = vld [vmem:[#allocation28_spill] sm:$0xff] }
0x25e5   : > { %9282 = vrot.lane.b32.xlu0 %v14003_v47, %s10320_s23  ;;  %v14057_v47 = vpack.i.bf16 %v14055_v0, %v14056_v58  ;;  %v14092_v58 = vld [vmem:[#allocation3_spill] sm:$0xff] }
0x25e9   : > { %9292 = vrot.lane.b32.xlu0 %v14004_v5, %s10321_s24  ;;  %v14058_v5 = vld [vmem:[#allocation32_spill] sm:$0xff] }
0x25ed   : > { %9302 = vrot.lane.b32.xlu0 %v14005_v22, %s10322_s26  ;;  %v14059_v22 = vld [vmem:[#allocation31_spill] sm:$0xff] }
0x25f0   : > { %6055 = vadd.xlane.f32.xlu1 %v6054_v1  ;;  %v14060_v1 = vpack.i.bf16 %v14058_v5, %v14059_v22 }
0x25f1   : > { %9312 = vrot.lane.b32.xlu0 %v14006_v59, %s10320_s23  ;;  %v14061_v59 = vld [vmem:[#allocation36_spill] sm:$0xff] }
0x25f4   : > { %6049 = vadd.xlane.f32.xlu1 %v6048_v28  ;;  %v14062_v28 = vld [vmem:[#allocation35_spill] sm:$0xff] }
0x25f5   : > { %9322 = vrot.lane.b32.xlu0 %v14007_v23, %s10321_s24  ;;  %v14063_v23 = vpack.i.bf16 %v14061_v59, %v14062_v28 }
0x25f9   : > { %9332 = vrot.lane.b32.xlu0 %v14008_v25, %s10322_s26  ;;  %v14064_v25 = vld [vmem:[#allocation46_spill] sm:$0xff] }
0x25fd   : > { %9342 = vrot.lane.b32.xlu0 %v14009_v35, %s10320_s23  ;;  %v14065_v35 = vld [vmem:[#allocation45_spill] sm:$0xff] }
0x2601   : > { %9352 = vrot.lane.b32.xlu0 %v14010_v7, %s10321_s24  ;;  %v14066_v7 = vpack.i.bf16 %v14064_v25, %v14065_v35 }
0x2605   : > { %9362 = vrot.lane.b32.xlu0 %v14011_v41, %s10322_s26  ;;  %6083 = vrot.lane.b32.xlu1 %v10990_v27, %s10319_s22  ;;  %v14016_v27 = vpack.i.bf16 %v12218_v62, %v12212_v2  ;;  %v14033_v2 = vpack.i.bf16 %v14031_v15, %v14032_v53  ;;  %v14034_v62 = vld [vmem:[#allocation16_spill] sm:$0xff]  ;;  %v14080_v15 = vld [vmem:[#allocation59_spill] sm:$0xff] }
0x2606   : > { %v14036_v32 = vpack.i.bf16 %v14034_v62, %v14035_v42 }
0x2609   : > { %9372 = vrot.lane.b32.xlu0 %v14012_v60, %s10320_s23  ;;  %9257 = vrot.lane.b32.xlu1 %v14013_v40, %s10320_s23  ;;  %v14067_v60 = vld [vmem:[#allocation52_spill] sm:$0xff]  ;;  %v14068_v40 = vld [vmem:[#allocation51_spill] sm:$0xff] }
0x260d   : > { %9382 = vrot.lane.b32.xlu0 %v14014_v43, %s10321_s24  ;;  %9267 = vrot.lane.b32.xlu1 %v14015_v29, %s10321_s24  ;;  %v14069_v43 = vpack.i.bf16 %v14067_v60, %v14068_v40 }
0x2611   : > { %9392 = vrot.lane.b32.xlu0 %v14016_v27, %s10322_s26  ;;  %9277 = vrot.lane.b32.xlu1 %v14018_v21, %s10322_s26  ;;  %v14071_v21 = vld [vmem:[#allocation57_spill] sm:$0xff] }
0x2612   : > { %v14072_v19 = vpack.i.bf16 %v14070_v34, %v14071_v21  ;;  %v14093_v21 = vld [vmem:[#allocation9_spill] sm:$0xff] }
0x2615   : > { %9402 = vrot.lane.b32.xlu0 %v14021_v44, %s10320_s23  ;;  %9287 = vrot.lane.b32.xlu1 %v14024_v55, %s10320_s23  ;;  %v14073_v44 = vld [vmem:[#allocation49_spill] sm:$0xff] }
0x2616   : > { %v14075_v45 = vpack.i.bf16 %v14073_v44, %v14074_v14 }
0x2619   : > { %9412 = vrot.lane.b32.xlu0 %v14027_v6, %s10321_s24  ;;  %9297 = vrot.lane.b32.xlu1 %v14030_v13, %s10321_s24  ;;  %v14078_v6 = vpack.i.bf16 %v14076_v52, %v14077_v33  ;;  %v14079_v13 = vld [vmem:[#allocation61_spill] sm:$0xff] }
0x261a   : > { %v14081_v53 = vpack.i.bf16 %v14079_v13, %v14080_v15 }
0x261d   : > { %9422 = vrot.lane.b32.xlu0 %v14033_v2, %s10322_s26  ;;  %9307 = vrot.lane.b32.xlu1 %v14036_v32, %s10322_s26 }
0x2621   : > { %9432 = vrot.lane.b32.xlu0 %v14039_v17, %s10320_s23  ;;  %9317 = vrot.lane.b32.xlu1 %v14042_v63, %s10320_s23  ;;  %v14083_v17 = vld [vmem:[#allocation71_spill] sm:$0xff] }
0x2622   : > { %v14084_v30 = vpack.i.bf16 %v14082_v54, %v14083_v17  ;;  %v14095_v54 = vld [vmem:[#allocation20_spill] sm:$0xff] }
0x2625   : > { %9442 = vrot.lane.b32.xlu0 %v14045_v10, %s10321_s24  ;;  %9327 = vrot.lane.b32.xlu1 %v14048_v39, %s10321_s24  ;;  %v14087_v10 = vpack.i.bf16 %v14085_v9, %v14086_v4  ;;  %v14088_v39 = vld [vmem:[#allocation77_spill] sm:$0xff] }
0x2626   : > { %v14090_v26 = vpack.i.bf16 %v14088_v39, %v14089_v36 }
0x2629   : > { %9452 = vrot.lane.b32.xlu0 %v14051_v31, %s10320_s23  ;;  %9337 = vrot.lane.b32.xlu1 %v14054_v49, %s10322_s26  ;;  %v14091_v49 = vld [vmem:[#allocation5_spill] sm:$0xff] }
0x262d   : > { %9347 = vrot.lane.b32.xlu1 %v14057_v47, %s10320_s23 }
0x2631   : > { %9357 = vrot.lane.b32.xlu1 %v14060_v1, %s10321_s24 }
0x2635   : > { %9367 = vrot.lane.b32.xlu1 %v14063_v23, %s10322_s26 }
0x2639   : > { %9377 = vrot.lane.b32.xlu1 %v14066_v7, %s10320_s23 }
0x263c   : > { %v12730_v41 = vpop.xlane.xlu0 %6040 }
0x263d   : > { %9387 = vrot.lane.b32.xlu1 %v14069_v43, %s10321_s24 }
0x2640   : > { %v6035_v29 = vpop.xlane.xlu0 %6034  ;;  %v12736_v27 = vpop.xlane.xlu1 %6043 }
0x2641   : > { %9397 = vrot.lane.b32.xlu1 %v14072_v19, %s10322_s26  ;;  %10061 = vrcp.f32 %v6035_v29 }
0x2644   : > { %v6038_v37 = vpop.xlane.xlu1 %6037 }
0x2645   : > { %10063 = vrcp.f32 %v6038_v37  ;;  %9407 = vrot.lane.b32.xlu1 %v14075_v45, %s10320_s23  ;;  %v14094_v37 = vld [vmem:[#allocation7_spill] sm:$0xff] }
0x2646   : > { %10065 = vrcp.f32 %v12736_v27 }
0x2647   : > { %10067 = vrcp.f32 %v12730_v41 }
0x2648   : > { %v12746_v55 = vpop.xlane.xlu0 %6052  ;;  %v6080_v62 = vpop.permute.xlu1 %6079 }
0x2649   : > { %9417 = vrot.lane.b32.xlu1 %v14078_v6, %s10321_s24  ;;  %10069 = vrcp.f32 %v12746_v55 }
0x264b   : > { %v10062_v16 = vpop.eup %10061 }
0x264c   : > { %v12752_v18 = vpop.xlane.xlu0 %6046  ;;  %v6065_v32 = vmul.f32 %v10062_v16, %v12556_v20  ;;  %v6082_v20 = vpop.permute.xlu1 %6081 }
0x264d   : > { %9427 = vrot.lane.b32.xlu1 %v14081_v53, %s10322_s26  ;;  %10071 = vrcp.f32 %v12752_v18 }
0x264f   : > { %v10064_v2 = vpop.eup %10063 }
0x2650   : > { %v6078_v42 = vpop.permute.xlu0 %6077  ;;  %v6066_v51 = vmul.f32 %v10064_v2, %v12564_v8 }
0x2651   : > { %9037 = vmatprep.subr.bf16.mxu1 %v6078_v42  ;;  %9437 = vrot.lane.b32.xlu1 %v14084_v30, %s10320_s23  ;;  %v14096_v30 = vld [vmem:[#allocation18_spill] sm:$0xff] }
0x2652   : > { %9038 = vmatpush3.bf16.msra.mxu1 %v6078_v42  ;;  %v6073_v57 = vpack.c.bf16 %v6066_v51, %v6065_v32 }
0x2653   : > { %9039 = vmatprep.subr.bf16.mxu1 %v6080_v62 }
0x2654   : > { %v9253_v63 = vpop.permute.xlu0 %9252  ;;  %9045 = vmatprep.mubr.msk.bf16.mxu1 %vm1332_vm2, %v6073_v57 }
0x2655   : > { %9447 = vrot.lane.b32.xlu1 %v14087_v10, %s10321_s24  ;;  %v9255_v48 = vunpack.i.h.bf16 %v9253_v63  ;;  %v9254_v61 = vunpack.i.l.bf16 %v9253_v63 }
0x2656   : > { %9040 = vmatpush3.bf16.msra.mxu1 %v6080_v62 }
0x2657   : > { %9041 = vmatprep.subr.bf16.mxu1 %v6082_v20  ;;  %v2469_v0 = vsel %vm1242_vm1, %v14091_v49, %v9255_v48  ;;  %v2468_v47 = vsel %vm1242_vm1, %v14092_v58, %v9254_v61  ;;  %v10066_v49 = vpop.eup %10065 }
0x2658   : > { %v9263_v8 = vpop.permute.xlu0 %9262  ;;  %v10068_v18 = vpop.eup %10067 }
0x2659   : > { %9457 = vrot.lane.b32.xlu1 %v14090_v26, %s10320_s23  ;;  %v9265_v31 = vunpack.i.h.bf16 %v9263_v8  ;;  %v9264_v24 = vunpack.i.l.bf16 %v9263_v8 }
0x265a   : > { %9042 = vmatpush3.bf16.msra.mxu1 %v6082_v20 }
0x265b   : > { %v2477_v1 = vsel %vm2476_vm3, %v2468_v47, %v9264_v24  ;;  %v2478_v59 = vsel %vm2476_vm3, %v2469_v0, %v9265_v31  ;;  %v14097_v0 = vld [vmem:[#allocation24_spill] sm:$0xff]  ;;  %v14098_v47 = vld [vmem:[#allocation22_spill] sm:$0xff] }
0x265c   : > { %v9273_v50 = vpop.permute.xlu0 %9272 }
0x265d   : > { %v9275_v5 = vunpack.i.h.bf16 %v9273_v50  ;;  %v9274_v22 = vunpack.i.l.bf16 %v9273_v50 }
0x265f   : > { %v12780_v28 = vsel %vm2485_vm4, %v2477_v1, %v9274_v22  ;;  %v12783_v23 = vsel %vm2485_vm4, %v2478_v59, %v9275_v5 }
0x2660   : > { %v9283_v25 = vpop.permute.xlu0 %9282  ;;  %v6286_v35 = vpack.c.bf16 %v12783_v23, %v12780_v28 }
0x2661   : > { %v9285_v60 = vunpack.i.h.bf16 %v9283_v25  ;;  %v9284_v40 = vunpack.i.l.bf16 %v9283_v25 }
0x2663   : > { %v2473_v19 = vsel %vm1242_vm1, %v14093_v21, %v9285_v60  ;;  %v2472_v44 = vsel %vm1242_vm1, %v14094_v37, %v9284_v40  ;;  %v6068_v60 = vmul.f32 %v10066_v49, %v12558_v3  ;;  %v6067_v21 = vmul.f32 %v10068_v18, %v12552_v12  ;;  %v9494_v3 = vld [vmem:[%s13834_s5 + $0x8] sm:$0xff]  }
0x2664   : > { %v9293_v7 = vpop.permute.xlu0 %9292 }
0x2665   : > { %v9295_v43 = vunpack.i.h.bf16 %v9293_v7  ;;  %v9294_v29 = vunpack.i.l.bf16 %v9293_v7 }
0x2667   : > { %v2481_v52 = vsel %vm2476_vm3, %v2472_v44, %v9294_v29  ;;  %v2482_v33 = vsel %vm2476_vm3, %v2473_v19, %v9295_v43  ;;  %v9493_v29 = vld [vmem:[%s13834_s5] sm:$0xff]   ;;  %v10070_v19 = vpop.eup %10069  ;;  %v6074_v44 = vpack.c.bf16 %v6068_v60, %v6067_v21 }
0x2668   : > { %v9303_v34 = vpop.permute.xlu0 %9302  ;;  %v10072_v37 = vpop.eup %10071  ;;  %v6071_v12 = vmul.f32 %v10070_v19, %v12568_v56 }
0x2669   : > { %v9305_v14 = vunpack.i.h.bf16 %v9303_v34  ;;  %v9304_v45 = vunpack.i.l.bf16 %v9303_v34 }
0x266b   : > { %v12794_v6 = vsel %vm2485_vm4, %v2481_v52, %v9304_v45  ;;  %v12797_v16 = vsel %vm2485_vm4, %v2482_v33, %v9305_v14 }
0x266c   : > { %v9313_v13 = vpop.permute.xlu0 %9312  ;;  %v6288_v15 = vpack.c.bf16 %v12797_v16, %v12794_v6 }
0x266d   : > { %v9315_v2 = vunpack.i.h.bf16 %v9313_v13  ;;  %v9314_v62 = vunpack.i.l.bf16 %v9313_v13 }
0x266f   : > { %v3735_v17 = vsel %vm1242_vm1, %v14095_v54, %v9315_v2  ;;  %v3734_v57 = vsel %vm1242_vm1, %v14096_v30, %v9314_v62  ;;  %v6069_v30 = vmul.f32 %v10072_v37, %v12572_v38 }
0x2670   : > { %v9323_v53 = vpop.permute.xlu0 %9322 }
0x2671   : > { %v9325_v42 = vunpack.i.h.bf16 %v9323_v53  ;;  %v9324_v32 = vunpack.i.l.bf16 %v9323_v53 }
0x2673   : > { %v3742_v4 = vsel %vm2476_vm3, %v3734_v57, %v9324_v32  ;;  %v3743_v10 = vsel %vm2476_vm3, %v3735_v17, %v9325_v42  ;;  %v14099_v42 = vld [vmem:[#allocation40_spill] sm:$0xff] }
0x2674   : > { %v9333_v51 = vpop.permute.xlu0 %9332 }
0x2675   : > { %v9335_v63 = vunpack.i.h.bf16 %v9333_v51  ;;  %v9334_v9 = vunpack.i.l.bf16 %v9333_v51  ;;  %v14100_v51 = vld [vmem:[#allocation38_spill] sm:$0xff] }
0x2677   : > { %v12809_v20 = vsel %vm2485_vm4, %v3742_v4, %v9334_v9  ;;  %v12812_v8 = vsel %vm2485_vm4, %v3743_v10, %v9335_v63 }
0x2678   : > { %v6290_v48 = vpack.c.bf16 %v12812_v8, %v12809_v20  ;;  %v9343_v61 = vpop.permute.xlu0 %9342 }
0x2679   : > { %v9345_v36 = vunpack.i.h.bf16 %v9343_v61  ;;  %v9344_v26 = vunpack.i.l.bf16 %v9343_v61 }
0x267b   : > { %v3739_v58 = vsel %vm1242_vm1, %v14097_v0, %v9345_v36  ;;  %v3738_v5 = vsel %vm1242_vm1, %v14098_v47, %v9344_v26  ;;  %v14101_v0 = vld [vmem:[#allocation4_spill] sm:$0xff]  ;;  %v14102_v47 = vld [vmem:[#allocation2_spill] sm:$0xff] }
0x267c   : > { %v9353_v39 = vpop.permute.xlu0 %9352 }
0x267d   : > { %v6056_v31 = vpop.xlane.xlu1 %6055  ;;  %v9355_v27 = vunpack.i.h.bf16 %v9353_v39  ;;  %v9354_v24 = vunpack.i.l.bf16 %v9353_v39 }
0x267e   : > { %10073 = vrcp.f32 %v6056_v31 }
0x267f   : > { %v3746_v55 = vsel %vm2476_vm3, %v3738_v5, %v9354_v24  ;;  %v3747_v59 = vsel %vm2476_vm3, %v3739_v58, %v9355_v27 }
0x2680   : > { %v9363_v50 = vpop.permute.xlu0 %9362 }
0x2681   : > { %v9365_v41 = vunpack.i.h.bf16 %v9363_v50  ;;  %v9364_v22 = vunpack.i.l.bf16 %v9363_v50  ;;  %v6050_v1 = vpop.xlane.xlu1 %6049 }
0x2682   : > { %10075 = vrcp.f32 %v6050_v1 }
0x2683   : > { %v12826_v25 = vsel %vm2485_vm4, %v3746_v55, %v9364_v22  ;;  %v12829_v7 = vsel %vm2485_vm4, %v3747_v59, %v9365_v41 }
0x2684   : > { %v6292_v40 = vpack.c.bf16 %v12829_v7, %v12826_v25  ;;  %v9373_v43 = vpop.permute.xlu0 %9372 }
0x2685   : > { %v6084_v34 = vpop.permute.xlu1 %6083  ;;  %v9375_v14 = vunpack.i.h.bf16 %v9373_v43  ;;  %v9374_v45 = vunpack.i.l.bf16 %v9373_v43 }
0x2686   : > { %9043 = vmatprep.subr.bf16.mxu1 %v6084_v34 }
0x2687   : > { %9044 = vmatpush3.bf16.msra.mxu1 %v6084_v34  ;;  %v4999_v32 = vsel %vm1242_vm1, %v14099_v42, %v9375_v14  ;;  %v4998_v54 = vsel %vm1242_vm1, %v14100_v51, %v9374_v45  ;;  %v14103_v14 = vld [vmem:[#allocation44_spill] sm:$0xff] }
0x2688   : > { %v9383_v52 = vpop.permute.xlu0 %9382  ;;  %9053 = vmatprep.subr.bf16.mxu1 %v9493_v29  ;;  %v10074_v33 = vpop.eup %10073 }
0x2689   : > { %v9258_v13 = vpop.permute.xlu1 %9257  ;;  %v9385_v53 = vunpack.i.h.bf16 %v9383_v52  ;;  %v9384_v2 = vunpack.i.l.bf16 %v9383_v52  ;;  %v6072_v57 = vmul.f32 %v10074_v33, %v12604_v46  ;;  %v14104_v52 = vld [vmem:[#allocation42_spill] sm:$0xff] }
0x268a   : > { %9046 = vmatmul.mubr.msk.bf16.vlgmr.msra.gmra.mrb[120].mxu1 %vm1332_vm2, %v6074_v44  ;;  %v9260_v63 = vunpack.i.h.bf16 %v9258_v13  ;;  %v9259_v36 = vunpack.i.l.bf16 %v9258_v13 }
0x268b   : > { %9054 = vmatpush3.bf16.msra.mxu1 %v9493_v29  ;;  %v5006_v61 = vsel %vm2476_vm3, %v4998_v54, %v9384_v2  ;;  %v5007_v39 = vsel %vm2476_vm3, %v4999_v32, %v9385_v53 }
0x268c   : > { %v10076_v62 = vpop.eup %10075  ;;  %v9393_v17 = vpop.permute.xlu0 %9392  ;;  %9055 = vmatprep.subr.bf16.mxu1 %v9494_v3  ;;  %v2471_v58 = vsel %vm1242_vm1, %v14101_v0, %v9260_v63  ;;  %v2470_v5 = vsel %vm1242_vm1, %v14102_v47, %v9259_v36  ;;  %v14108_v0 = vld [vmem:[#allocation17_spill] sm:$0xff] }
0x268d   : > { %v9395_v9 = vunpack.i.h.bf16 %v9393_v17  ;;  %v9394_v4 = vunpack.i.l.bf16 %v9393_v17  ;;  %v9268_v10 = vpop.permute.xlu1 %9267  ;;  %v6070_v56 = vmul.f32 %v10076_v62, %v12612_v11  ;;  %v6076_v11 = vpack.c.bf16 %v6072_v57, %v6071_v12  ;;  %v14105_v17 = vld [vmem:[#allocation8_spill] sm:$0xff]  ;;  %v14106_v57 = vld [vmem:[#allocation6_spill] sm:$0xff] }
0x268e   : > { %v9270_v26 = vunpack.i.h.bf16 %v9268_v10  ;;  %v9269_v46 = vunpack.i.l.bf16 %v9268_v10 }
0x268f   : > { %v12853_v31 = vsel %vm2485_vm4, %v5006_v61, %v9394_v4  ;;  %v12856_v38 = vsel %vm2485_vm4, %v5007_v39, %v9395_v9  ;;  %v6075_v27 = vpack.c.bf16 %v6070_v56, %v6069_v30  ;;  %9056 = vmatpush3.bf16.msra.mxu1 %v9494_v3 }
0x2690   : > { %v6294_v24 = vpack.c.bf16 %v12856_v38, %v12853_v31  ;;  %v9403_v50 = vpop.permute.xlu0 %9402  ;;  %v2479_v1 = vsel %vm2476_vm3, %v2470_v5, %v9269_v46  ;;  %v2480_v55 = vsel %vm2476_vm3, %v2471_v58, %v9270_v26 }
0x2691   : > { %9049 = vmatprep.mubr.msk.bf16.mxu1 %vm1332_vm2, %v6075_v27  ;;  %v9278_v49 = vpop.permute.xlu1 %9277  ;;  %v9405_v43 = vunpack.i.h.bf16 %v9403_v50  ;;  %v9404_v29 = vunpack.i.l.bf16 %v9403_v50 }
0x2692   : > { %v9280_v41 = vunpack.i.h.bf16 %v9278_v49  ;;  %v9279_v22 = vunpack.i.l.bf16 %v9278_v49  ;;  %9050 = vmatmul.mubr.msk.bf16.gmra.mrb[124].mxu1 %vm1332_vm2, %v6076_v11  ;;  %v14107_v11 = vld [vmem:[#allocation19_spill] sm:$0xff] }
0x2693   : > { %9057 = vmatprep.mubr.msk.bf16.mxu1 %vm482_vm0, %v6286_v35  ;;  %v5003_v45 = vsel %vm1242_vm1, %v14103_v14, %v9405_v43  ;;  %v5002_v28 = vsel %vm1242_vm1, %v14104_v52, %v9404_v29 }
0x2694   : > { %v2488_v59 = vsel %vm2485_vm4, %v2479_v1, %v9279_v22  ;;  %v2489_v18 = vsel %vm2485_vm4, %v2480_v55, %v9280_v41  ;;  %v9413_v60 = vpop.permute.xlu0 %9412 }
0x2695   : > { %v6287_v34 = vpack.c.bf16 %v2489_v18, %v2488_v59  ;;  %v9288_v21 = vpop.permute.xlu1 %9287  ;;  %v9415_v19 = vunpack.i.h.bf16 %v9413_v60  ;;  %v9414_v37 = vunpack.i.l.bf16 %v9413_v60 }
0x2696   : > { %v9290_v53 = vunpack.i.h.bf16 %v9288_v21  ;;  %v9289_v2 = vunpack.i.l.bf16 %v9288_v21 }
0x2697   : > { %v5010_v33 = vsel %vm2476_vm3, %v5002_v28, %v9414_v37  ;;  %v5011_v13 = vsel %vm2476_vm3, %v5003_v45, %v9415_v19  ;;  %v14110_v19 = vld [vmem:[#allocation21_spill] sm:$0xff] }
0x2698   : > { %v9423_v44 = vpop.permute.xlu0 %9422  ;;  %v2475_v30 = vsel %vm1242_vm1, %v14105_v17, %v9290_v53  ;;  %v2474_v63 = vsel %vm1242_vm1, %v14106_v57, %v9289_v2  ;;  %v14111_v2 = vld [vmem:[#allocation39_spill] sm:$0xff] }
0x2699   : > { %v9425_v23 = vunpack.i.h.bf16 %v9423_v44  ;;  %v9424_v35 = vunpack.i.l.bf16 %v9423_v44  ;;  %v9298_v3 = vpop.permute.xlu1 %9297 }
0x269a   : > { %9058 = vmatmul.mubr.msk.bf16.vlgmr.msra.gmra.mrb[128].mxu1 %vm482_vm0, %v6287_v34  ;;  %v9300_v42 = vunpack.i.h.bf16 %v9298_v3  ;;  %v9299_v32 = vunpack.i.l.bf16 %v9298_v3  ;;  %v14109_v34 = vld [vmem:[#allocation23_spill] sm:$0xff] }
0x269b   : > { %v12882_v12 = vsel %vm2485_vm4, %v5010_v33, %v9424_v35  ;;  %v12885_v62 = vsel %vm2485_vm4, %v5011_v13, %v9425_v23  ;;  %9061 = vmatprep.mubr.msk.bf16.mxu1 %vm482_vm0, %v6288_v15 }
0x269c   : > { %v6296_v51 = vpack.c.bf16 %v12885_v62, %v12882_v12  ;;  %v2483_v10 = vsel %vm2476_vm3, %v2474_v63, %v9299_v32  ;;  %v2484_v56 = vsel %vm2476_vm3, %v2475_v30, %v9300_v42  ;;  %v14112_v32 = vld [vmem:[#allocation37_spill] sm:$0xff] }
0x269d   : > { %v9308_v54 = vpop.permute.xlu1 %9307 }
0x269e   : > { %v9310_v9 = vunpack.i.h.bf16 %v9308_v54  ;;  %v9309_v4 = vunpack.i.l.bf16 %v9308_v54 }
0x26a0   : > { %v2492_v6 = vsel %vm2485_vm4, %v2483_v10, %v9309_v4  ;;  %v2493_v16 = vsel %vm2485_vm4, %v2484_v56, %v9310_v9 }
0x26a1   : > { %v9318_v15 = vpop.permute.xlu1 %9317  ;;  %v6289_v61 = vpack.c.bf16 %v2493_v16, %v2492_v6 }
0x26a2   : > { %v9320_v36 = vunpack.i.h.bf16 %v9318_v15  ;;  %v9319_v26 = vunpack.i.l.bf16 %v9318_v15 }
0x26a3   : > { %9062 = vmatmul.mubr.msk.bf16.gmra.mrb[132].mxu1 %vm482_vm0, %v6289_v61  ;;  %v14113_v61 = vld [vmem:[#allocation43_spill] sm:$0xff] }
0x26a4   : > { %9065 = vmatprep.mubr.msk.bf16.mxu1 %vm482_vm0, %v6290_v48  ;;  %v3737_v49 = vsel %vm1242_vm1, %v14107_v11, %v9320_v36  ;;  %v3736_v58 = vsel %vm1242_vm1, %v14108_v0, %v9319_v26  ;;  %v14114_v36 = vld [vmem:[#allocation41_spill] sm:$0xff] }
0x26a5   : > { %v9328_v39 = vpop.permute.xlu1 %9327 }
0x26a6   : > { %v9330_v46 = vunpack.i.h.bf16 %v9328_v39  ;;  %v9329_v27 = vunpack.i.l.bf16 %v9328_v39 }
0x26a8   : > { %v3744_v41 = vsel %vm2476_vm3, %v3736_v58, %v9329_v27  ;;  %v3745_v20 = vsel %vm2476_vm3, %v3737_v49, %v9330_v46 }
0x26a9   : > { %v9338_v50 = vpop.permute.xlu1 %9337 }
0x26aa   : > { %v9340_v47 = vunpack.i.h.bf16 %v9338_v50  ;;  %v9339_v5 = vunpack.i.l.bf16 %v9338_v50 }
0x26ac   : > { %v3752_v8 = vsel %vm2485_vm4, %v3744_v41, %v9339_v5  ;;  %v3753_v48 = vsel %vm2485_vm4, %v3745_v20, %v9340_v47 }
0x26ad   : > { %v6291_v22 = vpack.c.bf16 %v3753_v48, %v3752_v8  ;;  %v9348_v1 = vpop.permute.xlu1 %9347  ;;  %v14115_v8 = vld [vmem:[#allocation85_spill] sm:$0xff]  ;;  %v14116_v48 = vld [vmem:[#allocation83_spill] sm:$0xff] }
0x26ae   : > { %v9350_v59 = vunpack.i.h.bf16 %v9348_v1  ;;  %v9349_v18 = vunpack.i.l.bf16 %v9348_v1 }
0x26af   : > { %9066 = vmatmul.mubr.msk.bf16.gmra.mrb[136].mxu1 %vm482_vm0, %v6291_v22  ;;  %v14117_v22 = vpack.i.bf16 %v14115_v8, %v14116_v48  ;;  %v10278_v48 = vld [vmem:[%s10409_s14 + $0x40] sm:$0xff] }
0x26b0   : > { %9069 = vmatprep.mubr.msk.bf16.mxu1 %vm482_vm0, %v6292_v40  ;;  %v3741_v21 = vsel %vm1242_vm1, %v14109_v34, %v9350_v59  ;;  %v3740_v37 = vsel %vm1242_vm1, %v14110_v19, %v9349_v18  ;;  %v14119_v59 = vld [vmem:[#allocation84_spill] sm:$0xff] }
0x26b1   : > { %v9358_v55 = vpop.permute.xlu1 %9357 }
0x26b2   : > { %v9360_v60 = vunpack.i.h.bf16 %v9358_v55  ;;  %v9359_v43 = vunpack.i.l.bf16 %v9358_v55  ;;  %v14118_v55 = vld [vmem:[#allocation86_spill] sm:$0xff] }
0x26b3   : > { %v14120_v18 = vpack.i.bf16 %v14118_v55, %v14119_v59 }
0x26b4   : > { %v3748_v45 = vsel %vm2476_vm3, %v3740_v37, %v9359_v43  ;;  %v3749_v25 = vsel %vm2476_vm3, %v3741_v21, %v9360_v60 }
0x26b5   : > { %v9368_v29 = vpop.permute.xlu1 %9367 }
0x26b6   : > { %v9370_v44 = vunpack.i.h.bf16 %v9368_v29  ;;  %v9369_v14 = vunpack.i.l.bf16 %v9368_v29 }
0x26b8   : > { %v3756_v7 = vsel %vm2485_vm4, %v3748_v45, %v9369_v14  ;;  %v3757_v40 = vsel %vm2485_vm4, %v3749_v25, %v9370_v44 }
0x26b9   : > { %v6293_v52 = vpack.c.bf16 %v3757_v40, %v3756_v7  ;;  %v9378_v28 = vpop.permute.xlu1 %9377  ;;  %v12969_v40 = vld [vmem:[%s13835_s6] ss:$0 sm:$0xff] }
0x26ba   : > { %v9380_v35 = vunpack.i.h.bf16 %v9378_v28  ;;  %v9379_v3 = vunpack.i.l.bf16 %v9378_v28 }
0x26bb   : > { %9070 = vmatmul.mubr.msk.bf16.gmra.mrb[140].mxu1 %vm482_vm0, %v6293_v52 }
0x26bc   : > { %9073 = vmatprep.mubr.msk.bf16.mxu1 %vm482_vm0, %v6294_v24  ;;  %v5001_v42 = vsel %vm1242_vm1, %v14111_v2, %v9380_v35  ;;  %v5000_v54 = vsel %vm1242_vm1, %v14112_v32, %v9379_v3 }
0x26bd   : > { %v9388_v23 = vpop.permute.xlu1 %9387 }
0x26be   : > { %v9390_v33 = vunpack.i.h.bf16 %v9388_v23  ;;  %v9389_v13 = vunpack.i.l.bf16 %v9388_v23 }
0x26c0   : > { %v5008_v57 = vsel %vm2476_vm3, %v5000_v54, %v9389_v13  ;;  %v5009_v31 = vsel %vm2476_vm3, %v5001_v42, %v9390_v33  ;;  %v10269_v33 = vld [vmem:[%s10409_s14] sm:$0xff]  ;;  %v10270_v42 = vld [vmem:[%s10409_s14 + $0x10] sm:$0xff] }
0x26c1   : > { %v9398_v53 = vpop.permute.xlu1 %9397 }
0x26c2   : > { %v9400_v17 = vunpack.i.h.bf16 %v9398_v53  ;;  %v9399_v30 = vunpack.i.l.bf16 %v9398_v53 }
0x26c4   : > { %v5016_v38 = vsel %vm2485_vm4, %v5008_v57, %v9399_v30  ;;  %v5017_v24 = vsel %vm2485_vm4, %v5009_v31, %v9400_v17  ;;  %v10271_v17 = vld [vmem:[%s10409_s14 + $0x8] sm:$0xff] }
0x26c5   : > { %v6295_v63 = vpack.c.bf16 %v5017_v24, %v5016_v38  ;;  %v9408_v9 = vpop.permute.xlu1 %9407  ;;  %v10272_v38 = vld [vmem:[%s10409_s14 + $0x18] sm:$0xff] }
0x26c6   : > { %v9410_v10 = vunpack.i.h.bf16 %v9408_v9  ;;  %v9409_v56 = vunpack.i.l.bf16 %v9408_v9 }
0x26c7   : > { %9074 = vmatmul.mubr.msk.bf16.gmra.mrb[144].mxu1 %vm482_vm0, %v6295_v63 }
0x26c8   : > { %9077 = vmatprep.mubr.msk.bf16.mxu1 %vm482_vm0, %v6296_v51  ;;  %v5005_v39 = vsel %vm1242_vm1, %v14113_v61, %v9410_v10  ;;  %v5004_v26 = vsel %vm1242_vm1, %v14114_v36, %v9409_v56  ;;  %v10273_v10 = vld [vmem:[%s10409_s14 + $0x28] sm:$0xff] }
0x26c9   : > { %v9418_v4 = vpop.permute.xlu1 %9417 }
0x26ca   : > { %v9420_v6 = vunpack.i.h.bf16 %v9418_v4  ;;  %v9419_v16 = vunpack.i.l.bf16 %v9418_v4 }
0x26cc   : > { %v5012_v50 = vsel %vm2476_vm3, %v5004_v26, %v9419_v16  ;;  %v5013_v12 = vsel %vm2476_vm3, %v5005_v39, %v9420_v6  ;;  %v10274_v26 = vld [vmem:[%s10409_s14 + $0x20] sm:$0xff] }
0x26cd   : > { %v9428_v15 = vpop.permute.xlu1 %9427 }
0x26ce   : > { %v9430_v46 = vunpack.i.h.bf16 %v9428_v15  ;;  %v9429_v27 = vunpack.i.l.bf16 %v9428_v15 }
0x26d0   : > { %v5020_v62 = vsel %vm2485_vm4, %v5012_v50, %v9429_v27  ;;  %v5021_v51 = vsel %vm2485_vm4, %v5013_v12, %v9430_v46  ;;  %v10275_v27 = vld [vmem:[%s10409_s14 + $0x38] sm:$0xff] }
0x26d1   : > { %v6297_v11 = vpack.c.bf16 %v5021_v51, %v5020_v62 }
0x26d3   : > { %9078 = vmatmul.mubr.msk.bf16.gmra.mrb[148].mxu1 %vm482_vm0, %v6297_v11  ;;  %v10276_v11 = vld [vmem:[%s10409_s14 + $0x30] sm:$0xff] }
0x275d   : > { %v9047_v49 = vpop.f32.mrb[120].mxu1 }
0x275e   : > { %v6135_v0 = vpop.f32.mrb[121].mxu1 }
0x275f   : > { %v9048_v58 = vpop.f32.mrb[122].mxu1 }
0x2760   : > { %v9461_v47 = vpack.i.bf16 %v9048_v58, %v9047_v49  ;;  %v6138_v5 = vpop.f32.mrb[123].mxu1 }
0x2761   : > { %v9466_v41 = vpack.i.bf16 %v6138_v5, %v6135_v0 }
0x2762   : > { %9462 = vrot.lane.b32.xlu1 %v9461_v47, %s10322_s26  ;;  %v10277_v47 = vld [vmem:[%s10409_s14 + $0x48] sm:$0xff] }
0x2763   : > { %9467 = vrot.lane.b32.xlu0 %v9466_v41, %s10322_s26 }
0x2765   : > { %v9051_v20 = vpop.f32.mrb[124].mxu1 }
0x2766   : > { %9477 = vrot.lane.b32.xlu1 %v14117_v22, %s10321_s24  ;;  %v6151_v1 = vpop.f32.mrb[125].mxu1 }
0x2767   : > { %9472 = vrot.lane.b32.xlu0 %v14120_v18, %s10321_s24  ;;  %v9052_v60 = vpop.f32.mrb[126].mxu1 }
0x2768   : > { %v9486_v43 = vpack.i.bf16 %v9052_v60, %v9051_v20  ;;  %v6154_v29 = vpop.f32.mrb[127].mxu1 }
0x2769   : > { %v9481_v34 = vpack.i.bf16 %v6154_v29, %v6151_v1  ;;  %v10279_v1 = vld [vmem:[%s10409_s14 + $0x58] sm:$0xff] }
0x276a   : > { %9487 = vrot.lane.b32.xlu1 %v9486_v43, %s10322_s26 }
0x276b   : > { %9482 = vrot.lane.b32.xlu0 %v9481_v34, %s10322_s26  ;;  %v10280_v34 = vld [vmem:[%s10409_s14 + $0x50] sm:$0xff] }
0x276d   : > { %v9059_v21 = vpop.f32.mrb[128].mxu1 }
0x276e   : > { %v6407_v19 = vpop.f32.mrb[129].mxu1  ;;  %v6416_v35 = vadd.f32 %v9059_v21, %v12969_v40 }
0x276f   : > { %v9060_v37 = vpop.f32.mrb[130].mxu1  ;;  %v6408_v52 = vadd.f32 %v12969_v40, %v6407_v19 }
0x2770   : > { %v6410_v44 = vpop.f32.mrb[131].mxu1  ;;  %v12978_v32 = vadd.f32 %v10270_v42, %v6416_v35  ;;  %v6419_v54 = vadd.f32 %v9060_v37, %v12969_v40  ;;  %v10282_v35 = vld [vmem:[%s10409_s14 + $0x60] sm:$0xff] }
0x2771   : > { %v12974_v13 = vadd.f32 %v10269_v33, %v6408_v52  ;;  %v6411_v53 = vadd.f32 %v12969_v40, %v6410_v44  ;;  %v10283_v33 = vld [vmem:[%s10409_s14 + $0x78] sm:$0xff] }
0x2772   : > { %v12988_v24 = vadd.f32 %v10272_v38, %v6419_v54  ;;  %v6572_v63 = vsel %vm482_vm0, %v12978_v32, 0.0  ;;  %v10284_v54 = vld [vmem:[%s10409_s14 + $0x70] sm:$0xff]  ;;  %v10285_v38 = vld [vmem:[%s10409_s14 + $0x88] sm:$0xff] }
0x2773   : > { %v12982_v30 = vadd.f32 %v10271_v17, %v6411_v53  ;;  %v6566_v31 = vsel %vm482_vm0, %v12974_v13, 0.0 }
0x2774   : > { %v6575_v36 = vsel %vm482_vm0, %v12988_v24, 0.0 }
0x2775   : > { %v6569_v6 = vsel %vm482_vm0, %v12982_v30, 0.0 }
0x2776   : > { %v9063_v14 = vpop.f32.mrb[132].mxu1 }
0x2777   : > { %v6423_v45 = vpop.f32.mrb[133].mxu1  ;;  %v6432_v61 = vadd.f32 %v9063_v14, %v12969_v40 }
0x2778   : > { %v9064_v25 = vpop.f32.mrb[134].mxu1  ;;  %v6424_v9 = vadd.f32 %v12969_v40, %v6423_v45  ;;  %v10281_v45 = vld [vmem:[%s10409_s14 + $0x68] sm:$0xff] }
0x2779   : > { %v6426_v7 = vpop.f32.mrb[135].mxu1  ;;  %v6435_v4 = vadd.f32 %v9064_v25, %v12969_v40  ;;  %v13012_v49 = vadd.f32 %v10276_v11, %v6432_v61  ;;  %v10288_v11 = vld [vmem:[%s10409_s14 + $0x90] sm:$0xff] }
0x277a   : > { %v6427_v57 = vadd.f32 %v12969_v40, %v6426_v7  ;;  %v13003_v46 = vadd.f32 %v10274_v26, %v6424_v9 }
0x277b   : > { %v13006_v50 = vadd.f32 %v10275_v27, %v6435_v4  ;;  %v6584_v60 = vsel %vm482_vm0, %v13012_v49, 0.0 }
0x277c   : > { %v12995_v56 = vadd.f32 %v10273_v10, %v6427_v57  ;;  %v6578_v20 = vsel %vm482_vm0, %v13003_v46, 0.0 }
0x277d   : > { %v6587_v41 = vsel %vm482_vm0, %v13006_v50, 0.0 }
0x277e   : > { %v6581_v51 = vsel %vm482_vm0, %v12995_v56, 0.0 }
0x2782   : > { %v9067_v28 = vpop.f32.mrb[136].mxu1 }
0x2783   : > { %v6439_v23 = vpop.f32.mrb[137].mxu1  ;;  %v6448_v8 = vadd.f32 %v9067_v28, %v12969_v40 }
0x2784   : > { %v9068_v3 = vpop.f32.mrb[138].mxu1  ;;  %v6440_v0 = vadd.f32 %v12969_v40, %v6439_v23 }
0x2785   : > { %v6442_v2 = vpop.f32.mrb[139].mxu1  ;;  %v6451_v58 = vadd.f32 %v9068_v3, %v12969_v40  ;;  %v13036_v21 = vadd.f32 %v10280_v34, %v6448_v8 }
0x2786   : > { %v6443_v12 = vadd.f32 %v12969_v40, %v6442_v2  ;;  %v13025_v22 = vadd.f32 %v10278_v48, %v6440_v0 }
0x2787   : > { %v13028_v55 = vadd.f32 %v10279_v1, %v6451_v58  ;;  %v6596_v23 = vsel %vm482_vm0, %v13036_v21, 0.0 }
0x2788   : > { %v13017_v5 = vadd.f32 %v10277_v47, %v6443_v12  ;;  %v6590_v37 = vsel %vm482_vm0, %v13025_v22, 0.0 }
0x2789   : > { %v6599_v52 = vsel %vm482_vm0, %v13028_v55, 0.0 }
0x278a   : > { %6567 = vadd.xlane.f32.xlu0 %v6566_v31  ;;  %v6593_v18 = vsel %vm482_vm0, %v13017_v5, 0.0 }
0x278e   : > { %v9071_v16 = vpop.f32.mrb[140].mxu1  ;;  %6570 = vadd.xlane.f32.xlu1 %v6569_v6  ;;  %6573 = vadd.xlane.f32.xlu0 %v6572_v63 }
0x278f   : > { %v6455_v15 = vpop.f32.mrb[141].mxu1  ;;  %v6464_v28 = vadd.f32 %v9071_v16, %v12969_v40 }
0x2790   : > { %v9072_v39 = vpop.f32.mrb[142].mxu1  ;;  %v6456_v44 = vadd.f32 %v12969_v40, %v6455_v15  ;;  %v10286_v15 = vld [vmem:[%s10409_s14 + $0x80] sm:$0xff] }
0x2791   : > { %v6458_v62 = vpop.f32.mrb[143].mxu1  ;;  %v6467_v14 = vadd.f32 %v9072_v39, %v12969_v40  ;;  %v13060_v17 = vadd.f32 %v10284_v54, %v6464_v28 }
0x2792   : > { %6582 = vadd.xlane.f32.xlu1 %v6581_v51  ;;  %6576 = vadd.xlane.f32.xlu0 %v6575_v36  ;;  %v6459_v59 = vadd.f32 %v12969_v40, %v6458_v62  ;;  %v13051_v3 = vadd.f32 %v10282_v35, %v6456_v44  ;;  %v10287_v36 = vld [vmem:[%s10409_s14 + $0x98] sm:$0xff] }
0x2793   : > { %v13054_v53 = vadd.f32 %v10283_v33, %v6467_v14  ;;  %v6608_v62 = vsel %vm482_vm0, %v13060_v17, 0.0 }
0x2794   : > { %v13043_v25 = vadd.f32 %v10281_v45, %v6459_v59  ;;  %14122 = vst [vmem:[#allocation50_spill] sm:$0xff] %v13051_v3  ;;  %v6602_v4 = vsel %vm482_vm0, %v13051_v3, 0.0 }
0x2795   : > { %14123 = vst [vmem:[#allocation48_spill] sm:$0xff] %v13054_v53  ;;  %v6611_v9 = vsel %vm482_vm0, %v13054_v53, 0.0 }
0x2796   : > { %6588 = vadd.xlane.f32.xlu1 %v6587_v41  ;;  %6579 = vadd.xlane.f32.xlu0 %v6578_v20  ;;  %14121 = vst [vmem:[#allocation14_spill] sm:$0xff] %v13043_v25  ;;  %v6605_v42 = vsel %vm482_vm0, %v13043_v25, 0.0  ;;  %v10289_v20 = vld [vmem:[%s10409_s14 + $0xa8] sm:$0xff] }
0x279a   : > { %v9075_v43 = vpop.f32.mrb[144].mxu1  ;;  %6594 = vadd.xlane.f32.xlu1 %v6593_v18  ;;  %6585 = vadd.xlane.f32.xlu0 %v6584_v60  ;;  %v10290_v18 = vld [vmem:[%s10409_s14 + $0xa0] sm:$0xff] }
0x279b   : > { %v6471_v29 = vpop.f32.mrb[145].mxu1  ;;  %v6480_v16 = vadd.f32 %v9075_v43, %v12969_v40  ;;  %v10291_v43 = vld [vmem:[%s10409_s14 + $0xb8] sm:$0xff] }
0x279c   : > { %v9076_v19 = vpop.f32.mrb[146].mxu1  ;;  %v6472_v57 = vadd.f32 %v12969_v40, %v6471_v29 }
0x279d   : > { %v6474_v7 = vpop.f32.mrb[147].mxu1  ;;  %v6483_v31 = vadd.f32 %v9076_v19, %v12969_v40  ;;  %v13084_v0 = vadd.f32 %v10288_v11, %v6480_v16  ;;  %v10292_v19 = vld [vmem:[%s10409_s14 + $0xb0] sm:$0xff]  ;;  %v14133_v16 = vld [vmem:[#allocation66_spill] sm:$0xff] }
0x279e   : > { %6600 = vadd.xlane.f32.xlu1 %v6599_v52  ;;  %6591 = vadd.xlane.f32.xlu0 %v6590_v37  ;;  %v6475_v2 = vadd.f32 %v12969_v40, %v6474_v7  ;;  %v13073_v61 = vadd.f32 %v10286_v15, %v6472_v57  ;;  %v9438_v7 = vpop.permute.xlu1 %9437  ;;  %v9433_v52 = vpop.permute.xlu0 %9432 }
0x279f   : > { %v13076_v26 = vadd.f32 %v10287_v36, %v6483_v31  ;;  %14127 = vst [vmem:[#allocation54_spill] sm:$0xff] %v13084_v0  ;;  %v6620_v1 = vsel %vm482_vm0, %v13084_v0, 0.0  ;;  %v9434_v35 = vunpack.i.l.bf16 %v9433_v52  ;;  %v9435_v33 = vunpack.i.h.bf16 %v9433_v52 }
0x27a0   : > { %v13065_v63 = vadd.f32 %v10285_v38, %v6475_v2  ;;  %14125 = vst [vmem:[#allocation10_spill] sm:$0xff] %v13073_v61  ;;  %v6614_v58 = vsel %vm482_vm0, %v13073_v61, 0.0  ;;  %v9440_v57 = vunpack.i.h.bf16 %v9438_v7  ;;  %v9439_v31 = vunpack.i.l.bf16 %v9438_v7 }
0x27a1   : > { %14126 = vst [vmem:[#allocation56_spill] sm:$0xff] %v13076_v26  ;;  %v6623_v48 = vsel %vm482_vm0, %v13076_v26, 0.0  ;;  %v6263_v15 = vsel %vm1242_vm1, %v14133_v16, %v9435_v33  ;;  %v14139_v16 = vld [vmem:[#allocation67_spill] sm:$0xff] }
0x27a2   : > { %6606 = vadd.xlane.f32.xlu1 %v6605_v42  ;;  %6597 = vadd.xlane.f32.xlu0 %v6596_v23  ;;  %14124 = vst [vmem:[#allocation11_spill] sm:$0xff] %v13065_v63  ;;  %v6617_v12 = vsel %vm482_vm0, %v13065_v63, 0.0  ;;  %v9448_v28 = vpop.permute.xlu1 %9447  ;;  %v9443_v23 = vpop.permute.xlu0 %9442 }
0x27a3   : > { %v9444_v2 = vunpack.i.l.bf16 %v9443_v23  ;;  %v9450_v38 = vunpack.i.h.bf16 %v9448_v28 }
0x27a6   : > { %v9079_v10 = vpop.f32.mrb[148].mxu1  ;;  %6612 = vadd.xlane.f32.xlu1 %v6611_v9  ;;  %6603 = vadd.xlane.f32.xlu0 %v6602_v4  ;;  %v9458_v42 = vpop.permute.xlu1 %9457  ;;  %v9449_v9 = vunpack.i.l.bf16 %v9448_v28  ;;  %v14132_v4 = vld [vmem:[#allocation64_spill] sm:$0xff] }
0x27a7   : > { %v6487_v6 = vpop.f32.mrb[149].mxu1  ;;  %v6496_v59 = vadd.f32 %v9079_v10, %v12969_v40  ;;  %v9453_v54 = vpop.permute.xlu0 %9452  ;;  %v6262_v10 = vsel %vm1242_vm1, %v14132_v4, %v9434_v35  ;;  %v9460_v52 = vunpack.i.h.bf16 %v9458_v42  ;;  %v9459_v28 = vunpack.i.l.bf16 %v9458_v42 }
0x27a8   : > { %v9080_v39 = vpop.f32.mrb[150].mxu1  ;;  %v6488_v47 = vadd.f32 %v12969_v40, %v6487_v6  ;;  %v9445_v6 = vunpack.i.h.bf16 %v9443_v23 }
0x27a9   : > { %v6490_v27 = vpop.f32.mrb[151].mxu1  ;;  %v6499_v41 = vadd.f32 %v9080_v39, %v12969_v40  ;;  %v13107_v37 = vadd.f32 %v10292_v19, %v6496_v59  ;;  %v6270_v39 = vsel %vm2476_vm3, %v6262_v10, %v9444_v2  ;;  %v9454_v19 = vunpack.i.l.bf16 %v9453_v54 }
0x27aa   : > { %v6491_v51 = vadd.f32 %v12969_v40, %v6490_v27  ;;  %6618 = vadd.xlane.f32.xlu1 %v6617_v12  ;;  %6609 = vadd.xlane.f32.xlu0 %v6608_v62  ;;  %v13099_v60 = vadd.f32 %v10290_v18, %v6488_v47  ;;  %v14134_v27 = vld [vmem:[#allocation65_spill] sm:$0xff]  ;;  %v14135_v62 = vld [vmem:[#allocation63_spill] sm:$0xff]  ;;  %v6271_v59 = vsel %vm2476_vm3, %v6263_v15, %v9445_v6  ;;  %v9455_v18 = vunpack.i.h.bf16 %v9453_v54  ;;  %v14137_v54 = vld [vmem:[#allocation68_spill] sm:$0xff] }
0x27ab   : > { %v13102_v29 = vadd.f32 %v10291_v43, %v6499_v41  ;;  %14131 = vst [vmem:[#allocation60_spill] sm:$0xff] %v13107_v37  ;;  %v6632_v45 = vsel %vm482_vm0, %v13107_v37, 0.0  ;;  %v6265_v12 = vsel %vm1242_vm1, %v14134_v27, %v9440_v57  ;;  %v6266_v4 = vsel %vm1242_vm1, %v14137_v54, %v9454_v19  ;;  %v14138_v6 = vld [vmem:[#allocation69_spill] sm:$0xff] }
0x27ac   : > { %v13091_v8 = vadd.f32 %v10289_v20, %v6491_v51  ;;  %14129 = vst [vmem:[#allocation12_spill] sm:$0xff] %v13099_v60  ;;  %v6626_v14 = vsel %vm482_vm0, %v13099_v60, 0.0  ;;  %v6264_v51 = vsel %vm1242_vm1, %v14135_v62, %v9439_v31  ;;  %v6273_v20 = vsel %vm2476_vm3, %v6265_v12, %v9450_v38  ;;  %v14136_v38 = vld [vmem:[#allocation70_spill] sm:$0xff] }
0x27ad   : > { %14130 = vst [vmem:[#allocation62_spill] sm:$0xff] %v13102_v29  ;;  %v6635_v44 = vsel %vm482_vm0, %v13102_v29, 0.0  ;;  %v6272_v41 = vsel %vm2476_vm3, %v6264_v51, %v9449_v9  ;;  %v6267_v9 = vsel %vm1242_vm1, %v14136_v38, %v9455_v18  ;;  %v6269_v42 = vsel %vm1242_vm1, %v14138_v6, %v9460_v52  ;;  %v10295_v6 = vld [vmem:[%s10409_s14 + $0xc8] sm:$0xff] }
0x27ae   : > { %14128 = vst [vmem:[#allocation13_spill] sm:$0xff] %v13091_v8  ;;  %6624 = vadd.xlane.f32.xlu1 %v6623_v48  ;;  %6615 = vadd.xlane.f32.xlu0 %v6614_v58  ;;  %v6629_v34 = vsel %vm482_vm0, %v13091_v8, 0.0  ;;  %v6268_v15 = vsel %vm1242_vm1, %v14139_v16, %v9459_v28 }
0x27b2   : > { %6630 = vadd.xlane.f32.xlu1 %v6629_v34  ;;  %6621 = vadd.xlane.f32.xlu0 %v6620_v1 }
0x27b6   : > { %6636 = vadd.xlane.f32.xlu1 %v6635_v44  ;;  %6627 = vadd.xlane.f32.xlu0 %v6626_v14 }
0x27ba   : > { %6633 = vadd.xlane.f32.xlu0 %v6632_v45 }
0x27d4   : > { %v9463_v36 = vpop.permute.xlu1 %9462 }
0x27d5   : > { %v9465_v11 = vunpack.i.h.bf16 %v9463_v36  ;;  %v9464_v58 = vunpack.i.l.bf16 %v9463_v36  ;;  %v9468_v47 = vpop.permute.xlu0 %9467 }
0x27d6   : > { %v9470_v48 = vunpack.i.h.bf16 %v9468_v47  ;;  %v9469_v1 = vunpack.i.l.bf16 %v9468_v47 }
0x27d7   : > { %v6280_v43 = vsel %vm2485_vm4, %v6272_v41, %v9464_v58  ;;  %v6281_v34 = vsel %vm2485_vm4, %v6273_v20, %v9465_v11 }
0x27d8   : > { %v6299_v44 = vpack.c.bf16 %v6281_v34, %v6280_v43  ;;  %v6279_v14 = vsel %vm2485_vm4, %v6271_v59, %v9470_v48  ;;  %v6278_v45 = vsel %vm2485_vm4, %v6270_v39, %v9469_v1  ;;  %v9478_v7 = vpop.permute.xlu1 %9477 }
0x27d9   : > { %v6298_v23 = vpack.c.bf16 %v6279_v14, %v6278_v45  ;;  %v9473_v35 = vpop.permute.xlu0 %9472  ;;  %v9480_v33 = vunpack.i.h.bf16 %v9478_v7  ;;  %v9479_v2 = vunpack.i.l.bf16 %v9478_v7 }
0x27da   : > { %v9475_v57 = vunpack.i.h.bf16 %v9473_v35  ;;  %v9474_v31 = vunpack.i.l.bf16 %v9473_v35 }
0x27db   : > { %9081 = vmatprep.mubr.msk.bf16.mxu1 %vm482_vm0, %v6298_v23  ;;  %v6276_v12 = vsel %vm2476_vm3, %v6268_v15, %v9479_v2  ;;  %v6277_v62 = vsel %vm2476_vm3, %v6269_v42, %v9480_v33  ;;  %v10296_v15 = vld [vmem:[%s10409_s14 + $0xd8] sm:$0xff] }
0x27dc   : > { %v9488_v10 = vpop.permute.xlu1 %9487  ;;  %9082 = vmatmul.mubr.msk.bf16.gmra.mrb[152].mxu1 %vm482_vm0, %v6299_v44  ;;  %v6275_v58 = vsel %vm2476_vm3, %v6267_v9, %v9475_v57  ;;  %v6274_v47 = vsel %vm2476_vm3, %v6266_v4, %v9474_v31  ;;  %v10293_v57 = vld [vmem:[%s10409_s14 + $0xc0] sm:$0xff]  ;;  %v10294_v4 = vld [vmem:[%s10409_s14 + $0xd0] sm:$0xff] }
0x27dd   : > { %v9490_v39 = vunpack.i.h.bf16 %v9488_v10  ;;  %v9489_v36 = vunpack.i.l.bf16 %v9488_v10  ;;  %v9483_v27 = vpop.permute.xlu0 %9482 }
0x27de   : > { %v9485_v51 = vunpack.i.h.bf16 %v9483_v27  ;;  %v9484_v11 = vunpack.i.l.bf16 %v9483_v27 }
0x27df   : > { %v6284_v41 = vsel %vm2485_vm4, %v6276_v12, %v9489_v36  ;;  %v6285_v20 = vsel %vm2485_vm4, %v6277_v62, %v9490_v39 }
0x27e0   : > { %v6301_v48 = vpack.c.bf16 %v6285_v20, %v6284_v41  ;;  %v6283_v1 = vsel %vm2485_vm4, %v6275_v58, %v9485_v51  ;;  %v6282_v59 = vsel %vm2485_vm4, %v6274_v47, %v9484_v11 }
0x27e1   : > { %v6300_v18 = vpack.c.bf16 %v6283_v1, %v6282_v59  ;;  %v10297_v59 = vld [vmem:[%s10409_s14 + $0xe0] sm:$0xff] }
0x27e3   : > { %9085 = vmatprep.mubr.msk.bf16.mxu1 %vm482_vm0, %v6300_v18 }
0x27e4   : > { %9086 = vmatmul.mubr.msk.bf16.gmra.mrb[156].mxu1 %vm482_vm0, %v6301_v48 }
0x2817   : > { %v6568_v43 = vpop.xlane.xlu0 %6567 }
0x2818   : > { %v6662_v12 = vmul.f32 0.03125, %v6568_v43 }
0x281b   : > { %v6574_v34 = vpop.xlane.xlu0 %6573  ;;  %v6571_v44 = vpop.xlane.xlu1 %6570 }
0x281c   : > { %v6663_v20 = vmul.f32 0.03125, %v6571_v44  ;;  %v10298_v44 = vld [vmem:[%s10409_s14 + $0xf0] sm:$0xff] }
0x281f   : > { %v6577_v19 = vpop.xlane.xlu0 %6576  ;;  %v6583_v45 = vpop.xlane.xlu1 %6582 }
0x2823   : > { %v6580_v14 = vpop.xlane.xlu0 %6579  ;;  %v13160_v54 = vpop.xlane.xlu1 %6588 }
0x2827   : > { %v13153_v33 = vpop.xlane.xlu0 %6585  ;;  %v6595_v48 = vpop.xlane.xlu1 %6594 }
0x282b   : > { %v6592_v62 = vpop.xlane.xlu0 %6591 }
0x28af   : > { %v9083_v7 = vpop.f32.mrb[152].mxu1 }
0x28b0   : > { %v6503_v52 = vpop.f32.mrb[153].mxu1  ;;  %v6512_v28 = vadd.f32 %v9083_v7, %v12969_v40 }
0x28b1   : > { %v6504_v23 = vadd.f32 %v12969_v40, %v6503_v52  ;;  %v9084_v35 = vpop.f32.mrb[154].mxu1 }
0x28b2   : > { %v6506_v2 = vpop.f32.mrb[155].mxu1  ;;  %v6515_v38 = vadd.f32 %v9084_v35, %v12969_v40  ;;  %v13163_v10 = vadd.f32 %v10294_v4, %v6512_v28  ;;  %v13187_v28 = vsub.f32 %v12974_v13, %v6662_v12  ;;  %v6665_v4 = vmul.f32 0.03125, %v6577_v19 }
0x28b3   : > { %v13156_v31 = vadd.f32 %v10293_v57, %v6504_v23  ;;  %v6507_v9 = vadd.f32 %v12969_v40, %v6506_v2  ;;  %v6664_v23 = vmul.f32 0.03125, %v6574_v34  ;;  %v10299_v2 = vld [vmem:[%s10409_s14 + $0xe8] sm:$0xff]  ;;  %v6667_v19 = vmul.f32 0.03125, %v6583_v45 }
0x28b4   : > { %14141 = vst [vmem:[#allocation15_spill] sm:$0xff] %v13163_v10  ;;  %v13171_v39 = vadd.f32 %v10296_v15, %v6515_v38  ;;  %v6644_v41 = vsel %vm482_vm0, %v13163_v10, 0.0  ;;  %v6601_v15 = vpop.xlane.xlu1 %6600 }
0x28b5   : > { %14140 = vst [vmem:[#allocation16_spill] sm:$0xff] %v13156_v31  ;;  %v13166_v42 = vadd.f32 %v10295_v6, %v6507_v9  ;;  %v6638_v16 = vsel %vm482_vm0, %v13156_v31, 0.0  ;;  %v6598_v9 = vpop.xlane.xlu0 %6597  ;;  %v10300_v6 = vld [vmem:[%s10409_s14 + $0xf8] sm:$0xff] }
0x28b6   : > { %6639 = vadd.xlane.f32.xlu0 %v6638_v16  ;;  %14143 = vst [vmem:[#allocation72_spill] sm:$0xff] %v13171_v39  ;;  %v6647_v52 = vsel %vm482_vm0, %v13171_v39, 0.0 }
0x28b7   : > { %14142 = vst [vmem:[#allocation74_spill] sm:$0xff] %v13166_v42  ;;  %v9087_v36 = vpop.f32.mrb[156].mxu1  ;;  %v6641_v27 = vsel %vm482_vm0, %v13166_v42, 0.0 }
0x28b8   : > { %v6519_v51 = vpop.f32.mrb[157].mxu1  ;;  %6642 = vadd.xlane.f32.xlu1 %v6641_v27  ;;  %v6528_v11 = vadd.f32 %v9087_v36, %v12969_v40  ;;  %v13206_v36 = vsub.f32 %v12978_v32, %v6664_v23  ;;  %v6666_v27 = vmul.f32 0.03125, %v6580_v14 }
0x28b9   : > { %v6520_v58 = vadd.f32 %v12969_v40, %v6519_v51  ;;  %v9088_v47 = vpop.f32.mrb[158].mxu1  ;;  %v6726_v51 = vmul.f32 %v13187_v28, %v13187_v28 }
0x28ba   : > { %v6522_v1 = vpop.f32.mrb[159].mxu1  ;;  %6645 = vadd.xlane.f32.xlu0 %v6644_v41  ;;  %v6531_v43 = vadd.f32 %v9088_v47, %v12969_v40  ;;  %v13190_v35 = vadd.f32 %v10298_v44, %v6528_v11  ;;  %v13213_v11 = vsub.f32 %v12988_v24, %v6665_v4  ;;  %v6604_v41 = vpop.xlane.xlu0 %6603  ;;  %v13220_v14 = vsub.f32 %v13003_v46, %v6666_v27 }
0x28bb   : > { %v13180_v18 = vadd.f32 %v10297_v59, %v6520_v58  ;;  %v6523_v7 = vadd.f32 %v12969_v40, %v6522_v1  ;;  %v13198_v40 = vsub.f32 %v12982_v30, %v6663_v20  ;;  %v6668_v20 = vmul.f32 0.03125, %v13153_v33  ;;  %v6607_v59 = vpop.xlane.xlu1 %6606 }
0x28bc   : > { %6648 = vadd.xlane.f32.xlu1 %v6647_v52  ;;  %14145 = vst [vmem:[#allocation25_spill] sm:$0xff] %v13190_v35  ;;  %v13201_v16 = vadd.f32 %v10300_v6, %v6531_v43  ;;  %v6656_v12 = vsel %vm482_vm0, %v13190_v35, 0.0  ;;  %v6758_v1 = vsel %vm482_vm0, %v6726_v51, 0.0  ;;  %v6728_v45 = vmul.f32 %v13206_v36, %v13206_v36 }
0x28bd   : > { %14144 = vst [vmem:[#allocation26_spill] sm:$0xff] %v13180_v18  ;;  %v13193_v57 = vadd.f32 %v10299_v2, %v6523_v7  ;;  %v6650_v38 = vsel %vm482_vm0, %v13180_v18, 0.0  ;;  %v6727_v47 = vmul.f32 %v13198_v40, %v13198_v40  ;;  %v13227_v43 = vsub.f32 %v12995_v56, %v6667_v19 }
0x28be   : > { %6651 = vadd.xlane.f32.xlu0 %v6650_v38  ;;  %14147 = vst [vmem:[#allocation80_spill] sm:$0xff] %v13201_v16  ;;  %v6659_v58 = vsel %vm482_vm0, %v13201_v16, 0.0  ;;  %v6669_v7 = vmul.f32 0.03125, %v13160_v54  ;;  %v6729_v23 = vmul.f32 %v13213_v11, %v13213_v11  ;;  %v13234_v33 = vsub.f32 %v13012_v49, %v6668_v20  ;;  %v6610_v4 = vpop.xlane.xlu0 %6609 }
0x28bf   : > { %14146 = vst [vmem:[#allocation82_spill] sm:$0xff] %v13193_v57  ;;  %v6653_v34 = vsel %vm482_vm0, %v13193_v57, 0.0  ;;  %v6761_v52 = vsel %vm482_vm0, %v6727_v47, 0.0  ;;  %v6670_v44 = vmul.f32 0.03125, %v6592_v62  ;;  %v6764_v2 = vsel %vm482_vm0, %v6728_v45, 0.0 }
0x28c0   : > { %6654 = vadd.xlane.f32.xlu1 %v6653_v34  ;;  %v6730_v38 = vmul.f32 %v13220_v14, %v13220_v14  ;;  %v13240_v6 = vsub.f32 %v13006_v50, %v6669_v7  ;;  %v6671_v54 = vmul.f32 0.03125, %v6595_v48  ;;  %v6767_v34 = vsel %vm482_vm0, %v6729_v23, 0.0 }
0x28c1   : > { %v6731_v27 = vmul.f32 %v13227_v43, %v13227_v43  ;;  %v13246_v62 = vsub.f32 %v13025_v22, %v6670_v44  ;;  %v6672_v51 = vmul.f32 0.03125, %v6598_v9  ;;  %v6673_v48 = vmul.f32 0.03125, %v6601_v15 }
0x28c2   : > { %6657 = vadd.xlane.f32.xlu0 %v6656_v12  ;;  %v6613_v12 = vpop.xlane.xlu1 %6612  ;;  %v6770_v19 = vsel %vm482_vm0, %v6730_v38, 0.0  ;;  %v13252_v47 = vsub.f32 %v13017_v5, %v6671_v54  ;;  %v6616_v45 = vpop.xlane.xlu0 %6615  ;;  %v6674_v9 = vmul.f32 0.03125, %v6604_v41  ;;  %v6676_v41 = vmul.f32 0.03125, %v6610_v4 }
0x28c3   : > { %v6773_v20 = vsel %vm482_vm0, %v6731_v27, 0.0  ;;  %v13258_v7 = vsub.f32 %v13036_v21, %v6672_v51  ;;  %v6734_v23 = vmul.f32 %v13246_v62, %v13246_v62  ;;  %v13264_v15 = vsub.f32 %v13028_v55, %v6673_v48 }
0x28c4   : > { %6660 = vadd.xlane.f32.xlu1 %v6659_v58  ;;  %v6732_v58 = vmul.f32 %v13234_v33, %v13234_v33  ;;  %v6735_v54 = vmul.f32 %v13252_v47, %v13252_v47  ;;  %v13282_v4 = vsub.f32 %v13060_v17, %v6676_v41 }
0x28c5   : > { %v6782_v27 = vsel %vm482_vm0, %v6734_v23, 0.0  ;;  %v6736_v51 = vmul.f32 %v13258_v7, %v13258_v7 }
0x28c6   : > { %6759 = vadd.xlane.f32.xlu0 %v6758_v1  ;;  %v6733_v1 = vmul.f32 %v13240_v6, %v13240_v6  ;;  %v6619_v44 = vpop.xlane.xlu1 %6618  ;;  %v6785_v48 = vsel %vm482_vm0, %v6735_v54, 0.0 }
0x28c8   : > { %6762 = vadd.xlane.f32.xlu1 %v6761_v52  ;;  %v6776_v52 = vsel %vm482_vm0, %v6732_v58, 0.0  ;;  %v6779_v38 = vsel %vm482_vm0, %v6733_v1, 0.0 }
0x28ca   : > { %6765 = vadd.xlane.f32.xlu0 %v6764_v2  ;;  %v6675_v2 = vmul.f32 0.03125, %v6607_v59  ;;  %v6677_v59 = vmul.f32 0.03125, %v6613_v12  ;;  %v6625_v1 = vpop.xlane.xlu1 %6624  ;;  %v6679_v12 = vmul.f32 0.03125, %v6619_v44 }
0x28cc   : > { %6768 = vadd.xlane.f32.xlu1 %v6767_v34  ;;  %v13270_v34 = vsub.f32 %v13051_v3, %v6674_v9  ;;  %v13276_v58 = vsub.f32 %v13043_v25, %v6675_v2  ;;  %v6678_v9 = vmul.f32 0.03125, %v6616_v45  ;;  %v13288_v2 = vsub.f32 %v13054_v53, %v6677_v59 }
0x28cd   : > { %v13300_v44 = vsub.f32 %v13065_v63, %v6679_v12  ;;  %v6681_v59 = vmul.f32 0.03125, %v6625_v1 }
0x28ce   : > { %6771 = vadd.xlane.f32.xlu0 %v6770_v19  ;;  %v6622_v19 = vpop.xlane.xlu0 %6621  ;;  %v6738_v23 = vmul.f32 %v13270_v34, %v13270_v34  ;;  %v6739_v54 = vmul.f32 %v13276_v58, %v13276_v58  ;;  %v13294_v41 = vsub.f32 %v13073_v61, %v6678_v9 }
0x28cf   : > { %v6680_v45 = vmul.f32 0.03125, %v6622_v19  ;;  %v13312_v12 = vsub.f32 %v13076_v26, %v6681_v59 }
0x28d0   : > { %6774 = vadd.xlane.f32.xlu1 %v6773_v20  ;;  %v6737_v20 = vmul.f32 %v13264_v15, %v13264_v15  ;;  %v6742_v61 = vmul.f32 %v13294_v41, %v13294_v41 }
0x28d1   : > { %v13306_v9 = vsub.f32 %v13084_v0, %v6680_v45  ;;  %v6745_v26 = vmul.f32 %v13312_v12, %v13312_v12 }
0x28d2   : > { %6777 = vadd.xlane.f32.xlu0 %v6776_v52  ;;  %v6788_v52 = vsel %vm482_vm0, %v6736_v51, 0.0  ;;  %v6794_v51 = vsel %vm482_vm0, %v6738_v23, 0.0 }
0x28d4   : > { %6780 = vadd.xlane.f32.xlu1 %v6779_v38  ;;  %v6791_v38 = vsel %vm482_vm0, %v6737_v20, 0.0  ;;  %v6797_v20 = vsel %vm482_vm0, %v6739_v54, 0.0 }
0x28d6   : > { %6783 = vadd.xlane.f32.xlu0 %v6782_v27  ;;  %v6628_v27 = vpop.xlane.xlu0 %6627 }
0x28d7   : > { %v6682_v19 = vmul.f32 0.03125, %v6628_v27 }
0x28d8   : > { %6786 = vadd.xlane.f32.xlu1 %v6785_v48  ;;  %v6740_v48 = vmul.f32 %v13282_v4, %v13282_v4 }
0x28d9   : > { %v13318_v27 = vsub.f32 %v13099_v60, %v6682_v19  ;;  %v9495_v19 = vld [vmem:[%s13838_s9] sm:$0xff]  }
0x28da   : > { %6789 = vadd.xlane.f32.xlu0 %v6788_v52  ;;  %v6631_v52 = vpop.xlane.xlu1 %6630  ;;  %v6800_v23 = vsel %vm482_vm0, %v6740_v48, 0.0  ;;  %v6806_v48 = vsel %vm482_vm0, %v6742_v61, 0.0  ;;  %9089 = vmatprep.subr.bf16.mxu0 %v9495_v19 }
0x28db   : > { %v6683_v1 = vmul.f32 0.03125, %v6631_v52  ;;  %9090 = vmatpush3.bf16.msra.mxu0 %v9495_v19 }
0x28dc   : > { %6792 = vadd.xlane.f32.xlu1 %v6791_v38  ;;  %v6741_v38 = vmul.f32 %v13288_v2, %v13288_v2 }
0x28dd   : > { %v13324_v59 = vsub.f32 %v13091_v8, %v6683_v1  ;;  %v6746_v1 = vmul.f32 %v13318_v27, %v13318_v27 }
0x28de   : > { %6795 = vadd.xlane.f32.xlu0 %v6794_v51  ;;  %v6634_v51 = vpop.xlane.xlu0 %6633  ;;  %v6803_v54 = vsel %vm482_vm0, %v6741_v38, 0.0  ;;  %v6637_v63 = vpop.xlane.xlu1 %6636 }
0x28df   : > { %v6684_v45 = vmul.f32 0.03125, %v6634_v51  ;;  %v6685_v52 = vmul.f32 0.03125, %v6637_v63 }
0x28e0   : > { %6798 = vadd.xlane.f32.xlu1 %v6797_v20  ;;  %v6743_v20 = vmul.f32 %v13300_v44, %v13300_v44 }
0x28e1   : > { %v13333_v61 = vsub.f32 %v13107_v37, %v6684_v45  ;;  %v13339_v63 = vsub.f32 %v13102_v29, %v6685_v52  ;;  %v9496_v45 = vld [vmem:[%s13838_s9 + $0x8] sm:$0xff]  }
0x28e2   : > { %6801 = vadd.xlane.f32.xlu0 %v6800_v23  ;;  %v6744_v23 = vmul.f32 %v13306_v9, %v13306_v9  ;;  %v6809_v38 = vsel %vm482_vm0, %v6743_v20, 0.0  ;;  %v6747_v20 = vmul.f32 %v13324_v59, %v13324_v59  ;;  %9091 = vmatprep.subr.bf16.mxu0 %v9496_v45 }
0x28e3   : > { %9092 = vmatpush3.bf16.msra.mxu0 %v9496_v45 }
0x28e4   : > { %6804 = vadd.xlane.f32.xlu1 %v6803_v54  ;;  %v6812_v51 = vsel %vm482_vm0, %v6744_v23, 0.0  ;;  %v6815_v54 = vsel %vm482_vm0, %v6745_v26, 0.0  ;;  %v6748_v23 = vmul.f32 %v13333_v61, %v13333_v61  ;;  %v6821_v52 = vsel %vm482_vm0, %v6747_v20, 0.0 }
0x28e5   : > { %v6749_v26 = vmul.f32 %v13339_v63, %v13339_v63 }
0x28e6   : > { %6807 = vadd.xlane.f32.xlu0 %v6806_v48  ;;  %v6818_v48 = vsel %vm482_vm0, %v6746_v1, 0.0 }
0x28e7   : > { %v6827_v19 = vsel %vm482_vm0, %v6749_v26, 0.0 }
0x28e8   : > { %6810 = vadd.xlane.f32.xlu1 %v6809_v38  ;;  %v6824_v38 = vsel %vm482_vm0, %v6748_v23, 0.0 }
0x28ea   : > { %6813 = vadd.xlane.f32.xlu0 %v6812_v51 }
0x28ec   : > { %6816 = vadd.xlane.f32.xlu1 %v6815_v54 }
0x28ee   : > { %6819 = vadd.xlane.f32.xlu0 %v6818_v48 }
0x28f0   : > { %6822 = vadd.xlane.f32.xlu1 %v6821_v52 }
0x28f2   : > { %6825 = vadd.xlane.f32.xlu0 %v6824_v38 }
0x28f4   : > { %6828 = vadd.xlane.f32.xlu1 %v6827_v19 }
0x2943   : > { %v6640_v51 = vpop.xlane.xlu0 %6639 }
0x2944   : > { %v6686_v1 = vmul.f32 0.03125, %v6640_v51 }
0x2945   : > { %v6643_v54 = vpop.xlane.xlu1 %6642 }
0x2946   : > { %v13356_v8 = vsub.f32 %v13156_v31, %v6686_v1  ;;  %v6687_v48 = vmul.f32 0.03125, %v6643_v54 }
0x2947   : > { %v6646_v29 = vpop.xlane.xlu0 %6645 }
0x2948   : > { %v13359_v20 = vsub.f32 %v13166_v42, %v6687_v48  ;;  %v6688_v60 = vmul.f32 0.03125, %v6646_v29  ;;  %v6750_v45 = vmul.f32 %v13356_v8, %v13356_v8 }
0x2949   : > { %v6649_v23 = vpop.xlane.xlu1 %6648 }
0x294a   : > { %v13364_v52 = vsub.f32 %v13163_v10, %v6688_v60  ;;  %v6689_v26 = vmul.f32 0.03125, %v6649_v23  ;;  %v6830_v38 = vsel %vm482_vm0, %v6750_v45, 0.0  ;;  %v6751_v19 = vmul.f32 %v13359_v20, %v13359_v20 }
0x294b   : > { %6831 = vadd.xlane.f32.xlu0 %v6830_v38  ;;  %v6652_v51 = vpop.xlane.xlu0 %6651 }
0x294c   : > { %v13370_v1 = vsub.f32 %v13171_v39, %v6689_v26  ;;  %v6690_v54 = vmul.f32 0.03125, %v6652_v51  ;;  %v6833_v29 = vsel %vm482_vm0, %v6751_v19, 0.0  ;;  %v6752_v48 = vmul.f32 %v13364_v52, %v13364_v52 }
0x294d   : > { %v6655_v42 = vpop.xlane.xlu1 %6654  ;;  %6834 = vadd.xlane.f32.xlu1 %v6833_v29 }
0x294e   : > { %v13376_v60 = vsub.f32 %v13180_v18, %v6690_v54  ;;  %v6691_v45 = vmul.f32 0.03125, %v6655_v42  ;;  %v6836_v23 = vsel %vm482_vm0, %v6752_v48, 0.0  ;;  %v6753_v38 = vmul.f32 %v13370_v1, %v13370_v1 }
0x294f   : > { %6837 = vadd.xlane.f32.xlu0 %v6836_v23  ;;  %v6658_v26 = vpop.xlane.xlu0 %6657 }
0x2950   : > { %v13382_v51 = vsub.f32 %v13193_v57, %v6691_v45  ;;  %v6692_v19 = vmul.f32 0.03125, %v6658_v26  ;;  %v6839_v39 = vsel %vm482_vm0, %v6753_v38, 0.0  ;;  %v6754_v29 = vmul.f32 %v13376_v60, %v13376_v60 }
0x2951   : > { %v6661_v31 = vpop.xlane.xlu1 %6660  ;;  %6840 = vadd.xlane.f32.xlu1 %v6839_v39 }
0x2952   : > { %v13388_v42 = vsub.f32 %v13190_v35, %v6692_v19  ;;  %v6693_v54 = vmul.f32 0.03125, %v6661_v31  ;;  %v6842_v48 = vsel %vm482_vm0, %v6754_v29, 0.0  ;;  %v6755_v23 = vmul.f32 %v13382_v51, %v13382_v51 }
0x2953   : > { %6843 = vadd.xlane.f32.xlu0 %v6842_v48  ;;  %v6760_v45 = vpop.xlane.xlu0 %6759 }
0x2954   : > { %v13394_v26 = vsub.f32 %v13201_v16, %v6693_v54  ;;  %v6854_v38 = vmul.f32 0.03125, %v6760_v45  ;;  %v6845_v57 = vsel %vm482_vm0, %v6755_v23, 0.0  ;;  %v6756_v39 = vmul.f32 %v13388_v42, %v13388_v42 }
0x2955   : > { %v6763_v18 = vpop.xlane.xlu1 %6762  ;;  %6846 = vadd.xlane.f32.xlu1 %v6845_v57 }
0x2956   : > { %v6886_v19 = vadd.f32 1e-05, %v6854_v38  ;;  %v6855_v31 = vmul.f32 0.03125, %v6763_v18  ;;  %v6848_v29 = vsel %vm482_vm0, %v6756_v39, 0.0  ;;  %v6757_v35 = vmul.f32 %v13394_v26, %v13394_v26 }
0x2957   : > { %6849 = vadd.xlane.f32.xlu0 %v6848_v29  ;;  %v6766_v48 = vpop.xlane.xlu0 %6765 }
0x2958   : > { %10077 = vrsqrt.f32 %v6886_v19  ;;  %v6887_v54 = vadd.f32 1e-05, %v6855_v31  ;;  %v6856_v16 = vmul.f32 0.03125, %v6766_v48  ;;  %v6851_v45 = vsel %vm482_vm0, %v6757_v35, 0.0  ;;  %v13406_v35 = vld [vmem:[%s13836_s7] ss:$0 sm:$0xff] }
0x2959   : > { %6852 = vadd.xlane.f32.xlu1 %v6851_v45  ;;  %v6769_v23 = vpop.xlane.xlu1 %6768 }
0x295a   : > { %10079 = vrsqrt.f32 %v6887_v54  ;;  %v6888_v10 = vadd.f32 1e-05, %v6856_v16  ;;  %v6857_v37 = vmul.f32 0.03125, %v6769_v23 }
0x295b   : > { %v6772_v57 = vpop.xlane.xlu0 %6771 }
0x295c   : > { %10081 = vrsqrt.f32 %v6888_v10  ;;  %v6889_v18 = vadd.f32 1e-05, %v6857_v37  ;;  %v6858_v38 = vmul.f32 0.03125, %v6772_v57 }
0x295d   : > { %v6775_v39 = vpop.xlane.xlu1 %6774 }
0x295e   : > { %10083 = vrsqrt.f32 %v6889_v18  ;;  %v6890_v0 = vadd.f32 1e-05, %v6858_v38  ;;  %v6859_v25 = vmul.f32 0.03125, %v6775_v39  ;;  %v13414_v39 = vld [vmem:[%s13837_s8] ss:$0 sm:$0xff] }
0x295f   : > { %v6778_v29 = vpop.xlane.xlu0 %6777 }
0x2960   : > { %10085 = vrsqrt.f32 %v6890_v0  ;;  %v6891_v19 = vadd.f32 1e-05, %v6859_v25  ;;  %v6860_v31 = vmul.f32 0.03125, %v6778_v29 }
0x2961   : > { %v6781_v48 = vpop.xlane.xlu1 %6780 }
0x2962   : > { %v10078_v53 = vpop.eup %10077  ;;  %10087 = vrsqrt.f32 %v6891_v19  ;;  %v6892_v16 = vadd.f32 1e-05, %v6860_v31  ;;  %v6861_v10 = vmul.f32 0.03125, %v6781_v48 }
0x2963   : > { %v6950_v37 = vmul.f32 %v10078_v53, %v13187_v28  ;;  %v6784_v54 = vpop.xlane.xlu0 %6783 }
0x2964   : > { %v10080_v45 = vpop.eup %10079  ;;  %10089 = vrsqrt.f32 %v6892_v16  ;;  %v6893_v23 = vadd.f32 1e-05, %v6861_v10  ;;  %v6862_v57 = vmul.f32 0.03125, %v6784_v54 }
0x2965   : > { %v6951_v25 = vmul.f32 %v10080_v45, %v13198_v40  ;;  %v6787_v0 = vpop.xlane.xlu1 %6786  ;;  %v6989_v18 = vmul.f32 %v13406_v35, %v6950_v37 }
0x2966   : > { %v10082_v38 = vpop.eup %10081  ;;  %10091 = vrsqrt.f32 %v6893_v23  ;;  %v6894_v29 = vadd.f32 1e-05, %v6862_v57  ;;  %v6863_v19 = vmul.f32 0.03125, %v6787_v0 }
0x2967   : > { %v6952_v53 = vmul.f32 %v10082_v38, %v13206_v36  ;;  %v6790_v28 = vpop.xlane.xlu0 %6789  ;;  %v6990_v31 = vmul.f32 %v13406_v35, %v6951_v25  ;;  %v7028_v45 = vadd.f32 %v13414_v39, %v6989_v18 }
0x2968   : > { %v10084_v48 = vpop.eup %10083  ;;  %10093 = vrsqrt.f32 %v6894_v29  ;;  %v6895_v40 = vadd.f32 1e-05, %v6863_v19  ;;  %v6864_v16 = vmul.f32 0.03125, %v6790_v28 }
0x2969   : > { %v6991_v10 = vmul.f32 %v13406_v35, %v6952_v53  ;;  %v6953_v37 = vmul.f32 %v10084_v48, %v13213_v11  ;;  %v6793_v54 = vpop.xlane.xlu1 %6792  ;;  %v7029_v23 = vadd.f32 %v13414_v39, %v6990_v31 }
0x296a   : > { %v10086_v57 = vpop.eup %10085  ;;  %10095 = vrsqrt.f32 %v6895_v40  ;;  %v6896_v0 = vadd.f32 1e-05, %v6864_v16  ;;  %v6865_v36 = vmul.f32 0.03125, %v6793_v54 }
0x296b   : > { %v6992_v38 = vmul.f32 %v13406_v35, %v6953_v37  ;;  %v6954_v25 = vmul.f32 %v10086_v57, %v13220_v14  ;;  %v6796_v29 = vpop.xlane.xlu0 %6795  ;;  %v7060_v19 = vpack.c.bf16 %v7029_v23, %v7028_v45  ;;  %v7030_v11 = vadd.f32 %v13414_v39, %v6991_v10 }
0x296c   : > { %v10088_v28 = vpop.eup %10087  ;;  %10097 = vrsqrt.f32 %v6896_v0  ;;  %v6897_v53 = vadd.f32 1e-05, %v6865_v36  ;;  %v6866_v3 = vmul.f32 0.03125, %v6796_v29 }
0x296d   : > { %v7031_v18 = vadd.f32 %v13414_v39, %v6992_v38  ;;  %v6955_v31 = vmul.f32 %v10088_v28, %v13227_v43  ;;  %v6799_v48 = vpop.xlane.xlu1 %6798  ;;  %9093 = vmatprep.mubr.msk.bf16.mxu0 %vm482_vm0, %v7060_v19  ;;  %v6993_v40 = vmul.f32 %v13406_v35, %v6954_v25 }
0x296e   : > { %v10090_v16 = vpop.eup %10089  ;;  %10099 = vrsqrt.f32 %v6897_v53  ;;  %v6898_v14 = vadd.f32 1e-05, %v6866_v3  ;;  %v6867_v37 = vmul.f32 0.03125, %v6799_v48 }
0x296f   : > { %v6956_v54 = vmul.f32 %v10090_v16, %v13234_v33  ;;  %v6802_v45 = vpop.xlane.xlu0 %6801  ;;  %v7061_v23 = vpack.c.bf16 %v7031_v18, %v7030_v11  ;;  %v6994_v57 = vmul.f32 %v13406_v35, %v6955_v31  ;;  %v7032_v25 = vadd.f32 %v13414_v39, %v6993_v40 }
0x2970   : > { %v10092_v10 = vpop.eup %10091  ;;  %10101 = vrsqrt.f32 %v6898_v14  ;;  %v6899_v0 = vadd.f32 1e-05, %v6867_v37  ;;  %v6868_v36 = vmul.f32 0.03125, %v6802_v45 }
0x2971   : > { %v6957_v43 = vmul.f32 %v10092_v10, %v13240_v6  ;;  %v6805_v38 = vpop.xlane.xlu1 %6804  ;;  %9094 = vmatmul.mubr.msk.bf16.vlgmr.msra.gmra.mrb[160].mxu0 %vm482_vm0, %v7061_v23  ;;  %v7033_v3 = vadd.f32 %v13414_v39, %v6994_v57  ;;  %v6995_v29 = vmul.f32 %v13406_v35, %v6956_v54 }
0x2972   : > { %v10094_v33 = vpop.eup %10093  ;;  %10103 = vrsqrt.f32 %v6899_v0  ;;  %v6900_v19 = vadd.f32 1e-05, %v6868_v36  ;;  %v6869_v28 = vmul.f32 0.03125, %v6805_v38 }
0x2973   : > { %v6958_v53 = vmul.f32 %v10094_v33, %v13246_v62  ;;  %v6808_v11 = vpop.xlane.xlu0 %6807  ;;  %v7062_v18 = vpack.c.bf16 %v7033_v3, %v7032_v25  ;;  %v6996_v31 = vmul.f32 %v13406_v35, %v6957_v43  ;;  %v7034_v37 = vadd.f32 %v13414_v39, %v6995_v29 }
0x2974   : > { %v10096_v6 = vpop.eup %10095  ;;  %10105 = vrsqrt.f32 %v6900_v19  ;;  %v6901_v48 = vadd.f32 1e-05, %v6869_v28  ;;  %v6870_v16 = vmul.f32 0.03125, %v6808_v11 }
0x2975   : > { %v6959_v40 = vmul.f32 %v10096_v6, %v13252_v47  ;;  %v6811_v14 = vpop.xlane.xlu1 %6810  ;;  %9097 = vmatprep.mubr.msk.bf16.mxu0 %vm482_vm0, %v7062_v18  ;;  %v7035_v54 = vadd.f32 %v13414_v39, %v6996_v31  ;;  %v6997_v45 = vmul.f32 %v13406_v35, %v6958_v53 }
0x2976   : > { %v10098_v62 = vpop.eup %10097  ;;  %10107 = vrsqrt.f32 %v6901_v48  ;;  %v6902_v23 = vadd.f32 1e-05, %v6870_v16  ;;  %v6871_v57 = vmul.f32 0.03125, %v6811_v14 }
0x2977   : > { %v6960_v10 = vmul.f32 %v10098_v62, %v13258_v7  ;;  %v6814_v0 = vpop.xlane.xlu0 %6813  ;;  %v7063_v36 = vpack.c.bf16 %v7035_v54, %v7034_v37  ;;  %v6998_v43 = vmul.f32 %v13406_v35, %v6959_v40  ;;  %v7036_v33 = vadd.f32 %v13414_v39, %v6997_v45 }
0x2978   : > { %v10100_v47 = vpop.eup %10099  ;;  %10109 = vrsqrt.f32 %v6902_v23  ;;  %v6903_v38 = vadd.f32 1e-05, %v6871_v57  ;;  %v6872_v25 = vmul.f32 0.03125, %v6814_v0 }
0x2979   : > { %v6961_v3 = vmul.f32 %v10100_v47, %v13264_v15  ;;  %v6817_v29 = vpop.xlane.xlu1 %6816  ;;  %9098 = vmatmul.mubr.msk.bf16.gmra.mrb[164].mxu0 %vm482_vm0, %v7063_v36  ;;  %v7037_v19 = vadd.f32 %v13414_v39, %v6998_v43  ;;  %v6999_v28 = vmul.f32 %v13406_v35, %v6960_v10 }
0x297a   : > { %v10102_v7 = vpop.eup %10101  ;;  %10111 = vrsqrt.f32 %v6903_v38  ;;  %v6904_v53 = vadd.f32 1e-05, %v6872_v25  ;;  %v6873_v11 = vmul.f32 0.03125, %v6817_v29 }
0x297b   : > { %v6962_v18 = vmul.f32 %v10102_v7, %v13270_v34  ;;  %v6820_v31 = vpop.xlane.xlu0 %6819  ;;  %v7064_v6 = vpack.c.bf16 %v7037_v19, %v7036_v33  ;;  %v7000_v48 = vmul.f32 %v13406_v35, %v6961_v3  ;;  %v7038_v54 = vadd.f32 %v13414_v39, %v6999_v28 }
0x297c   : > { %v10104_v15 = vpop.eup %10103  ;;  %10113 = vrsqrt.f32 %v6904_v53  ;;  %v6905_v16 = vadd.f32 1e-05, %v6873_v11  ;;  %v6874_v40 = vmul.f32 0.03125, %v6820_v31 }
0x297d   : > { %v6963_v14 = vmul.f32 %v10104_v15, %v13276_v58  ;;  %v6823_v37 = vpop.xlane.xlu1 %6822  ;;  %9101 = vmatprep.mubr.msk.bf16.mxu0 %vm482_vm0, %v7064_v6  ;;  %v7039_v45 = vadd.f32 %v13414_v39, %v7000_v48  ;;  %v7001_v62 = vmul.f32 %v13406_v35, %v6962_v18 }
0x297e   : > { %v10106_v34 = vpop.eup %10105  ;;  %10115 = vrsqrt.f32 %v6905_v16  ;;  %v6906_v23 = vadd.f32 1e-05, %v6874_v40  ;;  %v6875_v57 = vmul.f32 0.03125, %v6823_v37 }
0x297f   : > { %v6964_v10 = vmul.f32 %v10106_v34, %v13282_v4  ;;  %v6826_v0 = vpop.xlane.xlu0 %6825  ;;  %v7065_v36 = vpack.c.bf16 %v7039_v45, %v7038_v54  ;;  %v7002_v43 = vmul.f32 %v13406_v35, %v6963_v14  ;;  %v7040_v29 = vadd.f32 %v13414_v39, %v7001_v62 }
0x2980   : > { %v10108_v58 = vpop.eup %10107  ;;  %10117 = vrsqrt.f32 %v6906_v23  ;;  %v6907_v47 = vadd.f32 1e-05, %v6875_v57  ;;  %v6876_v38 = vmul.f32 0.03125, %v6826_v0 }
0x2981   : > { %v6965_v25 = vmul.f32 %v10108_v58, %v13288_v2  ;;  %v6829_v3 = vpop.xlane.xlu1 %6828  ;;  %9102 = vmatmul.mubr.msk.bf16.gmra.mrb[168].mxu0 %vm482_vm0, %v7065_v36  ;;  %v7041_v33 = vadd.f32 %v13414_v39, %v7002_v43  ;;  %v7003_v19 = vmul.f32 %v13406_v35, %v6964_v10 }
0x2982   : > { %v10110_v4 = vpop.eup %10109  ;;  %10119 = vrsqrt.f32 %v6907_v47  ;;  %v6908_v28 = vadd.f32 1e-05, %v6876_v38  ;;  %v6877_v7 = vmul.f32 0.03125, %v6829_v3 }
0x2983   : > { %v6966_v53 = vmul.f32 %v10110_v4, %v13294_v41  ;;  %v7066_v11 = vpack.c.bf16 %v7041_v33, %v7040_v29  ;;  %v7004_v18 = vmul.f32 %v13406_v35, %v6965_v25  ;;  %v7042_v48 = vadd.f32 %v13414_v39, %v7003_v19 }
0x2984   : > { %v10112_v31 = vpop.eup %10111  ;;  %10121 = vrsqrt.f32 %v6908_v28  ;;  %v6909_v2 = vadd.f32 1e-05, %v6877_v7 }
0x2985   : > { %v6967_v6 = vmul.f32 %v10112_v31, %v13300_v44  ;;  %9105 = vmatprep.mubr.msk.bf16.mxu0 %vm482_vm0, %v7066_v11  ;;  %v7043_v15 = vadd.f32 %v13414_v39, %v7004_v18  ;;  %v7005_v16 = vmul.f32 %v13406_v35, %v6966_v53  ;;  %v9497_v11 = vld [vmem:[%s13840_s11] sm:$0xff]  }
0x2986   : > { %v10114_v40 = vpop.eup %10113  ;;  %10123 = vrsqrt.f32 %v6909_v2  ;;  %9125 = vmatprep.subr.bf16.mxu1 %v9497_v11 }
0x2987   : > { %v6968_v41 = vmul.f32 %v10114_v40, %v13306_v9  ;;  %v7067_v14 = vpack.c.bf16 %v7043_v15, %v7042_v48  ;;  %v7006_v37 = vmul.f32 %v13406_v35, %v6967_v6  ;;  %v7044_v44 = vadd.f32 %v13414_v39, %v7005_v16  ;;  %9126 = vmatpush3.bf16.msra.mxu1 %v9497_v11  ;;  %v9498_v15 = vld [vmem:[%s13840_s11 + $0x8] sm:$0xff]  }
0x2988   : > { %v10116_v54 = vpop.eup %10115  ;;  %9127 = vmatprep.subr.bf16.mxu1 %v9498_v15 }
0x2989   : > { %v6969_v45 = vmul.f32 %v10116_v54, %v13312_v12  ;;  %9106 = vmatmul.mubr.msk.bf16.gmra.mrb[172].mxu0 %vm482_vm0, %v7067_v14  ;;  %v7045_v62 = vadd.f32 %v13414_v39, %v7006_v37  ;;  %v7007_v34 = vmul.f32 %v13406_v35, %v6968_v41 }
0x298a   : > { %v10118_v23 = vpop.eup %10117 }
0x298b   : > { %v6970_v57 = vmul.f32 %v10118_v23, %v13318_v27  ;;  %v7068_v10 = vpack.c.bf16 %v7045_v62, %v7044_v44  ;;  %v7008_v9 = vmul.f32 %v13406_v35, %v6969_v45  ;;  %v7046_v12 = vadd.f32 %v13414_v39, %v7007_v34  ;;  %9128 = vmatpush3.bf16.msra.mxu1 %v9498_v15  ;;  %v9499_v45 = vld [vmem:[%s13840_s11 + $0x10] sm:$0xff]  }
0x298c   : > { %v10120_v0 = vpop.eup %10119  ;;  %9129 = vmatprep.subr.bf16.mxu1 %v9499_v45 }
0x298d   : > { %v6971_v36 = vmul.f32 %v10120_v0, %v13324_v59  ;;  %9109 = vmatprep.mubr.msk.bf16.mxu0 %vm482_vm0, %v7068_v10  ;;  %v7047_v43 = vadd.f32 %v13414_v39, %v7008_v9  ;;  %v7009_v58 = vmul.f32 %v13406_v35, %v6970_v57 }
0x298e   : > { %v10122_v47 = vpop.eup %10121 }
0x298f   : > { %v6972_v38 = vmul.f32 %v10122_v47, %v13333_v61  ;;  %v7069_v25 = vpack.c.bf16 %v7047_v43, %v7046_v12  ;;  %v7010_v27 = vmul.f32 %v13406_v35, %v6971_v36  ;;  %v7048_v59 = vadd.f32 %v13414_v39, %v7009_v58  ;;  %9130 = vmatpush3.bf16.msra.mxu1 %v9499_v45  ;;  %v9500_v36 = vld [vmem:[%s13840_s11 + $0x18] sm:$0xff]  }
0x2990   : > { %v10124_v3 = vpop.eup %10123  ;;  %9131 = vmatprep.subr.bf16.mxu1 %v9500_v36 }
0x2991   : > { %v6973_v29 = vmul.f32 %v10124_v3, %v13339_v63  ;;  %9110 = vmatmul.mubr.msk.bf16.gmra.mrb[176].mxu0 %vm482_vm0, %v7069_v25  ;;  %v7049_v33 = vadd.f32 %v13414_v39, %v7010_v27  ;;  %v7011_v19 = vmul.f32 %v13406_v35, %v6972_v38 }
0x2993   : > { %v7070_v4 = vpack.c.bf16 %v7049_v33, %v7048_v59  ;;  %v7012_v28 = vmul.f32 %v13406_v35, %v6973_v29  ;;  %v7050_v61 = vadd.f32 %v13414_v39, %v7011_v19  ;;  %9132 = vmatpush3.bf16.msra.mxu1 %v9500_v36 }
0x2995   : > { %9113 = vmatprep.mubr.msk.bf16.mxu0 %vm482_vm0, %v7070_v4  ;;  %v7051_v7 = vadd.f32 %v13414_v39, %v7012_v28 }
0x2997   : > { %v7071_v53 = vpack.c.bf16 %v7051_v7, %v7050_v61 }
0x2999   : > { %9114 = vmatmul.mubr.msk.bf16.gmra.mrb[180].mxu0 %vm482_vm0, %v7071_v53 }
0x29d8   : > { %v6832_v63 = vpop.xlane.xlu0 %6831 }
0x29d9   : > { %v6878_v18 = vmul.f32 0.03125, %v6832_v63 }
0x29da   : > { %v6835_v31 = vpop.xlane.xlu1 %6834 }
0x29db   : > { %v6910_v2 = vadd.f32 1e-05, %v6878_v18  ;;  %v6879_v6 = vmul.f32 0.03125, %v6835_v31 }
0x29dc   : > { %v6838_v48 = vpop.xlane.xlu0 %6837 }
0x29dd   : > { %10125 = vrsqrt.f32 %v6910_v2  ;;  %v6911_v16 = vadd.f32 1e-05, %v6879_v6  ;;  %v6880_v40 = vmul.f32 0.03125, %v6838_v48 }
0x29de   : > { %v6841_v41 = vpop.xlane.xlu1 %6840 }
0x29df   : > { %10127 = vrsqrt.f32 %v6911_v16  ;;  %v6912_v14 = vadd.f32 1e-05, %v6880_v40  ;;  %v6881_v37 = vmul.f32 0.03125, %v6841_v41 }
0x29e0   : > { %v6844_v54 = vpop.xlane.xlu0 %6843 }
0x29e1   : > { %10129 = vrsqrt.f32 %v6912_v14  ;;  %v6913_v44 = vadd.f32 1e-05, %v6881_v37  ;;  %v6882_v62 = vmul.f32 0.03125, %v6844_v54 }
0x29e2   : > { %v6847_v34 = vpop.xlane.xlu1 %6846 }
0x29e3   : > { %10131 = vrsqrt.f32 %v6913_v44  ;;  %v6914_v23 = vadd.f32 1e-05, %v6882_v62  ;;  %v6883_v57 = vmul.f32 0.03125, %v6847_v34 }
0x29e4   : > { %v6850_v10 = vpop.xlane.xlu0 %6849 }
0x29e5   : > { %10133 = vrsqrt.f32 %v6914_v23  ;;  %v6915_v9 = vadd.f32 1e-05, %v6883_v57  ;;  %v6884_v0 = vmul.f32 0.03125, %v6850_v10 }
0x29e6   : > { %v6853_v12 = vpop.xlane.xlu1 %6852 }
0x29e7   : > { %v10126_v43 = vpop.eup %10125  ;;  %10135 = vrsqrt.f32 %v6915_v9  ;;  %v6916_v58 = vadd.f32 1e-05, %v6884_v0  ;;  %v6885_v47 = vmul.f32 0.03125, %v6853_v12 }
0x29e8   : > { %v6974_v38 = vmul.f32 %v10126_v43, %v13356_v8 }
0x29e9   : > { %v10128_v25 = vpop.eup %10127  ;;  %10137 = vrsqrt.f32 %v6916_v58  ;;  %v6917_v27 = vadd.f32 1e-05, %v6885_v47 }
0x29ea   : > { %v6975_v3 = vmul.f32 %v10128_v25, %v13359_v20  ;;  %v7013_v29 = vmul.f32 %v13406_v35, %v6974_v38 }
0x29eb   : > { %v10130_v59 = vpop.eup %10129  ;;  %10139 = vrsqrt.f32 %v6917_v27 }
0x29ec   : > { %v6976_v33 = vmul.f32 %v10130_v59, %v13364_v52  ;;  %v7014_v19 = vmul.f32 %v13406_v35, %v6975_v3  ;;  %v7052_v61 = vadd.f32 %v13414_v39, %v7013_v29 }
0x29ed   : > { %v10132_v4 = vpop.eup %10131 }
0x29ee   : > { %v6977_v28 = vmul.f32 %v10132_v4, %v13370_v1  ;;  %v7053_v8 = vadd.f32 %v13414_v39, %v7014_v19  ;;  %v7015_v7 = vmul.f32 %v13406_v35, %v6976_v33 }
0x29ef   : > { %v10134_v53 = vpop.eup %10133 }
0x29f0   : > { %v6978_v20 = vmul.f32 %v10134_v53, %v13376_v60  ;;  %v7072_v63 = vpack.c.bf16 %v7053_v8, %v7052_v61  ;;  %v7016_v11 = vmul.f32 %v13406_v35, %v6977_v28  ;;  %v7054_v31 = vadd.f32 %v13414_v39, %v7015_v7 }
0x29f1   : > { %v10136_v18 = vpop.eup %10135 }
0x29f2   : > { %v6979_v52 = vmul.f32 %v10136_v18, %v13382_v51  ;;  %9117 = vmatprep.mubr.msk.bf16.mxu0 %vm482_vm0, %v7072_v63  ;;  %v7055_v1 = vadd.f32 %v13414_v39, %v7016_v11  ;;  %v7017_v2 = vmul.f32 %v13406_v35, %v6978_v20 }
0x29f3   : > { %v10138_v6 = vpop.eup %10137 }
0x29f4   : > { %v6980_v48 = vmul.f32 %v10138_v6, %v13388_v42  ;;  %v7073_v15 = vpack.c.bf16 %v7055_v1, %v7054_v31  ;;  %v7018_v60 = vmul.f32 %v13406_v35, %v6979_v52  ;;  %v7056_v51 = vadd.f32 %v13414_v39, %v7017_v2 }
0x29f5   : > { %v10140_v16 = vpop.eup %10139 }
0x29f6   : > { %v6981_v40 = vmul.f32 %v10140_v16, %v13394_v26  ;;  %9118 = vmatmul.mubr.msk.bf16.gmra.mrb[184].mxu0 %vm482_vm0, %v7073_v15  ;;  %v7057_v41 = vadd.f32 %v13414_v39, %v7018_v60  ;;  %v7019_v14 = vmul.f32 %v13406_v35, %v6980_v48  ;;  %v13540_v26 = vld [vmem:[%s13839_s10] ss:$0 sm:$0xff] }
0x29f8   : > { %v7074_v37 = vpack.c.bf16 %v7057_v41, %v7056_v51  ;;  %v7020_v54 = vmul.f32 %v13406_v35, %v6981_v40  ;;  %v7058_v42 = vadd.f32 %v13414_v39, %v7019_v14 }
0x29fa   : > { %9121 = vmatprep.mubr.msk.bf16.mxu0 %vm482_vm0, %v7074_v37  ;;  %v7059_v45 = vadd.f32 %v13414_v39, %v7020_v54 }
0x29fc   : > { %v7075_v44 = vpack.c.bf16 %v7059_v45, %v7058_v42 }
0x29fe   : > { %9122 = vmatmul.mubr.msk.bf16.gmra.mrb[188].mxu0 %vm482_vm0, %v7075_v44 }
0x2a44   : > { %v9095_v62 = vpop.f32.mrb[160].mxu0 }
0x2a45   : > { %v13543_v34 = vadd.f32 %v9095_v62, %v13540_v26  ;;  %v7181_v23 = vpop.f32.mrb[161].mxu0 }
0x2a46   : > { %v13546_v35 = vadd.f32 %v13540_v26, %v7181_v23  ;;  %v9096_v57 = vpop.f32.mrb[162].mxu0 }
0x2a47   : > { %v8120_v10 = vmul.f32 -1.442695, %v13543_v34  ;;  %v13550_v39 = vadd.f32 %v9096_v57, %v13540_v26  ;;  %v7184_v9 = vpop.f32.mrb[163].mxu0 }
0x2a48   : > { %v8118_v0 = vmul.f32 -1.442695, %v13546_v35  ;;  %v13554_v36 = vadd.f32 %v13540_v26, %v7184_v9 }
0x2a49   : > { %10141 = vpow2.f32 %v8120_v10  ;;  %v8121_v12 = vmul.f32 -1.442695, %v13550_v39 }
0x2a4a   : > { %10143 = vpow2.f32 %v8118_v0  ;;  %v8119_v43 = vmul.f32 -1.442695, %v13554_v36 }
0x2a4b   : > { %10145 = vpow2.f32 %v8121_v12 }
0x2a4c   : > { %10147 = vpow2.f32 %v8119_v43  ;;  %v9099_v58 = vpop.f32.mrb[164].mxu0 }
0x2a4d   : > { %v13559_v47 = vadd.f32 %v9099_v58, %v13540_v26  ;;  %v7197_v38 = vpop.f32.mrb[165].mxu0 }
0x2a4e   : > { %v13562_v25 = vadd.f32 %v13540_v26, %v7197_v38  ;;  %v9100_v27 = vpop.f32.mrb[166].mxu0 }
0x2a4f   : > { %v8124_v3 = vmul.f32 -1.442695, %v13559_v47  ;;  %v13566_v29 = vadd.f32 %v9100_v27, %v13540_v26  ;;  %v7200_v59 = vpop.f32.mrb[167].mxu0 }
0x2a50   : > { %v8122_v33 = vmul.f32 -1.442695, %v13562_v25  ;;  %v13570_v19 = vadd.f32 %v13540_v26, %v7200_v59 }
0x2a51   : > { %10149 = vpow2.f32 %v8124_v3  ;;  %v8125_v4 = vmul.f32 -1.442695, %v13566_v29 }
0x2a52   : > { %10151 = vpow2.f32 %v8122_v33  ;;  %v8123_v28 = vmul.f32 -1.442695, %v13570_v19 }
0x2a53   : > { %v10142_v61 = vpop.eup %10141  ;;  %10153 = vpow2.f32 %v8125_v4 }
0x2a54   : > { %v10144_v8 = vpop.eup %10143  ;;  %v7406_v7 = vadd.f32 1.0, %v10142_v61  ;;  %10155 = vpow2.f32 %v8123_v28  ;;  %v9103_v53 = vpop.f32.mrb[168].mxu0 }
0x2a55   : > { %v10146_v20 = vpop.eup %10145  ;;  %v7404_v63 = vadd.f32 1.0, %v10144_v8  ;;  %v13575_v11 = vadd.f32 %v9103_v53, %v13540_v26  ;;  %v7213_v18 = vpop.f32.mrb[169].mxu0 }
0x2a56   : > { %v10148_v52 = vpop.eup %10147  ;;  %10157 = vrcp.f32 %v7406_v7  ;;  %v7407_v31 = vadd.f32 1.0, %v10146_v20  ;;  %v13578_v1 = vadd.f32 %v13540_v26, %v7213_v18  ;;  %v9104_v2 = vpop.f32.mrb[170].mxu0 }
0x2a57   : > { %10159 = vrcp.f32 %v7404_v63  ;;  %v7405_v6 = vadd.f32 1.0, %v10148_v52  ;;  %v8128_v48 = vmul.f32 -1.442695, %v13575_v11  ;;  %v13582_v15 = vadd.f32 %v9104_v2, %v13540_v26  ;;  %v7216_v60 = vpop.f32.mrb[171].mxu0 }
0x2a58   : > { %10161 = vrcp.f32 %v7407_v31  ;;  %v8126_v16 = vmul.f32 -1.442695, %v13578_v1  ;;  %v13586_v40 = vadd.f32 %v13540_v26, %v7216_v60 }
0x2a59   : > { %10163 = vrcp.f32 %v7405_v6  ;;  %v8129_v51 = vmul.f32 -1.442695, %v13582_v15 }
0x2a5a   : > { %10165 = vpow2.f32 %v8128_v48  ;;  %v8127_v41 = vmul.f32 -1.442695, %v13586_v40 }
0x2a5b   : > { %v10150_v14 = vpop.eup %10149  ;;  %10167 = vpow2.f32 %v8126_v16 }
0x2a5c   : > { %v10152_v37 = vpop.eup %10151  ;;  %v7410_v54 = vadd.f32 1.0, %v10150_v14  ;;  %10169 = vpow2.f32 %v8129_v51  ;;  %v9107_v42 = vpop.f32.mrb[172].mxu0 }
0x2a5d   : > { %v10154_v45 = vpop.eup %10153  ;;  %v7408_v44 = vadd.f32 1.0, %v10152_v37  ;;  %10171 = vpow2.f32 %v8127_v41  ;;  %v13591_v62 = vadd.f32 %v9107_v42, %v13540_v26  ;;  %v7229_v23 = vpop.f32.mrb[173].mxu0 }
0x2a5e   : > { %v10156_v57 = vpop.eup %10155  ;;  %10173 = vrcp.f32 %v7410_v54  ;;  %v7411_v10 = vadd.f32 1.0, %v10154_v45  ;;  %v13594_v9 = vadd.f32 %v13540_v26, %v7229_v23  ;;  %v9108_v0 = vpop.f32.mrb[174].mxu0 }
0x2a5f   : > { %10175 = vrcp.f32 %v7408_v44  ;;  %v7409_v12 = vadd.f32 1.0, %v10156_v57  ;;  %v8132_v43 = vmul.f32 -1.442695, %v13591_v62  ;;  %v13598_v58 = vadd.f32 %v9108_v0, %v13540_v26  ;;  %v7232_v38 = vpop.f32.mrb[175].mxu0 }
0x2a60   : > { %v10158_v27 = vpop.eup %10157  ;;  %10177 = vrcp.f32 %v7411_v10  ;;  %v8130_v3 = vmul.f32 -1.442695, %v13594_v9  ;;  %v13602_v59 = vadd.f32 %v13540_v26, %v7232_v38 }
0x2a61   : > { %v10160_v33 = vpop.eup %10159  ;;  %10179 = vrcp.f32 %v7409_v12  ;;  %v8133_v4 = vmul.f32 -1.442695, %v13598_v58  ;;  %v7502_v7 = vmul.f32 %v10158_v27, %v13543_v34 }
0x2a62   : > { %v10162_v28 = vpop.eup %10161  ;;  %10181 = vpow2.f32 %v8132_v43  ;;  %v8131_v61 = vmul.f32 -1.442695, %v13602_v59  ;;  %v7500_v63 = vmul.f32 %v10160_v33, %v13546_v35 }
0x2a63   : > { %v10164_v8 = vpop.eup %10163  ;;  %v7503_v53 = vmul.f32 %v10162_v28, %v13550_v39  ;;  %10183 = vpow2.f32 %v8130_v3 }
0x2a64   : > { %v10166_v20 = vpop.eup %10165  ;;  %v7501_v18 = vmul.f32 %v10164_v8, %v13554_v36  ;;  %10185 = vpow2.f32 %v8133_v4  ;;  %v9111_v52 = vpop.f32.mrb[176].mxu0 }
0x2a65   : > { %v10168_v31 = vpop.eup %10167  ;;  %v7533_v2 = vpack.c.bf16 %v7503_v53, %v7502_v7  ;;  %v7414_v6 = vadd.f32 1.0, %v10166_v20  ;;  %10187 = vpow2.f32 %v8131_v61  ;;  %v13611_v48 = vadd.f32 %v9111_v52, %v13540_v26  ;;  %v7245_v60 = vpop.f32.mrb[177].mxu0 }
0x2a66   : > { %v10170_v16 = vpop.eup %10169  ;;  %v7532_v34 = vpack.c.bf16 %v7501_v18, %v7500_v63  ;;  %v7412_v51 = vadd.f32 1.0, %v10168_v31  ;;  %v13614_v39 = vadd.f32 %v13540_v26, %v7245_v60  ;;  %v9112_v41 = vpop.f32.mrb[178].mxu0 }
0x2a67   : > { %v10172_v35 = vpop.eup %10171  ;;  %10189 = vrcp.f32 %v7414_v6  ;;  %v7415_v36 = vadd.f32 1.0, %v10170_v16  ;;  %v8136_v14 = vmul.f32 -1.442695, %v13611_v48  ;;  %v13618_v37 = vadd.f32 %v9112_v41, %v13540_v26  ;;  %v7248_v54 = vpop.f32.mrb[179].mxu0 }
0x2a68   : > { %v10174_v42 = vpop.eup %10173  ;;  %10191 = vrcp.f32 %v7412_v51  ;;  %v7413_v45 = vadd.f32 1.0, %v10172_v35  ;;  %v8134_v44 = vmul.f32 -1.442695, %v13614_v39  ;;  %v13622_v23 = vadd.f32 %v13540_v26, %v7248_v54  ;;  %9133 = vmatprep.mubr.msk.bf16.mxu1 %vm1332_vm2, %v7532_v34 }
0x2a69   : > { %v10176_v57 = vpop.eup %10175  ;;  %10193 = vrcp.f32 %v7415_v36  ;;  %v8137_v10 = vmul.f32 -1.442695, %v13618_v37  ;;  %9134 = vmatmul.mubr.msk.bf16.vlgmr.msra.gmra.mrb[160].mxu1 %vm1332_vm2, %v7533_v2  ;;  %v7506_v38 = vmul.f32 %v10174_v42, %v13559_v47 }
0x2a6a   : > { %v10178_v0 = vpop.eup %10177  ;;  %10195 = vrcp.f32 %v7413_v45  ;;  %v8135_v12 = vmul.f32 -1.442695, %v13622_v23  ;;  %v7504_v33 = vmul.f32 %v10176_v57, %v13562_v25 }
0x2a6b   : > { %v10180_v43 = vpop.eup %10179  ;;  %v7507_v27 = vmul.f32 %v10178_v0, %v13566_v29  ;;  %10197 = vpow2.f32 %v8136_v14 }
0x2a6c   : > { %v10182_v3 = vpop.eup %10181  ;;  %v7505_v4 = vmul.f32 %v10180_v43, %v13570_v19  ;;  %10199 = vpow2.f32 %v8134_v44  ;;  %v9115_v28 = vpop.f32.mrb[180].mxu0 }
0x2a6d   : > { %v10184_v61 = vpop.eup %10183  ;;  %v7535_v8 = vpack.c.bf16 %v7507_v27, %v7506_v38  ;;  %v7418_v7 = vadd.f32 1.0, %v10182_v3  ;;  %10201 = vpow2.f32 %v8137_v10  ;;  %v13633_v53 = vadd.f32 %v9115_v28, %v13540_v26  ;;  %v7261_v20 = vpop.f32.mrb[181].mxu0 }
0x2a6e   : > { %v10186_v63 = vpop.eup %10185  ;;  %v7534_v47 = vpack.c.bf16 %v7505_v4, %v7504_v33  ;;  %v7416_v18 = vadd.f32 1.0, %v10184_v61  ;;  %10203 = vpow2.f32 %v8135_v12  ;;  %v13636_v29 = vadd.f32 %v13540_v26, %v7261_v20  ;;  %v9116_v25 = vpop.f32.mrb[182].mxu0 }
0x2a6f   : > { %v10188_v52 = vpop.eup %10187  ;;  %10205 = vrcp.f32 %v7418_v7  ;;  %v7419_v19 = vadd.f32 1.0, %v10186_v63  ;;  %v8140_v31 = vmul.f32 -1.442695, %v13633_v53  ;;  %v13640_v2 = vadd.f32 %v9116_v25, %v13540_v26  ;;  %v7264_v6 = vpop.f32.mrb[183].mxu0 }
0x2a70   : > { %10207 = vrcp.f32 %v7416_v18  ;;  %v7417_v60 = vadd.f32 1.0, %v10188_v52  ;;  %v8138_v16 = vmul.f32 -1.442695, %v13636_v29  ;;  %v13644_v34 = vadd.f32 %v13540_v26, %v7264_v6  ;;  %9137 = vmatprep.mubr.msk.bf16.mxu1 %vm1332_vm2, %v7534_v47 }
0x2a71   : > { %v10190_v51 = vpop.eup %10189  ;;  %10209 = vrcp.f32 %v7419_v19  ;;  %v8141_v41 = vmul.f32 -1.442695, %v13640_v2  ;;  %9138 = vmatmul.mubr.msk.bf16.gmra.mrb[164].mxu1 %vm1332_vm2, %v7535_v8 }
0x2a72   : > { %v10192_v35 = vpop.eup %10191  ;;  %10211 = vrcp.f32 %v7417_v60  ;;  %v8139_v36 = vmul.f32 -1.442695, %v13644_v34  ;;  %v7510_v42 = vmul.f32 %v10190_v51, %v13575_v11 }
0x2a73   : > { %v10194_v14 = vpop.eup %10193  ;;  %10213 = vpow2.f32 %v8140_v31  ;;  %v7508_v57 = vmul.f32 %v10192_v35, %v13578_v1 }
0x2a74   : > { %v10196_v54 = vpop.eup %10195  ;;  %v7511_v45 = vmul.f32 %v10194_v14, %v13582_v15  ;;  %10215 = vpow2.f32 %v8138_v16 }
0x2a75   : > { %v10198_v44 = vpop.eup %10197  ;;  %v7509_v10 = vmul.f32 %v10196_v54, %v13586_v40  ;;  %10217 = vpow2.f32 %v8141_v41 }
0x2a76   : > { %v10200_v0 = vpop.eup %10199  ;;  %v7537_v12 = vpack.c.bf16 %v7511_v45, %v7510_v42  ;;  %v7422_v43 = vadd.f32 1.0, %v10198_v44  ;;  %10219 = vpow2.f32 %v8139_v36 }
0x2a77   : > { %v10202_v38 = vpop.eup %10201  ;;  %v7536_v27 = vpack.c.bf16 %v7509_v10, %v7508_v57  ;;  %v7420_v3 = vadd.f32 1.0, %v10200_v0 }
0x2a78   : > { %v10204_v33 = vpop.eup %10203  ;;  %10221 = vrcp.f32 %v7422_v43  ;;  %v7423_v4 = vadd.f32 1.0, %v10202_v38 }
0x2a79   : > { %v10206_v11 = vpop.eup %10205  ;;  %10223 = vrcp.f32 %v7420_v3  ;;  %v7421_v15 = vadd.f32 1.0, %v10204_v33  ;;  %9141 = vmatprep.mubr.msk.bf16.mxu1 %vm1332_vm2, %v7536_v27 }
0x2a7a   : > { %v10208_v28 = vpop.eup %10207  ;;  %10225 = vrcp.f32 %v7423_v4  ;;  %9142 = vmatmul.mubr.msk.bf16.gmra.mrb[168].mxu1 %vm1332_vm2, %v7537_v12  ;;  %v7514_v61 = vmul.f32 %v10206_v11, %v13591_v62 }
0x2a7b   : > { %v10210_v1 = vpop.eup %10209  ;;  %10227 = vrcp.f32 %v7421_v15  ;;  %v7512_v20 = vmul.f32 %v10208_v28, %v13594_v9 }
0x2a7c   : > { %v10212_v40 = vpop.eup %10211  ;;  %v7515_v8 = vmul.f32 %v10210_v1, %v13598_v58 }
0x2a7d   : > { %v10214_v7 = vpop.eup %10213  ;;  %v7513_v63 = vmul.f32 %v10212_v40, %v13602_v59 }
0x2a7e   : > { %v10216_v47 = vpop.eup %10215  ;;  %v7539_v18 = vpack.c.bf16 %v7515_v8, %v7514_v61  ;;  %v7426_v25 = vadd.f32 1.0, %v10214_v7 }
0x2a7f   : > { %v10218_v52 = vpop.eup %10217  ;;  %v7538_v19 = vpack.c.bf16 %v7513_v63, %v7512_v20  ;;  %v7424_v31 = vadd.f32 1.0, %v10216_v47 }
0x2a80   : > { %v10220_v6 = vpop.eup %10219  ;;  %10229 = vrcp.f32 %v7426_v25  ;;  %v7427_v60 = vadd.f32 1.0, %v10218_v52 }
0x2a81   : > { %10231 = vrcp.f32 %v7424_v31  ;;  %v7425_v16 = vadd.f32 1.0, %v10220_v6  ;;  %9145 = vmatprep.mubr.msk.bf16.mxu1 %vm1332_vm2, %v7538_v19 }
0x2a82   : > { %v10222_v62 = vpop.eup %10221  ;;  %10233 = vrcp.f32 %v7427_v60  ;;  %9146 = vmatmul.mubr.msk.bf16.gmra.mrb[172].mxu1 %vm1332_vm2, %v7539_v18 }
0x2a83   : > { %v10224_v9 = vpop.eup %10223  ;;  %10235 = vrcp.f32 %v7425_v16  ;;  %v7518_v51 = vmul.f32 %v10222_v62, %v13611_v48 }
0x2a84   : > { %v10226_v58 = vpop.eup %10225  ;;  %v7516_v35 = vmul.f32 %v10224_v9, %v13614_v39 }
0x2a85   : > { %v10228_v59 = vpop.eup %10227  ;;  %v7519_v41 = vmul.f32 %v10226_v58, %v13618_v37 }
0x2a86   : > { %v7517_v36 = vmul.f32 %v10228_v59, %v13622_v23 }
0x2a87   : > { %v7541_v14 = vpack.c.bf16 %v7519_v41, %v7518_v51 }
0x2a88   : > { %v7540_v54 = vpack.c.bf16 %v7517_v36, %v7516_v35 }
0x2a8a   : > { %v10230_v42 = vpop.eup %10229  ;;  %9149 = vmatprep.mubr.msk.bf16.mxu1 %vm1332_vm2, %v7540_v54 }
0x2a8b   : > { %v10232_v45 = vpop.eup %10231  ;;  %9150 = vmatmul.mubr.msk.bf16.gmra.mrb[176].mxu1 %vm1332_vm2, %v7541_v14  ;;  %v7522_v10 = vmul.f32 %v10230_v42, %v13633_v53 }
0x2a8c   : > { %v10234_v44 = vpop.eup %10233  ;;  %v7520_v37 = vmul.f32 %v10232_v45, %v13636_v29 }
0x2a8d   : > { %v10236_v57 = vpop.eup %10235  ;;  %v7523_v48 = vmul.f32 %v10234_v44, %v13640_v2 }
0x2a8e   : > { %v7521_v39 = vmul.f32 %v10236_v57, %v13644_v34 }
0x2a8f   : > { %v7543_v0 = vpack.c.bf16 %v7523_v48, %v7522_v10 }
0x2a90   : > { %v7542_v23 = vpack.c.bf16 %v7521_v39, %v7520_v37 }
0x2a92   : > { %9153 = vmatprep.mubr.msk.bf16.mxu1 %vm1332_vm2, %v7542_v23 }
0x2a93   : > { %9154 = vmatmul.mubr.msk.bf16.gmra.mrb[180].mxu1 %vm1332_vm2, %v7543_v0 }
0x2ac9   : > { %v9119_v12 = vpop.f32.mrb[184].mxu0 }
0x2aca   : > { %v7286_v43 = vadd.f32 %v9119_v12, %v13540_v26  ;;  %v7277_v38 = vpop.f32.mrb[185].mxu0 }
0x2acb   : > { %v7278_v27 = vadd.f32 %v13540_v26, %v7277_v38  ;;  %v9120_v3 = vpop.f32.mrb[186].mxu0 }
0x2acc   : > { %v8144_v53 = vmul.f32 -1.442695, %v7286_v43  ;;  %v7289_v2 = vadd.f32 %v9120_v3, %v13540_v26  ;;  %v7280_v33 = vpop.f32.mrb[187].mxu0 }
0x2acd   : > { %v8142_v29 = vmul.f32 -1.442695, %v7278_v27  ;;  %v7281_v34 = vadd.f32 %v13540_v26, %v7280_v33 }
0x2ace   : > { %10237 = vpow2.f32 %v8144_v53  ;;  %v8145_v4 = vmul.f32 -1.442695, %v7289_v2 }
0x2acf   : > { %10239 = vpow2.f32 %v8142_v29  ;;  %v8143_v11 = vmul.f32 -1.442695, %v7281_v34 }
0x2ad0   : > { %10241 = vpow2.f32 %v8145_v4 }
0x2ad1   : > { %10243 = vpow2.f32 %v8143_v11  ;;  %v9123_v15 = vpop.f32.mrb[188].mxu0 }
0x2ad2   : > { %v7302_v28 = vadd.f32 %v9123_v15, %v13540_v26  ;;  %v7293_v1 = vpop.f32.mrb[189].mxu0 }
0x2ad3   : > { %v7294_v40 = vadd.f32 %v13540_v26, %v7293_v1  ;;  %v9124_v61 = vpop.f32.mrb[190].mxu0 }
0x2ad4   : > { %v8148_v8 = vmul.f32 -1.442695, %v7302_v28  ;;  %v7305_v7 = vadd.f32 %v9124_v61, %v13540_v26  ;;  %v7296_v20 = vpop.f32.mrb[191].mxu0 }
0x2ad5   : > { %v8146_v63 = vmul.f32 -1.442695, %v7294_v40  ;;  %v7297_v47 = vadd.f32 %v13540_v26, %v7296_v20 }
0x2ad6   : > { %10245 = vpow2.f32 %v8148_v8  ;;  %v8149_v18 = vmul.f32 -1.442695, %v7305_v7 }
0x2ad7   : > { %10247 = vpow2.f32 %v8146_v63  ;;  %v8147_v25 = vmul.f32 -1.442695, %v7297_v47 }
0x2ad8   : > { %v10238_v52 = vpop.eup %10237  ;;  %10249 = vpow2.f32 %v8149_v18 }
0x2ad9   : > { %v10240_v19 = vpop.eup %10239  ;;  %v7430_v31 = vadd.f32 1.0, %v10238_v52  ;;  %10251 = vpow2.f32 %v8147_v25 }
0x2ada   : > { %v10242_v6 = vpop.eup %10241  ;;  %v7428_v60 = vadd.f32 1.0, %v10240_v19 }
0x2adb   : > { %v10244_v16 = vpop.eup %10243  ;;  %10253 = vrcp.f32 %v7430_v31  ;;  %v7431_v62 = vadd.f32 1.0, %v10242_v6 }
0x2adc   : > { %10255 = vrcp.f32 %v7428_v60  ;;  %v7429_v9 = vadd.f32 1.0, %v10244_v16 }
0x2add   : > { %10257 = vrcp.f32 %v7431_v62 }
0x2ade   : > { %10259 = vrcp.f32 %v7429_v9 }
0x2ae0   : > { %v10246_v58 = vpop.eup %10245 }
0x2ae1   : > { %v10248_v26 = vpop.eup %10247  ;;  %v7434_v59 = vadd.f32 1.0, %v10246_v58 }
0x2ae2   : > { %v10250_v51 = vpop.eup %10249  ;;  %v7432_v41 = vadd.f32 1.0, %v10248_v26 }
0x2ae3   : > { %v10252_v35 = vpop.eup %10251  ;;  %10261 = vrcp.f32 %v7434_v59  ;;  %v7435_v36 = vadd.f32 1.0, %v10250_v51 }
0x2ae4   : > { %10263 = vrcp.f32 %v7432_v41  ;;  %v7433_v14 = vadd.f32 1.0, %v10252_v35 }
0x2ae5   : > { %v10254_v54 = vpop.eup %10253  ;;  %10265 = vrcp.f32 %v7435_v36 }
0x2ae6   : > { %v10256_v42 = vpop.eup %10255  ;;  %10267 = vrcp.f32 %v7433_v14  ;;  %v7526_v57 = vmul.f32 %v10254_v54, %v7286_v43 }
0x2ae7   : > { %v10258_v45 = vpop.eup %10257  ;;  %v7524_v48 = vmul.f32 %v10256_v42, %v7278_v27  ;;  %v13689_v27 = vld [vmem:[%s13841_s12] ss:$0 sm:$0xff] }
0x2ae8   : > { %v10260_v44 = vpop.eup %10259  ;;  %v7527_v10 = vmul.f32 %v10258_v45, %v7289_v2 }
0x2ae9   : > { %v7525_v37 = vmul.f32 %v10260_v44, %v7281_v34  ;;  %v14148_v44 = vld [vmem:[#allocation50_spill] sm:$0xff] }
0x2aea   : > { %v7545_v39 = vpack.c.bf16 %v7527_v10, %v7526_v57  ;;  %v14149_v10 = vld [vmem:[#allocation48_spill] sm:$0xff] }
0x2aeb   : > { %v7544_v0 = vpack.c.bf16 %v7525_v37, %v7524_v48  ;;  %v14150_v37 = vld [vmem:[#allocation14_spill] sm:$0xff] }
0x2aed   : > { %v10262_v23 = vpop.eup %10261  ;;  %9157 = vmatprep.mubr.msk.bf16.mxu1 %vm1332_vm2, %v7544_v0 }
0x2aee   : > { %v10264_v12 = vpop.eup %10263  ;;  %9158 = vmatmul.mubr.msk.bf16.gmra.mrb[184].mxu1 %vm1332_vm2, %v7545_v39  ;;  %v7530_v53 = vmul.f32 %v10262_v23, %v7302_v28 }
0x2aef   : > { %v10266_v38 = vpop.eup %10265  ;;  %v7528_v29 = vmul.f32 %v10264_v12, %v7294_v40 }
0x2af0   : > { %v10268_v3 = vpop.eup %10267  ;;  %v7531_v33 = vmul.f32 %v10266_v38, %v7305_v7 }
0x2af1   : > { %v7529_v4 = vmul.f32 %v10268_v3, %v7297_v47  ;;  %v14151_v3 = vld [vmem:[#allocation54_spill] sm:$0xff] }
0x2af2   : > { %v7547_v11 = vpack.c.bf16 %v7531_v33, %v7530_v53 }
0x2af3   : > { %v7546_v43 = vpack.c.bf16 %v7529_v4, %v7528_v29  ;;  %v14152_v4 = vld [vmem:[#allocation10_spill] sm:$0xff] }
0x2af5   : > { %9161 = vmatprep.mubr.msk.bf16.mxu1 %vm1332_vm2, %v7546_v43 }
0x2af6   : > { %9162 = vmatmul.mubr.msk.bf16.gmra.mrb[188].mxu1 %vm1332_vm2, %v7547_v11 }
0x2b3c   : > { %v9135_v2 = vpop.f32.mrb[160].mxu1 }
0x2b3d   : > { %v7678_v34 = vadd.f32 %v9135_v2, %v13689_v27  ;;  %v7669_v15 = vpop.f32.mrb[161].mxu1  ;;  %v14153_v2 = vld [vmem:[#allocation56_spill] sm:$0xff] }
0x2b3e   : > { %v7670_v28 = vadd.f32 %v13689_v27, %v7669_v15  ;;  %v9136_v1 = vpop.f32.mrb[162].mxu1  ;;  %v14154_v15 = vld [vmem:[#allocation11_spill] sm:$0xff] }
0x2b3f   : > { %v7798_v40 = vadd.f32 %v7678_v34, %v12978_v32  ;;  %v7681_v61 = vadd.f32 %v9136_v1, %v13689_v27  ;;  %v7672_v8 = vpop.f32.mrb[163].mxu1 }
0x2b40   : > { %v7796_v7 = vadd.f32 %v7670_v28, %v12974_v13  ;;  %v7673_v20 = vadd.f32 %v13689_v27, %v7672_v8 }
0x2b41   : > { %7830 = vst.msk [vmem:[%s13697_s29 + $0x10] sm:$0xff] %vm482_vm0, %v7798_v40  ;;  %v7799_v63 = vadd.f32 %v7681_v61, %v12988_v24 }
0x2b42   : > { %7828 = vst.msk [vmem:[%s13697_s29] sm:$0xff] %vm482_vm0, %v7796_v7  ;;  %v7797_v47 = vadd.f32 %v7673_v20, %v12982_v30  ;;  %v14155_v20 = vld [vmem:[#allocation60_spill] sm:$0xff] }
0x2b43   : > { %7831 = vst.msk [vmem:[%s13697_s29 + $0x18] sm:$0xff] %vm482_vm0, %v7799_v63 }
0x2b44   : > { %7829 = vst.msk [vmem:[%s13697_s29 + $0x8] sm:$0xff] %vm482_vm0, %v7797_v47  ;;  %v9139_v32 = vpop.f32.mrb[164].mxu1 }
0x2b45   : > { %v7694_v13 = vadd.f32 %v9139_v32, %v13689_v27  ;;  %v7685_v18 = vpop.f32.mrb[165].mxu1 }
0x2b46   : > { %v7686_v25 = vadd.f32 %v13689_v27, %v7685_v18  ;;  %v9140_v52 = vpop.f32.mrb[166].mxu1 }
0x2b47   : > { %v7802_v24 = vadd.f32 %v7694_v13, %v13012_v49  ;;  %v7697_v19 = vadd.f32 %v9140_v52, %v13689_v27  ;;  %v7688_v31 = vpop.f32.mrb[167].mxu1  ;;  %v14156_v13 = vld [vmem:[#allocation12_spill] sm:$0xff]  ;;  %v14157_v52 = vld [vmem:[#allocation62_spill] sm:$0xff] }
0x2b48   : > { %v7800_v30 = vadd.f32 %v7686_v25, %v13003_v46  ;;  %v7689_v6 = vadd.f32 %v13689_v27, %v7688_v31 }
0x2b49   : > { %7834 = vst.msk [vmem:[%s13697_s29 + $0x30] sm:$0xff] %vm482_vm0, %v7802_v24  ;;  %v7803_v60 = vadd.f32 %v7697_v19, %v13006_v50  ;;  %v14158_v19 = vld [vmem:[#allocation13_spill] sm:$0xff] }
0x2b4a   : > { %7832 = vst.msk [vmem:[%s13697_s29 + $0x20] sm:$0xff] %vm482_vm0, %v7800_v30  ;;  %v7801_v16 = vadd.f32 %v7689_v6, %v12995_v56 }
0x2b4b   : > { %7835 = vst.msk [vmem:[%s13697_s29 + $0x38] sm:$0xff] %vm482_vm0, %v7803_v60 }
0x2b4c   : > { %7833 = vst.msk [vmem:[%s13697_s29 + $0x28] sm:$0xff] %vm482_vm0, %v7801_v16 }
0x2b4d   : > { %v9143_v49 = vpop.f32.mrb[168].mxu1 }
0x2b4e   : > { %v7710_v46 = vadd.f32 %v9143_v49, %v13689_v27  ;;  %v7701_v62 = vpop.f32.mrb[169].mxu1 }
0x2b4f   : > { %v7702_v9 = vadd.f32 %v13689_v27, %v7701_v62  ;;  %v9144_v58 = vpop.f32.mrb[170].mxu1 }
0x2b50   : > { %v7806_v50 = vadd.f32 %v7710_v46, %v13036_v21  ;;  %v7713_v26 = vadd.f32 %v9144_v58, %v13689_v27  ;;  %v7704_v59 = vpop.f32.mrb[171].mxu1  ;;  %v14159_v46 = vld [vmem:[#allocation15_spill] sm:$0xff] }
0x2b51   : > { %v7804_v56 = vadd.f32 %v7702_v9, %v13025_v22  ;;  %v7705_v51 = vadd.f32 %v13689_v27, %v7704_v59 }
0x2b52   : > { %7838 = vst.msk [vmem:[%s13697_s29 + $0x50] sm:$0xff] %vm482_vm0, %v7806_v50  ;;  %v7807_v41 = vadd.f32 %v7713_v26, %v13028_v55  ;;  %v14160_v50 = vld [vmem:[#allocation16_spill] sm:$0xff] }
0x2b53   : > { %7836 = vst.msk [vmem:[%s13697_s29 + $0x40] sm:$0xff] %vm482_vm0, %v7804_v56  ;;  %v7805_v35 = vadd.f32 %v7705_v51, %v13017_v5  ;;  %v14161_v56 = vld [vmem:[#allocation72_spill] sm:$0xff] }
0x2b54   : > { %7839 = vst.msk [vmem:[%s13697_s29 + $0x58] sm:$0xff] %vm482_vm0, %v7807_v41  ;;  %v14162_v41 = vld [vmem:[#allocation74_spill] sm:$0xff] }
0x2b55   : > { %7837 = vst.msk [vmem:[%s13697_s29 + $0x48] sm:$0xff] %vm482_vm0, %v7805_v35  ;;  %v9147_v21 = vpop.f32.mrb[172].mxu1 }
0x2b56   : > { %v7726_v22 = vadd.f32 %v9147_v21, %v13689_v27  ;;  %v7717_v36 = vpop.f32.mrb[173].mxu1 }
0x2b57   : > { %v7718_v14 = vadd.f32 %v13689_v27, %v7717_v36  ;;  %v9148_v54 = vpop.f32.mrb[174].mxu1 }
0x2b58   : > { %v7810_v55 = vadd.f32 %v7726_v22, %v13060_v17  ;;  %v7729_v42 = vadd.f32 %v9148_v54, %v13689_v27  ;;  %v7720_v45 = vpop.f32.mrb[175].mxu1 }
0x2b59   : > { %v7808_v5 = vadd.f32 %v7718_v14, %v14148_v44  ;;  %v7721_v57 = vadd.f32 %v13689_v27, %v7720_v45 }
0x2b5a   : > { %7842 = vst.msk [vmem:[%s13697_s29 + $0x70] sm:$0xff] %vm482_vm0, %v7810_v55  ;;  %v7811_v48 = vadd.f32 %v7729_v42, %v14149_v10  ;;  %v14163_v55 = vld [vmem:[#allocation25_spill] sm:$0xff] }
0x2b5b   : > { %7840 = vst.msk [vmem:[%s13697_s29 + $0x60] sm:$0xff] %vm482_vm0, %v7808_v5  ;;  %v7809_v39 = vadd.f32 %v7721_v57, %v14150_v37  ;;  %v14164_v5 = vld [vmem:[#allocation26_spill] sm:$0xff] }
0x2b5c   : > { %7843 = vst.msk [vmem:[%s13697_s29 + $0x78] sm:$0xff] %vm482_vm0, %v7811_v48  ;;  %v14165_v48 = vld [vmem:[#allocation80_spill] sm:$0xff] }
0x2b5d   : > { %7841 = vst.msk [vmem:[%s13697_s29 + $0x68] sm:$0xff] %vm482_vm0, %v7809_v39  ;;  %v14166_v39 = vld [vmem:[#allocation82_spill] sm:$0xff] }
0x2b5e   : > { %v9151_v17 = vpop.f32.mrb[176].mxu1 }
0x2b5f   : > { %v7742_v0 = vadd.f32 %v9151_v17, %v13689_v27  ;;  %v7733_v23 = vpop.f32.mrb[177].mxu1 }
0x2b60   : > { %v7734_v12 = vadd.f32 %v13689_v27, %v7733_v23  ;;  %v9152_v38 = vpop.f32.mrb[178].mxu1 }
0x2b61   : > { %v7814_v53 = vadd.f32 %v7742_v0, %v14151_v3  ;;  %v7745_v33 = vadd.f32 %v9152_v38, %v13689_v27  ;;  %v7736_v29 = vpop.f32.mrb[179].mxu1 }
0x2b62   : > { %v7812_v11 = vadd.f32 %v7734_v12, %v14152_v4  ;;  %v7737_v43 = vadd.f32 %v13689_v27, %v7736_v29 }
0x2b63   : > { %7846 = vst.msk [vmem:[%s13697_s29 + $0x90] sm:$0xff] %vm482_vm0, %v7814_v53  ;;  %v7815_v34 = vadd.f32 %v7745_v33, %v14153_v2 }
0x2b64   : > { %7844 = vst.msk [vmem:[%s13697_s29 + $0x80] sm:$0xff] %vm482_vm0, %v7812_v11  ;;  %v7813_v28 = vadd.f32 %v7737_v43, %v14154_v15 }
0x2b65   : > { %7847 = vst.msk [vmem:[%s13697_s29 + $0x98] sm:$0xff] %vm482_vm0, %v7815_v34 }
0x2b66   : > { %7845 = vst.msk [vmem:[%s13697_s29 + $0x88] sm:$0xff] %vm482_vm0, %v7813_v28  ;;  %v9155_v1 = vpop.f32.mrb[180].mxu1 }
0x2b67   : > { %v7758_v40 = vadd.f32 %v9155_v1, %v13689_v27  ;;  %v7749_v61 = vpop.f32.mrb[181].mxu1 }
0x2b68   : > { %v7750_v8 = vadd.f32 %v13689_v27, %v7749_v61  ;;  %v9156_v7 = vpop.f32.mrb[182].mxu1 }
0x2b69   : > { %v7818_v63 = vadd.f32 %v7758_v40, %v14155_v20  ;;  %v7761_v47 = vadd.f32 %v9156_v7, %v13689_v27  ;;  %v7752_v32 = vpop.f32.mrb[183].mxu1 }
0x2b6a   : > { %v7816_v18 = vadd.f32 %v7750_v8, %v14156_v13  ;;  %v7753_v25 = vadd.f32 %v13689_v27, %v7752_v32 }
0x2b6b   : > { %7850 = vst.msk [vmem:[%s13697_s29 + $0xb0] sm:$0xff] %vm482_vm0, %v7818_v63  ;;  %v7819_v24 = vadd.f32 %v7761_v47, %v14157_v52 }
0x2b6c   : > { %7848 = vst.msk [vmem:[%s13697_s29 + $0xa0] sm:$0xff] %vm482_vm0, %v7816_v18  ;;  %v7817_v31 = vadd.f32 %v7753_v25, %v14158_v19 }
0x2b6d   : > { %7851 = vst.msk [vmem:[%s13697_s29 + $0xb8] sm:$0xff] %vm482_vm0, %v7819_v24 }
0x2b6e   : > { %7849 = vst.msk [vmem:[%s13697_s29 + $0xa8] sm:$0xff] %vm482_vm0, %v7817_v31 }
0x2bc1   : > { %v9159_v30 = vpop.f32.mrb[184].mxu1 }
0x2bc2   : > { %v7774_v6 = vadd.f32 %v9159_v30, %v13689_v27  ;;  %v7765_v60 = vpop.f32.mrb[185].mxu1 }
0x2bc3   : > { %v7766_v16 = vadd.f32 %v13689_v27, %v7765_v60  ;;  %v9160_v49 = vpop.f32.mrb[186].mxu1 }
0x2bc4   : > { %v7822_v62 = vadd.f32 %v7774_v6, %v14159_v46  ;;  %v7777_v9 = vadd.f32 %v9160_v49, %v13689_v27  ;;  %v7768_v58 = vpop.f32.mrb[187].mxu1 }
0x2bc5   : > { %v7820_v26 = vadd.f32 %v7766_v16, %v14160_v50  ;;  %v7769_v59 = vadd.f32 %v13689_v27, %v7768_v58 }
0x2bc6   : > { %7854 = vst.msk [vmem:[%s13697_s29 + $0xd0] sm:$0xff] %vm482_vm0, %v7822_v62  ;;  %v7823_v51 = vadd.f32 %v7777_v9, %v14161_v56 }
0x2bc7   : > { %7852 = vst.msk [vmem:[%s13697_s29 + $0xc0] sm:$0xff] %vm482_vm0, %v7820_v26  ;;  %v7821_v35 = vadd.f32 %v7769_v59, %v14162_v41 }
0x2bc8   : > { %7855 = vst.msk [vmem:[%s13697_s29 + $0xd8] sm:$0xff] %vm482_vm0, %v7823_v51 }
0x2bc9   : > { %7853 = vst.msk [vmem:[%s13697_s29 + $0xc8] sm:$0xff] %vm482_vm0, %v7821_v35  ;;  %v9163_v21 = vpop.f32.mrb[188].mxu1 }
0x2bca   : > { %v7790_v22 = vadd.f32 %v9163_v21, %v13689_v27  ;;  %v7781_v36 = vpop.f32.mrb[189].mxu1 }
0x2bcb   : > { %v7782_v14 = vadd.f32 %v13689_v27, %v7781_v36  ;;  %v9164_v54 = vpop.f32.mrb[190].mxu1 }
0x2bcc   : > { %v7826_v42 = vadd.f32 %v7790_v22, %v14163_v55  ;;  %v7793_v45 = vadd.f32 %v9164_v54, %v13689_v27  ;;  %v7784_v44 = vpop.f32.mrb[191].mxu1 }
0x2bcd   : > { %v7824_v57 = vadd.f32 %v7782_v14, %v14164_v5  ;;  %v7785_v10 = vadd.f32 %v13689_v27, %v7784_v44 }
0x2bce   : > { %7858 = vst.msk [vmem:[%s13697_s29 + $0xf0] sm:$0xff] %vm482_vm0, %v7826_v42  ;;  %v7827_v37 = vadd.f32 %v7793_v45, %v14165_v48 }
0x2bcf   : > { %7856 = vst.msk [vmem:[%s13697_s29 + $0xe0] sm:$0xff] %vm482_vm0, %v7824_v57  ;;  %v7825_v17 = vadd.f32 %v7785_v10, %v14166_v39 }
0x2bd0   : > { %7859 = vst.msk [vmem:[%s13697_s29 + $0xf8] sm:$0xff] %vm482_vm0, %v7827_v37 }
0x2bd1   : > { %7857 = vst.msk [vmem:[%s13697_s29 + $0xe8] sm:$0xff] %vm482_vm0, %v7825_v17 }
0x2bd2 PF: > { %s23_s25 = sadd.s32 1, %s10307_s25  }
0x2bd3   : > { %p20_p4 = scmp.ge.s32.totalorder %s23_s25, 4  }
0x2bd5   :  { %22 = sbr.rel (!%p20_p4) target bundleno = 1 (0x1), region = 102 }

</bundles_post_ra>
